<compile_context>
chip_gen: v5e
topology: v5e:2x2
jax: 0.10.0
libtpu: 0.0.40
codegen_flags: <defaults>
</compile_context>

<pallas_src>
import functools

import jax
import jax.numpy as jnp
from jax import lax
from jax.experimental import pallas as pl
from jax.experimental.pallas import tpu as pltpu


HIDDEN = 512
EPS = 1e-5


def _round_up(x, m):
    return ((x + m - 1) // m) * m


def _pick_tm(b):
    """Batch-tile rows.

    * 16-row multiples (bf16 packs (16,128) per vreg tile).
    * >= 2 grid steps whenever b > 32: the "parallel" grid axis is what v7x
      megacore shards across its two TensorCores, and >= 2 steps also lets the
      x/out DMAs pipeline against compute.
    * Capped at 512 rows: single-buffered weights (~2.3 MiB) + ~10 live
      (TM, 512) f32 slabs + x/out buffers stay well under v7x's 64 MiB VMEM
      (v5e/v6e have 128 MiB), and per-step MXU work (~2.3 MFLOP/row) dwarfs
      the ~0.35 us per-grid-step overhead.
    * Last-tile padding bounded (<~25% wasted rows) for unlucky batch sizes.
    """
    b16 = _round_up(b, 16)
    if b16 <= 32:                       # tiny batch: weight-DMA / latency bound
        return b16
    if b16 <= 1024:                     # two near-equal tiles
        return _round_up(b16 // 2, 16)
    best_tm, best_frac = 512, 1.0
    for tm in (512, 448, 384, 320, 256, 192, 128):
        steps = -(-b // tm)
        frac = (steps * tm - b) / (steps * tm)
        if frac <= 0.25:
            return tm                   # biggest tile with acceptable waste
        if frac < best_frac:
            best_tm, best_frac = tm, frac
    return best_tm


# -----------------------------------------------------------------------------
# Pallas kernel: one batch tile per grid step, all weights resident in VMEM.
# -----------------------------------------------------------------------------
def attention_net_kernel(
    x_ref,                                  # (TM, F)           f32 (cast in-kernel)
    w1_ref, c1_ref,                         # fc1 (+bn1 folded) bf16 / f32
    pe_ref,                                 # positional enc    f32
    wvo_ref, bvo_ref,                       # folded v_proj∘out_proj
    w2_ref, c2_ref,                         # fc2 (+bn2 folded)
    w3_ref, c3_ref,                         # fc3 (+bn3 folded)
    w4_ref, c4_ref,                         # fc4 (+bn4 folded)
    w56_ref, b56_ref,                       # fused policy|value head (N_pad)
    out_ref,                                # (TM, N_pad)       f32
    *, action_size,
):
    f32 = jnp.float32
    bf16 = jnp.bfloat16

    x = x_ref[...].astype(bf16)             # cast here: saves a wrapper HBM pass

    # fc1 -> bn1 (folded) -> relu, then + positional encoding
    h = jnp.dot(x, w1_ref[...], preferred_element_type=f32) + c1_ref[...]
    h = jnp.maximum(h, 0.0) + pe_ref[...]

    # Single-token self-attention: softmax over one key == 1, so the q/k
    # projections cancel and attn_out = out_proj(v_proj(h)) — folded to one
    # matmul in the wrapper (verified against the full-MHA reference below).
    a = jnp.dot(h.astype(bf16), wvo_ref[...], preferred_element_type=f32)
    a = a + bvo_ref[...]

    # residual block: relu(bn2(fc2(a))) + a
    h = jnp.dot(a.astype(bf16), w2_ref[...], preferred_element_type=f32) + c2_ref[...]
    h = jnp.maximum(h, 0.0) + a

    # relu(bn3(fc3(h)))
    h = jnp.dot(h.astype(bf16), w3_ref[...], preferred_element_type=f32) + c3_ref[...]
    h = jnp.maximum(h, 0.0)

    # relu(bn4(fc4(h)))
    h = jnp.dot(h.astype(bf16), w4_ref[...], preferred_element_type=f32) + c4_ref[...]
    h = jnp.maximum(h, 0.0)

    # fused heads: lanes [0, action_size) = policy logits, lane action_size =
    # value pre-activation, remaining lanes are zero padding.
    head = jnp.dot(h.astype(bf16), w56_ref[...], preferred_element_type=f32)
    head = head + b56_ref[...]                                # (TM, N_pad)

    col = lax.broadcasted_iota(jnp.int32, head.shape, 1)
    neg = jnp.float32(-1e30)

    # log_softmax over the policy lanes only (value/padding masked out)
    logits = jnp.where(col < action_size, head, neg)
    m = jnp.max(logits, axis=-1, keepdims=True)
    z = logits - m
    lse = jnp.log(jnp.sum(jnp.exp(z), axis=-1, keepdims=True))
    logp = z - lse

    # Value pre-activation: extract the single lane `action_size` via a masked
    # lane-max (exact — only that lane survives the mask; XLU reduce, avoids an
    # unaligned lane-slice relayout), then sigmoid on a (TM, 1) vector instead
    # of the whole (TM, N_pad) block.
    v_pre = jnp.max(jnp.where(col == action_size, head, neg),
                    axis=-1, keepdims=True)
    val = 1.0 / (1.0 + jnp.exp(-v_pre))

    # lanes: [0, A) = log-probs, lane A = sigmoid(value), lanes > A zeroed.
    out_ref[...] = jnp.where(col < action_size, logp,
                             jnp.where(col == action_size, val, 0.0))


# -----------------------------------------------------------------------------
# Wrapper: algebraic folding + padding + pallas_call with batch grid.
# -----------------------------------------------------------------------------
def _fold_linear_bn(w, bias, gamma, beta, mean, var):
    """relu(bn(x @ W^T + b))  ==  relu(x @ W' + shift)  (eval-mode BN)."""
    # TODO(synk): for real checkpoints with tiny BN running-variance the folded
    # bf16 weights can lose precision; keep that layer's weight in f32 (or
    # apply the BN scale to the f32 accumulator) in that case.
    scale = gamma / jnp.sqrt(var + EPS)                 # (out,)
    w_folded = w.T * scale[None, :]                     # (in, out)
    shift = bias * scale + beta - mean * scale          # (out,)
    return w_folded, shift.reshape(1, -1)


@functools.partial(jax.jit,
                   static_argnames=("action_size", "single_buffer_weights"))
def _forward_impl(x, params, *, action_size, single_buffer_weights):
    b = x.shape[0]
    x_flat = x.reshape(b, -1)                           # matches torch .view(B,-1)
    in_features = x_flat.shape[1]

    n_pad = _round_up(action_size + 1, 128)             # policy lanes + value lane
    tm = _pick_tm(b)
    b_pad = _round_up(b, tm)

    p = params
    bf16 = jnp.bfloat16

    # fc1..fc4 with BN folded into the weights
    w1, c1 = _fold_linear_bn(p["fc1_w"], p["fc1_b"],
                             p["bn1_g"], p["bn1_b"], p["bn1_m"], p["bn1_v"])
    w2, c2 = _fold_linear_bn(p["fc2_w"], p["fc2_b"],
                             p["bn2_g"], p["bn2_b"], p["bn2_m"], p["bn2_v"])
    w3, c3 = _fold_linear_bn(p["fc3_w"], p["fc3_b"],
                             p["bn3_g"], p["bn3_b"], p["bn3_m"], p["bn3_v"])
    w4, c4 = _fold_linear_bn(p["fc4_w"], p["fc4_b"],
                             p["bn4_g"], p["bn4_b"], p["bn4_m"], p["bn4_v"])

    # x stays f32 and un-padded in K (full-dim K block is legal; Mosaic pads
    # the layout internally); batch rows are padded only when needed.
    x_in = x_flat if b_pad == b else jnp.pad(x_flat, ((0, b_pad - b), (0, 0)))

    # fold the two attention matmuls (seq len 1 => softmax == 1)
    wo_t = p["attn_wo"].T                               # (512, 512)
    wvo = p["attn_wv"].T @ wo_t                         # (512, 512)
    bvo = (p["attn_bv"] @ wo_t + p["attn_bo"]).reshape(1, -1)

    # fused, lane-padded policy|value head
    w56 = jnp.concatenate([p["fc5_w"].T, p["fc6_w"].T], axis=1)   # (512, A+1)
    w56 = jnp.pad(w56, ((0, 0), (0, n_pad - (action_size + 1))))
    b56 = jnp.concatenate([p["fc5_b"], p["fc6_b"]])
    b56 = jnp.pad(b56, (0, n_pad - (action_size + 1))).reshape(1, -1)

    # TODO(synk): int8 weights (v5e/v6e int MXU) / fp8-e4m3 (v7x) with
    # per-channel scales would halve the weight DMA for small-batch calls;
    # needs generation dispatch + accuracy validation, so not done here.
    inputs = (
        x_in,
        w1.astype(bf16), c1,
        p["pos_enc"],
        wvo.astype(bf16), bvo,
        w2.astype(bf16), c2,
        w3.astype(bf16), c3,
        w4.astype(bf16), c4,
        w56.astype(bf16), b56,
    )

    # Resident weights: block index never changes across the batch grid, so a
    # single VMEM buffer suffices (the default would double-buffer them).
    if single_buffer_weights:
        def resident(shape):
            return pl.BlockSpec(shape, lambda i: (0, 0),
                                pipeline_mode=pl.Buffered(1))
    else:
        def resident(shape):
            return pl.BlockSpec(shape, lambda i: (0, 0))

    in_specs = [
        pl.BlockSpec((tm, in_features), lambda i: (i, 0)),    # x tile
        resident((in_features, HIDDEN)), resident((1, HIDDEN)),
        resident((1, HIDDEN)),
        resident((HIDDEN, HIDDEN)), resident((1, HIDDEN)),
        resident((HIDDEN, HIDDEN)), resident((1, HIDDEN)),
        resident((HIDDEN, HIDDEN)), resident((1, HIDDEN)),
        resident((HIDDEN, HIDDEN)), resident((1, HIDDEN)),
        resident((HIDDEN, n_pad)), resident((1, n_pad)),
    ]
    out_specs = pl.BlockSpec((tm, n_pad), lambda i: (i, 0))

    weight_bytes = (2 * (in_features * HIDDEN + 4 * HIDDEN * HIDDEN + HIDDEN * n_pad)
                    + 4 * (6 * HIDDEN + 2 * n_pad))
    act_bytes = (2 * tm * in_features * 4       # x tile, f32, double-buffered
                 + 2 * tm * n_pad * 4           # out tile, f32, double-buffered
                 + 10 * tm * HIDDEN * 4)        # live f32 intermediates (headroom)
    wb_mult = 1 if single_buffer_weights else 2
    vmem_limit = int(1.5 * (wb_mult * weight_bytes + act_bytes))
    vmem_limit = min(64 * 1024 * 1024, max(32 * 1024 * 1024, vmem_limit))

    cost = pl.CostEstimate(
        flops=2 * b_pad * HIDDEN * (in_features + 4 * HIDDEN + n_pad),
        transcendentals=b_pad * (n_pad + 2),
        bytes_accessed=4 * b_pad * in_features + weight_bytes + 4 * b_pad * n_pad,
    )

    out = pl.pallas_call(
        functools.partial(attention_net_kernel, action_size=action_size),
        out_shape=jax.ShapeDtypeStruct((b_pad, n_pad), jnp.float32),
        grid=(b_pad // tm,),
        in_specs=in_specs,
        out_specs=out_specs,
        compiler_params=pltpu.CompilerParams(
            dimension_semantics=("parallel",),
            vmem_limit_bytes=vmem_limit,
        ),
        cost_estimate=cost,
    )(*inputs)

    logp = out[:b, :action_size]
    val = out[:b, action_size:action_size + 1]
    return logp, val


_SINGLE_BUFFER_WEIGHTS = True


def attention_net_forward(x, params, *, action_size):
    """x: (B, board_x+1, board_x, board_y) f32 -> (log_pi (B,A), value (B,1)).

    TODO(synk): for AlphaZero self-play (many tiny-batch calls) the kernel is
    weight-DMA bound; batch requests across the tree search or keep weights
    VMEM-resident across calls (cross-call prefetch / input_output_aliases).
    """
    global _SINGLE_BUFFER_WEIGHTS
    try:
        return _forward_impl(x, params, action_size=action_size,
                             single_buffer_weights=_SINGLE_BUFFER_WEIGHTS)
    except Exception:
        if not _SINGLE_BUFFER_WEIGHTS:
            raise
        # pl.Buffered(1) not accepted by this jax/libtpu combination: fall back
        # to the default double-buffered weights (correctness identical).
        _SINGLE_BUFFER_WEIGHTS = False
        return _forward_impl(x, params, action_size=action_size,
                             single_buffer_weights=False)


# -----------------------------------------------------------------------------
# Pure-JAX f32 reference (full MHA with q/k/softmax, explicit BN) to validate.
# -----------------------------------------------------------------------------
def reference_forward(x, p, *, num_heads=8):
    b = x.shape[0]
    s = x.reshape(b, -1)

    def bn(h, g, be, m, v):
        return g * (h - m) / jnp.sqrt(v + EPS) + be

    h = jax.nn.relu(bn(s @ p["fc1_w"].T + p["fc1_b"],
                       p["bn1_g"], p["bn1_b"], p["bn1_m"], p["bn1_v"]))
    h = h + p["pos_enc"]                      # single-token sequence

    d = HIDDEN
    hd = d // num_heads
    q = h @ p["attn_wq"].T + p["attn_bq"]
    k = h @ p["attn_wk"].T + p["attn_bk"]
    v = h @ p["attn_wv"].T + p["attn_bv"]
    qh = q.reshape(b, num_heads, hd)
    kh = k.reshape(b, num_heads, hd)
    vh = v.reshape(b, num_heads, hd)
    scores = jnp.sum(qh * kh, axis=-1, keepdims=True) / jnp.sqrt(float(hd))
    attn = jax.nn.softmax(scores, axis=-1)    # (B, H, 1) -> all ones (seq=1)
    oh = attn * vh
    attn_out = oh.reshape(b, d) @ p["attn_wo"].T + p["attn_bo"]

    identity = attn_out
    h = jax.nn.relu(bn(attn_out @ p["fc2_w"].T + p["fc2_b"],
                       p["bn2_g"], p["bn2_b"], p["bn2_m"], p["bn2_v"])) + identity
    h = jax.nn.relu(bn(h @ p["fc3_w"].T + p["fc3_b"],
                       p["bn3_g"], p["bn3_b"], p["bn3_m"], p["bn3_v"]))
    h = jax.nn.relu(bn(h @ p["fc4_w"].T + p["fc4_b"],
                       p["bn4_g"], p["bn4_b"], p["bn4_m"], p["bn4_v"]))
    logits = h @ p["fc5_w"].T + p["fc5_b"]
    value = h @ p["fc6_w"].T + p["fc6_b"]
    return jax.nn.log_softmax(logits, axis=1), jax.nn.sigmoid(value)


# -----------------------------------------------------------------------------
# Deterministic parameter construction (synthetic, PyTorch-shaped).
# -----------------------------------------------------------------------------
def init_params(key, in_features, action_size):
    ks = iter(jax.random.split(key, 64))

    def lin(out_f, in_f):
        w = 0.05 * jax.random.normal(next(ks), (out_f, in_f), jnp.float32)
        b_ = 0.05 * jax.random.normal(next(ks), (out_f,), jnp.float32)
        return w, b_

    def bn(d):
        g = 1.0 + 0.1 * jax.random.normal(next(ks), (d,), jnp.float32)
        be = 0.1 * jax.random.normal(next(ks), (d,), jnp.float32)
        m = 0.1 * jax.random.normal(next(ks), (d,), jnp.float32)
        v = 0.5 + jnp.abs(jax.random.normal(next(ks), (d,), jnp.float32))
        return g, be, m, v

    p = {}
    p["fc1_w"], p["fc1_b"] = lin(HIDDEN, in_features)
    p["bn1_g"], p["bn1_b"], p["bn1_m"], p["bn1_v"] = bn(HIDDEN)
    p["pos_enc"] = jax.random.normal(next(ks), (1, HIDDEN), jnp.float32)
    p["attn_wq"], p["attn_bq"] = lin(HIDDEN, HIDDEN)
    p["attn_wk"], p["attn_bk"] = lin(HIDDEN, HIDDEN)
    p["attn_wv"], p["attn_bv"] = lin(HIDDEN, HIDDEN)
    p["attn_wo"], p["attn_bo"] = lin(HIDDEN, HIDDEN)
    p["fc2_w"], p["fc2_b"] = lin(HIDDEN, HIDDEN)
    p["bn2_g"], p["bn2_b"], p["bn2_m"], p["bn2_v"] = bn(HIDDEN)
    p["fc3_w"], p["fc3_b"] = lin(HIDDEN, HIDDEN)
    p["bn3_g"], p["bn3_b"], p["bn3_m"], p["bn3_v"] = bn(HIDDEN)
    p["fc4_w"], p["fc4_b"] = lin(HIDDEN, HIDDEN)
    p["bn4_g"], p["bn4_b"], p["bn4_m"], p["bn4_v"] = bn(HIDDEN)
    p["fc5_w"], p["fc5_b"] = lin(action_size, HIDDEN)
    p["fc6_w"], p["fc6_b"] = lin(1, HIDDEN)
    return p


if __name__ == "__main__":
    # Small synthetic "game": board 4x4, action_size = 17.
    board_x, board_y = 4, 4
    action_size = board_x * board_y + 1
    in_features = board_x * board_y * (board_x + 1)   # 80
    batch = 2

    key = jax.random.PRNGKey(0)
    k_x, k_p = jax.random.split(key)
    # Board tensor as fed to forward(): (B, board_x+1, board_x, board_y).
    x = jax.random.normal(k_x, (batch, board_x + 1, board_x, board_y), jnp.float32)
    params = init_params(k_p, in_features, action_size)

    logp, val = attention_net_forward(x, params, action_size=action_size)
    logp, val = jax.block_until_ready((logp, val))

    ref_logp, ref_val = reference_forward(x, params)
    assert logp.shape == (batch, action_size) and val.shape == (batch, 1)
    # bf16 matmul operands -> slightly looser tolerance than a pure-f32 version
    assert jnp.allclose(logp, ref_logp, rtol=2e-2, atol=2e-2), "log_softmax mismatch"
    assert jnp.allclose(val, ref_val, rtol=2e-2, atol=2e-2), "value mismatch"
    # probabilities must still sum to 1
    assert jnp.allclose(jnp.sum(jnp.exp(logp), axis=1), 1.0, atol=1e-3)

    print("KERNEL_OK")
</pallas_src>

<mosaic_0001>
module attributes {stable_mosaic.version = 11 : i64} {
  func.func @attention_net_kernel(%arg0: i32, %arg1: memref<16x80xf32, #tpu.memory_space<vmem>>, %arg2: memref<80x512xbf16, #tpu.memory_space<vmem>>, %arg3: memref<1x512xf32, #tpu.memory_space<vmem>>, %arg4: memref<1x512xf32, #tpu.memory_space<vmem>>, %arg5: memref<512x512xbf16, #tpu.memory_space<vmem>>, %arg6: memref<1x512xf32, #tpu.memory_space<vmem>>, %arg7: memref<512x512xbf16, #tpu.memory_space<vmem>>, %arg8: memref<1x512xf32, #tpu.memory_space<vmem>>, %arg9: memref<512x512xbf16, #tpu.memory_space<vmem>>, %arg10: memref<1x512xf32, #tpu.memory_space<vmem>>, %arg11: memref<512x512xbf16, #tpu.memory_space<vmem>>, %arg12: memref<1x512xf32, #tpu.memory_space<vmem>>, %arg13: memref<512x128xbf16, #tpu.memory_space<vmem>>, %arg14: memref<1x128xf32, #tpu.memory_space<vmem>>, %arg15: memref<16x128xf32, #tpu.memory_space<vmem>>) attributes {dimension_semantics = [#tpu.dimension_semantics<parallel>], iteration_bounds = array<i64: 1>, scalar_prefetch = 0 : i64, scratch_operands = 0 : i64, tpu.core_type = #tpu.core_type<tc>, window_params = [{transform_indices = @transform_0, window_bounds = array<i64: 16, 80>}, {pipeline_mode = #tpu.pipeline_mode<synchronous>, transform_indices = @transform_1, window_bounds = array<i64: 80, 512>}, {pipeline_mode = #tpu.pipeline_mode<synchronous>, transform_indices = @transform_2, window_bounds = array<i64: 1, 512>}, {pipeline_mode = #tpu.pipeline_mode<synchronous>, transform_indices = @transform_3, window_bounds = array<i64: 1, 512>}, {pipeline_mode = #tpu.pipeline_mode<synchronous>, transform_indices = @transform_4, window_bounds = array<i64: 512, 512>}, {pipeline_mode = #tpu.pipeline_mode<synchronous>, transform_indices = @transform_5, window_bounds = array<i64: 1, 512>}, {pipeline_mode = #tpu.pipeline_mode<synchronous>, transform_indices = @transform_6, window_bounds = array<i64: 512, 512>}, {pipeline_mode = #tpu.pipeline_mode<synchronous>, transform_indices = @transform_7, window_bounds = array<i64: 1, 512>}, {pipeline_mode = #tpu.pipeline_mode<synchronous>, transform_indices = @transform_8, window_bounds = array<i64: 512, 512>}, {pipeline_mode = #tpu.pipeline_mode<synchronous>, transform_indices = @transform_9, window_bounds = array<i64: 1, 512>}, {pipeline_mode = #tpu.pipeline_mode<synchronous>, transform_indices = @transform_10, window_bounds = array<i64: 512, 512>}, {pipeline_mode = #tpu.pipeline_mode<synchronous>, transform_indices = @transform_11, window_bounds = array<i64: 1, 512>}, {pipeline_mode = #tpu.pipeline_mode<synchronous>, transform_indices = @transform_12, window_bounds = array<i64: 512, 128>}, {pipeline_mode = #tpu.pipeline_mode<synchronous>, transform_indices = @transform_13, window_bounds = array<i64: 1, 128>}, {transform_indices = @transform_14, window_bounds = array<i64: 16, 128>}]} {
    %c0 = arith.constant 0 : index
    %c0_0 = arith.constant 0 : index
    %0 = vector.load %arg1[%c0, %c0_0] : memref<16x80xf32, #tpu.memory_space<vmem>>, vector<16x80xf32>
    %1 = arith.truncf %0 : vector<16x80xf32> to vector<16x80xbf16>
    %c0_1 = arith.constant 0 : index
    %c0_2 = arith.constant 0 : index
    %2 = vector.load %arg2[%c0_1, %c0_2] : memref<80x512xbf16, #tpu.memory_space<vmem>>, vector<80x512xbf16>
    %cst = arith.constant dense<0.000000e+00> : vector<16x512xf32>
    %3 = tpu.matmul %1, %2, %cst {dimension_numbers = #tpu.dot_dimension_numbers<[1], [0], [0], [1], [0, 0, 1, 1], [], []>} : vector<16x80xbf16>, vector<80x512xbf16>, vector<16x512xf32> -> vector<16x512xf32>
    %c0_3 = arith.constant 0 : index
    %c0_4 = arith.constant 0 : index
    %4 = vector.load %arg3[%c0_3, %c0_4] : memref<1x512xf32, #tpu.memory_space<vmem>>, vector<1x512xf32>
    %5 = vector.broadcast %4 : vector<1x512xf32> to vector<16x512xf32>
    %6 = arith.addf %3, %5 : vector<16x512xf32>
    %cst_5 = arith.constant 0.000000e+00 : f32
    %7 = vector.broadcast %cst_5 : f32 to vector<16x512xf32>
    %8 = arith.maximumf %6, %7 : vector<16x512xf32>
    %c0_6 = arith.constant 0 : index
    %c0_7 = arith.constant 0 : index
    %9 = vector.load %arg4[%c0_6, %c0_7] : memref<1x512xf32, #tpu.memory_space<vmem>>, vector<1x512xf32>
    %10 = vector.broadcast %9 : vector<1x512xf32> to vector<16x512xf32>
    %11 = arith.addf %8, %10 : vector<16x512xf32>
    %12 = arith.truncf %11 : vector<16x512xf32> to vector<16x512xbf16>
    %c0_8 = arith.constant 0 : index
    %c0_9 = arith.constant 0 : index
    %13 = vector.load %arg5[%c0_8, %c0_9] : memref<512x512xbf16, #tpu.memory_space<vmem>>, vector<512x512xbf16>
    %cst_10 = arith.constant dense<0.000000e+00> : vector<16x512xf32>
    %14 = tpu.matmul %12, %13, %cst_10 {dimension_numbers = #tpu.dot_dimension_numbers<[1], [0], [0], [1], [0, 0, 1, 1], [], []>} : vector<16x512xbf16>, vector<512x512xbf16>, vector<16x512xf32> -> vector<16x512xf32>
    %c0_11 = arith.constant 0 : index
    %c0_12 = arith.constant 0 : index
    %15 = vector.load %arg6[%c0_11, %c0_12] : memref<1x512xf32, #tpu.memory_space<vmem>>, vector<1x512xf32>
    %16 = vector.broadcast %15 : vector<1x512xf32> to vector<16x512xf32>
    %17 = arith.addf %14, %16 : vector<16x512xf32>
    %18 = arith.truncf %17 : vector<16x512xf32> to vector<16x512xbf16>
    %c0_13 = arith.constant 0 : index
    %c0_14 = arith.constant 0 : index
    %19 = vector.load %arg7[%c0_13, %c0_14] : memref<512x512xbf16, #tpu.memory_space<vmem>>, vector<512x512xbf16>
    %cst_15 = arith.constant dense<0.000000e+00> : vector<16x512xf32>
    %20 = tpu.matmul %18, %19, %cst_15 {dimension_numbers = #tpu.dot_dimension_numbers<[1], [0], [0], [1], [0, 0, 1, 1], [], []>} : vector<16x512xbf16>, vector<512x512xbf16>, vector<16x512xf32> -> vector<16x512xf32>
    %c0_16 = arith.constant 0 : index
    %c0_17 = arith.constant 0 : index
    %21 = vector.load %arg8[%c0_16, %c0_17] : memref<1x512xf32, #tpu.memory_space<vmem>>, vector<1x512xf32>
    %22 = vector.broadcast %21 : vector<1x512xf32> to vector<16x512xf32>
    %23 = arith.addf %20, %22 : vector<16x512xf32>
    %cst_18 = arith.constant 0.000000e+00 : f32
    %24 = vector.broadcast %cst_18 : f32 to vector<16x512xf32>
    %25 = arith.maximumf %23, %24 : vector<16x512xf32>
    %26 = arith.addf %25, %17 : vector<16x512xf32>
    %27 = arith.truncf %26 : vector<16x512xf32> to vector<16x512xbf16>
    %c0_19 = arith.constant 0 : index
    %c0_20 = arith.constant 0 : index
    %28 = vector.load %arg9[%c0_19, %c0_20] : memref<512x512xbf16, #tpu.memory_space<vmem>>, vector<512x512xbf16>
    %cst_21 = arith.constant dense<0.000000e+00> : vector<16x512xf32>
    %29 = tpu.matmul %27, %28, %cst_21 {dimension_numbers = #tpu.dot_dimension_numbers<[1], [0], [0], [1], [0, 0, 1, 1], [], []>} : vector<16x512xbf16>, vector<512x512xbf16>, vector<16x512xf32> -> vector<16x512xf32>
    %c0_22 = arith.constant 0 : index
    %c0_23 = arith.constant 0 : index
    %30 = vector.load %arg10[%c0_22, %c0_23] : memref<1x512xf32, #tpu.memory_space<vmem>>, vector<1x512xf32>
    %31 = vector.broadcast %30 : vector<1x512xf32> to vector<16x512xf32>
    %32 = arith.addf %29, %31 : vector<16x512xf32>
    %cst_24 = arith.constant 0.000000e+00 : f32
    %33 = vector.broadcast %cst_24 : f32 to vector<16x512xf32>
    %34 = arith.maximumf %32, %33 : vector<16x512xf32>
    %35 = arith.truncf %34 : vector<16x512xf32> to vector<16x512xbf16>
    %c0_25 = arith.constant 0 : index
    %c0_26 = arith.constant 0 : index
    %36 = vector.load %arg11[%c0_25, %c0_26] : memref<512x512xbf16, #tpu.memory_space<vmem>>, vector<512x512xbf16>
    %cst_27 = arith.constant dense<0.000000e+00> : vector<16x512xf32>
    %37 = tpu.matmul %35, %36, %cst_27 {dimension_numbers = #tpu.dot_dimension_numbers<[1], [0], [0], [1], [0, 0, 1, 1], [], []>} : vector<16x512xbf16>, vector<512x512xbf16>, vector<16x512xf32> -> vector<16x512xf32>
    %c0_28 = arith.constant 0 : index
    %c0_29 = arith.constant 0 : index
    %38 = vector.load %arg12[%c0_28, %c0_29] : memref<1x512xf32, #tpu.memory_space<vmem>>, vector<1x512xf32>
    %39 = vector.broadcast %38 : vector<1x512xf32> to vector<16x512xf32>
    %40 = arith.addf %37, %39 : vector<16x512xf32>
    %cst_30 = arith.constant 0.000000e+00 : f32
    %41 = vector.broadcast %cst_30 : f32 to vector<16x512xf32>
    %42 = arith.maximumf %40, %41 : vector<16x512xf32>
    %43 = arith.truncf %42 : vector<16x512xf32> to vector<16x512xbf16>
    %c0_31 = arith.constant 0 : index
    %c0_32 = arith.constant 0 : index
    %44 = vector.load %arg13[%c0_31, %c0_32] : memref<512x128xbf16, #tpu.memory_space<vmem>>, vector<512x128xbf16>
    %cst_33 = arith.constant dense<0.000000e+00> : vector<16x128xf32>
    %45 = tpu.matmul %43, %44, %cst_33 {dimension_numbers = #tpu.dot_dimension_numbers<[1], [0], [0], [1], [0, 0, 1, 1], [], []>} : vector<16x512xbf16>, vector<512x128xbf16>, vector<16x128xf32> -> vector<16x128xf32>
    %c0_34 = arith.constant 0 : index
    %c0_35 = arith.constant 0 : index
    %46 = vector.load %arg14[%c0_34, %c0_35] : memref<1x128xf32, #tpu.memory_space<vmem>>, vector<1x128xf32>
    %47 = vector.broadcast %46 : vector<1x128xf32> to vector<16x128xf32>
    %48 = arith.addf %45, %47 : vector<16x128xf32>
    %49 = tpu.iota {dimensions = array<i32: 1>} : vector<16x128xi32>
    %c17_i32 = arith.constant 17 : i32
    %50 = vector.broadcast %c17_i32 : i32 to vector<16x128xi32>
    %51 = arith.cmpi slt, %49, %50 : vector<16x128xi32>
    %cst_36 = arith.constant -1.000000e+30 : f32
    %52 = vector.broadcast %cst_36 : f32 to vector<16x128xf32>
    %53 = arith.select %51, %48, %52 : vector<16x128xi1>, vector<16x128xf32>
    %cst_37 = arith.constant dense<0xFF800000> : vector<16xf32>
    %54 = vector.multi_reduction <maximumf>, %53, %cst_37 [1] : vector<16x128xf32> to vector<16xf32>
    %55 = vector.shape_cast %54 : vector<16xf32> to vector<16x1xf32>
    %56 = vector.broadcast %55 : vector<16x1xf32> to vector<16x128xf32>
    %57 = arith.subf %53, %56 : vector<16x128xf32>
    %58 = math.exp %57 : vector<16x128xf32>
    %cst_38 = arith.constant dense<0.000000e+00> : vector<16xf32>
    %59 = vector.multi_reduction <add>, %58, %cst_38 [1] : vector<16x128xf32> to vector<16xf32>
    %60 = vector.shape_cast %59 : vector<16xf32> to vector<16x1xf32>
    %61 = math.log %60 : vector<16x1xf32>
    %62 = vector.broadcast %61 : vector<16x1xf32> to vector<16x128xf32>
    %63 = arith.subf %57, %62 : vector<16x128xf32>
    %c17_i32_39 = arith.constant 17 : i32
    %64 = vector.broadcast %c17_i32_39 : i32 to vector<16x128xi32>
    %65 = arith.cmpi eq, %49, %64 : vector<16x128xi32>
    %cst_40 = arith.constant -1.000000e+30 : f32
    %66 = vector.broadcast %cst_40 : f32 to vector<16x128xf32>
    %67 = arith.select %65, %48, %66 : vector<16x128xi1>, vector<16x128xf32>
    %cst_41 = arith.constant dense<0xFF800000> : vector<16xf32>
    %68 = vector.multi_reduction <maximumf>, %67, %cst_41 [1] : vector<16x128xf32> to vector<16xf32>
    %69 = vector.shape_cast %68 : vector<16xf32> to vector<16x1xf32>
    %cst_42 = arith.constant 0.000000e+00 : f32
    %70 = vector.broadcast %cst_42 : f32 to vector<16x1xf32>
    %71 = arith.subf %70, %69 : vector<16x1xf32>
    %72 = math.exp %71 : vector<16x1xf32>
    %cst_43 = arith.constant 1.000000e+00 : f32
    %73 = vector.broadcast %cst_43 : f32 to vector<16x1xf32>
    %74 = arith.addf %73, %72 : vector<16x1xf32>
    %cst_44 = arith.constant 1.000000e+00 : f32
    %75 = vector.broadcast %cst_44 : f32 to vector<16x1xf32>
    %76 = arith.divf %75, %74 : vector<16x1xf32>
    %c17_i32_45 = arith.constant 17 : i32
    %77 = vector.broadcast %c17_i32_45 : i32 to vector<16x128xi32>
    %78 = arith.cmpi slt, %49, %77 : vector<16x128xi32>
    %c17_i32_46 = arith.constant 17 : i32
    %79 = vector.broadcast %c17_i32_46 : i32 to vector<16x128xi32>
    %80 = arith.cmpi eq, %49, %79 : vector<16x128xi32>
    %cst_47 = arith.constant 0.000000e+00 : f32
    %81 = vector.shape_cast %76 : vector<16x1xf32> to vector<16x1xf32>
    %82 = vector.broadcast %81 : vector<16x1xf32> to vector<16x128xf32>
    %83 = vector.broadcast %cst_47 : f32 to vector<16x128xf32>
    %84 = arith.select %80, %82, %83 : vector<16x128xi1>, vector<16x128xf32>
    %85 = arith.select %78, %63, %84 : vector<16x128xi1>, vector<16x128xf32>
    %c0_48 = arith.constant 0 : index
    %c0_49 = arith.constant 0 : index
    %86 = vector.load %arg15[%c0_48, %c0_49] : memref<16x128xf32, #tpu.memory_space<vmem>>, vector<16x128xf32>
    tpu.vector_store %arg15[%c0_48, %c0_49], %85 {strides = array<i32>} : memref<16x128xf32, #tpu.memory_space<vmem>>, vector<16x128xf32>,
    return
  }
  func.func @transform_0(%arg0: i32) -> (i32, i32) {
    %c0_i32 = arith.constant 0 : i32
    %c0_i32_0 = arith.constant 0 : i32
    return %arg0, %c0_i32 : i32, i32
  }
  func.func @transform_1(%arg0: i32) -> (i32, i32) {
    %c0_i32 = arith.constant 0 : i32
    %c0_i32_0 = arith.constant 0 : i32
    %c0_i32_1 = arith.constant 0 : i32
    return %c0_i32, %c0_i32_0 : i32, i32
  }
  func.func @transform_2(%arg0: i32) -> (i32, i32) {
    %c0_i32 = arith.constant 0 : i32
    %c0_i32_0 = arith.constant 0 : i32
    %c0_i32_1 = arith.constant 0 : i32
    return %c0_i32, %c0_i32_0 : i32, i32
  }
  func.func @transform_3(%arg0: i32) -> (i32, i32) {
    %c0_i32 = arith.constant 0 : i32
    %c0_i32_0 = arith.constant 0 : i32
    %c0_i32_1 = arith.constant 0 : i32
    return %c0_i32, %c0_i32_0 : i32, i32
  }
  func.func @transform_4(%arg0: i32) -> (i32, i32) {
    %c0_i32 = arith.constant 0 : i32
    %c0_i32_0 = arith.constant 0 : i32
    %c0_i32_1 = arith.constant 0 : i32
    return %c0_i32, %c0_i32_0 : i32, i32
  }
  func.func @transform_5(%arg0: i32) -> (i32, i32) {
    %c0_i32 = arith.constant 0 : i32
    %c0_i32_0 = arith.constant 0 : i32
    %c0_i32_1 = arith.constant 0 : i32
    return %c0_i32, %c0_i32_0 : i32, i32
  }
  func.func @transform_6(%arg0: i32) -> (i32, i32) {
    %c0_i32 = arith.constant 0 : i32
    %c0_i32_0 = arith.constant 0 : i32
    %c0_i32_1 = arith.constant 0 : i32
    return %c0_i32, %c0_i32_0 : i32, i32
  }
  func.func @transform_7(%arg0: i32) -> (i32, i32) {
    %c0_i32 = arith.constant 0 : i32
    %c0_i32_0 = arith.constant 0 : i32
    %c0_i32_1 = arith.constant 0 : i32
    return %c0_i32, %c0_i32_0 : i32, i32
  }
  func.func @transform_8(%arg0: i32) -> (i32, i32) {
    %c0_i32 = arith.constant 0 : i32
    %c0_i32_0 = arith.constant 0 : i32
    %c0_i32_1 = arith.constant 0 : i32
    return %c0_i32, %c0_i32_0 : i32, i32
  }
  func.func @transform_9(%arg0: i32) -> (i32, i32) {
    %c0_i32 = arith.constant 0 : i32
    %c0_i32_0 = arith.constant 0 : i32
    %c0_i32_1 = arith.constant 0 : i32
    return %c0_i32, %c0_i32_0 : i32, i32
  }
  func.func @transform_10(%arg0: i32) -> (i32, i32) {
    %c0_i32 = arith.constant 0 : i32
    %c0_i32_0 = arith.constant 0 : i32
    %c0_i32_1 = arith.constant 0 : i32
    return %c0_i32, %c0_i32_0 : i32, i32
  }
  func.func @transform_11(%arg0: i32) -> (i32, i32) {
    %c0_i32 = arith.constant 0 : i32
    %c0_i32_0 = arith.constant 0 : i32
    %c0_i32_1 = arith.constant 0 : i32
    return %c0_i32, %c0_i32_0 : i32, i32
  }
  func.func @transform_12(%arg0: i32) -> (i32, i32) {
    %c0_i32 = arith.constant 0 : i32
    %c0_i32_0 = arith.constant 0 : i32
    %c0_i32_1 = arith.constant 0 : i32
    return %c0_i32, %c0_i32_0 : i32, i32
  }
  func.func @transform_13(%arg0: i32) -> (i32, i32) {
    %c0_i32 = arith.constant 0 : i32
    %c0_i32_0 = arith.constant 0 : i32
    %c0_i32_1 = arith.constant 0 : i32
    return %c0_i32, %c0_i32_0 : i32, i32
  }
  func.func @transform_14(%arg0: i32) -> (i32, i32) {
    %c0_i32 = arith.constant 0 : i32
    %c0_i32_0 = arith.constant 0 : i32
    return %arg0, %c0_i32 : i32, i32
  }
}

module attributes {stable_mosaic.version = 11 : i64} {
  func.func @attention_net_kernel(%arg0: i32, %arg1: memref<16x80xf32, #tpu.memory_space<vmem>>, %arg2: memref<80x512xbf16, #tpu.memory_space<vmem>>, %arg3: memref<1x512xf32, #tpu.memory_space<vmem>>, %arg4: memref<1x512xf32, #tpu.memory_space<vmem>>, %arg5: memref<512x512xbf16, #tpu.memory_space<vmem>>, %arg6: memref<1x512xf32, #tpu.memory_space<vmem>>, %arg7: memref<512x512xbf16, #tpu.memory_space<vmem>>, %arg8: memref<1x512xf32, #tpu.memory_space<vmem>>, %arg9: memref<512x512xbf16, #tpu.memory_space<vmem>>, %arg10: memref<1x512xf32, #tpu.memory_space<vmem>>, %arg11: memref<512x512xbf16, #tpu.memory_space<vmem>>, %arg12: memref<1x512xf32, #tpu.memory_space<vmem>>, %arg13: memref<512x128xbf16, #tpu.memory_space<vmem>>, %arg14: memref<1x128xf32, #tpu.memory_space<vmem>>, %arg15: memref<16x128xf32, #tpu.memory_space<vmem>>) attributes {dimension_semantics = [#tpu.dimension_semantics<parallel>], iteration_bounds = array<i64: 1>, scalar_prefetch = 0 : i64, scratch_operands = 0 : i64, tpu.core_type = #tpu.core_type<tc>, window_params = [{transform_indices = @transform_0, window_bounds = array<i64: 16, 80>}, {pipeline_mode = #tpu.pipeline_mode<synchronous>, transform_indices = @transform_1, window_bounds = array<i64: 80, 512>}, {pipeline_mode = #tpu.pipeline_mode<synchronous>, transform_indices = @transform_2, window_bounds = array<i64: 1, 512>}, {pipeline_mode = #tpu.pipeline_mode<synchronous>, transform_indices = @transform_3, window_bounds = array<i64: 1, 512>}, {pipeline_mode = #tpu.pipeline_mode<synchronous>, transform_indices = @transform_4, window_bounds = array<i64: 512, 512>}, {pipeline_mode = #tpu.pipeline_mode<synchronous>, transform_indices = @transform_5, window_bounds = array<i64: 1, 512>}, {pipeline_mode = #tpu.pipeline_mode<synchronous>, transform_indices = @transform_6, window_bounds = array<i64: 512, 512>}, {pipeline_mode = #tpu.pipeline_mode<synchronous>, transform_indices = @transform_7, window_bounds = array<i64: 1, 512>}, {pipeline_mode = #tpu.pipeline_mode<synchronous>, transform_indices = @transform_8, window_bounds = array<i64: 512, 512>}, {pipeline_mode = #tpu.pipeline_mode<synchronous>, transform_indices = @transform_9, window_bounds = array<i64: 1, 512>}, {pipeline_mode = #tpu.pipeline_mode<synchronous>, transform_indices = @transform_10, window_bounds = array<i64: 512, 512>}, {pipeline_mode = #tpu.pipeline_mode<synchronous>, transform_indices = @transform_11, window_bounds = array<i64: 1, 512>}, {pipeline_mode = #tpu.pipeline_mode<synchronous>, transform_indices = @transform_12, window_bounds = array<i64: 512, 128>}, {pipeline_mode = #tpu.pipeline_mode<synchronous>, transform_indices = @transform_13, window_bounds = array<i64: 1, 128>}, {transform_indices = @transform_14, window_bounds = array<i64: 16, 128>}]} {
    %c0 = arith.constant 0 : index
    %c0_0 = arith.constant 0 : index
    %0 = vector.load %arg1[%c0, %c0_0] : memref<16x80xf32, #tpu.memory_space<vmem>>, vector<16x80xf32>
    %1 = arith.truncf %0 : vector<16x80xf32> to vector<16x80xbf16>
    %c0_1 = arith.constant 0 : index
    %c0_2 = arith.constant 0 : index
    %2 = vector.load %arg2[%c0_1, %c0_2] : memref<80x512xbf16, #tpu.memory_space<vmem>>, vector<80x512xbf16>
    %cst = arith.constant dense<0.000000e+00> : vector<16x512xf32>
    %3 = tpu.matmul %1, %2, %cst {dimension_numbers = #tpu.dot_dimension_numbers<[1], [0], [0], [1], [0, 0, 1, 1], [], []>} : vector<16x80xbf16>, vector<80x512xbf16>, vector<16x512xf32> -> vector<16x512xf32>
    %c0_3 = arith.constant 0 : index
    %c0_4 = arith.constant 0 : index
    %4 = vector.load %arg3[%c0_3, %c0_4] : memref<1x512xf32, #tpu.memory_space<vmem>>, vector<1x512xf32>
    %5 = vector.broadcast %4 : vector<1x512xf32> to vector<16x512xf32>
    %6 = arith.addf %3, %5 : vector<16x512xf32>
    %cst_5 = arith.constant 0.000000e+00 : f32
    %7 = vector.broadcast %cst_5 : f32 to vector<16x512xf32>
    %8 = arith.maximumf %6, %7 : vector<16x512xf32>
    %c0_6 = arith.constant 0 : index
    %c0_7 = arith.constant 0 : index
    %9 = vector.load %arg4[%c0_6, %c0_7] : memref<1x512xf32, #tpu.memory_space<vmem>>, vector<1x512xf32>
    %10 = vector.broadcast %9 : vector<1x512xf32> to vector<16x512xf32>
    %11 = arith.addf %8, %10 : vector<16x512xf32>
    %12 = arith.truncf %11 : vector<16x512xf32> to vector<16x512xbf16>
    %c0_8 = arith.constant 0 : index
    %c0_9 = arith.constant 0 : index
    %13 = vector.load %arg5[%c0_8, %c0_9] : memref<512x512xbf16, #tpu.memory_space<vmem>>, vector<512x512xbf16>
    %cst_10 = arith.constant dense<0.000000e+00> : vector<16x512xf32>
    %14 = tpu.matmul %12, %13, %cst_10 {dimension_numbers = #tpu.dot_dimension_numbers<[1], [0], [0], [1], [0, 0, 1, 1], [], []>} : vector<16x512xbf16>, vector<512x512xbf16>, vector<16x512xf32> -> vector<16x512xf32>
    %c0_11 = arith.constant 0 : index
    %c0_12 = arith.constant 0 : index
    %15 = vector.load %arg6[%c0_11, %c0_12] : memref<1x512xf32, #tpu.memory_space<vmem>>, vector<1x512xf32>
    %16 = vector.broadcast %15 : vector<1x512xf32> to vector<16x512xf32>
    %17 = arith.addf %14, %16 : vector<16x512xf32>
    %18 = arith.truncf %17 : vector<16x512xf32> to vector<16x512xbf16>
    %c0_13 = arith.constant 0 : index
    %c0_14 = arith.constant 0 : index
    %19 = vector.load %arg7[%c0_13, %c0_14] : memref<512x512xbf16, #tpu.memory_space<vmem>>, vector<512x512xbf16>
    %cst_15 = arith.constant dense<0.000000e+00> : vector<16x512xf32>
    %20 = tpu.matmul %18, %19, %cst_15 {dimension_numbers = #tpu.dot_dimension_numbers<[1], [0], [0], [1], [0, 0, 1, 1], [], []>} : vector<16x512xbf16>, vector<512x512xbf16>, vector<16x512xf32> -> vector<16x512xf32>
    %c0_16 = arith.constant 0 : index
    %c0_17 = arith.constant 0 : index
    %21 = vector.load %arg8[%c0_16, %c0_17] : memref<1x512xf32, #tpu.memory_space<vmem>>, vector<1x512xf32>
    %22 = vector.broadcast %21 : vector<1x512xf32> to vector<16x512xf32>
    %23 = arith.addf %20, %22 : vector<16x512xf32>
    %cst_18 = arith.constant 0.000000e+00 : f32
    %24 = vector.broadcast %cst_18 : f32 to vector<16x512xf32>
    %25 = arith.maximumf %23, %24 : vector<16x512xf32>
    %26 = arith.addf %25, %17 : vector<16x512xf32>
    %27 = arith.truncf %26 : vector<16x512xf32> to vector<16x512xbf16>
    %c0_19 = arith.constant 0 : index
    %c0_20 = arith.constant 0 : index
    %28 = vector.load %arg9[%c0_19, %c0_20] : memref<512x512xbf16, #tpu.memory_space<vmem>>, vector<512x512xbf16>
    %cst_21 = arith.constant dense<0.000000e+00> : vector<16x512xf32>
    %29 = tpu.matmul %27, %28, %cst_21 {dimension_numbers = #tpu.dot_dimension_numbers<[1], [0], [0], [1], [0, 0, 1, 1], [], []>} : vector<16x512xbf16>, vector<512x512xbf16>, vector<16x512xf32> -> vector<16x512xf32>
    %c0_22 = arith.constant 0 : index
    %c0_23 = arith.constant 0 : index
    %30 = vector.load %arg10[%c0_22, %c0_23] : memref<1x512xf32, #tpu.memory_space<vmem>>, vector<1x512xf32>
    %31 = vector.broadcast %30 : vector<1x512xf32> to vector<16x512xf32>
    %32 = arith.addf %29, %31 : vector<16x512xf32>
    %cst_24 = arith.constant 0.000000e+00 : f32
    %33 = vector.broadcast %cst_24 : f32 to vector<16x512xf32>
    %34 = arith.maximumf %32, %33 : vector<16x512xf32>
    %35 = arith.truncf %34 : vector<16x512xf32> to vector<16x512xbf16>
    %c0_25 = arith.constant 0 : index
    %c0_26 = arith.constant 0 : index
    %36 = vector.load %arg11[%c0_25, %c0_26] : memref<512x512xbf16, #tpu.memory_space<vmem>>, vector<512x512xbf16>
    %cst_27 = arith.constant dense<0.000000e+00> : vector<16x512xf32>
    %37 = tpu.matmul %35, %36, %cst_27 {dimension_numbers = #tpu.dot_dimension_numbers<[1], [0], [0], [1], [0, 0, 1, 1], [], []>} : vector<16x512xbf16>, vector<512x512xbf16>, vector<16x512xf32> -> vector<16x512xf32>
    %c0_28 = arith.constant 0 : index
    %c0_29 = arith.constant 0 : index
    %38 = vector.load %arg12[%c0_28, %c0_29] : memref<1x512xf32, #tpu.memory_space<vmem>>, vector<1x512xf32>
    %39 = vector.broadcast %38 : vector<1x512xf32> to vector<16x512xf32>
    %40 = arith.addf %37, %39 : vector<16x512xf32>
    %cst_30 = arith.constant 0.000000e+00 : f32
    %41 = vector.broadcast %cst_30 : f32 to vector<16x512xf32>
    %42 = arith.maximumf %40, %41 : vector<16x512xf32>
    %43 = arith.truncf %42 : vector<16x512xf32> to vector<16x512xbf16>
    %c0_31 = arith.constant 0 : index
    %c0_32 = arith.constant 0 : index
    %44 = vector.load %arg13[%c0_31, %c0_32] : memref<512x128xbf16, #tpu.memory_space<vmem>>, vector<512x128xbf16>
    %cst_33 = arith.constant dense<0.000000e+00> : vector<16x128xf32>
    %45 = tpu.matmul %43, %44, %cst_33 {dimension_numbers = #tpu.dot_dimension_numbers<[1], [0], [0], [1], [0, 0, 1, 1], [], []>} : vector<16x512xbf16>, vector<512x128xbf16>, vector<16x128xf32> -> vector<16x128xf32>
    %c0_34 = arith.constant 0 : index
    %c0_35 = arith.constant 0 : index
    %46 = vector.load %arg14[%c0_34, %c0_35] : memref<1x128xf32, #tpu.memory_space<vmem>>, vector<1x128xf32>
    %47 = vector.broadcast %46 : vector<1x128xf32> to vector<16x128xf32>
    %48 = arith.addf %45, %47 : vector<16x128xf32>
    %49 = tpu.iota {dimensions = array<i32: 1>} : vector<16x128xi32>
    %c17_i32 = arith.constant 17 : i32
    %50 = vector.broadcast %c17_i32 : i32 to vector<16x128xi32>
    %51 = arith.cmpi slt, %49, %50 : vector<16x128xi32>
    %cst_36 = arith.constant -1.000000e+30 : f32
    %52 = vector.broadcast %cst_36 : f32 to vector<16x128xf32>
    %53 = arith.select %51, %48, %52 : vector<16x128xi1>, vector<16x128xf32>
    %cst_37 = arith.constant dense<0xFF800000> : vector<16xf32>
    %54 = vector.multi_reduction <maximumf>, %53, %cst_37 [1] : vector<16x128xf32> to vector<16xf32>
    %55 = vector.shape_cast %54 : vector<16xf32> to vector<16x1xf32>
    %56 = vector.broadcast %55 : vector<16x1xf32> to vector<16x128xf32>
    %57 = arith.subf %53, %56 : vector<16x128xf32>
    %58 = math.exp %57 : vector<16x128xf32>
    %cst_38 = arith.constant dense<0.000000e+00> : vector<16xf32>
    %59 = vector.multi_reduction <add>, %58, %cst_38 [1] : vector<16x128xf32> to vector<16xf32>
    %60 = vector.shape_cast %59 : vector<16xf32> to vector<16x1xf32>
    %61 = math.log %60 : vector<16x1xf32>
    %62 = vector.broadcast %61 : vector<16x1xf32> to vector<16x128xf32>
    %63 = arith.subf %57, %62 : vector<16x128xf32>
    %c17_i32_39 = arith.constant 17 : i32
    %64 = vector.broadcast %c17_i32_39 : i32 to vector<16x128xi32>
    %65 = arith.cmpi eq, %49, %64 : vector<16x128xi32>
    %cst_40 = arith.constant -1.000000e+30 : f32
    %66 = vector.broadcast %cst_40 : f32 to vector<16x128xf32>
    %67 = arith.select %65, %48, %66 : vector<16x128xi1>, vector<16x128xf32>
    %cst_41 = arith.constant dense<0xFF800000> : vector<16xf32>
    %68 = vector.multi_reduction <maximumf>, %67, %cst_41 [1] : vector<16x128xf32> to vector<16xf32>
    %69 = vector.shape_cast %68 : vector<16xf32> to vector<16x1xf32>
    %cst_42 = arith.constant 0.000000e+00 : f32
    %70 = vector.broadcast %cst_42 : f32 to vector<16x1xf32>
    %71 = arith.subf %70, %69 : vector<16x1xf32>
    %72 = math.exp %71 : vector<16x1xf32>
    %cst_43 = arith.constant 1.000000e+00 : f32
    %73 = vector.broadcast %cst_43 : f32 to vector<16x1xf32>
    %74 = arith.addf %73, %72 : vector<16x1xf32>
    %cst_44 = arith.constant 1.000000e+00 : f32
    %75 = vector.broadcast %cst_44 : f32 to vector<16x1xf32>
    %76 = arith.divf %75, %74 : vector<16x1xf32>
    %c17_i32_45 = arith.constant 17 : i32
    %77 = vector.broadcast %c17_i32_45 : i32 to vector<16x128xi32>
    %78 = arith.cmpi slt, %49, %77 : vector<16x128xi32>
    %c17_i32_46 = arith.constant 17 : i32
    %79 = vector.broadcast %c17_i32_46 : i32 to vector<16x128xi32>
    %80 = arith.cmpi eq, %49, %79 : vector<16x128xi32>
    %cst_47 = arith.constant 0.000000e+00 : f32
    %81 = vector.shape_cast %76 : vector<16x1xf32> to vector<16x1xf32>
    %82 = vector.broadcast %81 : vector<16x1xf32> to vector<16x128xf32>
    %83 = vector.broadcast %cst_47 : f32 to vector<16x128xf32>
    %84 = arith.select %80, %82, %83 : vector<16x128xi1>, vector<16x128xf32>
    %85 = arith.select %78, %63, %84 : vector<16x128xi1>, vector<16x128xf32>
    %c0_48 = arith.constant 0 : index
    %c0_49 = arith.constant 0 : index
    %86 = vector.load %arg15[%c0_48, %c0_49] : memref<16x128xf32, #tpu.memory_space<vmem>>, vector<16x128xf32>
    tpu.vector_store %arg15[%c0_48, %c0_49], %85 {strides = array<i32>} : memref<16x128xf32, #tpu.memory_space<vmem>>, vector<16x128xf32>,
    return
  }
  func.func @transform_0(%arg0: i32) -> (i32, i32) {
    %c0_i32 = arith.constant 0 : i32
    %c0_i32_0 = arith.constant 0 : i32
    return %arg0, %c0_i32 : i32, i32
  }
  func.func @transform_1(%arg0: i32) -> (i32, i32) {
    %c0_i32 = arith.constant 0 : i32
    %c0_i32_0 = arith.constant 0 : i32
    %c0_i32_1 = arith.constant 0 : i32
    return %c0_i32, %c0_i32_0 : i32, i32
  }
  func.func @transform_2(%arg0: i32) -> (i32, i32) {
    %c0_i32 = arith.constant 0 : i32
    %c0_i32_0 = arith.constant 0 : i32
    %c0_i32_1 = arith.constant 0 : i32
    return %c0_i32, %c0_i32_0 : i32, i32
  }
  func.func @transform_3(%arg0: i32) -> (i32, i32) {
    %c0_i32 = arith.constant 0 : i32
    %c0_i32_0 = arith.constant 0 : i32
    %c0_i32_1 = arith.constant 0 : i32
    return %c0_i32, %c0_i32_0 : i32, i32
  }
  func.func @transform_4(%arg0: i32) -> (i32, i32) {
    %c0_i32 = arith.constant 0 : i32
    %c0_i32_0 = arith.constant 0 : i32
    %c0_i32_1 = arith.constant 0 : i32
    return %c0_i32, %c0_i32_0 : i32, i32
  }
  func.func @transform_5(%arg0: i32) -> (i32, i32) {
    %c0_i32 = arith.constant 0 : i32
    %c0_i32_0 = arith.constant 0 : i32
    %c0_i32_1 = arith.constant 0 : i32
    return %c0_i32, %c0_i32_0 : i32, i32
  }
  func.func @transform_6(%arg0: i32) -> (i32, i32) {
    %c0_i32 = arith.constant 0 : i32
    %c0_i32_0 = arith.constant 0 : i32
    %c0_i32_1 = arith.constant 0 : i32
    return %c0_i32, %c0_i32_0 : i32, i32
  }
  func.func @transform_7(%arg0: i32) -> (i32, i32) {
    %c0_i32 = arith.constant 0 : i32
    %c0_i32_0 = arith.constant 0 : i32
    %c0_i32_1 = arith.constant 0 : i32
    return %c0_i32, %c0_i32_0 : i32, i32
  }
  func.func @transform_8(%arg0: i32) -> (i32, i32) {
    %c0_i32 = arith.constant 0 : i32
    %c0_i32_0 = arith.constant 0 : i32
    %c0_i32_1 = arith.constant 0 : i32
    return %c0_i32, %c0_i32_0 : i32, i32
  }
  func.func @transform_9(%arg0: i32) -> (i32, i32) {
    %c0_i32 = arith.constant 0 : i32
    %c0_i32_0 = arith.constant 0 : i32
    %c0_i32_1 = arith.constant 0 : i32
    return %c0_i32, %c0_i32_0 : i32, i32
  }
  func.func @transform_10(%arg0: i32) -> (i32, i32) {
    %c0_i32 = arith.constant 0 : i32
    %c0_i32_0 = arith.constant 0 : i32
    %c0_i32_1 = arith.constant 0 : i32
    return %c0_i32, %c0_i32_0 : i32, i32
  }
  func.func @transform_11(%arg0: i32) -> (i32, i32) {
    %c0_i32 = arith.constant 0 : i32
    %c0_i32_0 = arith.constant 0 : i32
    %c0_i32_1 = arith.constant 0 : i32
    return %c0_i32, %c0_i32_0 : i32, i32
  }
  func.func @transform_12(%arg0: i32) -> (i32, i32) {
    %c0_i32 = arith.constant 0 : i32
    %c0_i32_0 = arith.constant 0 : i32
    %c0_i32_1 = arith.constant 0 : i32
    return %c0_i32, %c0_i32_0 : i32, i32
  }
  func.func @transform_13(%arg0: i32) -> (i32, i32) {
    %c0_i32 = arith.constant 0 : i32
    %c0_i32_0 = arith.constant 0 : i32
    %c0_i32_1 = arith.constant 0 : i32
    return %c0_i32, %c0_i32_0 : i32, i32
  }
  func.func @transform_14(%arg0: i32) -> (i32, i32) {
    %c0_i32 = arith.constant 0 : i32
    %c0_i32_0 = arith.constant 0 : i32
    return %arg0, %c0_i32 : i32, i32
  }
}

</mosaic_0001>

<bundles_post_ra>
// kernel: _forward_impl.1
= control target key start
LH: loop header
LB: loop body
LE: loop exit
PB: predicated region body
PF: predicated region fallthrough
CT: control target
= control target key end

     0   :  { %vm181_vm0 = vcmask 654336   ;;  %s11158_s1 = inlined_call_operand.vmem [shape: bf16[80,512], index: 1, kind: input, shape index: {}]   ;;  %s11159_s0 = inlined_call_operand.vmem [shape: f32[16,80], index: 0, kind: input, shape index: {}]   ;;  %s11160_s4 = inlined_call_operand.vmem [shape: bf16[512,512], index: 4, kind: input, shape index: {}]   ;;  %s11161_s2 = inlined_call_operand.vmem [shape: f32[1,512], index: 2, kind: input, shape index: {}]   ;;  %s11162_s3 = inlined_call_operand.vmem [shape: f32[1,512], index: 3, kind: input, shape index: {}]   ;;  %s11163_s6 = inlined_call_operand.vmem [shape: bf16[512,512], index: 6, kind: input, shape index: {}]   ;;  %s11164_s5 = inlined_call_operand.vmem [shape: f32[1,512], index: 5, kind: input, shape index: {}]   ;;  %s11165_s8 = inlined_call_operand.vmem [shape: bf16[512,512], index: 8, kind: input, shape index: {}]   ;;  %s11166_s7 = inlined_call_operand.vmem [shape: f32[1,512], index: 7, kind: input, shape index: {}]   ;;  %s11167_s10 = inlined_call_operand.vmem [shape: bf16[512,512], index: 10, kind: input, shape index: {}]   ;;  %s11168_s9 = inlined_call_operand.vmem [shape: f32[1,512], index: 9, kind: input, shape index: {}]   ;;  %s11169_s12 = inlined_call_operand.vmem [shape: bf16[512,128], index: 12, kind: input, shape index: {}]   ;;  %s11170_s13 = inlined_call_operand.vmem [shape: f32[1,128], index: 13, kind: input, shape index: {}]   ;;  %s11171_s11 = inlined_call_operand.vmem [shape: f32[1,512], index: 11, kind: input, shape index: {}]   ;;  %s11172_s14 = inlined_call_operand.vmem [shape: f32[16,128], index: 14, kind: output, shape index: {}]  }
   0x1   :  { %v4789_v0 = vld [vmem:[%s11158_s1 + $0x80] sm:$0xf]  ;;  %v7001_v1 = vld [vmem:[%s11158_s1 + $0x8c] sm:$0xf0]  ;;  %v6999_v2 = vld [vmem:[%s11158_s1 + $0x84] sm:$0xf] }
   0x2   :  { %v4790_v3 = vor.u32 %v7001_v1, %v4789_v0  ;;  %v4791_v4 = vld [vmem:[%s11158_s1 + $0x90] sm:$0xf0]  ;;  %v4797_v5 = vld [vmem:[%s11158_s1 + $0x88] sm:$0xf]  ;;  %v7002_v6 = vld [vmem:[%s11158_s1 + $0x94] sm:$0xf0] }
   0x3   :  { %v4794_v7 = vor.u32 %v6999_v2, %v4791_v4  ;;  %v4798_v8 = vor.u32 %v7002_v6, %v4797_v5  ;;  %v7000_v9 = vld [vmem:[%s11158_s1 + $0x8c] sm:$0xf]  ;;  %v4799_v10 = vld [vmem:[%s11158_s1 + $0x98] sm:$0xf0]  ;;  %v4773_v11 = vld [vmem:[%s11158_s1 + $0x60] sm:$0xf] }
   0x4   :  { %188 = vmatpush.bf16.msra.mxu0 %v4790_v3  ;;  %v4802_v12 = vor.u32 %v7000_v9, %v4799_v10  ;;  %v6997_v13 = vld [vmem:[%s11158_s1 + $0x6c] sm:$0xf0]  ;;  %v6995_v14 = vld [vmem:[%s11158_s1 + $0x64] sm:$0xf]  ;;  %v4775_v15 = vld [vmem:[%s11158_s1 + $0x70] sm:$0xf0] }
   0x5   :  { %202 = vmatpush.bf16.msra.mxu1 %v4794_v7  ;;  %216 = vmatpush.bf16.msra.mxu2 %v4798_v8  ;;  %v4774_v16 = vor.u32 %v6997_v13, %v4773_v11  ;;  %v4778_v17 = vor.u32 %v6995_v14, %v4775_v15  ;;  %v4781_v18 = vld [vmem:[%s11158_s1 + $0x68] sm:$0xf]  ;;  %v6998_v19 = vld [vmem:[%s11158_s1 + $0x74] sm:$0xf0]  ;;  %v6996_v20 = vld [vmem:[%s11158_s1 + $0x6c] sm:$0xf] }
   0x6   :  { %230 = vmatpush.bf16.msra.mxu3 %v4802_v12  ;;  %v4782_v21 = vor.u32 %v6998_v19, %v4781_v18  ;;  %v4783_v22 = vld [vmem:[%s11158_s1 + $0x78] sm:$0xf0]  ;;  %v4757_v23 = vld [vmem:[%s11158_s1 + $0x40] sm:$0xf]  ;;  %v6993_v24 = vld [vmem:[%s11158_s1 + $0x4c] sm:$0xf0] }
   0x7   :  { %v4786_v25 = vor.u32 %v6996_v20, %v4783_v22  ;;  %v6991_v26 = vld [vmem:[%s11158_s1 + $0x44] sm:$0xf]  ;;  %v4759_v27 = vld [vmem:[%s11158_s1 + $0x50] sm:$0xf0]  ;;  %v4765_v28 = vld [vmem:[%s11158_s1 + $0x48] sm:$0xf]  ;;  %v4758_v29 = vor.u32 %v6993_v24, %v4757_v23 }
   0x8   :  { %189 = vmatpush.bf16.msra.mxu0 %v4774_v16  ;;  %v6994_v30 = vld [vmem:[%s11158_s1 + $0x54] sm:$0xf0]  ;;  %v6992_v31 = vld [vmem:[%s11158_s1 + $0x4c] sm:$0xf]  ;;  %v4767_v32 = vld [vmem:[%s11158_s1 + $0x58] sm:$0xf0]  ;;  %v4762_v33 = vor.u32 %v6991_v26, %v4759_v27 }
   0x9   :  { %203 = vmatpush.bf16.msra.mxu1 %v4778_v17  ;;  %217 = vmatpush.bf16.msra.mxu2 %v4782_v21  ;;  %v4766_v34 = vor.u32 %v6994_v30, %v4765_v28  ;;  %v4741_v35 = vld [vmem:[%s11158_s1 + $0x20] sm:$0xf]  ;;  %v6989_v36 = vld [vmem:[%s11158_s1 + $0x2c] sm:$0xf0]  ;;  %v6987_v37 = vld [vmem:[%s11158_s1 + $0x24] sm:$0xf]  ;;  %v4770_v38 = vor.u32 %v6992_v31, %v4767_v32 }
   0xa   :  { %231 = vmatpush.bf16.msra.mxu3 %v4786_v25  ;;  %v4743_v39 = vld [vmem:[%s11158_s1 + $0x30] sm:$0xf0]  ;;  %v4749_v40 = vld [vmem:[%s11158_s1 + $0x28] sm:$0xf]  ;;  %v6990_v41 = vld [vmem:[%s11158_s1 + $0x34] sm:$0xf0]  ;;  %v4742_v44 = vor.u32 %v6989_v36, %v4741_v35 }
   0xb   :  { %v6988_v42 = vld [vmem:[%s11158_s1 + $0x2c] sm:$0xf]  ;;  %v4751_v43 = vld [vmem:[%s11158_s1 + $0x38] sm:$0xf0]  ;;  %v4725_v45 = vld [vmem:[%s11158_s1] sm:$0xf]  ;;  %v4746_v47 = vor.u32 %v6987_v37, %v4743_v39  ;;  %v4750_v48 = vor.u32 %v6990_v41, %v4749_v40 }
   0xc   :  { %190 = vmatpush.bf16.msra.mxu0 %v4758_v29  ;;  %v6985_v46 = vld [vmem:[%s11158_s1 + $0xc] sm:$0xf0]  ;;  %v6983_v49 = vld [vmem:[%s11158_s1 + $0x4] sm:$0xf]  ;;  %v4727_v50 = vld [vmem:[%s11158_s1 + $0x10] sm:$0xf0]  ;;  %v4754_v52 = vor.u32 %v6988_v42, %v4751_v43 }
   0xd   :  { %204 = vmatpush.bf16.msra.mxu1 %v4762_v33  ;;  %218 = vmatpush.bf16.msra.mxu2 %v4766_v34  ;;  %v4733_v51 = vld [vmem:[%s11158_s1 + $0x8] sm:$0xf]  ;;  %v6986_v53 = vld [vmem:[%s11158_s1 + $0x14] sm:$0xf0]  ;;  %v6984_v54 = vld [vmem:[%s11158_s1 + $0xc] sm:$0xf]  ;;  %v4726_v59 = vor.u32 %v6985_v46, %v4725_v45  ;;  %v4730_v63 = vor.u32 %v6983_v49, %v4727_v50 }
   0xe   :  { %232 = vmatpush.bf16.msra.mxu3 %v4770_v38  ;;  %v4735_v55 = vld [vmem:[%s11158_s1 + $0x18] sm:$0xf0]  ;;  %v48_v56 = vld [vmem:[%s11159_s0] sm:$0xff]  ;;  %v7033_v58 = vld [vmem:[%s11160_s4 + $0xec] sm:$0xf0]  ;;  %v4734_v0 = vor.u32 %v6986_v53, %v4733_v51 }
   0xf   :  { %v4921_v57 = vld [vmem:[%s11160_s4 + $0xe0] sm:$0xf]  ;;  %v49_v60 = vld [vmem:[%s11159_s0 + $0x8] sm:$0xff]  ;;  %v7065_v62 = vld [vmem:[%s11160_s4 + $0x1ec] sm:$0xf0]  ;;  %v4738_v1 = vor.u32 %v6984_v54, %v4735_v55 }
  0x10   :  { %191 = vmatpush.bf16.msra.mxu0 %v4742_v44  ;;  %v5049_v61 = vld [vmem:[%s11160_s4 + $0x1e0] sm:$0xf]  ;;  %v4922_v2 = vor.u32 %v7033_v58, %v4921_v57  ;;  %v7097_v5 = vld [vmem:[%s11160_s4 + $0x2ec] sm:$0xf0]  ;;  %v50_v6 = vpack.c.bf16 %v49_v60, %v48_v56 }
  0x11   :  { %205 = vmatpush.bf16.msra.mxu1 %v4746_v47  ;;  %219 = vmatpush.bf16.msra.mxu2 %v4750_v48  ;;  %v4905_v3 = vld [vmem:[%s11160_s4 + $0xc0] sm:$0xf]  ;;  %v5050_v7 = vor.u32 %v7065_v62, %v5049_v61  ;;  %v7029_v8 = vld [vmem:[%s11160_s4 + $0xcc] sm:$0xf0] }
  0x12   :  { %233 = vmatpush.bf16.msra.mxu3 %v4754_v52  ;;  %v5177_v4 = vld [vmem:[%s11160_s4 + $0x2e0] sm:$0xf]  ;;  %v7129_v10 = vld [vmem:[%s11160_s4 + $0x3ec] sm:$0xf0]  ;;  %v4906_v14 = vor.u32 %v7029_v8, %v4905_v3 }
  0x13   :  { %v5305_v9 = vld [vmem:[%s11160_s4 + $0x3e0] sm:$0xf]  ;;  %v7061_v12 = vld [vmem:[%s11160_s4 + $0x1cc] sm:$0xf0]  ;;  %v5178_v13 = vor.u32 %v7097_v5, %v5177_v4 }
  0x14   :  { %192 = vmatpush.bf16.msra.mxu0 %v4726_v59  ;;  %v5033_v11 = vld [vmem:[%s11160_s4 + $0x1c0] sm:$0xf]  ;;  %v5306_v15 = vor.u32 %v7129_v10, %v5305_v9  ;;  %v7093_v18 = vld [vmem:[%s11160_s4 + $0x2cc] sm:$0xf0] }
  0x15   :  { %206 = vmatpush.bf16.msra.mxu1 %v4730_v63  ;;  %220 = vmatpush.bf16.msra.mxu2 %v4734_v0  ;;  %v4889_v16 = vld [vmem:[%s11160_s4 + $0xa0] sm:$0xf]  ;;  %v5034_v19 = vor.u32 %v7061_v12, %v5033_v11  ;;  %v7025_v20 = vld [vmem:[%s11160_s4 + $0xac] sm:$0xf0] }
  0x16   :  { %234 = vmatpush.bf16.msra.mxu3 %v4738_v1  ;;  %v5161_v17 = vld [vmem:[%s11160_s4 + $0x2c0] sm:$0xf]  ;;  %v7125_v22 = vld [vmem:[%s11160_s4 + $0x3cc] sm:$0xf0]  ;;  %v4890_v26 = vor.u32 %v7025_v20, %v4889_v16 }
  0x17   :  { %4803 = vmatmul.msk.bf16.vlgmr.msra.gmra.mxu0 %vm181_vm0, %v50_v6  ;;  %v5289_v21 = vld [vmem:[%s11160_s4 + $0x3c0] sm:$0xf]  ;;  %v7057_v24 = vld [vmem:[%s11160_s4 + $0x1ac] sm:$0xf0]  ;;  %v5162_v25 = vor.u32 %v7093_v18, %v5161_v17 }
  0x18   :  { %1049 = vmatpush.bf16.msrb.mxu0 %v4922_v2  ;;  %4804 = vmatmul.msk.bf16.vlgmr.msra.gmra.mxu1 %vm181_vm0, %v50_v6  ;;  %v5017_v23 = vld [vmem:[%s11160_s4 + $0x1a0] sm:$0xf]  ;;  %v5290_v27 = vor.u32 %v7125_v22, %v5289_v21  ;;  %v7089_v30 = vld [vmem:[%s11160_s4 + $0x2ac] sm:$0xf0]  ;;  %v7031_v21 = vld [vmem:[%s11160_s4 + $0xe4] sm:$0xf] }
  0x19   :  { %1063 = vmatpush.bf16.msrb.mxu1 %v5050_v7  ;;  %4805 = vmatmul.msk.bf16.vlgmr.msra.gmra.mxu2 %vm181_vm0, %v50_v6  ;;  %v4873_v28 = vld [vmem:[%s11160_s4 + $0x80] sm:$0xf]  ;;  %v5018_v31 = vor.u32 %v7057_v24, %v5017_v23  ;;  %v7021_v32 = vld [vmem:[%s11160_s4 + $0x8c] sm:$0xf0]  ;;  %v4923_v22 = vld [vmem:[%s11160_s4 + $0xf0] sm:$0xf0] }
  0x1a   :  { %4806 = vmatmul.msk.bf16.vlgmr.msra.gmra.mxu3 %vm181_vm0, %v50_v6  ;;  %1077 = vmatpush.bf16.msrb.mxu2 %v5178_v13  ;;  %v5145_v29 = vld [vmem:[%s11160_s4 + $0x2a0] sm:$0xf]  ;;  %v7121_v34 = vld [vmem:[%s11160_s4 + $0x3ac] sm:$0xf0]  ;;  %v4874_v38 = vor.u32 %v7021_v32, %v4873_v28  ;;  %v7063_v23 = vld [vmem:[%s11160_s4 + $0x1e4] sm:$0xf] }
  0x1b   :  { %1091 = vmatpush.bf16.msrb.mxu3 %v5306_v15  ;;  %v5273_v33 = vld [vmem:[%s11160_s4 + $0x3a0] sm:$0xf]  ;;  %v7053_v36 = vld [vmem:[%s11160_s4 + $0x18c] sm:$0xf0]  ;;  %v5146_v37 = vor.u32 %v7089_v30, %v5145_v29  ;;  %v5051_v24 = vld [vmem:[%s11160_s4 + $0x1f0] sm:$0xf0] }
  0x1c   :  { %1050 = vmatpush.bf16.msrb.mxu0 %v4906_v14  ;;  %v5001_v35 = vld [vmem:[%s11160_s4 + $0x180] sm:$0xf]  ;;  %v5274_v39 = vor.u32 %v7121_v34, %v5273_v33  ;;  %v7085_v42 = vld [vmem:[%s11160_s4 + $0x28c] sm:$0xf0]  ;;  %v7027_v28 = vld [vmem:[%s11160_s4 + $0xc4] sm:$0xf]  ;;  %v4926_v33 = vor.u32 %v7031_v21, %v4923_v22 }
  0x1d   :  { %1064 = vmatpush.bf16.msrb.mxu1 %v5034_v19  ;;  %v4857_v40 = vld [vmem:[%s11160_s4 + $0x60] sm:$0xf]  ;;  %v5002_v43 = vor.u32 %v7053_v36, %v5001_v35  ;;  %v7017_v44 = vld [vmem:[%s11160_s4 + $0x6c] sm:$0xf0]  ;;  %v7095_v35 = vld [vmem:[%s11160_s4 + $0x2e4] sm:$0xf] }
  0x1e   :  { %1078 = vmatpush.bf16.msrb.mxu2 %v5162_v25  ;;  %v5129_v41 = vld [vmem:[%s11160_s4 + $0x280] sm:$0xf]  ;;  %v7117_v46 = vld [vmem:[%s11160_s4 + $0x38c] sm:$0xf0]  ;;  %v4858_v50 = vor.u32 %v7017_v44, %v4857_v40  ;;  %v5179_v36 = vld [vmem:[%s11160_s4 + $0x2f0] sm:$0xf0] }
  0x1f   :  { %1092 = vmatpush.bf16.msrb.mxu3 %v5290_v27  ;;  %v5257_v45 = vld [vmem:[%s11160_s4 + $0x380] sm:$0xf]  ;;  %v7049_v48 = vld [vmem:[%s11160_s4 + $0x16c] sm:$0xf0]  ;;  %v5130_v49 = vor.u32 %v7085_v42, %v5129_v41  ;;  %v5307_v40 = vld [vmem:[%s11160_s4 + $0x3f0] sm:$0xf0] }
  0x20   :  { %1051 = vmatpush.bf16.msrb.mxu0 %v4890_v26  ;;  %v4985_v47 = vld [vmem:[%s11160_s4 + $0x160] sm:$0xf]  ;;  %v5258_v51 = vor.u32 %v7117_v46, %v5257_v45  ;;  %v7081_v54 = vld [vmem:[%s11160_s4 + $0x26c] sm:$0xf0]  ;;  %v7059_v41 = vld [vmem:[%s11160_s4 + $0x1c4] sm:$0xf]  ;;  %v5182_v45 = vor.u32 %v7095_v35, %v5179_v36 }
  0x21   :  { %1065 = vmatpush.bf16.msrb.mxu1 %v5018_v31  ;;  %v4841_v52 = vld [vmem:[%s11160_s4 + $0x40] sm:$0xf]  ;;  %v4986_v55 = vor.u32 %v7049_v48, %v4985_v47  ;;  %v7013_v56 = vld [vmem:[%s11160_s4 + $0x4c] sm:$0xf0]  ;;  %v5035_v42 = vld [vmem:[%s11160_s4 + $0x1d0] sm:$0xf0] }
  0x22   :  { %1079 = vmatpush.bf16.msrb.mxu2 %v5146_v37  ;;  %v5113_v53 = vld [vmem:[%s11160_s4 + $0x260] sm:$0xf]  ;;  %v7113_v58 = vld [vmem:[%s11160_s4 + $0x36c] sm:$0xf0]  ;;  %v4842_v62 = vor.u32 %v7013_v56, %v4841_v52  ;;  %v5054_v37 = vor.u32 %v7063_v23, %v5051_v24  ;;  %v7023_v48 = vld [vmem:[%s11160_s4 + $0xa4] sm:$0xf] }
  0x23   :  { %1093 = vmatpush.bf16.msrb.mxu3 %v5274_v39  ;;  %v5241_v57 = vld [vmem:[%s11160_s4 + $0x360] sm:$0xf]  ;;  %v7045_v60 = vld [vmem:[%s11160_s4 + $0x14c] sm:$0xf0]  ;;  %v5114_v61 = vor.u32 %v7081_v54, %v5113_v53  ;;  %v7127_v39 = vld [vmem:[%s11160_s4 + $0x3e4] sm:$0xf] }
  0x24   :  { %1052 = vmatpush.bf16.msrb.mxu0 %v4874_v38  ;;  %v4969_v59 = vld [vmem:[%s11160_s4 + $0x140] sm:$0xf]  ;;  %v5242_v63 = vor.u32 %v7113_v58, %v5241_v57  ;;  %v7077_v2 = vld [vmem:[%s11160_s4 + $0x24c] sm:$0xf0]  ;;  %v4907_v38 = vld [vmem:[%s11160_s4 + $0xd0] sm:$0xf0]  ;;  %v5310_v47 = vor.u32 %v7127_v39, %v5307_v40 }
  0x25   :  { %1066 = vmatpush.bf16.msrb.mxu1 %v5002_v43  ;;  %v4825_v0 = vld [vmem:[%s11160_s4 + $0x20] sm:$0xf]  ;;  %v4970_v3 = vor.u32 %v7045_v60, %v4969_v59  ;;  %v7009_v4 = vld [vmem:[%s11160_s4 + $0x2c] sm:$0xf0]  ;;  %v4910_v46 = vor.u32 %v7027_v28, %v4907_v38  ;;  %v4891_v52 = vld [vmem:[%s11160_s4 + $0xb0] sm:$0xf0] }
  0x26   :  { %1080 = vmatpush.bf16.msrb.mxu2 %v5130_v49  ;;  %v5097_v1 = vld [vmem:[%s11160_s4 + $0x240] sm:$0xf]  ;;  %v7109_v6 = vld [vmem:[%s11160_s4 + $0x34c] sm:$0xf0]  ;;  %v4826_v11 = vor.u32 %v7009_v4, %v4825_v0  ;;  %v7091_v49 = vld [vmem:[%s11160_s4 + $0x2c4] sm:$0xf]  ;;  %v4894_v58 = vor.u32 %v7023_v48, %v4891_v52 }
  0x27   :  { %1094 = vmatpush.bf16.msrb.mxu3 %v5258_v51  ;;  %v5225_v5 = vld [vmem:[%s11160_s4 + $0x340] sm:$0xf]  ;;  %v7041_v8 = vld [vmem:[%s11160_s4 + $0x12c] sm:$0xf0]  ;;  %v5098_v9 = vor.u32 %v7077_v2, %v5097_v1  ;;  %v5038_v51 = vor.u32 %v7059_v41, %v5035_v42  ;;  %v7123_v53 = vld [vmem:[%s11160_s4 + $0x3c4] sm:$0xf] }
  0x28   :  { %1053 = vmatpush.bf16.msrb.mxu0 %v4858_v50  ;;  %v4953_v7 = vld [vmem:[%s11160_s4 + $0x120] sm:$0xf]  ;;  %v5226_v12 = vor.u32 %v7109_v6, %v5225_v5  ;;  %v7005_v13 = vld [vmem:[%s11160_s4 + $0xc] sm:$0xf0]  ;;  %v5163_v50 = vld [vmem:[%s11160_s4 + $0x2d0] sm:$0xf0] }
  0x29   :  { %1067 = vmatpush.bf16.msrb.mxu1 %v4986_v55  ;;  %v4809_v10 = vld [vmem:[%s11160_s4] sm:$0xf]  ;;  %v7073_v15 = vld [vmem:[%s11160_s4 + $0x22c] sm:$0xf0]  ;;  %v4954_v16 = vor.u32 %v7041_v8, %v4953_v7  ;;  %v5291_v54 = vld [vmem:[%s11160_s4 + $0x3d0] sm:$0xf0]  ;;  %v5166_v57 = vor.u32 %v7091_v49, %v5163_v50 }
  0x2a   :  { %1081 = vmatpush.bf16.msrb.mxu2 %v5114_v61  ;;  %v5081_v14 = vld [vmem:[%s11160_s4 + $0x220] sm:$0xf]  ;;  %v7105_v19 = vld [vmem:[%s11160_s4 + $0x32c] sm:$0xf0]  ;;  %v4810_v26 = vor.u32 %v7005_v13, %v4809_v10  ;;  %v7055_v55 = vld [vmem:[%s11160_s4 + $0x1a4] sm:$0xf]  ;;  %v5294_v59 = vor.u32 %v7123_v53, %v5291_v54 }
  0x2b   :  { %1095 = vmatpush.bf16.msrb.mxu3 %v5242_v63  ;;  %v4937_v17 = vld [vmem:[%s11160_s4 + $0x100] sm:$0xf]  ;;  %v7037_v20 = vld [vmem:[%s11160_s4 + $0x10c] sm:$0xf0]  ;;  %v5082_v25 = vor.u32 %v7073_v15, %v5081_v14  ;;  %v5019_v56 = vld [vmem:[%s11160_s4 + $0x1b0] sm:$0xf0] }
  0x2c   :  { %1054 = vmatpush.bf16.msrb.mxu0 %v4842_v62  ;;  %v5209_v18 = vld [vmem:[%s11160_s4 + $0x320] sm:$0xf]  ;;  %v7069_v30 = vld [vmem:[%s11160_s4 + $0x20c] sm:$0xf0]  ;;  %v4938_v32 = vor.u32 %v7037_v20, %v4937_v17  ;;  %v5022_v60 = vor.u32 %v7055_v55, %v5019_v56  ;;  %v7019_v61 = vld [vmem:[%s11160_s4 + $0x84] sm:$0xf] }
  0x2d   :  { %1068 = vmatpush.bf16.msrb.mxu1 %v4970_v3  ;;  %v5210_v27 = vor.u32 %v7105_v19, %v5209_v18  ;;  %v5065_v29 = vld [vmem:[%s11160_s4 + $0x200] sm:$0xf]  ;;  %v7101_v34 = vld [vmem:[%s11160_s4 + $0x30c] sm:$0xf0]  ;;  %v4875_v62 = vld [vmem:[%s11160_s4 + $0x90] sm:$0xf0] }
  0x2e   :  { %1082 = vmatpush.bf16.msrb.mxu2 %v5098_v9  ;;  %v5193_v31 = vld [vmem:[%s11160_s4 + $0x300] sm:$0xf]  ;;  %v5066_v43 = vor.u32 %v7069_v30, %v5065_v29  ;;  %v7051_v63 = vld [vmem:[%s11160_s4 + $0x184] sm:$0xf]  ;;  %v4878_v0 = vor.u32 %v7019_v61, %v4875_v62  ;;  %v5003_v1 = vld [vmem:[%s11160_s4 + $0x190] sm:$0xf0] }
  0x2f   :  { %1096 = vmatpush.bf16.msrb.mxu3 %v5226_v12  ;;  %v5194_v44 = vor.u32 %v7101_v34, %v5193_v31  ;;  %v5006_v2 = vor.u32 %v7051_v63, %v5003_v1  ;;  %v7087_v3 = vld [vmem:[%s11160_s4 + $0x2a4] sm:$0xf]  ;;  %v5147_v4 = vld [vmem:[%s11160_s4 + $0x2b0] sm:$0xf0]  ;;  %v71_v63 = vld [vmem:[%s11161_s2] sm:$0xf] }
  0x30   :  { %1055 = vmatpush.bf16.msrb.mxu0 %v4826_v11  ;;  %v7119_v5 = vld [vmem:[%s11160_s4 + $0x3a4] sm:$0xf]  ;;  %v5150_v6 = vor.u32 %v7087_v3, %v5147_v4  ;;  %v5275_v7 = vld [vmem:[%s11160_s4 + $0x3b0] sm:$0xf0] }
  0x31   :  { %1069 = vmatpush.bf16.msrb.mxu1 %v4954_v16  ;;  %v5278_v8 = vor.u32 %v7119_v5, %v5275_v7  ;;  %v7015_v9 = vld [vmem:[%s11160_s4 + $0x64] sm:$0xf]  ;;  %v4859_v10 = vld [vmem:[%s11160_s4 + $0x70] sm:$0xf0] }
  0x32   :  { %1083 = vmatpush.bf16.msrb.mxu2 %v5082_v25  ;;  %v4862_v11 = vor.u32 %v7015_v9, %v4859_v10  ;;  %v7047_v12 = vld [vmem:[%s11160_s4 + $0x164] sm:$0xf]  ;;  %v4987_v13 = vld [vmem:[%s11160_s4 + $0x170] sm:$0xf0] }
  0x33   :  { %1097 = vmatpush.bf16.msrb.mxu3 %v5210_v27  ;;  %v4990_v14 = vor.u32 %v7047_v12, %v4987_v13  ;;  %v7083_v15 = vld [vmem:[%s11160_s4 + $0x284] sm:$0xf]  ;;  %v5131_v16 = vld [vmem:[%s11160_s4 + $0x290] sm:$0xf0]  ;;  %v75_v12 = vperm.slane %v71_v63, 2 }
  0x34   :  { %1056 = vmatpush.bf16.msrb.mxu0 %v4810_v26  ;;  %v5134_v17 = vor.u32 %v7083_v15, %v5131_v16  ;;  %v7115_v18 = vld [vmem:[%s11160_s4 + $0x384] sm:$0xf]  ;;  %v5259_v19 = vld [vmem:[%s11160_s4 + $0x390] sm:$0xf0]  ;;  %v76_v15 = vperm.slane %v71_v63, 3 }
  0x35   :  { %1070 = vmatpush.bf16.msrb.mxu1 %v4938_v32  ;;  %v5262_v20 = vor.u32 %v7115_v18, %v5259_v19  ;;  %v7011_v21 = vld [vmem:[%s11160_s4 + $0x44] sm:$0xf]  ;;  %v4843_v22 = vld [vmem:[%s11160_s4 + $0x50] sm:$0xf0] }
  0x36   :  { %1084 = vmatpush.bf16.msrb.mxu2 %v5066_v43  ;;  %v7043_v23 = vld [vmem:[%s11160_s4 + $0x144] sm:$0xf]  ;;  %v4846_v24 = vor.u32 %v7011_v21, %v4843_v22  ;;  %v4971_v25 = vld [vmem:[%s11160_s4 + $0x150] sm:$0xf0]  ;;  %v4929_v21 = vld [vmem:[%s11160_s4 + $0xe8] sm:$0xf] }
  0x37   :  { %1098 = vmatpush.bf16.msrb.mxu3 %v5194_v44  ;;  %v4974_v26 = vor.u32 %v7043_v23, %v4971_v25  ;;  %v7079_v27 = vld [vmem:[%s11160_s4 + $0x264] sm:$0xf]  ;;  %v5115_v28 = vld [vmem:[%s11160_s4 + $0x270] sm:$0xf0]  ;;  %v7034_v22 = vld [vmem:[%s11160_s4 + $0xf4] sm:$0xf0] }
  0x38   :  { %1105 = vmatpush.bf16.msra.mxu0 %v4926_v33  ;;  %v5118_v29 = vor.u32 %v7079_v27, %v5115_v28  ;;  %v7111_v30 = vld [vmem:[%s11160_s4 + $0x364] sm:$0xf]  ;;  %v5243_v31 = vld [vmem:[%s11160_s4 + $0x370] sm:$0xf0]  ;;  %v7066_v27 = vld [vmem:[%s11160_s4 + $0x1f4] sm:$0xf0] }
  0x39   :  { %1119 = vmatpush.bf16.msra.mxu1 %v5054_v37  ;;  %v5246_v32 = vor.u32 %v7111_v30, %v5243_v31  ;;  %v7007_v33 = vld [vmem:[%s11160_s4 + $0x24] sm:$0xf]  ;;  %v4827_v34 = vld [vmem:[%s11160_s4 + $0x30] sm:$0xf0]  ;;  %v4930_v31 = vor.u32 %v7034_v22, %v4929_v21  ;;  %v4865_v21 = vld [vmem:[%s11160_s4 + $0x68] sm:$0xf] }
  0x3a   :  { %1133 = vmatpush.bf16.msra.mxu2 %v5182_v45  ;;  %v7039_v35 = vld [vmem:[%s11160_s4 + $0x124] sm:$0xf]  ;;  %v4830_v36 = vor.u32 %v7007_v33, %v4827_v34  ;;  %v4955_v37 = vld [vmem:[%s11160_s4 + $0x130] sm:$0xf0]  ;;  %v7018_v22 = vld [vmem:[%s11160_s4 + $0x74] sm:$0xf0] }
  0x3b   :  { %1147 = vmatpush.bf16.msra.mxu3 %v5310_v47  ;;  %v4958_v38 = vor.u32 %v7039_v35, %v4955_v37  ;;  %v7075_v39 = vld [vmem:[%s11160_s4 + $0x244] sm:$0xf]  ;;  %v5099_v40 = vld [vmem:[%s11160_s4 + $0x250] sm:$0xf0]  ;;  %v4913_v35 = vld [vmem:[%s11160_s4 + $0xc8] sm:$0xf] }
  0x3c   :  { %1106 = vmatpush.bf16.msra.mxu0 %v4910_v46  ;;  %v7107_v41 = vld [vmem:[%s11160_s4 + $0x344] sm:$0xf]  ;;  %v5102_v42 = vor.u32 %v7075_v39, %v5099_v40  ;;  %v5227_v43 = vld [vmem:[%s11160_s4 + $0x350] sm:$0xf0] }
  0x3d   :  { %1120 = vmatpush.bf16.msra.mxu1 %v5038_v51  ;;  %v5230_v44 = vor.u32 %v7107_v41, %v5227_v43  ;;  %v7003_v45 = vld [vmem:[%s11160_s4 + $0x4] sm:$0xf]  ;;  %v4811_v46 = vld [vmem:[%s11160_s4 + $0x10] sm:$0xf0]  ;;  %v7062_v43 = vld [vmem:[%s11160_s4 + $0x1d4] sm:$0xf0] }
  0x3e   :  { %1134 = vmatpush.bf16.msra.mxu2 %v5166_v57  ;;  %v7035_v47 = vld [vmem:[%s11160_s4 + $0x104] sm:$0xf]  ;;  %v4814_v48 = vor.u32 %v7003_v45, %v4811_v46  ;;  %v4939_v49 = vld [vmem:[%s11160_s4 + $0x110] sm:$0xf0] }
  0x3f   :  { %1148 = vmatpush.bf16.msra.mxu3 %v5294_v59  ;;  %v4942_v50 = vor.u32 %v7035_v47, %v4939_v49  ;;  %v7071_v51 = vld [vmem:[%s11160_s4 + $0x224] sm:$0xf]  ;;  %v5083_v52 = vld [vmem:[%s11160_s4 + $0x230] sm:$0xf0]  ;;  %v5185_v47 = vld [vmem:[%s11160_s4 + $0x2e8] sm:$0xf] }
  0x40   :  { %1107 = vmatpush.bf16.msra.mxu0 %v4894_v58  ;;  %v7103_v53 = vld [vmem:[%s11160_s4 + $0x324] sm:$0xf]  ;;  %v5211_v54 = vld [vmem:[%s11160_s4 + $0x330] sm:$0xf0]  ;;  %v5086_v55 = vor.u32 %v7071_v51, %v5083_v52  ;;  %v5313_v51 = vld [vmem:[%s11160_s4 + $0x3e8] sm:$0xf] }
  0x41   :  { %1121 = vmatpush.bf16.msra.mxu1 %v5022_v60  ;;  %v5214_v56 = vor.u32 %v7103_v53, %v5211_v54  ;;  %v7067_v57 = vld [vmem:[%s11160_s4 + $0x204] sm:$0xf]  ;;  %v5067_v58 = vld [vmem:[%s11160_s4 + $0x210] sm:$0xf0]  ;;  %v7130_v52 = vld [vmem:[%s11160_s4 + $0x3f4] sm:$0xf0] }
  0x42   :  { %1135 = vmatpush.bf16.msra.mxu2 %v5150_v6  ;;  %v5070_v59 = vor.u32 %v7067_v57, %v5067_v58  ;;  %v7099_v60 = vld [vmem:[%s11160_s4 + $0x304] sm:$0xf]  ;;  %v5195_v61 = vld [vmem:[%s11160_s4 + $0x310] sm:$0xf0]  ;;  %v249_v6 = vld [vmem:[%s11162_s3] sm:$0xf] }
  0x43   :  { %1149 = vmatpush.bf16.msra.mxu3 %v5278_v8  ;;  %v5198_v62 = vor.u32 %v7099_v60, %v5195_v61  ;;  %v251_v8 = vperm.slane %v249_v6, 0  ;;  %v254_v45 = vperm.slane %v249_v6, 3  ;;  %v7058_v60 = vld [vmem:[%s11160_s4 + $0x1b4] sm:$0xf0] }
  0x44   :  { %1108 = vmatpush.bf16.msra.mxu0 %v4878_v0  ;;  %v73_v0 = vperm.slane %v71_v63, 0 }
  0x45   :  { %1122 = vmatpush.bf16.msra.mxu1 %v5006_v2  ;;  %v74_v2 = vperm.slane %v71_v63, 1 }
  0x46   :  { %1136 = vmatpush.bf16.msra.mxu2 %v5134_v17 }
  0x47   :  { %1150 = vmatpush.bf16.msra.mxu3 %v5262_v20 }
  0x48   :  { %1109 = vmatpush.bf16.msra.mxu0 %v4862_v11  ;;  %v252_v11 = vperm.slane %v249_v6, 1 }
  0x49   :  { %1123 = vmatpush.bf16.msra.mxu1 %v4990_v14 }
  0x4a   :  { %1137 = vmatpush.bf16.msra.mxu2 %v5118_v29 }
  0x4b   :  { %1151 = vmatpush.bf16.msra.mxu3 %v5246_v32 }
  0x4c   :  { %1110 = vmatpush.bf16.msra.mxu0 %v4846_v24 }
  0x4d   :  { %1124 = vmatpush.bf16.msra.mxu1 %v4974_v26  ;;  %v5057_v26 = vld [vmem:[%s11160_s4 + $0x1e8] sm:$0xf] }
  0x4e   :  { %1138 = vmatpush.bf16.msra.mxu2 %v5102_v42  ;;  %v5058_v34 = vor.u32 %v7066_v27, %v5057_v26  ;;  %v5041_v42 = vld [vmem:[%s11160_s4 + $0x1c8] sm:$0xf] }
  0x4f   :  { %1152 = vmatpush.bf16.msra.mxu3 %v5230_v44  ;;  %v5042_v54 = vor.u32 %v7062_v43, %v5041_v42  ;;  %v5137_v27 = vld [vmem:[%s11160_s4 + $0x288] sm:$0xf]  ;;  %v7082_v42 = vld [vmem:[%s11160_s4 + $0x274] sm:$0xf0] }
  0x50   :  { %1111 = vmatpush.bf16.msra.mxu0 %v4830_v36  ;;  %v7030_v36 = vld [vmem:[%s11160_s4 + $0xd4] sm:$0xf0] }
  0x51   :  { %1125 = vmatpush.bf16.msra.mxu1 %v4958_v38  ;;  %v253_v38 = vperm.slane %v249_v6, 2 }
  0x52   :  { %1139 = vmatpush.bf16.msra.mxu2 %v5086_v55  ;;  %v4897_v55 = vld [vmem:[%s11160_s4 + $0xa8] sm:$0xf] }
  0x53   :  { %1153 = vmatpush.bf16.msra.mxu3 %v5214_v56  ;;  %v7026_v56 = vld [vmem:[%s11160_s4 + $0xb4] sm:$0xf0] }
  0x54   :  { %1112 = vmatpush.bf16.msra.mxu0 %v4814_v48  ;;  %v7098_v48 = vld [vmem:[%s11160_s4 + $0x2f4] sm:$0xf0] }
  0x55   :  { %1126 = vmatpush.bf16.msra.mxu1 %v4942_v50  ;;  %v4914_v50 = vor.u32 %v7030_v36, %v4913_v35  ;;  %v5186_v63 = vor.u32 %v7098_v48, %v5185_v47  ;;  %v7014_v35 = vld [vmem:[%s11160_s4 + $0x54] sm:$0xf0]  ;;  %v4977_v36 = vld [vmem:[%s11160_s4 + $0x148] sm:$0xf] }
  0x56   :  { %1140 = vmatpush.bf16.msra.mxu2 %v5070_v59  ;;  %v5025_v59 = vld [vmem:[%s11160_s4 + $0x1a8] sm:$0xf]  ;;  %v7010_v48 = vld [vmem:[%s11160_s4 + $0x34] sm:$0xf0] }
  0x57   :  { %1154 = vmatpush.bf16.msra.mxu3 %v5198_v62  ;;  %v4833_v47 = vld [vmem:[%s11160_s4 + $0x28] sm:$0xf] }
  0x94   :  { %v194_v1 = vpop.f32.mrf.mxu0 }
  0x95   :  { %v208_v3 = vpop.f32.mrf.mxu1  ;;  %v195_v4 = vadd.f32 %v194_v1, %v73_v0  ;;  %v5314_v1 = vor.u32 %v7130_v52, %v5313_v51 }
  0x96   :  { %v209_v5 = vadd.f32 %v208_v3, %v74_v2  ;;  %v5169_v3 = vld [vmem:[%s11160_s4 + $0x2c8] sm:$0xf] }
  0x97   :  { %v241_v7 = vmax.f32 %v195_v4, 0.0  ;;  %v7094_v4 = vld [vmem:[%s11160_s4 + $0x2d4] sm:$0xf0] }
  0x98   :  { %v242_v10 = vmax.f32 %v209_v5, 0.0  ;;  %v5297_v5 = vld [vmem:[%s11160_s4 + $0x3c8] sm:$0xf] }
  0x99   :  { %v259_v19 = vadd.f32 %v251_v8, %v241_v7  ;;  %v5026_v7 = vor.u32 %v7058_v60, %v5025_v59  ;;  %v4817_v59 = vld [vmem:[%s11160_s4 + $0x8] sm:$0xf]  ;;  %v7006_v60 = vld [vmem:[%s11160_s4 + $0x14] sm:$0xf0] }
  0x9a   :  { %v260_v23 = vadd.f32 %v252_v11, %v242_v10  ;;  %v7022_v10 = vld [vmem:[%s11160_s4 + $0x94] sm:$0xf0] }
  0x9c   :  { %v222_v9 = vpop.f32.mrf.mxu2  ;;  %v196_v14 = vpop.f32.mrf.mxu0 }
  0x9d   :  { %v236_v13 = vpop.f32.mrf.mxu3  ;;  %v197_v16 = vadd.f32 %v196_v14, %v73_v0  ;;  %v210_v17 = vpop.f32.mrf.mxu1  ;;  %v223_v24 = vadd.f32 %v222_v9, %v75_v12  ;;  %v4881_v9 = vld [vmem:[%s11160_s4 + $0x88] sm:$0xf] }
  0x9e   :  { %v211_v18 = vadd.f32 %v210_v17, %v74_v2  ;;  %v237_v28 = vadd.f32 %v236_v13, %v76_v15  ;;  %v4898_v2 = vor.u32 %v7026_v56, %v4897_v55  ;;  %v5170_v13 = vor.u32 %v7094_v4, %v5169_v3  ;;  %v7090_v17 = vld [vmem:[%s11160_s4 + $0x2b4] sm:$0xf0]  ;;  %v5233_v55 = vld [vmem:[%s11160_s4 + $0x348] sm:$0xf]  ;;  %v7064_v3 = vld [vmem:[%s11160_s4 + $0x1ec] sm:$0xf] }
  0x9f   :  { %v245_v20 = vmax.f32 %v197_v16, 0.0  ;;  %v243_v37 = vmax.f32 %v223_v24, 0.0  ;;  %v5153_v16 = vld [vmem:[%s11160_s4 + $0x2a8] sm:$0xf]  ;;  %v7050_v24 = vld [vmem:[%s11160_s4 + $0x174] sm:$0xf0]  ;;  %v4834_v56 = vor.u32 %v7010_v48, %v4833_v47 }
  0xa0   :  { %v246_v25 = vmax.f32 %v211_v18, 0.0  ;;  %v244_v44 = vmax.f32 %v237_v28, 0.0  ;;  %v7086_v28 = vld [vmem:[%s11160_s4 + $0x294] sm:$0xf0]  ;;  %v5059_v4 = vld [vmem:[%s11160_s4 + $0x1f8] sm:$0xf0] }
  0xa1   :  { %v263_v29 = vadd.f32 %v251_v8, %v245_v20  ;;  %v261_v57 = vadd.f32 %v253_v38, %v243_v37  ;;  %v7126_v8 = vld [vmem:[%s11160_s4 + $0x3d4] sm:$0xf0]  ;;  %v7020_v47 = vld [vmem:[%s11160_s4 + $0x8c] sm:$0xf]  ;;  %v4883_v48 = vld [vmem:[%s11160_s4 + $0x98] sm:$0xf0] }
  0xa2   :  { %v264_v30 = vadd.f32 %v252_v11, %v246_v25  ;;  %v262_v61 = vadd.f32 %v254_v45, %v244_v44  ;;  %v5009_v11 = vld [vmem:[%s11160_s4 + $0x188] sm:$0xf]  ;;  %v5298_v14 = vor.u32 %v7126_v8, %v5297_v5  ;;  %v7122_v20 = vld [vmem:[%s11160_s4 + $0x3b4] sm:$0xf0]  ;;  %v5154_v25 = vor.u32 %v7090_v17, %v5153_v16  ;;  %v4915_v17 = vld [vmem:[%s11160_s4 + $0xd8] sm:$0xf0] }
  0xa3   :  { %v8171_v32 = vpack.c.bf16 %v263_v29, %v259_v19  ;;  %v5281_v19 = vld [vmem:[%s11160_s4 + $0x3a8] sm:$0xf]  ;;  %v4866_v29 = vor.u32 %v7018_v22, %v4865_v21  ;;  %v7046_v37 = vld [vmem:[%s11160_s4 + $0x154] sm:$0xf0] }
  0xa4   :  { %v224_v33 = vpop.f32.mrf.mxu2  ;;  %v8179_v39 = vpack.c.bf16 %v264_v30, %v260_v23  ;;  %v4993_v23 = vld [vmem:[%s11160_s4 + $0x168] sm:$0xf]  ;;  %v5282_v26 = vor.u32 %v7122_v20, %v5281_v19  ;;  %v4978_v44 = vor.u32 %v7046_v37, %v4977_v36  ;;  %v7074_v8 = vld [vmem:[%s11160_s4 + $0x234] sm:$0xf0]  ;;  %v5043_v19 = vld [vmem:[%s11160_s4 + $0x1d8] sm:$0xf0] }
  0xa5   :  { %v225_v40 = vadd.f32 %v224_v33, %v75_v12  ;;  %v238_v41 = vpop.f32.mrf.mxu3  ;;  %1057 = vmatmul.bf16.vlgmr.msrb.gmra.mxu0 %v8171_v32  ;;  %v7054_v12 = vld [vmem:[%s11160_s4 + $0x194] sm:$0xf0]  ;;  %v4994_v30 = vor.u32 %v7050_v24, %v4993_v23  ;;  %v5073_v21 = vld [vmem:[%s11160_s4 + $0x208] sm:$0xf]  ;;  %v5027_v36 = vld [vmem:[%s11160_s4 + $0x1b8] sm:$0xf0] }
  0xa6   :  { %v239_v46 = vadd.f32 %v238_v41, %v76_v15  ;;  %1071 = vmatmul.bf16.vlgmr.msrb.gmra.mxu1 %v8179_v39  ;;  %1161 = vmatpush.bf16.msrb.mxu0 %v4930_v31  ;;  %v4882_v15 = vor.u32 %v7022_v10, %v4881_v9  ;;  %v5010_v18 = vor.u32 %v7054_v12, %v5009_v11  ;;  %v5265_v31 = vld [vmem:[%s11160_s4 + $0x388] sm:$0xf]  ;;  %v7118_v33 = vld [vmem:[%s11160_s4 + $0x394] sm:$0xf0] }
  0xa7   :  { %v247_v49 = vmax.f32 %v225_v40, 0.0  ;;  %1175 = vmatpush.bf16.msrb.mxu1 %v5058_v34  ;;  %v4849_v34 = vld [vmem:[%s11160_s4 + $0x48] sm:$0xf]  ;;  %v5266_v40 = vor.u32 %v7118_v33, %v5265_v31  ;;  %v4818_v9 = vor.u32 %v7006_v60, %v4817_v59  ;;  %v7106_v12 = vld [vmem:[%s11160_s4 + $0x334] sm:$0xf0] }
  0xa8   :  { %v248_v53 = vmax.f32 %v239_v46, 0.0  ;;  %v5121_v41 = vld [vmem:[%s11160_s4 + $0x268] sm:$0xf]  ;;  %v4850_v43 = vor.u32 %v7014_v35, %v4849_v34  ;;  %v7114_v46 = vld [vmem:[%s11160_s4 + $0x374] sm:$0xf0] }
  0xa9   :  { %v265_v58 = vadd.f32 %v253_v38, %v247_v49  ;;  %v5138_v38 = vor.u32 %v7086_v28, %v5137_v27  ;;  %v4961_v49 = vld [vmem:[%s11160_s4 + $0x128] sm:$0xf]  ;;  %v5122_v51 = vor.u32 %v7082_v42, %v5121_v41  ;;  %v7070_v22 = vld [vmem:[%s11160_s4 + $0x214] sm:$0xf0]  ;;  %v7024_v31 = vld [vmem:[%s11160_s4 + $0xac] sm:$0xf] }
  0xaa   :  { %v266_v62 = vadd.f32 %v254_v45, %v248_v53  ;;  %1162 = vmatpush.bf16.msrb.mxu0 %v4914_v50  ;;  %v5249_v45 = vld [vmem:[%s11160_s4 + $0x368] sm:$0xf]  ;;  %v7042_v50 = vld [vmem:[%s11160_s4 + $0x134] sm:$0xf0]  ;;  %v5074_v33 = vor.u32 %v7070_v22, %v5073_v21  ;;  %v4899_v34 = vld [vmem:[%s11160_s4 + $0xb8] sm:$0xf0] }
  0xab   :  { %v8213_v0 = vpack.c.bf16 %v265_v58, %v261_v57  ;;  %1176 = vmatpush.bf16.msrb.mxu1 %v5042_v54  ;;  %v5250_v52 = vor.u32 %v7114_v46, %v5249_v45  ;;  %v5105_v53 = vld [vmem:[%s11160_s4 + $0x248] sm:$0xf]  ;;  %v7078_v54 = vld [vmem:[%s11160_s4 + $0x254] sm:$0xf0]  ;;  %v4962_v57 = vor.u32 %v7042_v50, %v4961_v49  ;;  %v7056_v35 = vld [vmem:[%s11160_s4 + $0x1ac] sm:$0xf] }
  0xac   :  { %v8224_v6 = vpack.c.bf16 %v266_v62, %v262_v61  ;;  %v7110_v58 = vld [vmem:[%s11160_s4 + $0x354] sm:$0xf0]  ;;  %v4945_v61 = vld [vmem:[%s11160_s4 + $0x108] sm:$0xf]  ;;  %v7092_v41 = vld [vmem:[%s11160_s4 + $0x2cc] sm:$0xf] }
  0xad   :  { %1085 = vmatmul.bf16.vlgmr.msrb.gmra.mxu2 %v8213_v0  ;;  %v7038_v62 = vld [vmem:[%s11160_s4 + $0x114] sm:$0xf0]  ;;  %v5234_v5 = vor.u32 %v7110_v58, %v5233_v55  ;;  %v5217_v11 = vld [vmem:[%s11160_s4 + $0x328] sm:$0xf]  ;;  %v5171_v42 = vld [vmem:[%s11160_s4 + $0x2d8] sm:$0xf0]  ;;  %v4886_v55 = vor.u32 %v7020_v47, %v4883_v48 }
  0xae   :  { %1099 = vmatmul.bf16.vlgmr.msrb.gmra.mxu3 %v8224_v6  ;;  %1189 = vmatpush.bf16.msrb.mxu2 %v5186_v63  ;;  %v7032_v63 = vld [vmem:[%s11160_s4 + $0xec] sm:$0xf]  ;;  %v4946_v10 = vor.u32 %v7038_v62, %v4945_v61  ;;  %v5218_v20 = vor.u32 %v7106_v12, %v5217_v11  ;;  %v5201_v23 = vld [vmem:[%s11160_s4 + $0x308] sm:$0xf]  ;;  %v7102_v24 = vld [vmem:[%s11160_s4 + $0x314] sm:$0xf0] }
  0xaf   :  { %1203 = vmatpush.bf16.msrb.mxu3 %v5314_v1  ;;  %1163 = vmatpush.bf16.msrb.mxu0 %v4898_v2  ;;  %v5106_v1 = vor.u32 %v7078_v54, %v5105_v53  ;;  %v4931_v2 = vld [vmem:[%s11160_s4 + $0xf8] sm:$0xf0]  ;;  %v5202_v37 = vor.u32 %v7102_v24, %v5201_v23  ;;  %v7124_v45 = vld [vmem:[%s11160_s4 + $0x3cc] sm:$0xf] }
  0xb0   :  { %1177 = vmatpush.bf16.msrb.mxu1 %v5026_v7  ;;  %v5089_v7 = vld [vmem:[%s11160_s4 + $0x228] sm:$0xf]  ;;  %v5299_v46 = vld [vmem:[%s11160_s4 + $0x3d8] sm:$0xf0]  ;;  %v7052_v49 = vld [vmem:[%s11160_s4 + $0x18c] sm:$0xf] }
  0xb1   :  { %v5090_v16 = vor.u32 %v7074_v8, %v5089_v7  ;;  %v5011_v50 = vld [vmem:[%s11160_s4 + $0x198] sm:$0xf0]  ;;  %v7088_v53 = vld [vmem:[%s11160_s4 + $0x2ac] sm:$0xf] }
  0xb2   :  { %1190 = vmatpush.bf16.msrb.mxu2 %v5170_v13  ;;  %v4934_v13 = vor.u32 %v7032_v63, %v4931_v2  ;;  %v5155_v54 = vld [vmem:[%s11160_s4 + $0x2b8] sm:$0xf0]  ;;  %v7016_v59 = vld [vmem:[%s11160_s4 + $0x6c] sm:$0xf] }
  0xb3   :  { %1204 = vmatpush.bf16.msrb.mxu3 %v5298_v14  ;;  %1164 = vmatpush.bf16.msrb.mxu0 %v4882_v15  ;;  %v5062_v14 = vor.u32 %v7064_v3, %v5059_v4  ;;  %v7028_v15 = vld [vmem:[%s11160_s4 + $0xcc] sm:$0xf]  ;;  %v5283_v58 = vld [vmem:[%s11160_s4 + $0x3b8] sm:$0xf0]  ;;  %v5158_v63 = vor.u32 %v7088_v53, %v5155_v54 }
  0xb4   :  { %1178 = vmatpush.bf16.msrb.mxu1 %v5010_v18  ;;  %v7060_v18 = vld [vmem:[%s11160_s4 + $0x1cc] sm:$0xf]  ;;  %v4918_v27 = vor.u32 %v7028_v15, %v4915_v17  ;;  %v4867_v60 = vld [vmem:[%s11160_s4 + $0x78] sm:$0xf0] }
  0xb5   :  { %1113 = vmatmul.bf16.vlgmr.msra.gmra.mxu0 %v8171_v32  ;;  %v5046_v28 = vor.u32 %v7060_v18, %v5043_v19  ;;  %v7048_v61 = vld [vmem:[%s11160_s4 + $0x16c] sm:$0xf]  ;;  %v4995_v62 = vld [vmem:[%s11160_s4 + $0x178] sm:$0xf0]  ;;  %v4870_v4 = vor.u32 %v7016_v59, %v4867_v60 }
  0xb6   :  { %1191 = vmatpush.bf16.msrb.mxu2 %v5154_v25  ;;  %1127 = vmatmul.bf16.vlgmr.msra.gmra.mxu1 %v8179_v39  ;;  %v7096_v25 = vld [vmem:[%s11160_s4 + $0x2ec] sm:$0xf]  ;;  %v5139_v3 = vld [vmem:[%s11160_s4 + $0x298] sm:$0xf0] }
  0xb7   :  { %1205 = vmatpush.bf16.msrb.mxu3 %v5282_v26  ;;  %1165 = vmatpush.bf16.msrb.mxu0 %v4866_v29  ;;  %v5187_v26 = vld [vmem:[%s11160_s4 + $0x2f8] sm:$0xf0]  ;;  %v7128_v29 = vld [vmem:[%s11160_s4 + $0x3ec] sm:$0xf] }
  0xb8   :  { %1179 = vmatpush.bf16.msrb.mxu1 %v4994_v30  ;;  %v5315_v30 = vld [vmem:[%s11160_s4 + $0x3f8] sm:$0xf0]  ;;  %v7084_v2 = vld [vmem:[%s11160_s4 + $0x28c] sm:$0xf] }
  0xb9   :  { %v7116_v7 = vld [vmem:[%s11160_s4 + $0x38c] sm:$0xf]  ;;  %v5267_v8 = vld [vmem:[%s11160_s4 + $0x398] sm:$0xf0] }
  0xba   :  { %1192 = vmatpush.bf16.msrb.mxu2 %v5138_v38  ;;  %v5190_v38 = vor.u32 %v7096_v25, %v5187_v26  ;;  %v7044_v11 = vld [vmem:[%s11160_s4 + $0x14c] sm:$0xf]  ;;  %v4979_v12 = vld [vmem:[%s11160_s4 + $0x158] sm:$0xf0] }
  0xbb   :  { %1206 = vmatpush.bf16.msrb.mxu3 %v5266_v40  ;;  %1166 = vmatpush.bf16.msrb.mxu0 %v4850_v43  ;;  %v5318_v40 = vor.u32 %v7128_v29, %v5315_v30  ;;  %v4902_v43 = vor.u32 %v7024_v31, %v4899_v34  ;;  %v7080_v15 = vld [vmem:[%s11160_s4 + $0x26c] sm:$0xf]  ;;  %v4982_v18 = vor.u32 %v7044_v11, %v4979_v12  ;;  %v4835_v22 = vld [vmem:[%s11160_s4 + $0x38] sm:$0xf0]  ;;  %v5513_v12 = vld [vmem:[%s11163_s6 + $0x180] sm:$0xf] }
  0xbc   :  { %1180 = vmatpush.bf16.msrb.mxu1 %v4978_v44  ;;  %v5030_v44 = vor.u32 %v7056_v35, %v5027_v36  ;;  %v7112_v19 = vld [vmem:[%s11160_s4 + $0x36c] sm:$0xf]  ;;  %v4963_v24 = vld [vmem:[%s11160_s4 + $0x138] sm:$0xf0] }
  0xbd   :  { %1141 = vmatmul.bf16.vlgmr.msra.gmra.mxu2 %v8213_v0  ;;  %v7008_v21 = vld [vmem:[%s11160_s4 + $0x2c] sm:$0xf]  ;;  %v4819_v35 = vld [vmem:[%s11160_s4 + $0x18] sm:$0xf0] }
  0xbe   :  { %1155 = vmatmul.bf16.vlgmr.msra.gmra.mxu3 %v8224_v6  ;;  %1193 = vmatpush.bf16.msrb.mxu2 %v5122_v51  ;;  %v5174_v51 = vor.u32 %v7092_v41, %v5171_v42  ;;  %v7040_v23 = vld [vmem:[%s11160_s4 + $0x12c] sm:$0xf]  ;;  %v4838_v30 = vor.u32 %v7008_v21, %v4835_v22  ;;  %v7161_v41 = vld [vmem:[%s11163_s6 + $0xec] sm:$0xf0]  ;;  %v5561_v42 = vld [vmem:[%s11163_s6 + $0x1e0] sm:$0xf] }
  0xbf   :  { %1207 = vmatpush.bf16.msrb.mxu3 %v5250_v52  ;;  %1167 = vmatpush.bf16.msrb.mxu0 %v4834_v56  ;;  %v5302_v52 = vor.u32 %v7124_v45, %v5299_v46  ;;  %v5014_v56 = vor.u32 %v7052_v49, %v5011_v50  ;;  %v7108_v29 = vld [vmem:[%s11160_s4 + $0x34c] sm:$0xf]  ;;  %v4966_v31 = vor.u32 %v7040_v23, %v4963_v24  ;;  %v5091_v46 = vld [vmem:[%s11160_s4 + $0x238] sm:$0xf0]  ;;  %v5321_v22 = vld [vmem:[%s11163_s6] sm:$0xf] }
  0xc0   :  { %1181 = vmatpush.bf16.msrb.mxu1 %v4962_v57  ;;  %v7120_v57 = vld [vmem:[%s11160_s4 + $0x3ac] sm:$0xf]  ;;  %v5219_v50 = vld [vmem:[%s11160_s4 + $0x338] sm:$0xf0]  ;;  %v7133_v23 = vld [vmem:[%s11163_s6 + $0xc] sm:$0xf0] }
  0xc1   :  { %v7004_v34 = vld [vmem:[%s11160_s4 + $0xc] sm:$0xf]  ;;  %v5075_v60 = vld [vmem:[%s11160_s4 + $0x218] sm:$0xf0]  ;;  %v7159_v24 = vld [vmem:[%s11163_s6 + $0xe4] sm:$0xf] }
  0xc2   :  { %1194 = vmatpush.bf16.msrb.mxu2 %v5106_v1  ;;  %v5286_v1 = vor.u32 %v7120_v57, %v5283_v58  ;;  %v7036_v36 = vld [vmem:[%s11160_s4 + $0x10c] sm:$0xf]  ;;  %v4822_v47 = vor.u32 %v7004_v34, %v4819_v35  ;;  %v7189_v57 = vld [vmem:[%s11163_s6 + $0x1cc] sm:$0xf0]  ;;  %v7155_v34 = vld [vmem:[%s11163_s6 + $0xc4] sm:$0xf] }
  0xc3   :  { %1208 = vmatpush.bf16.msrb.mxu3 %v5234_v5  ;;  %1168 = vmatpush.bf16.msrb.mxu0 %v4818_v9  ;;  %v4998_v5 = vor.u32 %v7048_v61, %v4995_v62  ;;  %v7012_v9 = vld [vmem:[%s11160_s4 + $0x4c] sm:$0xf]  ;;  %v5203_v62 = vld [vmem:[%s11160_s4 + $0x318] sm:$0xf0]  ;;  %v5419_v35 = vld [vmem:[%s11163_s6 + $0xd0] sm:$0xf0] }
  0xc4   :  { %1182 = vmatpush.bf16.msrb.mxu1 %v4946_v10  ;;  %v4851_v10 = vld [vmem:[%s11160_s4 + $0x58] sm:$0xf0]  ;;  %v7072_v45 = vld [vmem:[%s11160_s4 + $0x22c] sm:$0xf] }
  0xc5   :  { %v4854_v17 = vor.u32 %v7012_v9, %v4851_v10  ;;  %v7104_v49 = vld [vmem:[%s11160_s4 + $0x32c] sm:$0xf]  ;;  %v5094_v54 = vor.u32 %v7072_v45, %v5091_v46  ;;  %v5385_v10 = vld [vmem:[%s11163_s6 + $0x80] sm:$0xf]  ;;  %v5403_v45 = vld [vmem:[%s11163_s6 + $0xb0] sm:$0xf0] }
  0xc6   :  { %1195 = vmatpush.bf16.msrb.mxu2 %v5090_v16  ;;  %1169 = vmatmul.bf16.vlgmr.msrb.gmra.mxu0 %v8171_v32  ;;  %v5123_v16 = vld [vmem:[%s11160_s4 + $0x278] sm:$0xf0]  ;;  %v5222_v58 = vor.u32 %v7104_v49, %v5219_v50  ;;  %v7068_v59 = vld [vmem:[%s11160_s4 + $0x20c] sm:$0xf]  ;;  %v7169_v49 = vld [vmem:[%s11163_s6 + $0x12c] sm:$0xf0] }
  0xc7   :  { %1217 = vmatpush.bf16.msra.mxu0 %v4934_v13  ;;  %1209 = vmatpush.bf16.msrb.mxu3 %v5218_v20  ;;  %v5142_v13 = vor.u32 %v7084_v2, %v5139_v3  ;;  %v5251_v20 = vld [vmem:[%s11160_s4 + $0x378] sm:$0xf0]  ;;  %v5126_v25 = vor.u32 %v7080_v15, %v5123_v16  ;;  %v7100_v61 = vld [vmem:[%s11160_s4 + $0x30c] sm:$0xf]  ;;  %v5078_v2 = vor.u32 %v7068_v59, %v5075_v60  ;;  %v5401_v3 = vld [vmem:[%s11163_s6 + $0xa0] sm:$0xf] }
  0xc8   :  { %1231 = vmatpush.bf16.msra.mxu1 %v5062_v14  ;;  %v5270_v14 = vor.u32 %v7116_v7, %v5267_v8  ;;  %v5254_v26 = vor.u32 %v7112_v19, %v5251_v20  ;;  %v5529_v7 = vld [vmem:[%s11163_s6 + $0x1a0] sm:$0xf]  ;;  %v7185_v8 = vld [vmem:[%s11163_s6 + $0x1ac] sm:$0xf0] }
  0xc9   :  { %1183 = vmatmul.bf16.vlgmr.msrb.gmra.mxu1 %v8179_v39  ;;  %v5530_v11 = vor.u32 %v7185_v8, %v5529_v7  ;;  %v7145_v15 = vld [vmem:[%s11163_s6 + $0x6c] sm:$0xf0]  ;;  %v5337_v19 = vld [vmem:[%s11163_s6 + $0x20] sm:$0xf] }
  0xca   :  { %1196 = vmatpush.bf16.msrb.mxu2 %v5074_v33  ;;  %v5235_v33 = vld [vmem:[%s11160_s4 + $0x358] sm:$0xf0]  ;;  %v7137_v20 = vld [vmem:[%s11163_s6 + $0x2c] sm:$0xf0]  ;;  %v5657_v50 = vld [vmem:[%s11163_s6 + $0x2a0] sm:$0xf] }
  0xcb   :  { %1218 = vmatpush.bf16.msra.mxu0 %v4918_v27  ;;  %1210 = vmatpush.bf16.msrb.mxu3 %v5202_v37  ;;  %v7076_v27 = vld [vmem:[%s11160_s4 + $0x24c] sm:$0xf]  ;;  %v4947_v37 = vld [vmem:[%s11160_s4 + $0x118] sm:$0xf0]  ;;  %v5338_v21 = vor.u32 %v7137_v20, %v5337_v19  ;;  %v5641_v59 = vld [vmem:[%s11163_s6 + $0x280] sm:$0xf] }
  0xcc   :  { %1232 = vmatpush.bf16.msra.mxu1 %v5046_v28  ;;  %v5107_v28 = vld [vmem:[%s11160_s4 + $0x258] sm:$0xf0]  ;;  %v4950_v48 = vor.u32 %v7036_v36, %v4947_v37  ;;  %v5422_v37 = vor.u32 %v7155_v34, %v5419_v35  ;;  %v5625_v7 = vld [vmem:[%s11163_s6 + $0x260] sm:$0xf]  ;;  %v7209_v8 = vld [vmem:[%s11163_s6 + $0x26c] sm:$0xf0] }
  0xcd   :  { %1197 = vmatmul.bf16.vlgmr.msrb.gmra.mxu2 %v8213_v0  ;;  %v5531_v19 = vld [vmem:[%s11163_s6 + $0x1b0] sm:$0xf0]  ;;  %v7257_v35 = vld [vmem:[%s11163_s6 + $0x3ec] sm:$0xf0] }
  0xce   :  { %1245 = vmatpush.bf16.msra.mxu2 %v5190_v38  ;;  %1211 = vmatmul.bf16.vlgmr.msrb.gmra.mxu3 %v8224_v6  ;;  %v5433_v38 = vld [vmem:[%s11163_s6 + $0xe0] sm:$0xf] }
  0xcf   :  { %1259 = vmatpush.bf16.msra.mxu3 %v5318_v40  ;;  %1219 = vmatpush.bf16.msra.mxu0 %v4902_v43  ;;  %v5110_v40 = vor.u32 %v7076_v27, %v5107_v28  ;;  %v7193_v43 = vld [vmem:[%s11163_s6 + $0x1ec] sm:$0xf0]  ;;  %v5497_v28 = vld [vmem:[%s11163_s6 + $0x160] sm:$0xf] }
  0xd0   :  { %1233 = vmatpush.bf16.msra.mxu1 %v5030_v44  ;;  %v5238_v44 = vor.u32 %v7108_v29, %v5235_v33  ;;  %v5562_v53 = vor.u32 %v7193_v43, %v5561_v42  ;;  %v7177_v29 = vld [vmem:[%s11163_s6 + $0x16c] sm:$0xf0] }
  0xd1   :  { %v7225_v33 = vld [vmem:[%s11163_s6 + $0x2ec] sm:$0xf0] }
  0xd2   :  { %1246 = vmatpush.bf16.msra.mxu2 %v5174_v51  ;;  %v5434_v51 = vor.u32 %v7161_v41, %v5433_v38  ;;  %v5481_v38 = vld [vmem:[%s11163_s6 + $0x140] sm:$0xf]  ;;  %v7221_v43 = vld [vmem:[%s11163_s6 + $0x2cc] sm:$0xf0] }
  0xd3   :  { %1260 = vmatpush.bf16.msra.mxu3 %v5302_v52  ;;  %1220 = vmatpush.bf16.msra.mxu0 %v4886_v55  ;;  %v5417_v52 = vld [vmem:[%s11163_s6 + $0xc0] sm:$0xf]  ;;  %v7157_v55 = vld [vmem:[%s11163_s6 + $0xcc] sm:$0xf0] }
  0xd4   :  { %1234 = vmatpush.bf16.msra.mxu1 %v5014_v56  ;;  %v5545_v56 = vld [vmem:[%s11163_s6 + $0x1c0] sm:$0xf] }
  0xd5   :  { %v5673_v41 = vld [vmem:[%s11163_s6 + $0x2c0] sm:$0xf] }
  0xd6   :  { %1247 = vmatpush.bf16.msra.mxu2 %v5158_v63  ;;  %v5418_v63 = vor.u32 %v7157_v55, %v5417_v52  ;;  %v5674_v46 = vor.u32 %v7221_v43, %v5673_v41  ;;  %v7217_v52 = vld [vmem:[%s11163_s6 + $0x2ac] sm:$0xf0]  ;;  %v7223_v41 = vld [vmem:[%s11163_s6 + $0x2e4] sm:$0xf] }
  0xd7   :  { %1261 = vmatpush.bf16.msra.mxu3 %v5286_v1  ;;  %1221 = vmatpush.bf16.msra.mxu0 %v4870_v4  ;;  %v5546_v1 = vor.u32 %v7189_v57, %v5545_v56  ;;  %v7153_v4 = vld [vmem:[%s11163_s6 + $0xac] sm:$0xf0]  ;;  %v5658_v55 = vor.u32 %v7217_v52, %v5657_v50  ;;  %v5449_v57 = vld [vmem:[%s11163_s6 + $0x100] sm:$0xf]  ;;  %v5483_v50 = vld [vmem:[%s11163_s6 + $0x150] sm:$0xf0] }
  0xd8   :  { %1235 = vmatpush.bf16.msra.mxu1 %v4998_v5  ;;  %v5206_v5 = vor.u32 %v7100_v61, %v5203_v62  ;;  %v5402_v9 = vor.u32 %v7153_v4, %v5401_v3  ;;  %v7213_v61 = vld [vmem:[%s11163_s6 + $0x28c] sm:$0xf0]  ;;  %v7143_v62 = vld [vmem:[%s11163_s6 + $0x64] sm:$0xf]  ;;  %v5563_v4 = vld [vmem:[%s11163_s6 + $0x1f0] sm:$0xf0] }
  0xd9   :  { %v7191_v3 = vld [vmem:[%s11163_s6 + $0x1e4] sm:$0xf] }
  0xda   :  { %1248 = vmatpush.bf16.msra.mxu2 %v5142_v13 }
  0xdb   :  { %1262 = vmatpush.bf16.msra.mxu3 %v5270_v14  ;;  %1222 = vmatpush.bf16.msra.mxu0 %v4854_v17  ;;  %v5369_v14 = vld [vmem:[%s11163_s6 + $0x60] sm:$0xf] }
  0xdc   :  { %1236 = vmatpush.bf16.msra.mxu1 %v4982_v18  ;;  %v5370_v17 = vor.u32 %v7145_v15, %v5369_v14  ;;  %v5609_v14 = vld [vmem:[%s11163_s6 + $0x240] sm:$0xf]  ;;  %v7205_v15 = vld [vmem:[%s11163_s6 + $0x24c] sm:$0xf0] }
  0xde   :  { %1249 = vmatpush.bf16.msra.mxu2 %v5126_v25  ;;  %v5435_v25 = vld [vmem:[%s11163_s6 + $0xf0] sm:$0xf0] }
  0xdf   :  { %1263 = vmatpush.bf16.msra.mxu3 %v5254_v26  ;;  %1223 = vmatpush.bf16.msra.mxu0 %v4838_v30  ;;  %v5322_v26 = vor.u32 %v7133_v23, %v5321_v22  ;;  %v5438_v27 = vor.u32 %v7159_v24, %v5435_v25  ;;  %v5689_v30 = vld [vmem:[%s11163_s6 + $0x2e0] sm:$0xf]  ;;  %v7201_v22 = vld [vmem:[%s11163_s6 + $0x22c] sm:$0xf0]  ;;  %v7131_v24 = vld [vmem:[%s11163_s6 + $0x4] sm:$0xf] }
  0xe0   :  { %1237 = vmatpush.bf16.msra.mxu1 %v4966_v31  ;;  %v5498_v31 = vor.u32 %v7177_v29, %v5497_v28  ;;  %v5690_v36 = vor.u32 %v7225_v33, %v5689_v30  ;;  %v5323_v25 = vld [vmem:[%s11163_s6 + $0x10] sm:$0xf0]  ;;  %v5577_v30 = vld [vmem:[%s11163_s6 + $0x200] sm:$0xf] }
  0xe1   :  { %v5515_v28 = vld [vmem:[%s11163_s6 + $0x190] sm:$0xf0]  ;;  %v5817_v33 = vld [vmem:[%s11163_s6 + $0x3e0] sm:$0xf] }
  0xe2   :  { %1250 = vmatpush.bf16.msra.mxu2 %v5110_v40  ;;  %v7173_v40 = vld [vmem:[%s11163_s6 + $0x14c] sm:$0xf0] }
  0xe3   :  { %1264 = vmatpush.bf16.msra.mxu3 %v5238_v44  ;;  %1224 = vmatpush.bf16.msra.mxu0 %v4822_v47  ;;  %v5482_v42 = vor.u32 %v7173_v40, %v5481_v38  ;;  %v7151_v44 = vld [vmem:[%s11163_s6 + $0xa4] sm:$0xf]  ;;  %v5818_v38 = vor.u32 %v7257_v35, %v5817_v33  ;;  %v5441_v33 = vld [vmem:[%s11163_s6 + $0xe8] sm:$0xf]  ;;  %v7233_v35 = vld [vmem:[%s11163_s6 + $0x32c] sm:$0xf0] }
  0xe4   :  { %1238 = vmatpush.bf16.msra.mxu1 %v4950_v48  ;;  %v5406_v47 = vor.u32 %v7151_v44, %v5403_v45  ;;  %v5465_v48 = vld [vmem:[%s11163_s6 + $0x120] sm:$0xf] }
  0xe5   :  { %v5801_v45 = vld [vmem:[%s11163_s6 + $0x3c0] sm:$0xf] }
  0xe6   :  { %1251 = vmatpush.bf16.msra.mxu2 %v5094_v54  ;;  %1225 = vmatmul.bf16.vlgmr.msra.gmra.mxu0 %v8171_v32  ;;  %v7149_v32 = vld [vmem:[%s11163_s6 + $0x8c] sm:$0xf0]  ;;  %v5387_v54 = vld [vmem:[%s11163_s6 + $0x90] sm:$0xf0] }
  0xe7   :  { %2055 = vmatpush.bf16.msrb.mxu0 %v5434_v51  ;;  %1265 = vmatpush.bf16.msra.mxu3 %v5222_v58  ;;  %v5386_v13 = vor.u32 %v7149_v32, %v5385_v10  ;;  %v5466_v51 = vor.u32 %v7169_v49, %v5465_v48  ;;  %v7165_v58 = vld [vmem:[%s11163_s6 + $0x10c] sm:$0xf0]  ;;  %v7139_v10 = vld [vmem:[%s11163_s6 + $0x44] sm:$0xf]  ;;  %v5355_v32 = vld [vmem:[%s11163_s6 + $0x50] sm:$0xf0] }
  0xe8   :  { %2069 = vmatpush.bf16.msrb.mxu1 %v5562_v53  ;;  %v7147_v53 = vld [vmem:[%s11163_s6 + $0x84] sm:$0xf]  ;;  %v5450_v60 = vor.u32 %v7165_v58, %v5449_v57  ;;  %v7249_v57 = vld [vmem:[%s11163_s6 + $0x3ac] sm:$0xf0] }
  0xe9   :  { %1239 = vmatmul.bf16.vlgmr.msra.gmra.mxu1 %v8179_v39  ;;  %v7181_v39 = vld [vmem:[%s11163_s6 + $0x18c] sm:$0xf0]  ;;  %v5390_v56 = vor.u32 %v7147_v53, %v5387_v54  ;;  %v7171_v49 = vld [vmem:[%s11163_s6 + $0x144] sm:$0xf]  ;;  %v5675_v53 = vld [vmem:[%s11163_s6 + $0x2d0] sm:$0xf0] }
  0xea   :  { %1252 = vmatpush.bf16.msra.mxu2 %v5078_v2  ;;  %v5514_v16 = vor.u32 %v7181_v39, %v5513_v12  ;;  %v5358_v12 = vor.u32 %v7139_v10, %v5355_v32  ;;  %v5547_v39 = vld [vmem:[%s11163_s6 + $0x1d0] sm:$0xf0]  ;;  %v5486_v52 = vor.u32 %v7171_v49, %v5483_v50  ;;  %v7211_v10 = vld [vmem:[%s11163_s6 + $0x284] sm:$0xf] }
  0xeb   :  { %2056 = vmatpush.bf16.msrb.mxu0 %v5418_v63  ;;  %1266 = vmatpush.bf16.msra.mxu3 %v5206_v5  ;;  %v5371_v63 = vld [vmem:[%s11163_s6 + $0x70] sm:$0xf0]  ;;  %v5566_v5 = vor.u32 %v7191_v3, %v5563_v4  ;;  %v5769_v4 = vld [vmem:[%s11163_s6 + $0x380] sm:$0xf] }
  0xec   :  { %2070 = vmatpush.bf16.msrb.mxu1 %v5546_v1  ;;  %v5642_v1 = vor.u32 %v7213_v61, %v5641_v59  ;;  %v5374_v2 = vor.u32 %v7143_v62, %v5371_v63  ;;  %v7167_v59 = vld [vmem:[%s11163_s6 + $0x124] sm:$0xf]  ;;  %v5659_v63 = vld [vmem:[%s11163_s6 + $0x2b0] sm:$0xf0] }
  0xed   :  { %1253 = vmatmul.bf16.vlgmr.msra.gmra.mxu2 %v8213_v0  ;;  %v5353_v0 = vld [vmem:[%s11163_s6 + $0x40] sm:$0xf]  ;;  %v7215_v61 = vld [vmem:[%s11163_s6 + $0x2a4] sm:$0xf] }
  0xee   :  { %1267 = vmatmul.bf16.vlgmr.msra.gmra.mxu3 %v8224_v6  ;;  %v7141_v6 = vld [vmem:[%s11163_s6 + $0x4c] sm:$0xf0]  ;;  %2083 = vmatpush.bf16.msrb.mxu2 %v5690_v36  ;;  %v7175_v36 = vld [vmem:[%s11163_s6 + $0x164] sm:$0xf] }
  0xef   :  { %2057 = vmatpush.bf16.msrb.mxu0 %v5402_v9  ;;  %v5354_v18 = vor.u32 %v7141_v6, %v5353_v0  ;;  %v5626_v9 = vor.u32 %v7209_v8, %v5625_v7  ;;  %v5339_v0 = vld [vmem:[%s11163_s6 + $0x30] sm:$0xf0]  ;;  %v7183_v6 = vld [vmem:[%s11163_s6 + $0x1a4] sm:$0xf]  ;;  %2097 = vmatpush.bf16.msrb.mxu3 %v5818_v38 }
  0xf0   :  { %2071 = vmatpush.bf16.msrb.mxu1 %v5530_v11  ;;  %v7187_v11 = vld [vmem:[%s11163_s6 + $0x1c4] sm:$0xf]  ;;  %v5534_v20 = vor.u32 %v7183_v6, %v5531_v19 }
  0xf1   :  { %v7163_v8 = vld [vmem:[%s11163_s6 + $0x104] sm:$0xf] }
  0xf2   :  { %2084 = vmatpush.bf16.msrb.mxu2 %v5674_v46  ;;  %v7253_v46 = vld [vmem:[%s11163_s6 + $0x3cc] sm:$0xf0]  ;;  %v7207_v6 = vld [vmem:[%s11163_s6 + $0x264] sm:$0xf] }
  0xf3   :  { %2058 = vmatpush.bf16.msrb.mxu0 %v5386_v13  ;;  %v5550_v13 = vor.u32 %v7187_v11, %v5547_v39  ;;  %v5802_v48 = vor.u32 %v7253_v46, %v5801_v45  ;;  %v5643_v11 = vld [vmem:[%s11163_s6 + $0x290] sm:$0xf0] }
  0xf4   :  { %2072 = vmatpush.bf16.msrb.mxu1 %v5514_v16  ;;  %v5610_v16 = vor.u32 %v7205_v15, %v5609_v14  ;;  %v5646_v39 = vor.u32 %v7211_v10, %v5643_v11  ;;  %v5753_v14 = vld [vmem:[%s11163_s6 + $0x360] sm:$0xf]  ;;  %v7241_v15 = vld [vmem:[%s11163_s6 + $0x36c] sm:$0xf0] }
  0xf5   :  { %2098 = vmatpush.bf16.msrb.mxu3 %v5802_v48  ;;  %v5425_v48 = vld [vmem:[%s11163_s6 + $0xc8] sm:$0xf] }
  0xf6   :  { %2085 = vmatpush.bf16.msrb.mxu2 %v5658_v55  ;;  %v8822_v55 = vld [vmem:[%s11164_s5] sm:$0xf] }
  0xf7   :  { %2059 = vmatpush.bf16.msrb.mxu0 %v5370_v17  ;;  %v7135_v17 = vld [vmem:[%s11163_s6 + $0x24] sm:$0xf]  ;;  %v401_v3 = vperm.slane %v8822_v55, 0  ;;  %v402_v46 = vperm.slane %v8822_v55, 1 }
  0xf8   :  { %2073 = vmatpush.bf16.msrb.mxu1 %v5498_v31  ;;  %v7197_v31 = vld [vmem:[%s11163_s6 + $0x20c] sm:$0xf0] }
  0xf9   :  { %v5578_v34 = vor.u32 %v7197_v31, %v5577_v30 }
  0xfa   :  { %2086 = vmatpush.bf16.msrb.mxu2 %v5642_v1 }
  0xfb   :  { %2060 = vmatpush.bf16.msrb.mxu0 %v5354_v18  ;;  %v5342_v18 = vor.u32 %v7135_v17, %v5339_v0  ;;  %v5754_v0 = vor.u32 %v7241_v15, %v5753_v14  ;;  %v7247_v14 = vld [vmem:[%s11163_s6 + $0x3a4] sm:$0xf]  ;;  %v5787_v15 = vld [vmem:[%s11163_s6 + $0x3b0] sm:$0xf0] }
  0xfc   :  { %2074 = vmatpush.bf16.msrb.mxu1 %v5482_v42  ;;  %v5691_v42 = vld [vmem:[%s11163_s6 + $0x2f0] sm:$0xf0] }
  0xfd   :  { %v5694_v44 = vor.u32 %v7223_v41, %v5691_v42  ;;  %v7199_v42 = vld [vmem:[%s11163_s6 + $0x224] sm:$0xf] }
  0xfe   :  { %2087 = vmatpush.bf16.msrb.mxu2 %v5626_v9  ;;  %v5451_v9 = vld [vmem:[%s11163_s6 + $0x110] sm:$0xf0] }
  0xff   :  { %2061 = vmatpush.bf16.msrb.mxu0 %v5338_v21  ;;  %v5593_v21 = vld [vmem:[%s11163_s6 + $0x220] sm:$0xf]  ;;  %v5454_v32 = vor.u32 %v7163_v8, %v5451_v9  ;;  %v5803_v8 = vld [vmem:[%s11163_s6 + $0x3d0] sm:$0xf0] }
 0x100   :  { %2075 = vmatpush.bf16.msrb.mxu1 %v5466_v51  ;;  %v5594_v23 = vor.u32 %v7201_v22, %v5593_v21  ;;  %v7219_v51 = vld [vmem:[%s11163_s6 + $0x2c4] sm:$0xf]  ;;  %v5737_v22 = vld [vmem:[%s11163_s6 + $0x340] sm:$0xf] }
 0x101   :  { %v5678_v54 = vor.u32 %v7219_v51, %v5675_v53  ;;  %v7158_v51 = vld [vmem:[%s11163_s6 + $0xd4] sm:$0xf0]  ;;  %v7229_v53 = vld [vmem:[%s11163_s6 + $0x30c] sm:$0xf0] }
 0x102   :  { %2088 = vmatpush.bf16.msrb.mxu2 %v5610_v16 }
 0x103   :  { %2062 = vmatpush.bf16.msrb.mxu0 %v5322_v26  ;;  %v7179_v26 = vld [vmem:[%s11163_s6 + $0x184] sm:$0xf] }
 0x104   :  { %2076 = vmatpush.bf16.msrb.mxu1 %v5450_v60  ;;  %v5518_v29 = vor.u32 %v7179_v26, %v5515_v28  ;;  %v5467_v60 = vld [vmem:[%s11163_s6 + $0x130] sm:$0xf0] }
 0x105   :  { %v5470_v62 = vor.u32 %v7167_v59, %v5467_v60  ;;  %v7255_v59 = vld [vmem:[%s11163_s6 + $0x3e4] sm:$0xf] }
 0x106   :  { %2089 = vmatpush.bf16.msrb.mxu2 %v5594_v23  ;;  %v7237_v23 = vld [vmem:[%s11163_s6 + $0x34c] sm:$0xf0] }
 0x107   :  { %2111 = vmatpush.bf16.msra.mxu0 %v5438_v27  ;;  %v5326_v27 = vor.u32 %v7131_v24, %v5323_v25  ;;  %v7203_v24 = vld [vmem:[%s11163_s6 + $0x244] sm:$0xf]  ;;  %v5738_v26 = vor.u32 %v7237_v23, %v5737_v22  ;;  %v5569_v22 = vld [vmem:[%s11163_s6 + $0x1e8] sm:$0xf] }
 0x108   :  { %2125 = vmatpush.bf16.msra.mxu1 %v5566_v5  ;;  %v7245_v5 = vld [vmem:[%s11163_s6 + $0x38c] sm:$0xf0] }
 0x109   :  { %v5770_v7 = vor.u32 %v7245_v5, %v5769_v4  ;;  %v7154_v5 = vld [vmem:[%s11163_s6 + $0xb4] sm:$0xf0] }
 0x10a   :  { %2090 = vmatpush.bf16.msrb.mxu2 %v5578_v34  ;;  %v5721_v34 = vld [vmem:[%s11163_s6 + $0x320] sm:$0xf] }
 0x10b   :  { %2112 = vmatpush.bf16.msra.mxu0 %v5422_v37  ;;  %v5499_v37 = vld [vmem:[%s11163_s6 + $0x170] sm:$0xf0]  ;;  %v5722_v41 = vor.u32 %v7233_v35, %v5721_v34  ;;  %v5361_v34 = vld [vmem:[%s11163_s6 + $0x48] sm:$0xf]  ;;  %v7142_v35 = vld [vmem:[%s11163_s6 + $0x54] sm:$0xf0] }
 0x10c   :  { %2126 = vmatpush.bf16.msra.mxu1 %v5550_v13  ;;  %v5502_v40 = vor.u32 %v7175_v36, %v5499_v37 }
 0x10e   :  { %2139 = vmatpush.bf16.msra.mxu2 %v5694_v44 }
 0x10f   :  { %2113 = vmatpush.bf16.msra.mxu0 %v5406_v47 }
 0x110   :  { %2127 = vmatpush.bf16.msra.mxu1 %v5534_v20 }
 0x112   :  { %2140 = vmatpush.bf16.msra.mxu2 %v5678_v54 }
 0x113   :  { %2114 = vmatpush.bf16.msra.mxu0 %v5390_v56  ;;  %v5785_v56 = vld [vmem:[%s11163_s6 + $0x3a0] sm:$0xf] }
 0x114   :  { %2128 = vmatpush.bf16.msra.mxu1 %v5518_v29  ;;  %v5786_v58 = vor.u32 %v7249_v57, %v5785_v56  ;;  %v7195_v57 = vld [vmem:[%s11163_s6 + $0x204] sm:$0xf] }
 0x116   :  { %2099 = vmatpush.bf16.msrb.mxu3 %v5786_v58  ;;  %v5579_v58 = vld [vmem:[%s11163_s6 + $0x210] sm:$0xf0] }
 0x117   :  { %2115 = vmatpush.bf16.msra.mxu0 %v5374_v2  ;;  %v5662_v2 = vor.u32 %v7215_v61, %v5659_v63  ;;  %v5582_v60 = vor.u32 %v7195_v57, %v5579_v58  ;;  %v5819_v61 = vld [vmem:[%s11163_s6 + $0x3f0] sm:$0xf0]  ;;  %v7186_v57 = vld [vmem:[%s11163_s6 + $0x1b4] sm:$0xf0]  ;;  %v7235_v58 = vld [vmem:[%s11163_s6 + $0x344] sm:$0xf] }
 0x118   :  { %2129 = vmatpush.bf16.msra.mxu1 %v5502_v40  ;;  %v7162_v40 = vld [vmem:[%s11163_s6 + $0xf4] sm:$0xf0] }
 0x119   :  { %2141 = vmatpush.bf16.msra.mxu2 %v5662_v2  ;;  %v5442_v50 = vor.u32 %v7162_v40, %v5441_v33  ;;  %v5409_v2 = vld [vmem:[%s11163_s6 + $0xa8] sm:$0xf]  ;;  %v7190_v40 = vld [vmem:[%s11163_s6 + $0x1d4] sm:$0xf0] }
 0x11a   :  { %2100 = vmatpush.bf16.msrb.mxu3 %v5770_v7  ;;  %v7251_v7 = vld [vmem:[%s11163_s6 + $0x3c4] sm:$0xf]  ;;  %v5410_v11 = vor.u32 %v7154_v5, %v5409_v2  ;;  %v5329_v2 = vld [vmem:[%s11163_s6 + $0x8] sm:$0xf]  ;;  %v7182_v5 = vld [vmem:[%s11163_s6 + $0x194] sm:$0xf0] }
 0x11b   :  { %2116 = vmatpush.bf16.msra.mxu0 %v5358_v12  ;;  %v5806_v9 = vor.u32 %v7251_v7, %v5803_v8  ;;  %v7231_v7 = vld [vmem:[%s11163_s6 + $0x324] sm:$0xf]  ;;  %v5723_v8 = vld [vmem:[%s11163_s6 + $0x330] sm:$0xf0] }
 0x11c   :  { %2130 = vmatpush.bf16.msra.mxu1 %v5486_v52  ;;  %v5705_v52 = vld [vmem:[%s11163_s6 + $0x300] sm:$0xf] }
 0x11d   :  { %2142 = vmatpush.bf16.msra.mxu2 %v5646_v39  ;;  %v5706_v56 = vor.u32 %v7229_v53, %v5705_v52  ;;  %v5537_v52 = vld [vmem:[%s11163_s6 + $0x1a8] sm:$0xf] }
 0x11e   :  { %2101 = vmatpush.bf16.msrb.mxu3 %v5754_v0 }
 0x11f   :  { %2117 = vmatpush.bf16.msra.mxu0 %v5342_v18  ;;  %v5627_v18 = vld [vmem:[%s11163_s6 + $0x270] sm:$0xf0] }
 0x120   :  { %2131 = vmatpush.bf16.msra.mxu1 %v5470_v62  ;;  %v5630_v19 = vor.u32 %v7207_v6, %v5627_v18  ;;  %v5822_v62 = vor.u32 %v7255_v59, %v5819_v61  ;;  %v5739_v59 = vld [vmem:[%s11163_s6 + $0x350] sm:$0xf0] }
 0x121   :  { %v5742_v61 = vor.u32 %v7235_v58, %v5739_v59 }
 0x122   :  { %v1058_v43 = vpop.f32.mrf.mxu0  ;;  %2143 = vmatpush.bf16.msra.mxu2 %v5630_v19  ;;  %2102 = vmatpush.bf16.msrb.mxu3 %v5738_v26  ;;  %v7243_v26 = vld [vmem:[%s11163_s6 + $0x384] sm:$0xf] }
 0x123   :  { %2118 = vmatpush.bf16.msra.mxu0 %v5326_v27  ;;  %v1072_v47 = vpop.f32.mrf.mxu1  ;;  %v1059_v16 = vadd.f32 %v1058_v43, %v401_v3  ;;  %v5611_v27 = vld [vmem:[%s11163_s6 + $0x250] sm:$0xf0] }
 0x124   :  { %2132 = vmatpush.bf16.msra.mxu1 %v5454_v32  ;;  %v5614_v28 = vor.u32 %v7203_v24, %v5611_v27  ;;  %v5595_v43 = vld [vmem:[%s11163_s6 + $0x230] sm:$0xf0] }
 0x125   :  { %v1073_v25 = vadd.f32 %v1072_v47, %v1059_v16  ;;  %v5598_v44 = vor.u32 %v7199_v42, %v5595_v43  ;;  %v5771_v27 = vld [vmem:[%s11163_s6 + $0x390] sm:$0xf0]  ;;  %v403_v43 = vperm.slane %v8822_v55, 2 }
 0x126   :  { %2144 = vmatpush.bf16.msra.mxu2 %v5614_v28  ;;  %2103 = vmatpush.bf16.msrb.mxu3 %v5722_v41  ;;  %v5774_v28 = vor.u32 %v7243_v26, %v5771_v27  ;;  %v7239_v41 = vld [vmem:[%s11163_s6 + $0x364] sm:$0xf]  ;;  %v5755_v42 = vld [vmem:[%s11163_s6 + $0x370] sm:$0xf0] }
 0x12a   :  { %v1060_v1 = vpop.f32.mrf.mxu0  ;;  %2145 = vmatpush.bf16.msra.mxu2 %v5598_v44  ;;  %2104 = vmatpush.bf16.msrb.mxu3 %v5706_v56  ;;  %v5758_v44 = vor.u32 %v7239_v41, %v5755_v42  ;;  %v7222_v41 = vld [vmem:[%s11163_s6 + $0x2d4] sm:$0xf0]  ;;  %v7152_v42 = vld [vmem:[%s11163_s6 + $0xac] sm:$0xf] }
 0x12b   :  { %v1074_v12 = vpop.f32.mrf.mxu1  ;;  %v1061_v20 = vadd.f32 %v1060_v1, %v401_v3  ;;  %v5426_v1 = vor.u32 %v7158_v51, %v5425_v48  ;;  %v5362_v48 = vor.u32 %v7142_v35, %v5361_v34  ;;  %v7138_v51 = vld [vmem:[%s11163_s6 + $0x34] sm:$0xf0]  ;;  %v5489_v35 = vld [vmem:[%s11163_s6 + $0x148] sm:$0xf] }
 0x12d   :  { %v1075_v29 = vadd.f32 %v1074_v12, %v1061_v20  ;;  %v5393_v12 = vld [vmem:[%s11163_s6 + $0x88] sm:$0xf] }
 0x12e   :  { %2146 = vmatpush.bf16.msra.mxu2 %v5582_v60  ;;  %2153 = vmatpush.bf16.msra.mxu3 %v5822_v62  ;;  %v5377_v20 = vld [vmem:[%s11163_s6 + $0x68] sm:$0xf] }
 0x130   :  { %v1086_v13 = vpop.f32.mrf.mxu2 }
 0x131   :  { %v1100_v17 = vpop.f32.mrf.mxu3  ;;  %v1087_v30 = vadd.f32 %v1086_v13, %v1073_v25  ;;  %v7150_v13 = vld [vmem:[%s11163_s6 + $0x94] sm:$0xf0] }
 0x132   :  { %v1114_v21 = vpop.f32.mrf.mxu0  ;;  %2154 = vmatpush.bf16.msra.mxu3 %v5806_v9  ;;  %v5394_v19 = vor.u32 %v7150_v13, %v5393_v12  ;;  %v7194_v25 = vld [vmem:[%s11163_s6 + $0x1f4] sm:$0xf0] }
 0x133   :  { %v1128_v36 = vpop.f32.mrf.mxu1  ;;  %v8903_v45 = vadd.f32 %v1100_v17, %v1087_v30  ;;  %v1115_v3 = vadd.f32 %v1114_v21, %v402_v46  ;;  %v5790_v17 = vor.u32 %v7247_v14, %v5787_v15  ;;  %v7146_v21 = vld [vmem:[%s11163_s6 + $0x74] sm:$0xf0]  ;;  %v5570_v33 = vor.u32 %v7194_v25, %v5569_v22 }
 0x134   :  { %v7226_v22 = vld [vmem:[%s11163_s6 + $0x2f4] sm:$0xf0] }
 0x135   :  { %v1129_v39 = vadd.f32 %v1128_v36, %v1115_v3  ;;  %v5553_v36 = vld [vmem:[%s11163_s6 + $0x1c8] sm:$0xf]  ;;  %v7134_v3 = vld [vmem:[%s11163_s6 + $0x14] sm:$0xf0] }
 0x136   :  { %2155 = vmatpush.bf16.msra.mxu3 %v5790_v17  ;;  %v7178_v17 = vld [vmem:[%s11163_s6 + $0x174] sm:$0xf0] }
 0x138   :  { %v1088_v31 = vpop.f32.mrf.mxu2 }
 0x139   :  { %v1089_v37 = vadd.f32 %v1088_v31, %v1075_v29  ;;  %v1102_v38 = vpop.f32.mrf.mxu3  ;;  %v5378_v31 = vor.u32 %v7146_v21, %v5377_v20  ;;  %v5707_v20 = vld [vmem:[%s11163_s6 + $0x310] sm:$0xf0] }
 0x13a   :  { %v1116_v49 = vpop.f32.mrf.mxu0  ;;  %2156 = vmatpush.bf16.msra.mxu3 %v5774_v28 }
 0x13b   :  { %v8906_v47 = vadd.f32 %v1102_v38, %v1089_v37  ;;  %v1117_v10 = vadd.f32 %v1116_v49, %v402_v46  ;;  %v1130_v32 = vpop.f32.mrf.mxu1  ;;  %v5554_v49 = vor.u32 %v7190_v40, %v5553_v36  ;;  %v7174_v36 = vld [vmem:[%s11163_s6 + $0x154] sm:$0xf0] }
 0x13d   :  { %v8922_v54 = vpack.c.bf16 %v8906_v47, %v8903_v45  ;;  %v1131_v0 = vadd.f32 %v1130_v32, %v1117_v10  ;;  %v7160_v10 = vld [vmem:[%s11163_s6 + $0xec] sm:$0xf]  ;;  %v5443_v32 = vld [vmem:[%s11163_s6 + $0xf8] sm:$0xf0] }
 0x13e   :  { %2157 = vmatpush.bf16.msra.mxu3 %v5758_v44  ;;  %v5490_v44 = vor.u32 %v7174_v36, %v5489_v35  ;;  %v5601_v35 = vld [vmem:[%s11163_s6 + $0x228] sm:$0xf] }
 0x13f   :  { %2063 = vmatmul.bf16.vlgmr.msrb.gmra.mxu0 %v8922_v54 }
 0x140   :  { %2167 = vmatpush.bf16.msrb.mxu0 %v5442_v50  ;;  %v1142_v63 = vpop.f32.mrf.mxu2  ;;  %v5345_v50 = vld [vmem:[%s11163_s6 + $0x28] sm:$0xf] }
 0x141   :  { %v1156_v4 = vpop.f32.mrf.mxu3  ;;  %v1143_v6 = vadd.f32 %v1142_v63, %v1129_v39  ;;  %v5346_v63 = vor.u32 %v7138_v51, %v5345_v50  ;;  %v5330_v39 = vor.u32 %v7134_v3, %v5329_v2  ;;  %v7170_v50 = vld [vmem:[%s11163_s6 + $0x134] sm:$0xf0]  ;;  %v5665_v51 = vld [vmem:[%s11163_s6 + $0x2a8] sm:$0xf]  ;;  %v7144_v2 = vld [vmem:[%s11163_s6 + $0x6c] sm:$0xf] }
 0x142   :  { %2158 = vmatpush.bf16.msra.mxu3 %v5742_v61  ;;  %v5457_v61 = vld [vmem:[%s11163_s6 + $0x108] sm:$0xf]  ;;  %v5379_v3 = vld [vmem:[%s11163_s6 + $0x78] sm:$0xf0] }
 0x143   :  { %v1170_v16 = vpop.f32.mrf.mxu0  ;;  %v8979_v29 = vadd.f32 %v1156_v4, %v1143_v6  ;;  %v5521_v4 = vld [vmem:[%s11163_s6 + $0x188] sm:$0xf]  ;;  %v5446_v6 = vor.u32 %v7160_v10, %v5443_v32  ;;  %v5382_v32 = vor.u32 %v7144_v2, %v5379_v3  ;;  %v7224_v2 = vld [vmem:[%s11163_s6 + $0x2ec] sm:$0xf]  ;;  %v5699_v3 = vld [vmem:[%s11163_s6 + $0x2f8] sm:$0xf0] }
 0x144   :  { %2168 = vmatpush.bf16.msrb.mxu0 %v5426_v1  ;;  %v1171_v60 = vadd.f32 %v1170_v16, %v403_v43  ;;  %v5538_v1 = vor.u32 %v7186_v57, %v5537_v52  ;;  %v5522_v15 = vor.u32 %v7182_v5, %v5521_v4  ;;  %v5505_v16 = vld [vmem:[%s11163_s6 + $0x168] sm:$0xf]  ;;  %v7218_v52 = vld [vmem:[%s11163_s6 + $0x2b4] sm:$0xf0]  ;;  %v7192_v4 = vld [vmem:[%s11163_s6 + $0x1ec] sm:$0xf] }
 0x145   :  { %v5666_v59 = vor.u32 %v7218_v52, %v5665_v51  ;;  %v5571_v5 = vld [vmem:[%s11163_s6 + $0x1f8] sm:$0xf0] }
 0x146   :  { %v1184_v37 = vpop.f32.mrf.mxu1 }
 0x147   :  { %v1185_v9 = vadd.f32 %v1184_v37, %v1171_v60  ;;  %v5681_v37 = vld [vmem:[%s11163_s6 + $0x2c8] sm:$0xf] }
 0x148   :  { %2169 = vmatpush.bf16.msrb.mxu0 %v5410_v11  ;;  %v1144_v18 = vpop.f32.mrf.mxu2  ;;  %v5726_v11 = vor.u32 %v7231_v7, %v5723_v8  ;;  %v404_v8 = vperm.slane %v8822_v55, 3  ;;  %v5363_v55 = vld [vmem:[%s11163_s6 + $0x58] sm:$0xf0] }
 0x149   :  { %v1145_v23 = vadd.f32 %v1144_v18, %v1131_v0  ;;  %v1158_v24 = vpop.f32.mrf.mxu3  ;;  %v5697_v18 = vld [vmem:[%s11163_s6 + $0x2e8] sm:$0xf] }
 0x14a   :  { %2159 = vmatpush.bf16.msra.mxu3 %v5726_v11  ;;  %v5633_v11 = vld [vmem:[%s11163_s6 + $0x268] sm:$0xf] }
 0x14b   :  { %v8981_v30 = vadd.f32 %v1158_v24, %v1145_v23  ;;  %v1172_v46 = vpop.f32.mrf.mxu0  ;;  %v7156_v23 = vld [vmem:[%s11163_s6 + $0xcc] sm:$0xf]  ;;  %v5427_v24 = vld [vmem:[%s11163_s6 + $0xd8] sm:$0xf0] }
 0x14c   :  { %2170 = vmatpush.bf16.msrb.mxu0 %v5394_v19  ;;  %v1173_v62 = vadd.f32 %v1172_v46, %v403_v43  ;;  %v7227_v19 = vld [vmem:[%s11163_s6 + $0x304] sm:$0xf]  ;;  %v5430_v34 = vor.u32 %v7156_v23, %v5427_v24  ;;  %v5411_v43 = vld [vmem:[%s11163_s6 + $0xb8] sm:$0xf0]  ;;  %v5682_v46 = vor.u32 %v7222_v41, %v5681_v37  ;;  %v7136_v23 = vld [vmem:[%s11163_s6 + $0x2c] sm:$0xf] }
 0x14d   :  { %v8994_v38 = vpack.c.bf16 %v8981_v30, %v8979_v29  ;;  %v5710_v25 = vor.u32 %v7227_v19, %v5707_v20  ;;  %v5347_v24 = vld [vmem:[%s11163_s6 + $0x38] sm:$0xf0]  ;;  %v7202_v41 = vld [vmem:[%s11163_s6 + $0x234] sm:$0xf0] }
 0x14e   :  { %v1186_v12 = vpop.f32.mrf.mxu1  ;;  %v5602_v52 = vor.u32 %v7202_v41, %v5601_v35  ;;  %v5761_v41 = vld [vmem:[%s11163_s6 + $0x368] sm:$0xf] }
 0x14f   :  { %2077 = vmatmul.bf16.vlgmr.msrb.gmra.mxu1 %v8994_v38  ;;  %2119 = vmatmul.bf16.vlgmr.msra.gmra.mxu0 %v8922_v54  ;;  %v1187_v13 = vadd.f32 %v1186_v12, %v1173_v62  ;;  %v7166_v62 = vld [vmem:[%s11163_s6 + $0x114] sm:$0xf0]  ;;  %v5574_v12 = vor.u32 %v7192_v4, %v5571_v5 }
 0x150   :  { %2171 = vmatpush.bf16.msrb.mxu0 %v5378_v31  ;;  %2181 = vmatpush.bf16.msrb.mxu1 %v5570_v33  ;;  %v1198_v53 = vpop.f32.mrf.mxu2  ;;  %v5506_v31 = vor.u32 %v7178_v17, %v5505_v16  ;;  %v5698_v33 = vor.u32 %v7226_v22, %v5697_v18  ;;  %v5458_v7 = vor.u32 %v7166_v62, %v5457_v61  ;;  %v5617_v18 = vld [vmem:[%s11163_s6 + $0x248] sm:$0xf]  ;;  %v7206_v22 = vld [vmem:[%s11163_s6 + $0x254] sm:$0xf0]  ;;  %v7176_v62 = vld [vmem:[%s11163_s6 + $0x16c] sm:$0xf] }
 0x151   :  { %v1212_v56 = vpop.f32.mrf.mxu3  ;;  %v1199_v14 = vadd.f32 %v1198_v53, %v1185_v9  ;;  %2160 = vmatpush.bf16.msra.mxu3 %v5710_v25  ;;  %v7148_v53 = vld [vmem:[%s11163_s6 + $0x8c] sm:$0xf]  ;;  %v7258_v61 = vld [vmem:[%s11163_s6 + $0x3f4] sm:$0xf0] }
 0x152   :  { %v7184_v25 = vld [vmem:[%s11163_s6 + $0x1ac] sm:$0xf] }
 0x153   :  { %v9074_v27 = vadd.f32 %v1212_v56, %v1199_v14  ;;  %v5395_v56 = vld [vmem:[%s11163_s6 + $0x98] sm:$0xf0]  ;;  %v7188_v14 = vld [vmem:[%s11163_s6 + $0x1cc] sm:$0xf] }
 0x154   :  { %2172 = vmatpush.bf16.msrb.mxu0 %v5362_v48  ;;  %2182 = vmatpush.bf16.msrb.mxu1 %v5554_v49  ;;  %v5414_v48 = vor.u32 %v7152_v42, %v5411_v43  ;;  %v5473_v49 = vld [vmem:[%s11163_s6 + $0x128] sm:$0xf]  ;;  %v5398_v60 = vor.u32 %v7148_v53, %v5395_v56  ;;  %v7132_v42 = vld [vmem:[%s11163_s6 + $0xc] sm:$0xf]  ;;  %v5331_v43 = vld [vmem:[%s11163_s6 + $0x18] sm:$0xf0] }
 0x155   :  { %v5474_v58 = vor.u32 %v7170_v50, %v5473_v49  ;;  %v5334_v53 = vor.u32 %v7132_v42, %v5331_v43  ;;  %v5585_v56 = vld [vmem:[%s11163_s6 + $0x208] sm:$0xf]  ;;  %v7242_v42 = vld [vmem:[%s11163_s6 + $0x374] sm:$0xf0]  ;;  %v7208_v43 = vld [vmem:[%s11163_s6 + $0x26c] sm:$0xf] }
 0x158   :  { %2173 = vmatpush.bf16.msrb.mxu0 %v5346_v63  ;;  %2183 = vmatpush.bf16.msrb.mxu1 %v5538_v1  ;;  %v1200_v0 = vpop.f32.mrf.mxu2  ;;  %v5649_v63 = vld [vmem:[%s11163_s6 + $0x288] sm:$0xf]  ;;  %v7214_v1 = vld [vmem:[%s11163_s6 + $0x294] sm:$0xf0] }
 0x159   :  { %v1201_v21 = vadd.f32 %v1200_v0, %v1187_v13  ;;  %v1214_v26 = vpop.f32.mrf.mxu3  ;;  %v5650_v10 = vor.u32 %v7214_v1, %v5649_v63  ;;  %v7140_v13 = vld [vmem:[%s11163_s6 + $0x4c] sm:$0xf]  ;;  %v5507_v1 = vld [vmem:[%s11163_s6 + $0x178] sm:$0xf0] }
 0x15b   :  { %v9076_v28 = vadd.f32 %v1214_v26, %v1201_v21  ;;  %v5539_v26 = vld [vmem:[%s11163_s6 + $0x1b8] sm:$0xf0] }
 0x15c   :  { %2174 = vmatpush.bf16.msrb.mxu0 %v5330_v39  ;;  %2184 = vmatpush.bf16.msrb.mxu1 %v5522_v15  ;;  %v7210_v39 = vld [vmem:[%s11163_s6 + $0x274] sm:$0xf0]  ;;  %v5555_v15 = vld [vmem:[%s11163_s6 + $0x1d8] sm:$0xf0]  ;;  %v5542_v37 = vor.u32 %v7184_v25, %v5539_v26  ;;  %v7164_v26 = vld [vmem:[%s11163_s6 + $0x10c] sm:$0xf] }
 0x15d   :  { %v9089_v40 = vpack.c.bf16 %v9076_v28, %v9074_v27  ;;  %v5634_v0 = vor.u32 %v7210_v39, %v5633_v11  ;;  %v5558_v21 = vor.u32 %v7188_v14, %v5555_v15  ;;  %v5809_v11 = vld [vmem:[%s11163_s6 + $0x3c8] sm:$0xf]  ;;  %v7172_v39 = vld [vmem:[%s11163_s6 + $0x14c] sm:$0xf]  ;;  %v5683_v14 = vld [vmem:[%s11163_s6 + $0x2d8] sm:$0xf0] }
 0x15e   :  { %v7246_v25 = vld [vmem:[%s11163_s6 + $0x394] sm:$0xf0] }
 0x15f   :  { %2133 = vmatmul.bf16.vlgmr.msra.gmra.mxu1 %v8994_v38  ;;  %2175 = vmatmul.bf16.vlgmr.msrb.gmra.mxu0 %v8922_v54 }
 0x160   :  { %2223 = vmatpush.bf16.msra.mxu0 %v5446_v6  ;;  %2091 = vmatmul.bf16.vlgmr.msrb.gmra.mxu2 %v9089_v40  ;;  %v5366_v6 = vor.u32 %v7140_v13, %v5363_v55  ;;  %v5491_v13 = vld [vmem:[%s11163_s6 + $0x158] sm:$0xf0]  ;;  %v7220_v55 = vld [vmem:[%s11163_s6 + $0x2cc] sm:$0xf] }
 0x161   :  { %2185 = vmatpush.bf16.msrb.mxu1 %v5506_v31  ;;  %2195 = vmatpush.bf16.msrb.mxu2 %v5698_v33  ;;  %v5618_v33 = vor.u32 %v7206_v22, %v5617_v18  ;;  %v7168_v18 = vld [vmem:[%s11163_s6 + $0x12c] sm:$0xf] }
 0x163   :  { %v1226_v57 = vpop.f32.mrf.mxu0 }
 0x164   :  { %2224 = vmatpush.bf16.msra.mxu0 %v5430_v34  ;;  %v1227_v19 = vadd.f32 %v1226_v57, %v404_v8  ;;  %v5350_v34 = vor.u32 %v7136_v23, %v5347_v24  ;;  %v7198_v57 = vld [vmem:[%s11163_s6 + $0x214] sm:$0xf0]  ;;  %v5777_v24 = vld [vmem:[%s11163_s6 + $0x388] sm:$0xf] }
 0x165   :  { %2186 = vmatpush.bf16.msrb.mxu1 %v5490_v44  ;;  %2196 = vmatpush.bf16.msrb.mxu2 %v5682_v46  ;;  %v7180_v46 = vld [vmem:[%s11163_s6 + $0x18c] sm:$0xf]  ;;  %v5778_v35 = vor.u32 %v7246_v25, %v5777_v24  ;;  %v5715_v24 = vld [vmem:[%s11163_s6 + $0x318] sm:$0xf0] }
 0x166   :  { %v1240_v9 = vpop.f32.mrf.mxu1 }
 0x167   :  { %v1241_v36 = vadd.f32 %v1240_v9, %v1227_v19  ;;  %v7216_v19 = vld [vmem:[%s11163_s6 + $0x2ac] sm:$0xf] }
 0x168   :  { %2225 = vmatpush.bf16.msra.mxu0 %v5414_v48  ;;  %v5523_v48 = vld [vmem:[%s11163_s6 + $0x198] sm:$0xf0] }
 0x169   :  { %2187 = vmatpush.bf16.msrb.mxu1 %v5474_v58  ;;  %2197 = vmatpush.bf16.msrb.mxu2 %v5666_v59  ;;  %v5526_v59 = vor.u32 %v7180_v46, %v5523_v48  ;;  %v5762_v46 = vor.u32 %v7242_v42, %v5761_v41  ;;  %v7281_v41 = vld [vmem:[%s11165_s8 + $0xac] sm:$0xf0] }
 0x16b   :  { %v1228_v16 = vpop.f32.mrf.mxu0 }
 0x16c   :  { %2226 = vmatpush.bf16.msra.mxu0 %v5398_v60  ;;  %v1229_v31 = vadd.f32 %v1228_v16, %v404_v8  ;;  %v5825_v60 = vld [vmem:[%s11163_s6 + $0x3e8] sm:$0xf]  ;;  %v5494_v16 = vor.u32 %v7172_v39, %v5491_v13  ;;  %v7248_v13 = vld [vmem:[%s11163_s6 + $0x3ac] sm:$0xf] }
 0x16d   :  { %2188 = vmatpush.bf16.msrb.mxu1 %v5458_v7  ;;  %2198 = vmatpush.bf16.msrb.mxu2 %v5650_v10  ;;  %v5586_v7 = vor.u32 %v7198_v57, %v5585_v56  ;;  %v5826_v8 = vor.u32 %v7258_v61, %v5825_v60  ;;  %v5510_v10 = vor.u32 %v7176_v62, %v5507_v1  ;;  %v5729_v57 = vld [vmem:[%s11163_s6 + $0x328] sm:$0xf]  ;;  %v5603_v60 = vld [vmem:[%s11163_s6 + $0x238] sm:$0xf0]  ;;  %v7196_v1 = vld [vmem:[%s11163_s6 + $0x20c] sm:$0xf] }
 0x16e   :  { %v1242_v44 = vpop.f32.mrf.mxu1  ;;  %v5713_v62 = vld [vmem:[%s11163_s6 + $0x308] sm:$0xf] }
 0x16f   :  { %v1243_v49 = vadd.f32 %v1242_v44, %v1229_v31  ;;  %v5459_v31 = vld [vmem:[%s11163_s6 + $0x118] sm:$0xf0] }
 0x170   :  { %v1254_v17 = vpop.f32.mrf.mxu2  ;;  %2227 = vmatpush.bf16.msra.mxu0 %v5382_v32  ;;  %2189 = vmatmul.bf16.vlgmr.msrb.gmra.mxu1 %v8994_v38  ;;  %v5702_v32 = vor.u32 %v7224_v2, %v5699_v3  ;;  %v5635_v44 = vld [vmem:[%s11163_s6 + $0x278] sm:$0xf0]  ;;  %v7256_v3 = vld [vmem:[%s11163_s6 + $0x3ec] sm:$0xf] }
 0x171   :  { %v1268_v20 = vpop.f32.mrf.mxu3  ;;  %2237 = vmatpush.bf16.msra.mxu1 %v5574_v12  ;;  %2147 = vmatmul.bf16.vlgmr.msra.gmra.mxu2 %v9089_v40  ;;  %v1255_v50 = vadd.f32 %v1254_v17, %v1241_v36  ;;  %v7254_v12 = vld [vmem:[%s11163_s6 + $0x3d4] sm:$0xf0]  ;;  %v5686_v17 = vor.u32 %v7220_v55, %v5683_v14  ;;  %v5462_v36 = vor.u32 %v7164_v26, %v5459_v31  ;;  %v5587_v2 = vld [vmem:[%s11163_s6 + $0x218] sm:$0xf0]  ;;  %v5945_v26 = vld [vmem:[%s11165_s8 + $0xe0] sm:$0xf] }
 0x172   :  { %2199 = vmatpush.bf16.msrb.mxu2 %v5634_v0  ;;  %v5810_v15 = vor.u32 %v7254_v12, %v5809_v11  ;;  %v5793_v0 = vld [vmem:[%s11163_s6 + $0x3a8] sm:$0xf]  ;;  %v5638_v48 = vor.u32 %v7208_v43, %v5635_v44  ;;  %v7252_v11 = vld [vmem:[%s11163_s6 + $0x3cc] sm:$0xf]  ;;  %v5811_v12 = vld [vmem:[%s11163_s6 + $0x3d8] sm:$0xf0] }
 0x173   :  { %v9226_v4 = vadd.f32 %v1268_v20, %v1255_v50  ;;  %v5667_v20 = vld [vmem:[%s11163_s6 + $0x2b8] sm:$0xf0]  ;;  %v7238_v50 = vld [vmem:[%s11163_s6 + $0x354] sm:$0xf0]  ;;  %v5814_v39 = vor.u32 %v7252_v11, %v5811_v12  ;;  %v7289_v31 = vld [vmem:[%s11165_s8 + $0xec] sm:$0xf0] }
 0x174   :  { %2228 = vmatpush.bf16.msra.mxu0 %v5366_v6  ;;  %v7250_v6 = vld [vmem:[%s11163_s6 + $0x3b4] sm:$0xf0]  ;;  %v5670_v23 = vor.u32 %v7216_v19, %v5667_v20  ;;  %v5795_v55 = vld [vmem:[%s11163_s6 + $0x3b8] sm:$0xf0]  ;;  %v7232_v20 = vld [vmem:[%s11163_s6 + $0x32c] sm:$0xf] }
 0x175   :  { %2238 = vmatpush.bf16.msra.mxu1 %v5558_v21  ;;  %v5794_v21 = vor.u32 %v7250_v6, %v5793_v0  ;;  %v5798_v14 = vor.u32 %v7248_v13, %v5795_v55  ;;  %v7240_v0 = vld [vmem:[%s11163_s6 + $0x36c] sm:$0xf]  ;;  %v5897_v43 = vld [vmem:[%s11165_s8 + $0x80] sm:$0xf]  ;;  %v7277_v44 = vld [vmem:[%s11165_s8 + $0x8c] sm:$0xf0] }
 0x176   :  { %2200 = vmatpush.bf16.msrb.mxu2 %v5618_v33  ;;  %v7212_v33 = vld [vmem:[%s11163_s6 + $0x28c] sm:$0xf]  ;;  %v7287_v12 = vld [vmem:[%s11165_s8 + $0xe4] sm:$0xf]  ;;  %v6009_v55 = vld [vmem:[%s11165_s8 + $0x160] sm:$0xf] }
 0x178   :  { %v1256_v51 = vpop.f32.mrf.mxu2  ;;  %2229 = vmatpush.bf16.msra.mxu0 %v5350_v34  ;;  %v5651_v34 = vld [vmem:[%s11163_s6 + $0x298] sm:$0xf0] }
 0x179   :  { %v1257_v58 = vadd.f32 %v1256_v51, %v1243_v49  ;;  %2239 = vmatpush.bf16.msra.mxu1 %v5542_v37  ;;  %v1270_v63 = vpop.f32.mrf.mxu3  ;;  %v5654_v37 = vor.u32 %v7212_v33, %v5651_v34  ;;  %v5745_v49 = vld [vmem:[%s11163_s6 + $0x348] sm:$0xf]  ;;  %v7204_v51 = vld [vmem:[%s11163_s6 + $0x24c] sm:$0xf]  ;;  %v5946_v33 = vor.u32 %v7289_v31, %v5945_v26  ;;  %v5929_v34 = vld [vmem:[%s11165_s8 + $0xc0] sm:$0xf] }
 0x17a   :  { %2201 = vmatpush.bf16.msrb.mxu2 %v5602_v52  ;;  %v5619_v52 = vld [vmem:[%s11163_s6 + $0x258] sm:$0xf0]  ;;  %v5977_v31 = vld [vmem:[%s11165_s8 + $0x120] sm:$0xf] }
 0x17b   :  { %v9228_v5 = vadd.f32 %v1270_v63, %v1257_v58  ;;  %v5622_v56 = vor.u32 %v7204_v51, %v5619_v52  ;;  %v7234_v58 = vld [vmem:[%s11163_s6 + $0x334] sm:$0xf0]  ;;  %v7321_v51 = vld [vmem:[%s11165_s8 + $0x1ec] sm:$0xf0]  ;;  %v5865_v52 = vld [vmem:[%s11165_s8 + $0x40] sm:$0xf] }
 0x17c   :  { %2230 = vmatpush.bf16.msra.mxu0 %v5334_v53  ;;  %v5746_v53 = vor.u32 %v7238_v50, %v5745_v49  ;;  %v7230_v63 = vld [vmem:[%s11163_s6 + $0x314] sm:$0xf0]  ;;  %v6073_v49 = vld [vmem:[%s11165_s8 + $0x1e0] sm:$0xf] }
 0x17d   :  { %v9232_v9 = vpack.c.bf16 %v9228_v5, %v9226_v4  ;;  %2240 = vmatpush.bf16.msra.mxu1 %v5526_v59  ;;  %v7200_v59 = vld [vmem:[%s11163_s6 + $0x22c] sm:$0xf] }
 0x17e   :  { %2202 = vmatpush.bf16.msrb.mxu2 %v5586_v7  ;;  %v5606_v61 = vor.u32 %v7200_v59, %v5603_v60  ;;  %v5827_v7 = vld [vmem:[%s11163_s6 + $0x3f8] sm:$0xf0] }
 0x17f   :  { %2105 = vmatmul.bf16.vlgmr.msrb.gmra.mxu3 %v9232_v9  ;;  %2231 = vmatmul.bf16.vlgmr.msra.gmra.mxu0 %v8922_v54  ;;  %v5475_v54 = vld [vmem:[%s11163_s6 + $0x138] sm:$0xf0] }
 0x180   :  { %2209 = vmatpush.bf16.msrb.mxu3 %v5826_v8  ;;  %v5478_v22 = vor.u32 %v7168_v18, %v5475_v54  ;;  %v5714_v8 = vor.u32 %v7230_v63, %v5713_v62  ;;  %v7236_v18 = vld [vmem:[%s11163_s6 + $0x34c] sm:$0xf]  ;;  %v5747_v54 = vld [vmem:[%s11163_s6 + $0x358] sm:$0xf0]  ;;  %3077 = vmatpush.bf16.msrb.mxu0 %v5946_v33  ;;  %v6041_v62 = vld [vmem:[%s11165_s8 + $0x1a0] sm:$0xf] }
 0x181   :  { %2241 = vmatpush.bf16.msra.mxu1 %v5510_v10  ;;  %2203 = vmatmul.bf16.vlgmr.msrb.gmra.mxu2 %v9089_v40  ;;  %v5590_v10 = vor.u32 %v7196_v1, %v5587_v2  ;;  %v5750_v19 = vor.u32 %v7236_v18, %v5747_v54  ;;  %v7313_v1 = vld [vmem:[%s11165_s8 + $0x1ac] sm:$0xf0]  ;;  %v5833_v2 = vld [vmem:[%s11165_s8] sm:$0xf] }
 0x182   :  { %2251 = vmatpush.bf16.msra.mxu2 %v5702_v32  ;;  %v5830_v32 = vor.u32 %v7256_v3, %v5827_v7  ;;  %v7261_v3 = vld [vmem:[%s11165_s8 + $0xc] sm:$0xf0]  ;;  %v6042_v7 = vor.u32 %v7313_v1, %v6041_v62  ;;  %v5993_v54 = vld [vmem:[%s11165_s8 + $0x140] sm:$0xf]  ;;  %v5867_v62 = vld [vmem:[%s11165_s8 + $0x50] sm:$0xf0] }
 0x183   :  { %v7297_v33 = vld [vmem:[%s11165_s8 + $0x12c] sm:$0xf0] }
 0x184   :  { %2210 = vmatpush.bf16.msrb.mxu3 %v5810_v15  ;;  %v7244_v15 = vld [vmem:[%s11163_s6 + $0x38c] sm:$0xf] }
 0x185   :  { %2242 = vmatpush.bf16.msra.mxu1 %v5494_v16  ;;  %v5779_v16 = vld [vmem:[%s11163_s6 + $0x398] sm:$0xf0] }
 0x186   :  { %2252 = vmatpush.bf16.msra.mxu2 %v5686_v17  ;;  %v5782_v17 = vor.u32 %v7244_v15, %v5779_v16  ;;  %v6201_v15 = vld [vmem:[%s11165_s8 + $0x2e0] sm:$0xf] }
 0x188   :  { %2211 = vmatpush.bf16.msrb.mxu3 %v5794_v21  ;;  %v5731_v21 = vld [vmem:[%s11163_s6 + $0x338] sm:$0xf0] }
 0x189   :  { %2243 = vmatpush.bf16.msra.mxu1 %v5478_v22  ;;  %v5734_v22 = vor.u32 %v7232_v20, %v5731_v21  ;;  %v6185_v20 = vld [vmem:[%s11165_s8 + $0x2c0] sm:$0xf] }
 0x18a   :  { %2253 = vmatpush.bf16.msra.mxu2 %v5670_v23  ;;  %v7228_v23 = vld [vmem:[%s11163_s6 + $0x30c] sm:$0xf] }
 0x18b   :  { %v5718_v25 = vor.u32 %v7228_v23, %v5715_v24  ;;  %v7279_v23 = vld [vmem:[%s11165_s8 + $0xa4] sm:$0xf]  ;;  %v5915_v24 = vld [vmem:[%s11165_s8 + $0xb0] sm:$0xf0] }
 0x18c   :  { %2212 = vmatpush.bf16.msrb.mxu3 %v5778_v35  ;;  %v7285_v35 = vld [vmem:[%s11165_s8 + $0xcc] sm:$0xf0]  ;;  %v5918_v26 = vor.u32 %v7279_v23, %v5915_v24  ;;  %v6329_v23 = vld [vmem:[%s11165_s8 + $0x3e0] sm:$0xf] }
 0x18d   :  { %2244 = vmatpush.bf16.msra.mxu1 %v5462_v36  ;;  %v5930_v36 = vor.u32 %v7285_v35, %v5929_v34  ;;  %v6169_v34 = vld [vmem:[%s11165_s8 + $0x2a0] sm:$0xf]  ;;  %v5978_v35 = vor.u32 %v7297_v33, %v5977_v31  ;;  %v7303_v31 = vld [vmem:[%s11165_s8 + $0x164] sm:$0xf]  ;;  %v6011_v33 = vld [vmem:[%s11165_s8 + $0x170] sm:$0xf0] }
 0x18e   :  { %2254 = vmatpush.bf16.msra.mxu2 %v5654_v37  ;;  %v5913_v37 = vld [vmem:[%s11165_s8 + $0xa0] sm:$0xf] }
 0x18f   :  { %2161 = vmatmul.bf16.vlgmr.msra.gmra.mxu3 %v9232_v9  ;;  %3078 = vmatpush.bf16.msrb.mxu0 %v5930_v36  ;;  %v5914_v42 = vor.u32 %v7281_v41, %v5913_v37  ;;  %v7345_v36 = vld [vmem:[%s11165_s8 + $0x2ac] sm:$0xf0]  ;;  %v7275_v37 = vld [vmem:[%s11165_s8 + $0x84] sm:$0xf]  ;;  %v5899_v41 = vld [vmem:[%s11165_s8 + $0x90] sm:$0xf0] }
 0x190   :  { %2213 = vmatpush.bf16.msrb.mxu3 %v5762_v46  ;;  %2245 = vmatmul.bf16.vlgmr.msra.gmra.mxu1 %v8994_v38  ;;  %v5730_v38 = vor.u32 %v7234_v58, %v5729_v57  ;;  %v5881_v46 = vld [vmem:[%s11165_s8 + $0x60] sm:$0xf]  ;;  %v7317_v58 = vld [vmem:[%s11165_s8 + $0x1cc] sm:$0xf0] }
 0x191   :  { %v6057_v57 = vld [vmem:[%s11165_s8 + $0x1c0] sm:$0xf] }
 0x192   :  { %2255 = vmatpush.bf16.msra.mxu2 %v5638_v48  ;;  %v7273_v48 = vld [vmem:[%s11165_s8 + $0x6c] sm:$0xf0]  ;;  %v6058_v60 = vor.u32 %v7317_v58, %v6057_v57  ;;  %v6075_v57 = vld [vmem:[%s11165_s8 + $0x1f0] sm:$0xf0] }
 0x193   :  { %3079 = vmatpush.bf16.msrb.mxu0 %v5914_v42  ;;  %v5882_v50 = vor.u32 %v7273_v48, %v5881_v46  ;;  %v6170_v42 = vor.u32 %v7345_v36, %v6169_v34  ;;  %v6153_v46 = vld [vmem:[%s11165_s8 + $0x280] sm:$0xf]  ;;  %v7351_v36 = vld [vmem:[%s11165_s8 + $0x2e4] sm:$0xf] }
 0x194   :  { %2214 = vmatpush.bf16.msrb.mxu3 %v5746_v53  ;;  %v7269_v53 = vld [vmem:[%s11165_s8 + $0x4c] sm:$0xf0] }
 0x195   :  { %v5866_v59 = vor.u32 %v7269_v53, %v5865_v52 }
 0x196   :  { %2256 = vmatpush.bf16.msra.mxu2 %v5622_v56  ;;  %v6074_v56 = vor.u32 %v7321_v51, %v6073_v49  ;;  %v7341_v49 = vld [vmem:[%s11165_s8 + $0x28c] sm:$0xf0]  ;;  %v5883_v51 = vld [vmem:[%s11165_s8 + $0x70] sm:$0xf0] }
 0x197   :  { %v6154_v52 = vor.u32 %v7341_v49, %v6153_v46  ;;  %v5995_v46 = vld [vmem:[%s11165_s8 + $0x150] sm:$0xf0] }
 0x198   :  { %2215 = vmatpush.bf16.msrb.mxu3 %v5730_v38  ;;  %3091 = vmatpush.bf16.msrb.mxu1 %v6074_v56  ;;  %v5849_v38 = vld [vmem:[%s11165_s8 + $0x20] sm:$0xf]  ;;  %v7319_v56 = vld [vmem:[%s11165_s8 + $0x1e4] sm:$0xf] }
 0x199   :  { %v6078_v58 = vor.u32 %v7319_v56, %v6075_v57  ;;  %v6297_v56 = vld [vmem:[%s11165_s8 + $0x3a0] sm:$0xf]  ;;  %v7377_v57 = vld [vmem:[%s11165_s8 + $0x3ac] sm:$0xf0] }
 0x19a   :  { %2257 = vmatpush.bf16.msra.mxu2 %v5606_v61  ;;  %v7265_v61 = vld [vmem:[%s11165_s8 + $0x2c] sm:$0xf0] }
 0x19b   :  { %v5850_v63 = vor.u32 %v7265_v61, %v5849_v38  ;;  %v7267_v61 = vld [vmem:[%s11165_s8 + $0x44] sm:$0xf] }
 0x19c   :  { %2216 = vmatpush.bf16.msrb.mxu3 %v5714_v8  ;;  %3092 = vmatpush.bf16.msrb.mxu1 %v6058_v60  ;;  %v6025_v8 = vld [vmem:[%s11165_s8 + $0x180] sm:$0xf]  ;;  %v7337_v60 = vld [vmem:[%s11165_s8 + $0x26c] sm:$0xf0]  ;;  %v5870_v1 = vor.u32 %v7267_v61, %v5867_v62  ;;  %v7343_v61 = vld [vmem:[%s11165_s8 + $0x2a4] sm:$0xf] }
 0x19e   :  { %2258 = vmatpush.bf16.msra.mxu2 %v5590_v10  ;;  %v7309_v10 = vld [vmem:[%s11165_s8 + $0x18c] sm:$0xf0] }
 0x19f   :  { %2217 = vmatmul.bf16.vlgmr.msrb.gmra.mxu3 %v9232_v9  ;;  %v6026_v11 = vor.u32 %v7309_v10, %v6025_v8  ;;  %v7333_v8 = vld [vmem:[%s11165_s8 + $0x24c] sm:$0xf0] }
 0x1a0   :  { %2265 = vmatpush.bf16.msra.mxu3 %v5830_v32  ;;  %v5834_v32 = vor.u32 %v7261_v3, %v5833_v2  ;;  %3093 = vmatpush.bf16.msrb.mxu1 %v6042_v7  ;;  %v6059_v2 = vld [vmem:[%s11165_s8 + $0x1d0] sm:$0xf0]  ;;  %v6121_v7 = vld [vmem:[%s11165_s8 + $0x240] sm:$0xf] }
 0x1a1   :  { %2259 = vmatmul.bf16.vlgmr.msra.gmra.mxu2 %v9089_v40  ;;  %v5763_v40 = vld [vmem:[%s11163_s6 + $0x378] sm:$0xf0]  ;;  %v6122_v10 = vor.u32 %v7333_v8, %v6121_v7  ;;  %v6281_v7 = vld [vmem:[%s11165_s8 + $0x380] sm:$0xf]  ;;  %v7373_v8 = vld [vmem:[%s11165_s8 + $0x38c] sm:$0xf0] }
 0x1a2   :  { %v5766_v6 = vor.u32 %v7240_v0, %v5763_v40  ;;  %v7283_v0 = vld [vmem:[%s11165_s8 + $0xc4] sm:$0xf]  ;;  %v5931_v40 = vld [vmem:[%s11165_s8 + $0xd0] sm:$0xf0] }
 0x1a3   :  { %v5934_v18 = vor.u32 %v7283_v0, %v5931_v40  ;;  %v7259_v0 = vld [vmem:[%s11165_s8 + $0x4] sm:$0xf]  ;;  %v5835_v40 = vld [vmem:[%s11165_s8 + $0x10] sm:$0xf0] }
 0x1a4   :  { %2266 = vmatpush.bf16.msra.mxu3 %v5814_v39  ;;  %v5947_v39 = vld [vmem:[%s11165_s8 + $0xf0] sm:$0xf0]  ;;  %3094 = vmatpush.bf16.msrb.mxu1 %v6026_v11 }
 0x1a5   :  { %v5950_v13 = vor.u32 %v7287_v12, %v5947_v39  ;;  %v5851_v11 = vld [vmem:[%s11165_s8 + $0x30] sm:$0xf0]  ;;  %v7311_v12 = vld [vmem:[%s11165_s8 + $0x1a4] sm:$0xf] }
 0x1a8   :  { %2267 = vmatpush.bf16.msra.mxu3 %v5798_v14  ;;  %v7305_v14 = vld [vmem:[%s11165_s8 + $0x16c] sm:$0xf0] }
 0x1a9   :  { %v6010_v16 = vor.u32 %v7305_v14, %v6009_v55  ;;  %v6105_v14 = vld [vmem:[%s11165_s8 + $0x220] sm:$0xf] }
 0x1ab   :  { %3095 = vmatpush.bf16.msrb.mxu1 %v6010_v16 }
 0x1ac   :  { %2268 = vmatpush.bf16.msra.mxu3 %v5782_v17  ;;  %v7353_v17 = vld [vmem:[%s11165_s8 + $0x2ec] sm:$0xf0] }
 0x1b0   :  { %2269 = vmatpush.bf16.msra.mxu3 %v5766_v6  ;;  %v6202_v6 = vor.u32 %v7353_v17, %v6201_v15  ;;  %v7329_v15 = vld [vmem:[%s11165_s8 + $0x22c] sm:$0xf0] }
 0x1b1   :  { %v6106_v17 = vor.u32 %v7329_v15, %v6105_v14 }
 0x1b2   :  { %3105 = vmatpush.bf16.msrb.mxu2 %v6202_v6  ;;  %v7307_v6 = vld [vmem:[%s11165_s8 + $0x184] sm:$0xf] }
 0x1b4   :  { %2270 = vmatpush.bf16.msra.mxu3 %v5750_v19  ;;  %v7301_v19 = vld [vmem:[%s11165_s8 + $0x14c] sm:$0xf0] }
 0x1b5   :  { %v5994_v21 = vor.u32 %v7301_v19, %v5993_v54  ;;  %v6027_v54 = vld [vmem:[%s11165_s8 + $0x190] sm:$0xf0] }
 0x1b7   :  { %3096 = vmatpush.bf16.msrb.mxu1 %v5994_v21  ;;  %v6089_v21 = vld [vmem:[%s11165_s8 + $0x200] sm:$0xf] }
 0x1b8   :  { %2271 = vmatpush.bf16.msra.mxu3 %v5734_v22  ;;  %v7349_v22 = vld [vmem:[%s11165_s8 + $0x2cc] sm:$0xf0] }
 0x1bb   :  { %3097 = vmatpush.bf16.msrb.mxu1 %v5978_v35  ;;  %v6014_v35 = vor.u32 %v7303_v31, %v6011_v33  ;;  %v7365_v31 = vld [vmem:[%s11165_s8 + $0x34c] sm:$0xf0] }
 0x1bc   :  { %2272 = vmatpush.bf16.msra.mxu3 %v5718_v25  ;;  %v6186_v25 = vor.u32 %v7349_v22, %v6185_v20  ;;  %v9590_v16 = vpop.f32.mrf.mxu0  ;;  %v6030_v20 = vor.u32 %v7307_v6, %v6027_v54  ;;  %v7325_v22 = vld [vmem:[%s11165_s8 + $0x20c] sm:$0xf0]  ;;  %v6139_v54 = vld [vmem:[%s11165_s8 + $0x270] sm:$0xf0] }
 0x1be   :  { %3106 = vmatpush.bf16.msrb.mxu2 %v6186_v25  ;;  %v6090_v25 = vor.u32 %v7325_v22, %v6089_v21 }
 0x1bf   :  { %2273 = vmatmul.bf16.vlgmr.msra.gmra.mxu3 %v9232_v9  ;;  %v5898_v9 = vor.u32 %v7277_v44, %v5897_v43  ;;  %v5902_v43 = vor.u32 %v7275_v37, %v5899_v41  ;;  %v5961_v44 = vld [vmem:[%s11165_s8 + $0x100] sm:$0xf]  ;;  %v6203_v37 = vld [vmem:[%s11165_s8 + $0x2f0] sm:$0xf0] }
 0x1c0   :  { %v6206_v41 = vor.u32 %v7351_v36, %v6203_v37 }
 0x1c1   :  { %3080 = vmatpush.bf16.msrb.mxu0 %v5898_v9  ;;  %v7293_v9 = vld [vmem:[%s11165_s8 + $0x10c] sm:$0xf0] }
 0x1c2   :  { %3107 = vmatpush.bf16.msrb.mxu2 %v6170_v42  ;;  %v5962_v48 = vor.u32 %v7293_v9, %v5961_v44  ;;  %v6313_v42 = vld [vmem:[%s11165_s8 + $0x3c0] sm:$0xf]  ;;  %v7299_v9 = vld [vmem:[%s11165_s8 + $0x144] sm:$0xf] }
 0x1c3   :  { %v5998_v49 = vor.u32 %v7299_v9, %v5995_v46  ;;  %v7361_v9 = vld [vmem:[%s11165_s8 + $0x32c] sm:$0xf0] }
 0x1c4   :  { %3098 = vmatpush.bf16.msrb.mxu1 %v5962_v48  ;;  %v7347_v48 = vld [vmem:[%s11165_s8 + $0x2c4] sm:$0xf] }
 0x1c5   :  { %3081 = vmatpush.bf16.msrb.mxu0 %v5882_v50  ;;  %v7271_v50 = vld [vmem:[%s11165_s8 + $0x64] sm:$0xf] }
 0x1c6   :  { %v5886_v53 = vor.u32 %v7271_v50, %v5883_v51  ;;  %3108 = vmatpush.bf16.msrb.mxu2 %v6154_v52  ;;  %v6187_v50 = vld [vmem:[%s11165_s8 + $0x2d0] sm:$0xf0]  ;;  %v9653_v51 = vld [vmem:[%s11166_s7] sm:$0xf]  ;;  %v2066_v52 = vpop.f32.mrf.mxu0 }
 0x1c7   :  { %v1407_v62 = vperm.slane %v9653_v51, 0 }
 0x1c8   :  { %3147 = vmatpush.bf16.msra.mxu1 %v6078_v58 }
 0x1c9   :  { %3082 = vmatpush.bf16.msrb.mxu0 %v5866_v59  ;;  %v6137_v59 = vld [vmem:[%s11165_s8 + $0x260] sm:$0xf] }
 0x1ca   :  { %v6138_v38 = vor.u32 %v7337_v60, %v6137_v59  ;;  %v6298_v59 = vor.u32 %v7377_v57, %v6297_v56  ;;  %v7295_v60 = vld [vmem:[%s11165_s8 + $0x124] sm:$0xf]  ;;  %v7290_v56 = vld [vmem:[%s11165_s8 + $0xf4] sm:$0xf0] }
 0x1cc   :  { %3109 = vmatpush.bf16.msrb.mxu2 %v6138_v38  ;;  %v9604_v19 = vpop.f32.mrf.mxu1  ;;  %v5979_v38 = vld [vmem:[%s11165_s8 + $0x130] sm:$0xf0] }
 0x1cd   :  { %3083 = vmatpush.bf16.msrb.mxu0 %v5850_v63  ;;  %v7315_v63 = vld [vmem:[%s11165_s8 + $0x1c4] sm:$0xf] }
 0x1ce   :  { %v6062_v3 = vor.u32 %v7315_v63, %v6059_v2  ;;  %v5982_v63 = vor.u32 %v7295_v60, %v5979_v38  ;;  %v2120_v6 = vpop.f32.mrf.mxu0  ;;  %v6217_v38 = vld [vmem:[%s11165_s8 + $0x300] sm:$0xf] }
 0x1d0   :  { %3148 = vmatpush.bf16.msra.mxu1 %v6062_v3  ;;  %3110 = vmatpush.bf16.msrb.mxu2 %v6122_v10  ;;  %v6282_v10 = vor.u32 %v7373_v8, %v6281_v7  ;;  %v5937_v8 = vld [vmem:[%s11165_s8 + $0xc8] sm:$0xf] }
 0x1d1   :  { %3084 = vmatpush.bf16.msrb.mxu0 %v5834_v32  ;;  %v7263_v32 = vld [vmem:[%s11165_s8 + $0x24] sm:$0xf] }
 0x1d2   :  { %v5854_v39 = vor.u32 %v7263_v32, %v5851_v11  ;;  %v7291_v32 = vld [vmem:[%s11165_s8 + $0x104] sm:$0xf]  ;;  %v5963_v11 = vld [vmem:[%s11165_s8 + $0x110] sm:$0xf0] }
 0x1d4   :  { %3111 = vmatpush.bf16.msrb.mxu2 %v6106_v17  ;;  %v2080_v58 = vpop.f32.mrf.mxu1 }
 0x1d5   :  { %3133 = vmatpush.bf16.msra.mxu0 %v5950_v13  ;;  %v6043_v13 = vld [vmem:[%s11165_s8 + $0x1b0] sm:$0xf0] }
 0x1d6   :  { %v6046_v55 = vor.u32 %v7311_v12, %v6043_v13  ;;  %v7339_v12 = vld [vmem:[%s11165_s8 + $0x284] sm:$0xf]  ;;  %v5966_v13 = vor.u32 %v7291_v32, %v5963_v11  ;;  %v6331_v11 = vld [vmem:[%s11165_s8 + $0x3f0] sm:$0xf0] }
 0x1d8   :  { %3149 = vmatpush.bf16.msra.mxu1 %v6046_v55  ;;  %3112 = vmatpush.bf16.msrb.mxu2 %v6090_v25  ;;  %v6155_v55 = vld [vmem:[%s11165_s8 + $0x290] sm:$0xf0] }
 0x1d9   :  { %3134 = vmatpush.bf16.msra.mxu0 %v5934_v18  ;;  %v5838_v18 = vor.u32 %v7259_v0, %v5835_v40  ;;  %v6158_v15 = vor.u32 %v7339_v12, %v6155_v55  ;;  %v6265_v0 = vld [vmem:[%s11165_s8 + $0x360] sm:$0xf]  ;;  %v7369_v40 = vld [vmem:[%s11165_s8 + $0x36c] sm:$0xf0] }
 0x1dc   :  { %3150 = vmatpush.bf16.msra.mxu1 %v6030_v20  ;;  %3161 = vmatpush.bf16.msra.mxu2 %v6206_v41  ;;  %v2134_v22 = vpop.f32.mrf.mxu1 }
 0x1dd   :  { %3135 = vmatpush.bf16.msra.mxu0 %v5918_v26  ;;  %v7385_v26 = vld [vmem:[%s11165_s8 + $0x3ec] sm:$0xf0] }
 0x1de   :  { %v6330_v34 = vor.u32 %v7385_v26, %v6329_v23  ;;  %v6249_v26 = vld [vmem:[%s11165_s8 + $0x340] sm:$0xf] }
 0x1e0   :  { %3119 = vmatpush.bf16.msrb.mxu3 %v6330_v34  ;;  %3151 = vmatpush.bf16.msra.mxu1 %v6014_v35  ;;  %v6250_v34 = vor.u32 %v7365_v31, %v6249_v26  ;;  %v6123_v35 = vld [vmem:[%s11165_s8 + $0x250] sm:$0xf0]  ;;  %v7375_v26 = vld [vmem:[%s11165_s8 + $0x3a4] sm:$0xf] }
 0x1e1   :  { %3136 = vmatpush.bf16.msra.mxu0 %v5902_v43  ;;  %v7381_v43 = vld [vmem:[%s11165_s8 + $0x3cc] sm:$0xf0]  ;;  %v6299_v31 = vld [vmem:[%s11165_s8 + $0x3b0] sm:$0xf0] }
 0x1e2   :  { %v6314_v44 = vor.u32 %v7381_v43, %v6313_v42 }
 0x1e3   :  { %v9615_v24 = vpop.f32.mrf.mxu2 }
 0x1e4   :  { %3120 = vmatpush.bf16.msrb.mxu3 %v6314_v44  ;;  %3152 = vmatpush.bf16.msra.mxu1 %v5998_v49  ;;  %v6233_v44 = vld [vmem:[%s11165_s8 + $0x320] sm:$0xf]  ;;  %v6107_v49 = vld [vmem:[%s11165_s8 + $0x230] sm:$0xf0] }
 0x1e5   :  { %3137 = vmatpush.bf16.msra.mxu0 %v5886_v53  ;;  %v6190_v53 = vor.u32 %v7347_v48, %v6187_v50  ;;  %v6234_v46 = vor.u32 %v7361_v9, %v6233_v44  ;;  %v7327_v48 = vld [vmem:[%s11165_s8 + $0x224] sm:$0xf]  ;;  %v1408_v50 = vperm.slane %v9653_v51, 1  ;;  %v6081_v44 = vld [vmem:[%s11165_s8 + $0x1e8] sm:$0xf] }
 0x1e6   :  { %v6110_v57 = vor.u32 %v7327_v48, %v6107_v49  ;;  %v7322_v9 = vld [vmem:[%s11165_s8 + $0x1f4] sm:$0xf0]  ;;  %v7371_v49 = vld [vmem:[%s11165_s8 + $0x384] sm:$0xf] }
 0x1e7   :  { %3162 = vmatpush.bf16.msra.mxu2 %v6190_v53  ;;  %v5953_v53 = vld [vmem:[%s11165_s8 + $0xe8] sm:$0xf] }
 0x1e8   :  { %3121 = vmatpush.bf16.msrb.mxu3 %v6298_v59  ;;  %3153 = vmatpush.bf16.msra.mxu1 %v5982_v63  ;;  %v5954_v63 = vor.u32 %v7290_v56, %v5953_v53 }
 0x1e9   :  { %3138 = vmatpush.bf16.msra.mxu0 %v5870_v1  ;;  %v6171_v1 = vld [vmem:[%s11165_s8 + $0x2b0] sm:$0xf0] }
 0x1ea   :  { %v6174_v3 = vor.u32 %v7343_v61, %v6171_v1  ;;  %v7357_v61 = vld [vmem:[%s11165_s8 + $0x30c] sm:$0xf0] }
 0x1eb   :  { %v2094_v2 = vpop.f32.mrf.mxu2  ;;  %v6218_v1 = vor.u32 %v7357_v61, %v6217_v38  ;;  %v6065_v38 = vld [vmem:[%s11165_s8 + $0x1c8] sm:$0xf] }
 0x1ec   :  { %3163 = vmatpush.bf16.msra.mxu2 %v6174_v3  ;;  %3122 = vmatpush.bf16.msrb.mxu3 %v6282_v10  ;;  %v2121_v3 = vadd.f32 %v2120_v6, %v1408_v50  ;;  %v7286_v10 = vld [vmem:[%s11165_s8 + $0xd4] sm:$0xf0]  ;;  %v7379_v6 = vld [vmem:[%s11165_s8 + $0x3c4] sm:$0xf] }
 0x1ed   :  { %3139 = vmatpush.bf16.msra.mxu0 %v5854_v39  ;;  %v2065_v39 = vadd.f32 %v9590_v16, %v1407_v62  ;;  %3154 = vmatpush.bf16.msra.mxu1 %v5966_v13  ;;  %v6266_v16 = vor.u32 %v7369_v40, %v6265_v0  ;;  %v7282_v40 = vld [vmem:[%s11165_s8 + $0xb4] sm:$0xf0] }
 0x1ee   :  { %v2135_v55 = vadd.f32 %v2134_v22, %v2121_v3  ;;  %v5905_v22 = vld [vmem:[%s11165_s8 + $0x88] sm:$0xf] }
 0x1ef   :  { %v2079_v17 = vadd.f32 %v9604_v19, %v2065_v39  ;;  %v2067_v19 = vadd.f32 %v2066_v52, %v1407_v62  ;;  %v2136_v62 = vpop.f32.mrf.mxu1 }
 0x1f0   :  { %3164 = vmatpush.bf16.msra.mxu2 %v6158_v15  ;;  %3123 = vmatpush.bf16.msrb.mxu3 %v6266_v16  ;;  %v5921_v15 = vld [vmem:[%s11165_s8 + $0xa8] sm:$0xf]  ;;  %v6315_v16 = vld [vmem:[%s11165_s8 + $0x3d0] sm:$0xf0] }
 0x1f1   :  { %3140 = vmatpush.bf16.msra.mxu0 %v5838_v18  ;;  %v7335_v18 = vld [vmem:[%s11165_s8 + $0x264] sm:$0xf]  ;;  %v2093_v20 = vadd.f32 %v9615_v24, %v2079_v17  ;;  %v2081_v23 = vadd.f32 %v2080_v58, %v2067_v19  ;;  %v2122_v58 = vpop.f32.mrf.mxu0 }
 0x1f2   :  { %v6142_v21 = vor.u32 %v7335_v18, %v6139_v54  ;;  %v7331_v24 = vld [vmem:[%s11165_s8 + $0x244] sm:$0xf]  ;;  %v2123_v17 = vadd.f32 %v2122_v58, %v1408_v50  ;;  %v6318_v18 = vor.u32 %v7379_v6, %v6315_v16  ;;  %v6283_v50 = vld [vmem:[%s11165_s8 + $0x390] sm:$0xf0]  ;;  %v6082_v58 = vor.u32 %v7322_v9, %v6081_v44 }
 0x1f3   :  { %v2095_v36 = vadd.f32 %v2094_v2, %v2081_v23  ;;  %v6126_v37 = vor.u32 %v7331_v24, %v6123_v35  ;;  %v7323_v2 = vld [vmem:[%s11165_s8 + $0x204] sm:$0xf]  ;;  %v6302_v24 = vor.u32 %v7375_v26, %v6299_v31  ;;  %v7288_v31 = vld [vmem:[%s11165_s8 + $0xec] sm:$0xf] }
 0x1f4   :  { %v2148_v33 = vpop.f32.mrf.mxu2  ;;  %3165 = vmatpush.bf16.msra.mxu2 %v6142_v21  ;;  %3124 = vmatpush.bf16.msrb.mxu3 %v6250_v34  ;;  %v2137_v54 = vadd.f32 %v2136_v62, %v2123_v17  ;;  %v5922_v21 = vor.u32 %v7282_v40, %v5921_v15  ;;  %v6251_v15 = vld [vmem:[%s11165_s8 + $0x350] sm:$0xf0] }
 0x1f5   :  { %v2149_v0 = vadd.f32 %v2148_v33, %v2135_v55  ;;  %v7314_v55 = vld [vmem:[%s11165_s8 + $0x1b4] sm:$0xf0] }
 0x1f7   :  { %v2190_v33 = vpop.f32.mrf.mxu1 }
 0x1f8   :  { %3166 = vmatpush.bf16.msra.mxu2 %v6126_v37  ;;  %3125 = vmatpush.bf16.msrb.mxu3 %v6234_v46  ;;  %v5889_v37 = vld [vmem:[%s11165_s8 + $0x68] sm:$0xf]  ;;  %v1409_v46 = vperm.slane %v9653_v51, 2 }
 0x1fc   :  { %3167 = vmatpush.bf16.msra.mxu2 %v6110_v57  ;;  %v2150_v12 = vpop.f32.mrf.mxu2  ;;  %3126 = vmatpush.bf16.msrb.mxu3 %v6218_v1 }
 0x1fd   :  { %v2151_v23 = vadd.f32 %v2150_v12, %v2137_v54  ;;  %v6049_v12 = vld [vmem:[%s11165_s8 + $0x1a8] sm:$0xf] }
 0x1fe   :  { %v5841_v54 = vld [vmem:[%s11165_s8 + $0x8] sm:$0xf] }
 0x1ff   :  { %v2192_v3 = vpop.f32.mrf.mxu1 }
 0x202   :  { %v2106_v14 = vpop.f32.mrf.mxu3 }
 0x203   :  { %v2107_v25 = vadd.f32 %v2106_v14, %v2093_v20  ;;  %v5938_v14 = vor.u32 %v7286_v10, %v5937_v8  ;;  %v2176_v20 = vpop.f32.mrf.mxu0 }
 0x204   :  { %v2177_v61 = vadd.f32 %v2176_v20, %v1409_v46  ;;  %v6033_v20 = vld [vmem:[%s11165_s8 + $0x188] sm:$0xf] }
 0x205   :  { %v2279_v42 = vmax.f32 %v2107_v25, 0.0  ;;  %v7278_v25 = vld [vmem:[%s11165_s8 + $0x94] sm:$0xf0] }
 0x207   :  { %v2287_v59 = vadd.f32 %v2279_v42, %v8903_v45  ;;  %v6091_v45 = vld [vmem:[%s11165_s8 + $0x210] sm:$0xf0]  ;;  %v5906_v42 = vor.u32 %v7278_v25, %v5905_v22  ;;  %v7310_v22 = vld [vmem:[%s11165_s8 + $0x194] sm:$0xf0] }
 0x208   :  { %v6094_v32 = vor.u32 %v7323_v2, %v6091_v45  ;;  %v6235_v25 = vld [vmem:[%s11165_s8 + $0x330] sm:$0xf0] }
 0x20a   :  { %v2108_v41 = vpop.f32.mrf.mxu3  ;;  %3168 = vmatpush.bf16.msra.mxu2 %v6094_v32  ;;  %v5857_v32 = vld [vmem:[%s11165_s8 + $0x28] sm:$0xf] }
 0x20b   :  { %v2109_v43 = vadd.f32 %v2108_v41, %v2095_v36  ;;  %v2204_v41 = vpop.f32.mrf.mxu2  ;;  %v2178_v1 = vpop.f32.mrf.mxu0 }
 0x20d   :  { %v2283_v52 = vmax.f32 %v2109_v43, 0.0  ;;  %v7274_v43 = vld [vmem:[%s11165_s8 + $0x74] sm:$0xf0] }
 0x20e   :  { %v5890_v57 = vor.u32 %v7274_v43, %v5889_v37  ;;  %v6034_v37 = vor.u32 %v7310_v22, %v6033_v20  ;;  %v6209_v43 = vld [vmem:[%s11165_s8 + $0x2e8] sm:$0xf] }
 0x20f   :  { %v2291_v60 = vadd.f32 %v2283_v52, %v8906_v47  ;;  %v7383_v47 = vld [vmem:[%s11165_s8 + $0x3e4] sm:$0xf]  ;;  %v6286_v52 = vor.u32 %v7371_v49, %v6283_v50  ;;  %v7354_v49 = vld [vmem:[%s11165_s8 + $0x2f4] sm:$0xf0]  ;;  %v7284_v50 = vld [vmem:[%s11165_s8 + $0xcc] sm:$0xf] }
 0x210   :  { %v6334_v13 = vor.u32 %v7383_v47, %v6331_v11  ;;  %v2191_v47 = vadd.f32 %v2190_v33, %v2177_v61  ;;  %v7266_v11 = vld [vmem:[%s11165_s8 + $0x34] sm:$0xf0]  ;;  %v5955_v33 = vld [vmem:[%s11165_s8 + $0xf8] sm:$0xf0]  ;;  %v6001_v61 = vld [vmem:[%s11165_s8 + $0x148] sm:$0xf] }
 0x211   :  { %v9755_v7 = vpack.c.bf16 %v2291_v60, %v2287_v59  ;;  %v5873_v59 = vld [vmem:[%s11165_s8 + $0x48] sm:$0xf]  ;;  %v7270_v60 = vld [vmem:[%s11165_s8 + $0x54] sm:$0xf0]  ;;  %v5858_v16 = vor.u32 %v7266_v11, %v5857_v32  ;;  %v5958_v9 = vor.u32 %v7288_v31, %v5955_v33  ;;  %v7276_v11 = vld [vmem:[%s11165_s8 + $0x8c] sm:$0xf] }
 0x212   :  { %v2162_v39 = vpop.f32.mrf.mxu3  ;;  %3175 = vmatpush.bf16.msra.mxu3 %v6334_v13  ;;  %v5874_v8 = vor.u32 %v7270_v60, %v5873_v59  ;;  %v2205_v13 = vadd.f32 %v2204_v41, %v2191_v47  ;;  %v6017_v41 = vld [vmem:[%s11165_s8 + $0x168] sm:$0xf]  ;;  %v6210_v60 = vor.u32 %v7354_v49, %v6209_v43  ;;  %v7346_v32 = vld [vmem:[%s11165_s8 + $0x2b4] sm:$0xf0]  ;;  %v7268_v33 = vld [vmem:[%s11165_s8 + $0x4c] sm:$0xf] }
 0x213   :  { %3085 = vmatmul.bf16.vlgmr.msrb.gmra.mxu0 %v9755_v7  ;;  %v2163_v19 = vadd.f32 %v2162_v39, %v2149_v0  ;;  %v2179_v39 = vadd.f32 %v2178_v1, %v1409_v46  ;;  %v2206_v17 = vpop.f32.mrf.mxu2  ;;  %v7355_v46 = vld [vmem:[%s11165_s8 + $0x304] sm:$0xf]  ;;  %v7338_v31 = vld [vmem:[%s11165_s8 + $0x274] sm:$0xf0] }
 0x214   :  { %3189 = vmatpush.bf16.msrb.mxu0 %v5954_v63  ;;  %v6267_v63 = vld [vmem:[%s11165_s8 + $0x370] sm:$0xf0] }
 0x215   :  { %v2280_v35 = vmax.f32 %v2163_v19, 0.0  ;;  %v2193_v40 = vadd.f32 %v2192_v3, %v2179_v39  ;;  %v7262_v19 = vld [vmem:[%s11165_s8 + $0x14] sm:$0xf0]  ;;  %v5985_v3 = vld [vmem:[%s11165_s8 + $0x128] sm:$0xf]  ;;  %v2246_v39 = vpop.f32.mrf.mxu1 }
 0x216   :  { %3176 = vmatpush.bf16.msra.mxu3 %v6318_v18  ;;  %v6050_v18 = vor.u32 %v7314_v55, %v6049_v12  ;;  %v5907_v12 = vld [vmem:[%s11165_s8 + $0x98] sm:$0xf0] }
 0x217   :  { %v2288_v53 = vadd.f32 %v2280_v35, %v8979_v29  ;;  %v7318_v29 = vld [vmem:[%s11165_s8 + $0x1d4] sm:$0xf0] }
 0x218   :  { %3190 = vmatpush.bf16.msrb.mxu0 %v5938_v14  ;;  %v6066_v10 = vor.u32 %v7318_v29, %v6065_v38  ;;  %v7363_v14 = vld [vmem:[%s11165_s8 + $0x344] sm:$0xf]  ;;  %v7302_v29 = vld [vmem:[%s11165_s8 + $0x154] sm:$0xf0] }
 0x219   :  { %v6254_v0 = vor.u32 %v7363_v14, %v6251_v15  ;;  %v6002_v1 = vor.u32 %v7302_v29, %v6001_v61 }
 0x21a   :  { %v2164_v34 = vpop.f32.mrf.mxu3  ;;  %3177 = vmatpush.bf16.msra.mxu3 %v6302_v24 }
 0x21b   :  { %v2165_v36 = vadd.f32 %v2164_v34, %v2151_v23  ;;  %v7359_v23 = vld [vmem:[%s11165_s8 + $0x324] sm:$0xf] }
 0x21c   :  { %3191 = vmatpush.bf16.msrb.mxu0 %v5922_v21  ;;  %v2207_v21 = vadd.f32 %v2206_v17, %v2193_v40  ;;  %v6238_v34 = vor.u32 %v7359_v23, %v6235_v25  ;;  %v5910_v17 = vor.u32 %v7276_v11, %v5907_v12  ;;  %v7294_v40 = vld [vmem:[%s11165_s8 + $0x114] sm:$0xf0]  ;;  %v6145_v23 = vld [vmem:[%s11165_s8 + $0x268] sm:$0xf] }
 0x21d   :  { %v2284_v48 = vmax.f32 %v2165_v36, 0.0  ;;  %v5842_v36 = vor.u32 %v7262_v19, %v5841_v54  ;;  %v7320_v54 = vld [vmem:[%s11165_s8 + $0x1ec] sm:$0xf]  ;;  %v6083_v19 = vld [vmem:[%s11165_s8 + $0x1f8] sm:$0xf0]  ;;  %v6146_v43 = vor.u32 %v7338_v31, %v6145_v23 }
 0x21e   :  { %3178 = vmatpush.bf16.msra.mxu3 %v6286_v52  ;;  %v5939_v52 = vld [vmem:[%s11165_s8 + $0xd8] sm:$0xf0]  ;;  %v6097_v12 = vld [vmem:[%s11165_s8 + $0x208] sm:$0xf]  ;;  %v7382_v23 = vld [vmem:[%s11165_s8 + $0x3d4] sm:$0xf0] }
 0x21f   :  { %v2292_v56 = vadd.f32 %v2284_v48, %v8981_v30  ;;  %v7367_v30 = vld [vmem:[%s11165_s8 + $0x364] sm:$0xf]  ;;  %v6219_v48 = vld [vmem:[%s11165_s8 + $0x310] sm:$0xf0]  ;;  %v5942_v38 = vor.u32 %v7284_v50, %v5939_v52  ;;  %v7334_v50 = vld [vmem:[%s11165_s8 + $0x254] sm:$0xf0] }
 0x220   :  { %3192 = vmatpush.bf16.msrb.mxu0 %v5906_v42  ;;  %v6270_v45 = vor.u32 %v7367_v30, %v6267_v63  ;;  %v7306_v42 = vld [vmem:[%s11165_s8 + $0x174] sm:$0xf0]  ;;  %v7280_v30 = vld [vmem:[%s11165_s8 + $0xac] sm:$0xf]  ;;  %v5923_v63 = vld [vmem:[%s11165_s8 + $0xb8] sm:$0xf0] }
 0x221   :  { %v9821_v62 = vpack.c.bf16 %v2292_v56, %v2288_v53  ;;  %v6222_v53 = vor.u32 %v7355_v46, %v6219_v48  ;;  %v5926_v47 = vor.u32 %v7280_v30, %v5923_v63  ;;  %v7264_v52 = vld [vmem:[%s11165_s8 + $0x2c] sm:$0xf]  ;;  %v7330_v63 = vld [vmem:[%s11165_s8 + $0x234] sm:$0xf0] }
 0x222   :  { %v2218_v2 = vpop.f32.mrf.mxu3  ;;  %3179 = vmatpush.bf16.msra.mxu3 %v6270_v45 }
 0x223   :  { %3099 = vmatmul.bf16.vlgmr.msrb.gmra.mxu1 %v9821_v62  ;;  %3141 = vmatmul.bf16.vlgmr.msra.gmra.mxu0 %v9755_v7  ;;  %v2219_v6 = vadd.f32 %v2218_v2, %v2205_v13  ;;  %v2232_v2 = vpop.f32.mrf.mxu0  ;;  %v1410_v13 = vperm.slane %v9653_v51, 3  ;;  %v7342_v51 = vld [vmem:[%s11165_s8 + $0x294] sm:$0xf0] }
 0x224   :  { %3193 = vmatpush.bf16.msrb.mxu0 %v5890_v57  ;;  %3203 = vmatpush.bf16.msrb.mxu1 %v6082_v58  ;;  %v6018_v58 = vor.u32 %v7306_v42, %v6017_v41  ;;  %v2260_v14 = vpop.f32.mrf.mxu2  ;;  %v2248_v42 = vpop.f32.mrf.mxu1 }
 0x225   :  { %v2281_v24 = vmax.f32 %v2219_v6, 0.0  ;;  %v6161_v6 = vld [vmem:[%s11165_s8 + $0x288] sm:$0xf]  ;;  %v2233_v25 = vadd.f32 %v2232_v2, %v1410_v13  ;;  %v5843_v2 = vld [vmem:[%s11165_s8 + $0x18] sm:$0xf0] }
 0x226   :  { %3180 = vmatpush.bf16.msra.mxu3 %v6254_v0  ;;  %v5969_v0 = vld [vmem:[%s11165_s8 + $0x108] sm:$0xf] }
 0x227   :  { %v2289_v56 = vadd.f32 %v2281_v24, %v9074_v27  ;;  %v6193_v27 = vld [vmem:[%s11165_s8 + $0x2c8] sm:$0xf]  ;;  %v5970_v20 = vor.u32 %v7294_v40, %v5969_v0  ;;  %v2247_v41 = vadd.f32 %v2246_v39, %v2233_v25  ;;  %v7326_v39 = vld [vmem:[%s11165_s8 + $0x214] sm:$0xf0]  ;;  %v6019_v0 = vld [vmem:[%s11165_s8 + $0x178] sm:$0xf0] }
 0x228   :  { %3194 = vmatpush.bf16.msrb.mxu0 %v5874_v8  ;;  %3204 = vmatpush.bf16.msrb.mxu1 %v6066_v10  ;;  %v7298_v8 = vld [vmem:[%s11165_s8 + $0x134] sm:$0xf0]  ;;  %v6177_v10 = vld [vmem:[%s11165_s8 + $0x2a8] sm:$0xf]  ;;  %v7352_v40 = vld [vmem:[%s11165_s8 + $0x2ec] sm:$0xf] }
 0x229   :  { %v5986_v55 = vor.u32 %v7298_v8, %v5985_v3  ;;  %v6178_v15 = vor.u32 %v7346_v32, %v6177_v10  ;;  %v2261_v48 = vadd.f32 %v2260_v14, %v2247_v41  ;;  %v6035_v3 = vld [vmem:[%s11165_s8 + $0x198] sm:$0xf0]  ;;  %v7348_v25 = vld [vmem:[%s11165_s8 + $0x2cc] sm:$0xf] }
 0x22a   :  { %v2220_v26 = vpop.f32.mrf.mxu3  ;;  %3181 = vmatpush.bf16.msra.mxu3 %v6238_v34  ;;  %v5875_v34 = vld [vmem:[%s11165_s8 + $0x58] sm:$0xf0] }
 0x22b   :  { %v2221_v35 = vadd.f32 %v2220_v26, %v2207_v21  ;;  %v6162_v21 = vor.u32 %v7342_v51, %v6161_v6  ;;  %v6086_v26 = vor.u32 %v7320_v54, %v6083_v19  ;;  %v2234_v24 = vpop.f32.mrf.mxu0  ;;  %v6211_v6 = vld [vmem:[%s11165_s8 + $0x2f8] sm:$0xf0] }
 0x22c   :  { %3195 = vmatpush.bf16.msrb.mxu0 %v5858_v16  ;;  %3205 = vmatpush.bf16.msrb.mxu1 %v6050_v18  ;;  %v7272_v16 = vld [vmem:[%s11165_s8 + $0x6c] sm:$0xf]  ;;  %v5891_v18 = vld [vmem:[%s11165_s8 + $0x78] sm:$0xf0]  ;;  %v2235_v46 = vadd.f32 %v2234_v24, %v1410_v13  ;;  %v6337_v13 = vld [vmem:[%s11165_s8 + $0x3e8] sm:$0xf] }
 0x22d   :  { %v2285_v44 = vmax.f32 %v2221_v35, 0.0  ;;  %v5894_v22 = vor.u32 %v7272_v16, %v5891_v18  ;;  %v6098_v18 = vor.u32 %v7326_v39, %v6097_v12  ;;  %v6305_v24 = vld [vmem:[%s11165_s8 + $0x3a8] sm:$0xf]  ;;  %v6179_v41 = vld [vmem:[%s11165_s8 + $0x2b8] sm:$0xf0] }
 0x22e   :  { %3182 = vmatpush.bf16.msra.mxu3 %v6222_v53  ;;  %v5859_v53 = vld [vmem:[%s11165_s8 + $0x38] sm:$0xf0]  ;;  %v7358_v12 = vld [vmem:[%s11165_s8 + $0x314] sm:$0xf0]  ;;  %v7324_v39 = vld [vmem:[%s11165_s8 + $0x20c] sm:$0xf] }
 0x22f   :  { %v2293_v57 = vadd.f32 %v2285_v44, %v9076_v28  ;;  %v7350_v28 = vld [vmem:[%s11165_s8 + $0x2d4] sm:$0xf0]  ;;  %v5878_v44 = vor.u32 %v7268_v33, %v5875_v34  ;;  %v5862_v29 = vor.u32 %v7264_v52, %v5859_v53  ;;  %v6163_v52 = vld [vmem:[%s11165_s8 + $0x298] sm:$0xf0] }
 0x230   :  { %3196 = vmatpush.bf16.msrb.mxu0 %v5842_v36  ;;  %3206 = vmatpush.bf16.msrb.mxu1 %v6034_v37  ;;  %v6194_v45 = vor.u32 %v7350_v28, %v6193_v27  ;;  %v7316_v36 = vld [vmem:[%s11165_s8 + $0x1cc] sm:$0xf]  ;;  %v6067_v37 = vld [vmem:[%s11165_s8 + $0x1d8] sm:$0xf0]  ;;  %v6113_v27 = vld [vmem:[%s11165_s8 + $0x228] sm:$0xf] }
 0x231   :  { %v9902_v59 = vpack.c.bf16 %v2293_v57, %v2289_v56  ;;  %v6070_v49 = vor.u32 %v7316_v36, %v6067_v37  ;;  %v2262_v56 = vpop.f32.mrf.mxu2  ;;  %v7312_v57 = vld [vmem:[%s11165_s8 + $0x1ac] sm:$0xf]  ;;  %v6114_v32 = vor.u32 %v7330_v63, %v6113_v27 }
 0x232   :  { %v7296_v36 = vld [vmem:[%s11165_s8 + $0x12c] sm:$0xf] }
 0x233   :  { %3113 = vmatmul.bf16.vlgmr.msrb.gmra.mxu2 %v9902_v59  ;;  %3155 = vmatmul.bf16.vlgmr.msra.gmra.mxu1 %v9821_v62  ;;  %v7344_v37 = vld [vmem:[%s11165_s8 + $0x2ac] sm:$0xf] }
 0x234   :  { %3245 = vmatpush.bf16.msra.mxu0 %v5958_v9  ;;  %3207 = vmatpush.bf16.msrb.mxu1 %v6018_v58  ;;  %v6129_v9 = vld [vmem:[%s11165_s8 + $0x248] sm:$0xf]  ;;  %v6051_v58 = vld [vmem:[%s11165_s8 + $0x1b8] sm:$0xf0]  ;;  %v7332_v63 = vld [vmem:[%s11165_s8 + $0x24c] sm:$0xf] }
 0x235   :  { %3197 = vmatmul.bf16.vlgmr.msrb.gmra.mxu0 %v9755_v7  ;;  %3217 = vmatpush.bf16.msrb.mxu2 %v6210_v60  ;;  %v2249_v60 = vadd.f32 %v2248_v42, %v2235_v46  ;;  %v6130_v61 = vor.u32 %v7334_v50, %v6129_v9  ;;  %v6054_v30 = vor.u32 %v7312_v57, %v6051_v58  ;;  %v6289_v9 = vld [vmem:[%s11165_s8 + $0x388] sm:$0xf]  ;;  %v7374_v46 = vld [vmem:[%s11165_s8 + $0x394] sm:$0xf0]  ;;  %v7340_v50 = vld [vmem:[%s11165_s8 + $0x28c] sm:$0xf] }
 0x236   :  { %v6290_v53 = vor.u32 %v7374_v46, %v6289_v9  ;;  %v6166_v57 = vor.u32 %v7340_v50, %v6163_v52  ;;  %v6273_v58 = vld [vmem:[%s11165_s8 + $0x368] sm:$0xf]  ;;  %v7409_v46 = vld [vmem:[%s11167_s10 + $0xac] sm:$0xf0] }
 0x237   :  { %v2263_v28 = vadd.f32 %v2262_v56, %v2249_v60  ;;  %v7370_v60 = vld [vmem:[%s11165_s8 + $0x374] sm:$0xf0]  ;;  %v7405_v50 = vld [vmem:[%s11167_s10 + $0x8c] sm:$0xf0] }
 0x238   :  { %3246 = vmatpush.bf16.msra.mxu0 %v5942_v38  ;;  %3208 = vmatpush.bf16.msrb.mxu1 %v6002_v1  ;;  %v7260_v1 = vld [vmem:[%s11165_s8 + $0xc] sm:$0xf] }
 0x239   :  { %3218 = vmatpush.bf16.msrb.mxu2 %v6194_v45  ;;  %v5846_v11 = vor.u32 %v7260_v1, %v5843_v2  ;;  %v6131_v1 = vld [vmem:[%s11165_s8 + $0x258] sm:$0xf0] }
 0x23c   :  { %3247 = vmatpush.bf16.msra.mxu0 %v5926_v47  ;;  %3209 = vmatpush.bf16.msrb.mxu1 %v5986_v55  ;;  %v7308_v47 = vld [vmem:[%s11165_s8 + $0x18c] sm:$0xf] }
 0x23d   :  { %3219 = vmatpush.bf16.msrb.mxu2 %v6178_v15  ;;  %v6038_v14 = vor.u32 %v7308_v47, %v6035_v3  ;;  %v7386_v15 = vld [vmem:[%s11165_s8 + $0x3f4] sm:$0xf0]  ;;  %v6241_v47 = vld [vmem:[%s11165_s8 + $0x328] sm:$0xf] }
 0x23e   :  { %v6338_v54 = vor.u32 %v7386_v15, %v6337_v13  ;;  %v7362_v3 = vld [vmem:[%s11165_s8 + $0x334] sm:$0xf0]  ;;  %v6099_v13 = vld [vmem:[%s11165_s8 + $0x218] sm:$0xf0] }
 0x240   :  { %3248 = vmatpush.bf16.msra.mxu0 %v5910_v17  ;;  %3210 = vmatpush.bf16.msrb.mxu1 %v5970_v20  ;;  %v7304_v17 = vld [vmem:[%s11165_s8 + $0x16c] sm:$0xf] }
 0x241   :  { %3220 = vmatpush.bf16.msrb.mxu2 %v6162_v21  ;;  %v6022_v20 = vor.u32 %v7304_v17, %v6019_v0  ;;  %v6214_v21 = vor.u32 %v7352_v40, %v6211_v6  ;;  %v6102_v17 = vor.u32 %v7324_v39, %v6099_v13  ;;  %v7380_v40 = vld [vmem:[%s11165_s8 + $0x3cc] sm:$0xf]  ;;  %v6323_v6 = vld [vmem:[%s11165_s8 + $0x3d8] sm:$0xf0]  ;;  %v6459_v39 = vld [vmem:[%s11167_s10 + $0xf0] sm:$0xf0] }
 0x242   :  { %v2274_v35 = vpop.f32.mrf.mxu3 }
 0x243   :  { %3169 = vmatmul.bf16.vlgmr.msra.gmra.mxu2 %v9902_v59  ;;  %3211 = vmatmul.bf16.vlgmr.msrb.gmra.mxu1 %v9821_v62  ;;  %v2275_v38 = vadd.f32 %v2274_v35, %v2261_v48  ;;  %v7378_v35 = vld [vmem:[%s11165_s8 + $0x3b4] sm:$0xf0]  ;;  %v7292_v48 = vld [vmem:[%s11165_s8 + $0x10c] sm:$0xf] }
 0x244   :  { %3249 = vmatpush.bf16.msra.mxu0 %v5894_v22  ;;  %3259 = vmatpush.bf16.msra.mxu1 %v6086_v26  ;;  %v6321_v22 = vld [vmem:[%s11165_s8 + $0x3c8] sm:$0xf]  ;;  %v6195_v26 = vld [vmem:[%s11165_s8 + $0x2d8] sm:$0xf0]  ;;  %v6306_v42 = vor.u32 %v7378_v35, %v6305_v24  ;;  %v7417_v24 = vld [vmem:[%s11167_s10 + $0xec] sm:$0xf0] }
 0x245   :  { %3221 = vmatpush.bf16.msrb.mxu2 %v6146_v43  ;;  %v2282_v8 = vmax.f32 %v2275_v38, 0.0  ;;  %v6322_v31 = vor.u32 %v7382_v23, %v6321_v22  ;;  %v6198_v34 = vor.u32 %v7348_v25, %v6195_v26  ;;  %v7336_v38 = vld [vmem:[%s11165_s8 + $0x26c] sm:$0xf]  ;;  %v6259_v25 = vld [vmem:[%s11165_s8 + $0x358] sm:$0xf0] }
 0x246   :  { %v7368_v23 = vld [vmem:[%s11165_s8 + $0x36c] sm:$0xf] }
 0x247   :  { %v2290_v51 = vadd.f32 %v2282_v8, %v9226_v4  ;;  %v7300_v4 = vld [vmem:[%s11165_s8 + $0x14c] sm:$0xf] }
 0x248   :  { %3250 = vmatpush.bf16.msra.mxu0 %v5878_v44  ;;  %3260 = vmatpush.bf16.msra.mxu1 %v6070_v49  ;;  %v6182_v44 = vor.u32 %v7344_v37, %v6179_v41  ;;  %v5971_v49 = vld [vmem:[%s11165_s8 + $0x118] sm:$0xf0]  ;;  %v7328_v8 = vld [vmem:[%s11165_s8 + $0x22c] sm:$0xf] }
 0x249   :  { %3222 = vmatpush.bf16.msrb.mxu2 %v6130_v61  ;;  %v5974_v56 = vor.u32 %v7292_v48, %v5971_v49  ;;  %v6147_v61 = vld [vmem:[%s11165_s8 + $0x278] sm:$0xf0]  ;;  %v6409_v49 = vld [vmem:[%s11167_s10 + $0x80] sm:$0xf] }
 0x24a   :  { %v2276_v45 = vpop.f32.mrf.mxu3  ;;  %v6150_v27 = vor.u32 %v7336_v38, %v6147_v61  ;;  %v6227_v37 = vld [vmem:[%s11165_s8 + $0x318] sm:$0xf0]  ;;  %v6410_v52 = vor.u32 %v7405_v50, %v6409_v49  ;;  %v6377_v38 = vld [vmem:[%s11167_s10 + $0x40] sm:$0xf]  ;;  %v7397_v61 = vld [vmem:[%s11167_s10 + $0x4c] sm:$0xf0] }
 0x24b   :  { %v2277_v10 = vadd.f32 %v2276_v45, %v2263_v28  ;;  %v6257_v28 = vld [vmem:[%s11165_s8 + $0x348] sm:$0xf]  ;;  %v6134_v45 = vor.u32 %v7332_v63, %v6131_v1  ;;  %v6361_v63 = vld [vmem:[%s11167_s10 + $0x20] sm:$0xf]  ;;  %v7393_v1 = vld [vmem:[%s11167_s10 + $0x2c] sm:$0xf0] }
 0x24c   :  { %3251 = vmatpush.bf16.msra.mxu0 %v5862_v29  ;;  %3261 = vmatpush.bf16.msra.mxu1 %v6054_v30  ;;  %v6274_v29 = vor.u32 %v7370_v60, %v6273_v58  ;;  %v7366_v30 = vld [vmem:[%s11165_s8 + $0x354] sm:$0xf0]  ;;  %v7449_v58 = vld [vmem:[%s11167_s10 + $0x1ec] sm:$0xf0] }
 0x24d   :  { %v2286_v55 = vmax.f32 %v2277_v10, 0.0  ;;  %3223 = vmatpush.bf16.msrb.mxu2 %v6114_v32  ;;  %v6258_v2 = vor.u32 %v7366_v30, %v6257_v28  ;;  %v6115_v10 = vld [vmem:[%s11165_s8 + $0x238] sm:$0xf0]  ;;  %v7445_v28 = vld [vmem:[%s11167_s10 + $0x1cc] sm:$0xf0] }
 0x24e   :  { %v6118_v32 = vor.u32 %v7328_v8, %v6115_v10  ;;  %v6345_v8 = vld [vmem:[%s11167_s10] sm:$0xf]  ;;  %v7389_v10 = vld [vmem:[%s11167_s10 + $0xc] sm:$0xf0] }
 0x24f   :  { %v2294_v16 = vadd.f32 %v2286_v55, %v9228_v5  ;;  %v6003_v5 = vld [vmem:[%s11165_s8 + $0x158] sm:$0xf0]  ;;  %v7384_v55 = vld [vmem:[%s11165_s8 + $0x3ec] sm:$0xf] }
 0x250   :  { %3252 = vmatpush.bf16.msra.mxu0 %v5846_v11  ;;  %3262 = vmatpush.bf16.msra.mxu1 %v6038_v14  ;;  %v6006_v33 = vor.u32 %v7300_v4, %v6003_v5  ;;  %v6225_v11 = vld [vmem:[%s11165_s8 + $0x308] sm:$0xf]  ;;  %v6339_v14 = vld [vmem:[%s11165_s8 + $0x3f8] sm:$0xf0]  ;;  %v7364_v5 = vld [vmem:[%s11165_s8 + $0x34c] sm:$0xf] }
 0x251   :  { %v10050_v19 = vpack.c.bf16 %v2294_v16, %v2290_v51  ;;  %3224 = vmatpush.bf16.msrb.mxu2 %v6098_v18  ;;  %v6226_v15 = vor.u32 %v7358_v12, %v6225_v11  ;;  %v6342_v0 = vor.u32 %v7384_v55, %v6339_v14  ;;  %v6326_v51 = vor.u32 %v7380_v40, %v6323_v6  ;;  %v7376_v16 = vld [vmem:[%s11165_s8 + $0x3ac] sm:$0xf]  ;;  %v6307_v18 = vld [vmem:[%s11165_s8 + $0x3b8] sm:$0xf0]  ;;  %v7437_v11 = vld [vmem:[%s11167_s10 + $0x18c] sm:$0xf0] }
 0x252   :  { %v6262_v26 = vor.u32 %v7364_v5, %v6259_v25  ;;  %v7415_v12 = vld [vmem:[%s11167_s10 + $0xe4] sm:$0xf]  ;;  %v6521_v14 = vld [vmem:[%s11167_s10 + $0x160] sm:$0xf]  ;;  %v7481_v40 = vld [vmem:[%s11167_s10 + $0x2ec] sm:$0xf0] }
 0x253   :  { %3127 = vmatmul.bf16.vlgmr.msrb.gmra.mxu3 %v10050_v19  ;;  %3253 = vmatmul.bf16.vlgmr.msra.gmra.mxu0 %v9755_v7  ;;  %v5987_v7 = vld [vmem:[%s11165_s8 + $0x138] sm:$0xf0]  ;;  %v6462_v55 = vor.u32 %v7415_v12, %v6459_v39  ;;  %v7411_v6 = vld [vmem:[%s11167_s10 + $0xc4] sm:$0xf]  ;;  %v6427_v5 = vld [vmem:[%s11167_s10 + $0xb0] sm:$0xf0] }
 0x254   :  { %3231 = vmatpush.bf16.msrb.mxu3 %v6338_v54  ;;  %3263 = vmatpush.bf16.msra.mxu1 %v6022_v20  ;;  %v5990_v43 = vor.u32 %v7296_v36, %v5987_v7  ;;  %v6310_v54 = vor.u32 %v7376_v16, %v6307_v18  ;;  %v7372_v20 = vld [vmem:[%s11165_s8 + $0x38c] sm:$0xf]  ;;  %v7387_v12 = vld [vmem:[%s11167_s10 + $0x4] sm:$0xf]  ;;  %v6347_v39 = vld [vmem:[%s11167_s10 + $0x10] sm:$0xf0] }
 0x255   :  { %3273 = vmatpush.bf16.msra.mxu2 %v6214_v21  ;;  %v6291_v21 = vld [vmem:[%s11165_s8 + $0x398] sm:$0xf0]  ;;  %v7356_v7 = vld [vmem:[%s11165_s8 + $0x30c] sm:$0xf] }
 0x256   :  { %3225 = vmatmul.bf16.vlgmr.msrb.gmra.mxu2 %v9902_v59  ;;  %v6294_v22 = vor.u32 %v7372_v20, %v6291_v21  ;;  %v6230_v41 = vor.u32 %v7356_v7, %v6227_v37  ;;  %v7429_v20 = vld [vmem:[%s11167_s10 + $0x14c] sm:$0xf0]  ;;  %v6697_v21 = vld [vmem:[%s11167_s10 + $0x2c0] sm:$0xf] }
 0x258   :  { %3232 = vmatpush.bf16.msrb.mxu3 %v6322_v31  ;;  %3264 = vmatpush.bf16.msra.mxu1 %v6006_v33  ;;  %v7360_v31 = vld [vmem:[%s11165_s8 + $0x32c] sm:$0xf]  ;;  %v6243_v33 = vld [vmem:[%s11165_s8 + $0x338] sm:$0xf0] }
 0x259   :  { %3274 = vmatpush.bf16.msra.mxu2 %v6198_v34  ;;  %v6457_v34 = vld [vmem:[%s11167_s10 + $0xe0] sm:$0xf]  ;;  %v6246_v35 = vor.u32 %v7360_v31, %v6243_v33  ;;  %v7425_v31 = vld [vmem:[%s11167_s10 + $0x12c] sm:$0xf0] }
 0x25a   :  { %v6458_v36 = vor.u32 %v7417_v24, %v6457_v34  ;;  %v6681_v33 = vld [vmem:[%s11167_s10 + $0x2a0] sm:$0xf]  ;;  %v7473_v24 = vld [vmem:[%s11167_s10 + $0x2ac] sm:$0xf0] }
 0x25b   :  { %v6682_v7 = vor.u32 %v7473_v24, %v6681_v33  ;;  %v7427_v33 = vld [vmem:[%s11167_s10 + $0x144] sm:$0xf] }
 0x25c   :  { %3233 = vmatpush.bf16.msrb.mxu3 %v6306_v42  ;;  %3265 = vmatpush.bf16.msra.mxu1 %v5990_v43  ;;  %v6441_v42 = vld [vmem:[%s11167_s10 + $0xc0] sm:$0xf]  ;;  %v7413_v43 = vld [vmem:[%s11167_s10 + $0xcc] sm:$0xf0]  ;;  %v7475_v24 = vld [vmem:[%s11167_s10 + $0x2c4] sm:$0xf] }
 0x25d   :  { %3275 = vmatpush.bf16.msra.mxu2 %v6182_v44  ;;  %4091 = vmatpush.bf16.msrb.mxu0 %v6458_v36  ;;  %v6425_v44 = vld [vmem:[%s11167_s10 + $0xa0] sm:$0xf]  ;;  %v6442_v9 = vor.u32 %v7413_v43, %v6441_v42  ;;  %v6411_v36 = vld [vmem:[%s11167_s10 + $0x90] sm:$0xf0]  ;;  %v7421_v42 = vld [vmem:[%s11167_s10 + $0x10c] sm:$0xf0] }
 0x25e   :  { %v6426_v48 = vor.u32 %v7409_v46, %v6425_v44  ;;  %v6665_v43 = vld [vmem:[%s11167_s10 + $0x280] sm:$0xf]  ;;  %v7399_v46 = vld [vmem:[%s11167_s10 + $0x64] sm:$0xf] }
 0x260   :  { %3234 = vmatpush.bf16.msrb.mxu3 %v6290_v53  ;;  %3266 = vmatpush.bf16.msra.mxu1 %v5974_v56  ;;  %v6393_v53 = vld [vmem:[%s11167_s10 + $0x60] sm:$0xf]  ;;  %v7401_v56 = vld [vmem:[%s11167_s10 + $0x6c] sm:$0xf0] }
 0x261   :  { %3276 = vmatpush.bf16.msra.mxu2 %v6166_v57  ;;  %4092 = vmatpush.bf16.msrb.mxu0 %v6442_v9  ;;  %v6394_v57 = vor.u32 %v7401_v56, %v6393_v53  ;;  %v7469_v9 = vld [vmem:[%s11167_s10 + $0x28c] sm:$0xf0]  ;;  %v6587_v53 = vld [vmem:[%s11167_s10 + $0x1f0] sm:$0xf0] }
 0x262   :  { %v6666_v49 = vor.u32 %v7469_v9, %v6665_v43  ;;  %v6491_v9 = vld [vmem:[%s11167_s10 + $0x130] sm:$0xf0] }
 0x263   :  { %3183 = vmatmul.bf16.vlgmr.msra.gmra.mxu3 %v10050_v19  ;;  %3267 = vmatmul.bf16.vlgmr.msra.gmra.mxu1 %v9821_v62  ;;  %v6242_v62 = vor.u32 %v7362_v3, %v6241_v47  ;;  %v7441_v47 = vld [vmem:[%s11167_s10 + $0x1ac] sm:$0xf0] }
 0x264   :  { %3235 = vmatpush.bf16.msrb.mxu3 %v6274_v29  ;;  %v6569_v29 = vld [vmem:[%s11167_s10 + $0x1c0] sm:$0xf] }
 0x265   :  { %3277 = vmatpush.bf16.msra.mxu2 %v6150_v27  ;;  %4093 = vmatpush.bf16.msrb.mxu0 %v6426_v48  ;;  %v6378_v27 = vor.u32 %v7397_v61, %v6377_v38  ;;  %v6570_v30 = vor.u32 %v7445_v28, %v6569_v29  ;;  %v6395_v48 = vld [vmem:[%s11167_s10 + $0x70] sm:$0xf0]  ;;  %v7443_v61 = vld [vmem:[%s11167_s10 + $0x1c4] sm:$0xf] }
 0x266   :  { %v6398_v50 = vor.u32 %v7399_v46, %v6395_v48  ;;  %v6379_v38 = vld [vmem:[%s11167_s10 + $0x50] sm:$0xf0]  ;;  %v7471_v46 = vld [vmem:[%s11167_s10 + $0x2a4] sm:$0xf] }
 0x268   :  { %3236 = vmatpush.bf16.msrb.mxu3 %v6258_v2  ;;  %v6553_v2 = vld [vmem:[%s11167_s10 + $0x1a0] sm:$0xf] }
 0x269   :  { %3278 = vmatpush.bf16.msra.mxu2 %v6134_v45  ;;  %4094 = vmatpush.bf16.msrb.mxu0 %v6410_v52  ;;  %v6362_v45 = vor.u32 %v7393_v1, %v6361_v63  ;;  %v6554_v3 = vor.u32 %v7441_v47, %v6553_v2  ;;  %v7447_v52 = vld [vmem:[%s11167_s10 + $0x1e4] sm:$0xf]  ;;  %v7461_v63 = vld [vmem:[%s11167_s10 + $0x24c] sm:$0xf0] }
 0x26a   :  { %v6590_v56 = vor.u32 %v7447_v52, %v6587_v53  ;;  %v7391_v2 = vld [vmem:[%s11167_s10 + $0x24] sm:$0xf] }
 0x26b   :  { %v7439_v47 = vld [vmem:[%s11167_s10 + $0x1a4] sm:$0xf] }
 0x26c   :  { %3237 = vmatpush.bf16.msrb.mxu3 %v6242_v62  ;;  %v6537_v62 = vld [vmem:[%s11167_s10 + $0x180] sm:$0xf] }
 0x26d   :  { %3279 = vmatpush.bf16.msra.mxu2 %v6118_v32  ;;  %4095 = vmatpush.bf16.msrb.mxu0 %v6394_v57  ;;  %v6346_v32 = vor.u32 %v7389_v10, %v6345_v8  ;;  %v6538_v13 = vor.u32 %v7437_v11, %v6537_v62  ;;  %v7465_v57 = vld [vmem:[%s11167_s10 + $0x26c] sm:$0xf0]  ;;  %v6555_v8 = vld [vmem:[%s11167_s10 + $0x1b0] sm:$0xf0]  ;;  %v6617_v62 = vld [vmem:[%s11167_s10 + $0x220] sm:$0xf] }
 0x26e   :  { %v6558_v10 = vor.u32 %v7439_v47, %v6555_v8  ;;  %v7463_v47 = vld [vmem:[%s11167_s10 + $0x264] sm:$0xf] }
 0x270   :  { %3238 = vmatpush.bf16.msrb.mxu3 %v6226_v15  ;;  %v7433_v15 = vld [vmem:[%s11167_s10 + $0x16c] sm:$0xf0] }
 0x271   :  { %3280 = vmatpush.bf16.msra.mxu2 %v6102_v17  ;;  %4096 = vmatpush.bf16.msrb.mxu0 %v6378_v27  ;;  %v6713_v17 = vld [vmem:[%s11167_s10 + $0x2e0] sm:$0xf]  ;;  %v6571_v27 = vld [vmem:[%s11167_s10 + $0x1d0] sm:$0xf0] }
 0x272   :  { %v6714_v16 = vor.u32 %v7481_v40, %v6713_v17  ;;  %v6574_v28 = vor.u32 %v7443_v61, %v6571_v27  ;;  %v7453_v40 = vld [vmem:[%s11167_s10 + $0x20c] sm:$0xf0]  ;;  %v7467_v61 = vld [vmem:[%s11167_s10 + $0x284] sm:$0xf] }
 0x273   :  { %3239 = vmatmul.bf16.vlgmr.msrb.gmra.mxu3 %v10050_v19 }
 0x274   :  { %3287 = vmatpush.bf16.msra.mxu3 %v6342_v0  ;;  %3281 = vmatmul.bf16.vlgmr.msra.gmra.mxu2 %v9902_v59  ;;  %v6275_v59 = vld [vmem:[%s11165_s8 + $0x378] sm:$0xf0]  ;;  %v6522_v0 = vor.u32 %v7433_v15, %v6521_v14  ;;  %v6539_v14 = vld [vmem:[%s11167_s10 + $0x190] sm:$0xf0] }
 0x275   :  { %v6278_v4 = vor.u32 %v7368_v23, %v6275_v59  ;;  %4097 = vmatpush.bf16.msrb.mxu0 %v6362_v45  ;;  %4119 = vmatpush.bf16.msrb.mxu2 %v6714_v16  ;;  %v7477_v23 = vld [vmem:[%s11167_s10 + $0x2cc] sm:$0xf0]  ;;  %v6363_v45 = vld [vmem:[%s11167_s10 + $0x30] sm:$0xf0] }
 0x276   :  { %v6698_v59 = vor.u32 %v7477_v23, %v6697_v21  ;;  %v7479_v23 = vld [vmem:[%s11167_s10 + $0x2e4] sm:$0xf] }
 0x278   :  { %3288 = vmatpush.bf16.msra.mxu3 %v6326_v51  ;;  %v6443_v51 = vld [vmem:[%s11167_s10 + $0xd0] sm:$0xf0] }
 0x279   :  { %4098 = vmatpush.bf16.msrb.mxu0 %v6346_v32  ;;  %v6446_v18 = vor.u32 %v7411_v6, %v6443_v51  ;;  %4120 = vmatpush.bf16.msrb.mxu2 %v6698_v59  ;;  %v7457_v32 = vld [vmem:[%s11167_s10 + $0x22c] sm:$0xf0]  ;;  %v6841_v6 = vld [vmem:[%s11167_s10 + $0x3e0] sm:$0xf]  ;;  %v6715_v59 = vld [vmem:[%s11167_s10 + $0x2f0] sm:$0xf0] }
 0x27a   :  { %v6618_v11 = vor.u32 %v7457_v32, %v6617_v62 }
 0x27c   :  { %3289 = vmatpush.bf16.msra.mxu3 %v6310_v54  ;;  %v6505_v54 = vld [vmem:[%s11167_s10 + $0x140] sm:$0xf] }
 0x27d   :  { %4147 = vmatpush.bf16.msra.mxu0 %v6462_v55  ;;  %4121 = vmatpush.bf16.msrb.mxu2 %v6682_v7  ;;  %v6350_v55 = vor.u32 %v7387_v12, %v6347_v39  ;;  %v6761_v12 = vld [vmem:[%s11167_s10 + $0x340] sm:$0xf]  ;;  %v7493_v39 = vld [vmem:[%s11167_s10 + $0x34c] sm:$0xf0] }
 0x280   :  { %3290 = vmatpush.bf16.msra.mxu3 %v6294_v22  ;;  %v6506_v22 = vor.u32 %v7429_v20, %v6505_v54  ;;  %v7431_v54 = vld [vmem:[%s11167_s10 + $0x164] sm:$0xf]  ;;  %v6523_v20 = vld [vmem:[%s11167_s10 + $0x170] sm:$0xf0] }
 0x281   :  { %4148 = vmatpush.bf16.msra.mxu0 %v6446_v18  ;;  %4122 = vmatpush.bf16.msrb.mxu2 %v6666_v49  ;;  %v7513_v18 = vld [vmem:[%s11167_s10 + $0x3ec] sm:$0xf0]  ;;  %v6683_v49 = vld [vmem:[%s11167_s10 + $0x2b0] sm:$0xf0] }
 0x282   :  { %v6842_v21 = vor.u32 %v7513_v18, %v6841_v6  ;;  %v6686_v53 = vor.u32 %v7471_v46, %v6683_v49  ;;  %v6745_v18 = vld [vmem:[%s11167_s10 + $0x320] sm:$0xf] }
 0x284   :  { %3291 = vmatpush.bf16.msra.mxu3 %v6278_v4  ;;  %v7407_v4 = vld [vmem:[%s11167_s10 + $0xa4] sm:$0xf] }
 0x285   :  { %v6430_v25 = vor.u32 %v7407_v4, %v6427_v5  ;;  %v6718_v5 = vor.u32 %v7479_v23, %v6715_v59  ;;  %v6619_v23 = vld [vmem:[%s11167_s10 + $0x230] sm:$0xf0] }
 0x287   :  { %4149 = vmatpush.bf16.msra.mxu0 %v6430_v25  ;;  %v6825_v25 = vld [vmem:[%s11167_s10 + $0x3c0] sm:$0xf] }
 0x288   :  { %3292 = vmatpush.bf16.msra.mxu3 %v6262_v26  ;;  %v6489_v26 = vld [vmem:[%s11167_s10 + $0x120] sm:$0xf] }
 0x289   :  { %v6490_v34 = vor.u32 %v7425_v31, %v6489_v26  ;;  %v7509_v26 = vld [vmem:[%s11167_s10 + $0x3cc] sm:$0xf0] }
 0x28a   :  { %v6826_v31 = vor.u32 %v7509_v26, %v6825_v25 }
 0x28c   :  { %3293 = vmatpush.bf16.msra.mxu3 %v6246_v35  ;;  %v7403_v35 = vld [vmem:[%s11167_s10 + $0x84] sm:$0xf] }
 0x28d   :  { %v6414_v37 = vor.u32 %v7403_v35, %v6411_v36  ;;  %v6699_v36 = vld [vmem:[%s11167_s10 + $0x2d0] sm:$0xf0] }
 0x28e   :  { %v6702_v7 = vor.u32 %v7475_v24, %v6699_v36  ;;  %v7485_v24 = vld [vmem:[%s11167_s10 + $0x30c] sm:$0xf0] }
 0x28f   :  { %4150 = vmatpush.bf16.msra.mxu0 %v6414_v37  ;;  %v6809_v37 = vld [vmem:[%s11167_s10 + $0x3a0] sm:$0xf] }
 0x290   :  { %3294 = vmatpush.bf16.msra.mxu3 %v6230_v41  ;;  %v6473_v41 = vld [vmem:[%s11167_s10 + $0x100] sm:$0xf]  ;;  %v10420_v15 = vpop.f32.mrf.mxu0 }
 0x291   :  { %v6474_v44 = vor.u32 %v7421_v42, %v6473_v41  ;;  %v7505_v41 = vld [vmem:[%s11167_s10 + $0x3ac] sm:$0xf0] }
 0x292   :  { %v6810_v43 = vor.u32 %v7505_v41, %v6809_v37  ;;  %v7451_v37 = vld [vmem:[%s11167_s10 + $0x204] sm:$0xf]  ;;  %v6603_v41 = vld [vmem:[%s11167_s10 + $0x210] sm:$0xf0] }
 0x293   :  { %3295 = vmatmul.bf16.vlgmr.msra.gmra.mxu3 %v10050_v19  ;;  %v6585_v19 = vld [vmem:[%s11167_s10 + $0x1e0] sm:$0xf]  ;;  %4151 = vmatpush.bf16.msra.mxu0 %v6398_v50  ;;  %v6606_v46 = vor.u32 %v7451_v37, %v6603_v41  ;;  %v6561_v37 = vld [vmem:[%s11167_s10 + $0x1a8] sm:$0xf] }
 0x294   :  { %v6586_v60 = vor.u32 %v7449_v58, %v6585_v19  ;;  %v6649_v19 = vld [vmem:[%s11167_s10 + $0x260] sm:$0xf]  ;;  %4133 = vmatpush.bf16.msrb.mxu3 %v6842_v21 }
 0x295   :  { %v6650_v58 = vor.u32 %v7465_v57, %v6649_v19  ;;  %v10489_v50 = vld [vmem:[%s11168_s9] sm:$0xf]  ;;  %v7501_v19 = vld [vmem:[%s11167_s10 + $0x38c] sm:$0xf0] }
 0x296   :  { %4105 = vmatpush.bf16.msrb.mxu1 %v6586_v60  ;;  %v7395_v60 = vld [vmem:[%s11167_s10 + $0x44] sm:$0xf]  ;;  %v2430_v26 = vperm.slane %v10489_v50, 1 }
 0x297   :  { %v6382_v29 = vor.u32 %v7395_v60, %v6379_v38  ;;  %4123 = vmatpush.bf16.msrb.mxu2 %v6650_v58  ;;  %v7419_v60 = vld [vmem:[%s11167_s10 + $0x104] sm:$0xf]  ;;  %v6475_v38 = vld [vmem:[%s11167_s10 + $0x110] sm:$0xf0] }
 0x298   :  { %4134 = vmatpush.bf16.msrb.mxu3 %v6826_v31  ;;  %v3088_v42 = vpop.f32.mrf.mxu0  ;;  %v6478_v27 = vor.u32 %v7419_v60, %v6475_v38  ;;  %v7410_v60 = vld [vmem:[%s11167_s10 + $0xb4] sm:$0xf0]  ;;  %v7507_v38 = vld [vmem:[%s11167_s10 + $0x3c4] sm:$0xf] }
 0x299   :  { %4152 = vmatpush.bf16.msra.mxu0 %v6382_v29  ;;  %v2429_v29 = vperm.slane %v10489_v50, 0 }
 0x29a   :  { %4106 = vmatpush.bf16.msrb.mxu1 %v6570_v30  ;;  %v6633_v30 = vld [vmem:[%s11167_s10 + $0x240] sm:$0xf] }
 0x29b   :  { %v6634_v1 = vor.u32 %v7461_v63, %v6633_v30  ;;  %v6777_v63 = vld [vmem:[%s11167_s10 + $0x360] sm:$0xf]  ;;  %v3087_v8 = vadd.f32 %v10420_v15, %v2429_v29  ;;  %v3089_v32 = vadd.f32 %v3088_v42, %v2429_v29  ;;  %v6635_v15 = vld [vmem:[%s11167_s10 + $0x250] sm:$0xf0]  ;;  %v7511_v42 = vld [vmem:[%s11167_s10 + $0x3e4] sm:$0xf] }
 0x29c   :  { %4135 = vmatpush.bf16.msrb.mxu3 %v6810_v43 }
 0x29d   :  { %4124 = vmatpush.bf16.msrb.mxu2 %v6634_v1  ;;  %v7497_v1 = vld [vmem:[%s11167_s10 + $0x36c] sm:$0xf0] }
 0x29e   :  { %4107 = vmatpush.bf16.msrb.mxu1 %v6554_v3  ;;  %v6366_v3 = vor.u32 %v7391_v2, %v6363_v45  ;;  %v6778_v45 = vor.u32 %v7497_v1, %v6777_v63  ;;  %v6417_v63 = vld [vmem:[%s11167_s10 + $0x88] sm:$0xf] }
 0x2a0   :  { %4153 = vmatpush.bf16.msra.mxu0 %v6366_v3  ;;  %v10431_v51 = vpop.f32.mrf.mxu1  ;;  %v6651_v3 = vld [vmem:[%s11167_s10 + $0x270] sm:$0xf0]  ;;  %v3142_v62 = vpop.f32.mrf.mxu0 }
 0x2a1   :  { %4125 = vmatpush.bf16.msrb.mxu2 %v6618_v11  ;;  %v3101_v11 = vadd.f32 %v10431_v51, %v3087_v8 }
 0x2a2   :  { %4108 = vmatpush.bf16.msrb.mxu1 %v6538_v13  ;;  %v7435_v13 = vld [vmem:[%s11167_s10 + $0x184] sm:$0xf] }
 0x2a3   :  { %v6542_v17 = vor.u32 %v7435_v13, %v6539_v14  ;;  %v7459_v14 = vld [vmem:[%s11167_s10 + $0x244] sm:$0xf] }
 0x2a4   :  { %4154 = vmatpush.bf16.msra.mxu0 %v6350_v55  ;;  %v6762_v55 = vor.u32 %v7493_v39, %v6761_v12 }
 0x2a6   :  { %4109 = vmatpush.bf16.msrb.mxu1 %v6522_v0  ;;  %v6601_v0 = vld [vmem:[%s11167_s10 + $0x200] sm:$0xf] }
 0x2a7   :  { %v6602_v16 = vor.u32 %v7453_v40, %v6601_v0  ;;  %v6638_v40 = vor.u32 %v7459_v14, %v6635_v15  ;;  %v6593_v14 = vld [vmem:[%s11167_s10 + $0x1e8] sm:$0xf] }
 0x2a8   :  { %v3102_v52 = vpop.f32.mrf.mxu1 }
 0x2a9   :  { %4126 = vmatpush.bf16.msrb.mxu2 %v6602_v16 }
 0x2aa   :  { %4110 = vmatpush.bf16.msrb.mxu1 %v6506_v22  ;;  %v6526_v22 = vor.u32 %v7431_v54, %v6523_v20  ;;  %v7489_v54 = vld [vmem:[%s11167_s10 + $0x32c] sm:$0xf0] }
 0x2ab   :  { %v6746_v21 = vor.u32 %v7489_v54, %v6745_v18 }
 0x2ad   :  { %4175 = vmatpush.bf16.msra.mxu2 %v6718_v5  ;;  %v7418_v5 = vld [vmem:[%s11167_s10 + $0xf4] sm:$0xf0] }
 0x2ae   :  { %4111 = vmatpush.bf16.msrb.mxu1 %v6490_v34  ;;  %v6507_v34 = vld [vmem:[%s11167_s10 + $0x150] sm:$0xf0] }
 0x2af   :  { %v6510_v35 = vor.u32 %v7427_v33, %v6507_v34  ;;  %v6729_v34 = vld [vmem:[%s11167_s10 + $0x300] sm:$0xf] }
 0x2b0   :  { %v3156_v13 = vpop.f32.mrf.mxu1 }
 0x2b1   :  { %4176 = vmatpush.bf16.msra.mxu2 %v6702_v7  ;;  %v6730_v7 = vor.u32 %v7485_v24, %v6729_v34 }
 0x2b2   :  { %4112 = vmatpush.bf16.msrb.mxu1 %v6474_v44  ;;  %v7423_v44 = vld [vmem:[%s11167_s10 + $0x124] sm:$0xf] }
 0x2b3   :  { %v6494_v48 = vor.u32 %v7423_v44, %v6491_v9  ;;  %v6449_v44 = vld [vmem:[%s11167_s10 + $0xc8] sm:$0xf]  ;;  %v7414_v9 = vld [vmem:[%s11167_s10 + $0xd4] sm:$0xf0] }
 0x2b5   :  { %4177 = vmatpush.bf16.msra.mxu2 %v6686_v53 }
 0x2b6   :  { %4161 = vmatpush.bf16.msra.mxu1 %v6590_v56  ;;  %v10448_v4 = vpop.f32.mrf.mxu2  ;;  %v6793_v56 = vld [vmem:[%s11167_s10 + $0x380] sm:$0xf] }
 0x2b7   :  { %v6794_v58 = vor.u32 %v7501_v19, %v6793_v56  ;;  %v3115_v0 = vadd.f32 %v10448_v4, %v3101_v11  ;;  %v6465_v4 = vld [vmem:[%s11167_s10 + $0xe8] sm:$0xf]  ;;  %v6450_v19 = vor.u32 %v7414_v9, %v6449_v44  ;;  %v7491_v44 = vld [vmem:[%s11167_s10 + $0x344] sm:$0xf]  ;;  %v6763_v9 = vld [vmem:[%s11167_s10 + $0x350] sm:$0xf0] }
 0x2b8   :  { %v6466_v36 = vor.u32 %v7418_v5, %v6465_v4  ;;  %v3158_v49 = vpop.f32.mrf.mxu1  ;;  %v7446_v5 = vld [vmem:[%s11167_s10 + $0x1d4] sm:$0xf0] }
 0x2b9   :  { %4136 = vmatpush.bf16.msrb.mxu3 %v6794_v58  ;;  %v3143_v58 = vadd.f32 %v3142_v62, %v2430_v26 }
 0x2ba   :  { %4162 = vmatpush.bf16.msra.mxu1 %v6574_v28  ;;  %v6667_v28 = vld [vmem:[%s11167_s10 + $0x290] sm:$0xf0] }
 0x2bb   :  { %v6670_v30 = vor.u32 %v7467_v61, %v6667_v28  ;;  %v6827_v61 = vld [vmem:[%s11167_s10 + $0x3d0] sm:$0xf0]  ;;  %v3157_v28 = vadd.f32 %v3156_v13, %v3143_v58  ;;  %v6401_v13 = vld [vmem:[%s11167_s10 + $0x68] sm:$0xf]  ;;  %v7390_v58 = vld [vmem:[%s11167_s10 + $0x14] sm:$0xf0] }
 0x2bc   :  { %v6830_v29 = vor.u32 %v7507_v38, %v6827_v61 }
 0x2bd   :  { %4178 = vmatpush.bf16.msra.mxu2 %v6670_v30  ;;  %4137 = vmatpush.bf16.msrb.mxu3 %v6778_v45  ;;  %v7406_v45 = vld [vmem:[%s11167_s10 + $0x94] sm:$0xf0] }
 0x2be   :  { %4163 = vmatpush.bf16.msra.mxu1 %v6558_v10  ;;  %v3116_v57 = vpop.f32.mrf.mxu2  ;;  %v6654_v10 = vor.u32 %v7463_v47, %v6651_v3  ;;  %v7503_v47 = vld [vmem:[%s11167_s10 + $0x3a4] sm:$0xf]  ;;  %v6811_v3 = vld [vmem:[%s11167_s10 + $0x3b0] sm:$0xf0]  ;;  %v6418_v39 = vor.u32 %v7406_v45, %v6417_v63  ;;  %v6467_v63 = vld [vmem:[%s11167_s10 + $0xf8] sm:$0xf0] }
 0x2c0   :  { %v3212_v11 = vpop.f32.mrf.mxu1 }
 0x2c1   :  { %4179 = vmatpush.bf16.msra.mxu2 %v6654_v10  ;;  %4138 = vmatpush.bf16.msrb.mxu3 %v6762_v55  ;;  %v6814_v10 = vor.u32 %v7503_v47, %v6811_v3  ;;  %v7402_v55 = vld [vmem:[%s11167_s10 + $0x74] sm:$0xf0] }
 0x2c2   :  { %4164 = vmatpush.bf16.msra.mxu1 %v6542_v17  ;;  %v3103_v17 = vadd.f32 %v3102_v52, %v3089_v32 }
 0x2c4   :  { %v3117_v51 = vadd.f32 %v3116_v57, %v3103_v17  ;;  %v6433_v57 = vld [vmem:[%s11167_s10 + $0xa8] sm:$0xf]  ;;  %v7450_v17 = vld [vmem:[%s11167_s10 + $0x1f4] sm:$0xf0] }
 0x2c5   :  { %4180 = vmatpush.bf16.msra.mxu2 %v6638_v40  ;;  %4139 = vmatpush.bf16.msrb.mxu3 %v6746_v21  ;;  %v6434_v30 = vor.u32 %v7410_v60, %v6433_v57  ;;  %v6795_v40 = vld [vmem:[%s11167_s10 + $0x390] sm:$0xf0]  ;;  %v6594_v21 = vor.u32 %v7450_v17, %v6593_v14  ;;  %v6353_v57 = vld [vmem:[%s11167_s10 + $0x8] sm:$0xf]  ;;  %v7412_v14 = vld [vmem:[%s11167_s10 + $0xcc] sm:$0xf] }
 0x2c6   :  { %4165 = vmatpush.bf16.msra.mxu1 %v6526_v22  ;;  %v3170_v6 = vpop.f32.mrf.mxu2  ;;  %v7455_v22 = vld [vmem:[%s11167_s10 + $0x224] sm:$0xf]  ;;  %v6545_v60 = vld [vmem:[%s11167_s10 + $0x188] sm:$0xf]  ;;  %v6354_v3 = vor.u32 %v7390_v58, %v6353_v57  ;;  %v6595_v57 = vld [vmem:[%s11167_s10 + $0x1f8] sm:$0xf0] }
 0x2c7   :  { %v6622_v25 = vor.u32 %v7455_v22, %v6619_v23  ;;  %v6385_v22 = vld [vmem:[%s11167_s10 + $0x48] sm:$0xf]  ;;  %v7398_v23 = vld [vmem:[%s11167_s10 + $0x54] sm:$0xf0] }
 0x2c8   :  { %v6386_v24 = vor.u32 %v7398_v23, %v6385_v22  ;;  %v7478_v22 = vld [vmem:[%s11167_s10 + $0x2d4] sm:$0xf0]  ;;  %v7408_v23 = vld [vmem:[%s11167_s10 + $0xac] sm:$0xf] }
 0x2c9   :  { %4181 = vmatpush.bf16.msra.mxu2 %v6622_v25  ;;  %4140 = vmatpush.bf16.msrb.mxu3 %v6730_v7  ;;  %v7495_v25 = vld [vmem:[%s11167_s10 + $0x364] sm:$0xf]  ;;  %v7394_v7 = vld [vmem:[%s11167_s10 + $0x34] sm:$0xf0] }
 0x2ca   :  { %4166 = vmatpush.bf16.msra.mxu1 %v6510_v35  ;;  %v3144_v35 = vpop.f32.mrf.mxu0 }
 0x2cd   :  { %4182 = vmatpush.bf16.msra.mxu2 %v6606_v46  ;;  %v3214_v46 = vpop.f32.mrf.mxu1 }
 0x2ce   :  { %4167 = vmatpush.bf16.msra.mxu1 %v6494_v48  ;;  %v6843_v48 = vld [vmem:[%s11167_s10 + $0x3f0] sm:$0xf0]  ;;  %v3172_v53 = vpop.f32.mrf.mxu2 }
 0x2cf   :  { %v6846_v52 = vor.u32 %v7511_v42, %v6843_v48  ;;  %v7442_v42 = vld [vmem:[%s11167_s10 + $0x1b4] sm:$0xf0]  ;;  %v6766_v48 = vor.u32 %v7491_v44, %v6763_v9  ;;  %v6481_v9 = vld [vmem:[%s11167_s10 + $0x108] sm:$0xf] }
 0x2d1   :  { %4189 = vmatpush.bf16.msra.mxu3 %v6846_v52 }
 0x2d2   :  { %4168 = vmatpush.bf16.msra.mxu1 %v6478_v27  ;;  %v3145_v27 = vadd.f32 %v3144_v35, %v2430_v26  ;;  %v3198_v8 = vpop.f32.mrf.mxu0  ;;  %v6779_v26 = vld [vmem:[%s11167_s10 + $0x370] sm:$0xf0] }
 0x2d4   :  { %v3159_v1 = vadd.f32 %v3158_v49, %v3145_v27  ;;  %v7487_v27 = vld [vmem:[%s11167_s10 + $0x324] sm:$0xf] }
 0x2d5   :  { %4190 = vmatpush.bf16.msra.mxu3 %v6830_v29  ;;  %v7438_v29 = vld [vmem:[%s11167_s10 + $0x194] sm:$0xf0] }
 0x2d6   :  { %v3128_v2 = vpop.f32.mrf.mxu3  ;;  %v3173_v62 = vadd.f32 %v3172_v53, %v3159_v1 }
 0x2d7   :  { %v3129_v16 = vadd.f32 %v3128_v2, %v3115_v0  ;;  %v3171_v2 = vadd.f32 %v3170_v6, %v3157_v28  ;;  %v7499_v0 = vld [vmem:[%s11167_s10 + $0x384] sm:$0xf]  ;;  %v6747_v28 = vld [vmem:[%s11167_s10 + $0x330] sm:$0xf0] }
 0x2d8   :  { %v6750_v1 = vor.u32 %v7487_v27, %v6747_v28  ;;  %v7466_v28 = vld [vmem:[%s11167_s10 + $0x274] sm:$0xf0] }
 0x2d9   :  { %v3301_v31 = vmax.f32 %v3129_v16, 0.0  ;;  %4191 = vmatpush.bf16.msra.mxu3 %v6814_v10  ;;  %v3226_v6 = vpop.f32.mrf.mxu2  ;;  %v2431_v16 = vperm.slane %v10489_v50, 2  ;;  %v6529_v10 = vld [vmem:[%s11167_s10 + $0x168] sm:$0xf] }
 0x2db   :  { %v3199_v41 = vadd.f32 %v3198_v8, %v2431_v16  ;;  %v6546_v8 = vor.u32 %v7438_v29, %v6545_v60  ;;  %v2432_v60 = vperm.slane %v10489_v50, 3  ;;  %v6657_v29 = vld [vmem:[%s11167_s10 + $0x268] sm:$0xf]  ;;  %v6387_v50 = vld [vmem:[%s11167_s10 + $0x58] sm:$0xf0] }
 0x2dd   :  { %v3213_v52 = vadd.f32 %v3212_v11, %v3199_v41 }
 0x2de   :  { %v3130_v20 = vpop.f32.mrf.mxu3 }
 0x2df   :  { %v3131_v59 = vadd.f32 %v3130_v20, %v3117_v51  ;;  %v6798_v51 = vor.u32 %v7499_v0, %v6795_v40  ;;  %v6402_v20 = vor.u32 %v7402_v55, %v6401_v13  ;;  %v3227_v61 = vadd.f32 %v3226_v6, %v3213_v52  ;;  %v6731_v13 = vld [vmem:[%s11167_s10 + $0x310] sm:$0xf0]  ;;  %v7482_v55 = vld [vmem:[%s11167_s10 + $0x2f4] sm:$0xf0]  ;;  %v7400_v52 = vld [vmem:[%s11167_s10 + $0x6c] sm:$0xf] }
 0x2e0   :  { %v3268_v41 = vpop.f32.mrf.mxu1 }
 0x2e1   :  { %v3305_v33 = vmax.f32 %v3131_v59, 0.0  ;;  %v6577_v59 = vld [vmem:[%s11167_s10 + $0x1c8] sm:$0xf]  ;;  %4192 = vmatpush.bf16.msra.mxu3 %v6798_v51  ;;  %v3228_v53 = vpop.f32.mrf.mxu2 }
 0x2e2   :  { %v6578_v35 = vor.u32 %v7446_v5, %v6577_v59  ;;  %v6435_v59 = vld [vmem:[%s11167_s10 + $0xb8] sm:$0xf0] }
 0x2e3   :  { %v10571_v43 = vpack.c.bf16 %v3305_v33, %v3301_v31  ;;  %v6782_v31 = vor.u32 %v7495_v25, %v6779_v26  ;;  %v3200_v33 = vpop.f32.mrf.mxu0  ;;  %v6438_v26 = vor.u32 %v7408_v23, %v6435_v59  ;;  %v7436_v23 = vld [vmem:[%s11167_s10 + $0x18c] sm:$0xf]  ;;  %v6547_v59 = vld [vmem:[%s11167_s10 + $0x198] sm:$0xf0] }
 0x2e4   :  { %v3201_v49 = vadd.f32 %v3200_v33, %v2431_v16  ;;  %v7426_v33 = vld [vmem:[%s11167_s10 + $0x134] sm:$0xf0] }
 0x2e5   :  { %4099 = vmatmul.bf16.vlgmr.msrb.gmra.mxu0 %v10571_v43  ;;  %4193 = vmatpush.bf16.msra.mxu3 %v6782_v31  ;;  %v6497_v31 = vld [vmem:[%s11167_s10 + $0x128] sm:$0xf] }
 0x2e6   :  { %4203 = vmatpush.bf16.msrb.mxu0 %v6466_v36  ;;  %v3184_v56 = vpop.f32.mrf.mxu3  ;;  %v6369_v36 = vld [vmem:[%s11167_s10 + $0x28] sm:$0xf]  ;;  %v3215_v38 = vadd.f32 %v3214_v46, %v3201_v49  ;;  %v7422_v46 = vld [vmem:[%s11167_s10 + $0x114] sm:$0xf0] }
 0x2e7   :  { %v3185_v32 = vadd.f32 %v3184_v56, %v3171_v2  ;;  %v6370_v56 = vor.u32 %v7394_v7, %v6369_v36  ;;  %v6419_v36 = vld [vmem:[%s11167_s10 + $0x98] sm:$0xf0]  ;;  %v7470_v49 = vld [vmem:[%s11167_s10 + $0x294] sm:$0xf0]  ;;  %v6482_v58 = vor.u32 %v7422_v46, %v6481_v9 }
 0x2e8   :  { %v3229_v2 = vadd.f32 %v3228_v53, %v3215_v38  ;;  %v6403_v53 = vld [vmem:[%s11167_s10 + $0x78] sm:$0xf0] }
 0x2e9   :  { %v3302_v18 = vmax.f32 %v3185_v32, 0.0  ;;  %4194 = vmatpush.bf16.msra.mxu3 %v6766_v48  ;;  %v6673_v48 = vld [vmem:[%s11167_s10 + $0x288] sm:$0xf]  ;;  %v6723_v9 = vld [vmem:[%s11167_s10 + $0x2f8] sm:$0xf0] }
 0x2ea   :  { %4204 = vmatpush.bf16.msrb.mxu0 %v6450_v19  ;;  %v6562_v19 = vor.u32 %v7442_v42, %v6561_v37  ;;  %v6498_v37 = vor.u32 %v7426_v33, %v6497_v31  ;;  %v6674_v38 = vor.u32 %v7470_v49, %v6673_v48 }
 0x2eb   :  { %v3254_v7 = vpop.f32.mrf.mxu0 }
 0x2ed   :  { %4195 = vmatpush.bf16.msra.mxu3 %v6750_v1  ;;  %v6579_v1 = vld [vmem:[%s11167_s10 + $0x1d8] sm:$0xf0] }
 0x2ee   :  { %4205 = vmatpush.bf16.msrb.mxu0 %v6434_v30  ;;  %v3186_v12 = vpop.f32.mrf.mxu3  ;;  %v7416_v30 = vld [vmem:[%s11167_s10 + $0xec] sm:$0xf] }
 0x2ef   :  { %v3187_v15 = vadd.f32 %v3186_v12, %v3173_v62  ;;  %v7434_v62 = vld [vmem:[%s11167_s10 + $0x174] sm:$0xf0]  ;;  %v6470_v11 = vor.u32 %v7416_v30, %v6467_v63  ;;  %v6721_v12 = vld [vmem:[%s11167_s10 + $0x2e8] sm:$0xf]  ;;  %v7396_v30 = vld [vmem:[%s11167_s10 + $0x4c] sm:$0xf] }
 0x2f0   :  { %v6530_v6 = vor.u32 %v7434_v62, %v6529_v10  ;;  %v6722_v16 = vor.u32 %v7482_v55, %v6721_v12  ;;  %v7444_v63 = vld [vmem:[%s11167_s10 + $0x1cc] sm:$0xf]  ;;  %v3255_v10 = vadd.f32 %v3254_v7, %v2432_v60  ;;  %v6371_v12 = vld [vmem:[%s11167_s10 + $0x38] sm:$0xf0]  ;;  %v6849_v7 = vld [vmem:[%s11167_s10 + $0x3e8] sm:$0xf] }
 0x2f1   :  { %v3306_v54 = vmax.f32 %v3187_v15, 0.0  ;;  %v6451_v15 = vld [vmem:[%s11167_s10 + $0xd8] sm:$0xf0]  ;;  %v6582_v62 = vor.u32 %v7444_v63, %v6579_v1  ;;  %v7506_v63 = vld [vmem:[%s11167_s10 + $0x3b4] sm:$0xf0] }
 0x2f2   :  { %4206 = vmatpush.bf16.msrb.mxu0 %v6418_v39  ;;  %v7483_v39 = vld [vmem:[%s11167_s10 + $0x304] sm:$0xf]  ;;  %v6563_v55 = vld [vmem:[%s11167_s10 + $0x1b8] sm:$0xf0]  ;;  %v7424_v1 = vld [vmem:[%s11167_s10 + $0x12c] sm:$0xf] }
 0x2f3   :  { %v10635_v4 = vpack.c.bf16 %v3306_v54, %v3302_v18  ;;  %v6734_v17 = vor.u32 %v7483_v39, %v6731_v13  ;;  %v6454_v18 = vor.u32 %v7412_v14, %v6451_v15  ;;  %v6513_v54 = vld [vmem:[%s11167_s10 + $0x148] sm:$0xf]  ;;  %v3270_v39 = vpop.f32.mrf.mxu1  ;;  %v7440_v13 = vld [vmem:[%s11167_s10 + $0x1ac] sm:$0xf]  ;;  %v3269_v15 = vadd.f32 %v3268_v41, %v3255_v10 }
 0x2f4   :  { %v7432_v41 = vld [vmem:[%s11167_s10 + $0x16c] sm:$0xf]  ;;  %v6801_v10 = vld [vmem:[%s11167_s10 + $0x388] sm:$0xf] }
 0x2f5   :  { %4113 = vmatmul.bf16.vlgmr.msrb.gmra.mxu1 %v10635_v4  ;;  %4155 = vmatmul.bf16.vlgmr.msra.gmra.mxu0 %v10571_v43 }
 0x2f6   :  { %4207 = vmatpush.bf16.msrb.mxu0 %v6402_v20  ;;  %4217 = vmatpush.bf16.msrb.mxu1 %v6594_v21  ;;  %v3240_v34 = vpop.f32.mrf.mxu3  ;;  %v7430_v20 = vld [vmem:[%s11167_s10 + $0x154] sm:$0xf0]  ;;  %v6705_v21 = vld [vmem:[%s11167_s10 + $0x2c8] sm:$0xf] }
 0x2f7   :  { %v3241_v45 = vadd.f32 %v3240_v34, %v3227_v61  ;;  %4196 = vmatpush.bf16.msra.mxu3 %v6734_v17  ;;  %v6514_v5 = vor.u32 %v7430_v20, %v6513_v54  ;;  %v6706_v25 = vor.u32 %v7478_v22, %v6705_v21  ;;  %v6689_v34 = vld [vmem:[%s11167_s10 + $0x2a8] sm:$0xf]  ;;  %v6406_v61 = vor.u32 %v7400_v52, %v6403_v53  ;;  %v7458_v20 = vld [vmem:[%s11167_s10 + $0x234] sm:$0xf0]  ;;  %v7388_v21 = vld [vmem:[%s11167_s10 + $0xc] sm:$0xf] }
 0x2f8   :  { %v6566_v54 = vor.u32 %v7440_v13, %v6563_v55  ;;  %v6355_v22 = vld [vmem:[%s11167_s10 + $0x18] sm:$0xf0] }
 0x2f9   :  { %v3303_v0 = vmax.f32 %v3241_v45, 0.0  ;;  %v6358_v33 = vor.u32 %v7388_v21, %v6355_v22  ;;  %v6643_v21 = vld [vmem:[%s11167_s10 + $0x258] sm:$0xf0] }
 0x2fa   :  { %4208 = vmatpush.bf16.msrb.mxu0 %v6386_v24  ;;  %4218 = vmatpush.bf16.msrb.mxu1 %v6578_v35  ;;  %v7474_v24 = vld [vmem:[%s11167_s10 + $0x2b4] sm:$0xf0]  ;;  %v7404_v35 = vld [vmem:[%s11167_s10 + $0x8c] sm:$0xf] }
 0x2fb   :  { %v6690_v42 = vor.u32 %v7474_v24, %v6689_v34  ;;  %v6422_v44 = vor.u32 %v7404_v35, %v6419_v36  ;;  %v6609_v34 = vld [vmem:[%s11167_s10 + $0x208] sm:$0xf]  ;;  %v7454_v24 = vld [vmem:[%s11167_s10 + $0x214] sm:$0xf0]  ;;  %v6550_v36 = vor.u32 %v7436_v23, %v6547_v59 }
 0x2fc   :  { %v6610_v49 = vor.u32 %v7454_v24, %v6609_v34  ;;  %v6753_v59 = vld [vmem:[%s11167_s10 + $0x328] sm:$0xf]  ;;  %v7486_v34 = vld [vmem:[%s11167_s10 + $0x314] sm:$0xf0]  ;;  %v7452_v24 = vld [vmem:[%s11167_s10 + $0x20c] sm:$0xf] }
 0x2fe   :  { %4209 = vmatpush.bf16.msrb.mxu0 %v6370_v56  ;;  %4219 = vmatpush.bf16.msrb.mxu1 %v6562_v19  ;;  %v3242_v47 = vpop.f32.mrf.mxu3  ;;  %v3282_v56 = vpop.f32.mrf.mxu2  ;;  %v7448_v19 = vld [vmem:[%s11167_s10 + $0x1ec] sm:$0xf] }
 0x2ff   :  { %v3243_v32 = vadd.f32 %v3242_v47, %v3229_v2  ;;  %v6598_v27 = vor.u32 %v7448_v19, %v6595_v57  ;;  %v3256_v2 = vpop.f32.mrf.mxu0  ;;  %v6658_v47 = vor.u32 %v7466_v28, %v6657_v29  ;;  %v6833_v57 = vld [vmem:[%s11167_s10 + $0x3c8] sm:$0xf]  ;;  %v6707_v29 = vld [vmem:[%s11167_s10 + $0x2d8] sm:$0xf0] }
 0x300   :  { %v3257_v14 = vadd.f32 %v3256_v2, %v2432_v60  ;;  %v7428_v60 = vld [vmem:[%s11167_s10 + $0x14c] sm:$0xf] }
 0x301   :  { %v3307_v40 = vmax.f32 %v3243_v32, 0.0  ;;  %v7462_v32 = vld [vmem:[%s11167_s10 + $0x254] sm:$0xf0]  ;;  %v7472_v2 = vld [vmem:[%s11167_s10 + $0x2ac] sm:$0xf] }
 0x302   :  { %4210 = vmatpush.bf16.msrb.mxu0 %v6354_v3  ;;  %4220 = vmatpush.bf16.msrb.mxu1 %v6546_v8  ;;  %v6390_v3 = vor.u32 %v7396_v30, %v6387_v50  ;;  %v6641_v8 = vld [vmem:[%s11167_s10 + $0x248] sm:$0xf] }
 0x303   :  { %v10714_v51 = vpack.c.bf16 %v3307_v40, %v3303_v0  ;;  %v6642_v0 = vor.u32 %v7462_v32, %v6641_v8  ;;  %v6817_v50 = vld [vmem:[%s11167_s10 + $0x3a8] sm:$0xf]  ;;  %v7420_v32 = vld [vmem:[%s11167_s10 + $0x10c] sm:$0xf] }
 0x305   :  { %4127 = vmatmul.bf16.vlgmr.msrb.gmra.mxu2 %v10714_v51  ;;  %4169 = vmatmul.bf16.vlgmr.msra.gmra.mxu1 %v10635_v4 }
 0x306   :  { %4259 = vmatpush.bf16.msra.mxu0 %v6470_v11  ;;  %4221 = vmatpush.bf16.msrb.mxu1 %v6530_v6  ;;  %v7392_v11 = vld [vmem:[%s11167_s10 + $0x2c] sm:$0xf]  ;;  %v3284_v17 = vpop.f32.mrf.mxu2  ;;  %v6625_v6 = vld [vmem:[%s11167_s10 + $0x228] sm:$0xf] }
 0x307   :  { %4211 = vmatmul.bf16.vlgmr.msrb.gmra.mxu0 %v10571_v43  ;;  %4231 = vmatpush.bf16.msrb.mxu2 %v6722_v16  ;;  %v6374_v40 = vor.u32 %v7392_v11, %v6371_v12  ;;  %v3271_v16 = vadd.f32 %v3270_v39, %v3257_v14  ;;  %v6626_v31 = vor.u32 %v7458_v20, %v6625_v6  ;;  %v6483_v11 = vld [vmem:[%s11167_s10 + $0x118] sm:$0xf0]  ;;  %v7468_v12 = vld [vmem:[%s11167_s10 + $0x28c] sm:$0xf] }
 0x308   :  { %v6675_v39 = vld [vmem:[%s11167_s10 + $0x298] sm:$0xf0]  ;;  %v6486_v55 = vor.u32 %v7420_v32, %v6483_v11  ;;  %v7460_v20 = vld [vmem:[%s11167_s10 + $0x24c] sm:$0xf]  ;;  %v7515_v11 = vld [vmem:[%s11169_s12] sm:$0xff] }
 0x309   :  { %v6678_v14 = vor.u32 %v7468_v12, %v6675_v39  ;;  %v6646_v23 = vor.u32 %v7460_v20, %v6643_v21  ;;  %v7528_v32 = vld [vmem:[%s11169_s12 + $0x68] sm:$0xff]  ;;  %v7527_v12 = vld [vmem:[%s11169_s12 + $0x60] sm:$0xff] }
 0x30a   :  { %4260 = vmatpush.bf16.msra.mxu0 %v6454_v18  ;;  %4222 = vmatpush.bf16.msrb.mxu1 %v6514_v5  ;;  %v3283_v18 = vadd.f32 %v3282_v56, %v3269_v15  ;;  %v3285_v5 = vadd.f32 %v3284_v17, %v3271_v16  ;;  %v6785_v15 = vld [vmem:[%s11167_s10 + $0x368] sm:$0xf]  ;;  %v7498_v17 = vld [vmem:[%s11167_s10 + $0x374] sm:$0xf0]  ;;  %v7523_v20 = vld [vmem:[%s11169_s12 + $0x40] sm:$0xff] }
 0x30b   :  { %4232 = vmatpush.bf16.msrb.mxu2 %v6706_v25  ;;  %v6786_v6 = vor.u32 %v7498_v17, %v6785_v15  ;;  %v7525_v17 = vld [vmem:[%s11169_s12 + $0x50] sm:$0xff]  ;;  %v7535_v21 = vld [vmem:[%s11169_s12 + $0xa0] sm:$0xff] }
 0x30e   :  { %4261 = vmatpush.bf16.msra.mxu0 %v6438_v26  ;;  %4223 = vmatpush.bf16.msrb.mxu1 %v6498_v37  ;;  %v7514_v37 = vld [vmem:[%s11167_s10 + $0x3f4] sm:$0xf0] }
 0x30f   :  { %4233 = vmatpush.bf16.msrb.mxu2 %v6690_v42  ;;  %v6531_v42 = vld [vmem:[%s11167_s10 + $0x178] sm:$0xf0]  ;;  %v6850_v52 = vor.u32 %v7514_v37, %v6849_v7 }
 0x310   :  { %v6534_v56 = vor.u32 %v7432_v41, %v6531_v42  ;;  %v6851_v7 = vld [vmem:[%s11167_s10 + $0x3f8] sm:$0xf0] }
 0x312   :  { %4262 = vmatpush.bf16.msra.mxu0 %v6422_v44  ;;  %4224 = vmatpush.bf16.msrb.mxu1 %v6482_v58  ;;  %v7480_v44 = vld [vmem:[%s11167_s10 + $0x2ec] sm:$0xf]  ;;  %v7510_v58 = vld [vmem:[%s11167_s10 + $0x3d4] sm:$0xf0] }
 0x313   :  { %4234 = vmatpush.bf16.msrb.mxu2 %v6674_v38  ;;  %v6726_v19 = vor.u32 %v7480_v44, %v6723_v9  ;;  %v6515_v38 = vld [vmem:[%s11167_s10 + $0x158] sm:$0xf0]  ;;  %v7508_v44 = vld [vmem:[%s11167_s10 + $0x3cc] sm:$0xf] }
 0x314   :  { %v6518_v28 = vor.u32 %v7428_v60, %v6515_v38  ;;  %v6835_v9 = vld [vmem:[%s11167_s10 + $0x3d8] sm:$0xf0]  ;;  %v7492_v38 = vld [vmem:[%s11167_s10 + $0x34c] sm:$0xf] }
 0x315   :  { %4183 = vmatmul.bf16.vlgmr.msra.gmra.mxu2 %v10714_v51  ;;  %4225 = vmatmul.bf16.vlgmr.msrb.gmra.mxu1 %v10635_v4 }
 0x316   :  { %v3296_v45 = vpop.f32.mrf.mxu3  ;;  %4263 = vmatpush.bf16.msra.mxu0 %v6406_v61  ;;  %4273 = vmatpush.bf16.msra.mxu1 %v6598_v27  ;;  %v7476_v61 = vld [vmem:[%s11167_s10 + $0x2cc] sm:$0xf]  ;;  %v6834_v27 = vor.u32 %v7510_v58, %v6833_v57 }
 0x317   :  { %4235 = vmatpush.bf16.msrb.mxu2 %v6658_v47  ;;  %v3297_v25 = vadd.f32 %v3296_v45, %v3283_v18  ;;  %v6710_v30 = vor.u32 %v7476_v61, %v6707_v29  ;;  %v6691_v45 = vld [vmem:[%s11167_s10 + $0x2b8] sm:$0xf0]  ;;  %v6818_v47 = vor.u32 %v7506_v63, %v6817_v50  ;;  %v6769_v18 = vld [vmem:[%s11167_s10 + $0x348] sm:$0xf]  ;;  %v7496_v58 = vld [vmem:[%s11167_s10 + $0x36c] sm:$0xf] }
 0x318   :  { %v6694_v8 = vor.u32 %v7472_v2, %v6691_v45  ;;  %v6771_v61 = vld [vmem:[%s11167_s10 + $0x358] sm:$0xf0]  ;;  %v7484_v50 = vld [vmem:[%s11167_s10 + $0x30c] sm:$0xf]  ;;  %v7521_v2 = vld [vmem:[%s11169_s12 + $0x30] sm:$0xff] }
 0x319   :  { %v3304_v46 = vmax.f32 %v3297_v25, 0.0  ;;  %v7456_v25 = vld [vmem:[%s11167_s10 + $0x22c] sm:$0xf]  ;;  %v6774_v29 = vor.u32 %v7492_v38, %v6771_v61  ;;  %v6739_v63 = vld [vmem:[%s11167_s10 + $0x318] sm:$0xf0] }
 0x31a   :  { %4264 = vmatpush.bf16.msra.mxu0 %v6390_v3  ;;  %4274 = vmatpush.bf16.msra.mxu1 %v6582_v62  ;;  %v7502_v62 = vld [vmem:[%s11167_s10 + $0x394] sm:$0xf0]  ;;  %v7520_v45 = vld [vmem:[%s11169_s12 + $0x28] sm:$0xff] }
 0x31b   :  { %4236 = vmatpush.bf16.msrb.mxu2 %v6642_v0  ;;  %v6802_v13 = vor.u32 %v7502_v62, %v6801_v10  ;;  %v7464_v0 = vld [vmem:[%s11167_s10 + $0x26c] sm:$0xf]  ;;  %v7529_v10 = vld [vmem:[%s11169_s12 + $0x70] sm:$0xff] }
 0x31c   :  { %v7516_v62 = vld [vmem:[%s11169_s12 + $0x8] sm:$0xff] }
 0x31d   :  { %v7544_v61 = vld [vmem:[%s11169_s12 + $0xe8] sm:$0xff] }
 0x31e   :  { %v3298_v26 = vpop.f32.mrf.mxu3  ;;  %4265 = vmatpush.bf16.msra.mxu0 %v6374_v40  ;;  %4275 = vmatpush.bf16.msra.mxu1 %v6566_v54  ;;  %v6659_v40 = vld [vmem:[%s11167_s10 + $0x278] sm:$0xf0]  ;;  %v7494_v54 = vld [vmem:[%s11167_s10 + $0x354] sm:$0xf0] }
 0x31f   :  { %v3299_v35 = vadd.f32 %v3298_v26, %v3285_v5  ;;  %4237 = vmatpush.bf16.msrb.mxu2 %v6626_v31  ;;  %v6662_v16 = vor.u32 %v7464_v0, %v6659_v40  ;;  %v6770_v22 = vor.u32 %v7494_v54, %v6769_v18  ;;  %v7490_v5 = vld [vmem:[%s11167_s10 + $0x334] sm:$0xf0]  ;;  %v6627_v26 = vld [vmem:[%s11167_s10 + $0x238] sm:$0xf0]  ;;  %v7537_v0 = vld [vmem:[%s11169_s12 + $0xb0] sm:$0xff] }
 0x320   :  { %v6630_v31 = vor.u32 %v7456_v25, %v6627_v26  ;;  %v7524_v40 = vld [vmem:[%s11169_s12 + $0x48] sm:$0xff]  ;;  %v11077_v18 = vld [vmem:[%s11171_s11] sm:$0xf] }
 0x321   :  { %v3308_v48 = vmax.f32 %v3299_v35, 0.0  ;;  %v6611_v35 = vld [vmem:[%s11167_s10 + $0x218] sm:$0xf0] }
 0x322   :  { %4266 = vmatpush.bf16.msra.mxu0 %v6358_v33  ;;  %4276 = vmatpush.bf16.msra.mxu1 %v6550_v36  ;;  %v6737_v33 = vld [vmem:[%s11167_s10 + $0x308] sm:$0xf]  ;;  %v7512_v36 = vld [vmem:[%s11167_s10 + $0x3ec] sm:$0xf]  ;;  %v6614_v41 = vor.u32 %v7452_v24, %v6611_v35 }
 0x323   :  { %v10860_v53 = vpack.c.bf16 %v3308_v48, %v3304_v46  ;;  %4238 = vmatpush.bf16.msrb.mxu2 %v6610_v49  ;;  %v6738_v37 = vor.u32 %v7486_v34, %v6737_v33  ;;  %v6854_v42 = vor.u32 %v7512_v36, %v6851_v7  ;;  %v6838_v46 = vor.u32 %v7508_v44, %v6835_v9  ;;  %v7504_v48 = vld [vmem:[%s11167_s10 + $0x3ac] sm:$0xf]  ;;  %v6819_v49 = vld [vmem:[%s11167_s10 + $0x3b8] sm:$0xf0]  ;;  %v7533_v33 = vld [vmem:[%s11169_s12 + $0x90] sm:$0xff] }
 0x325   :  { %4141 = vmatmul.bf16.vlgmr.msrb.gmra.mxu3 %v10860_v53  ;;  %4267 = vmatmul.bf16.vlgmr.msra.gmra.mxu0 %v10571_v43  ;;  %v6499_v43 = vld [vmem:[%s11167_s10 + $0x138] sm:$0xf0] }
 0x326   :  { %4245 = vmatpush.bf16.msrb.mxu3 %v6850_v52  ;;  %4277 = vmatpush.bf16.msra.mxu1 %v6534_v56  ;;  %v6502_v3 = vor.u32 %v7424_v1, %v6499_v43  ;;  %v6822_v52 = vor.u32 %v7504_v48, %v6819_v49  ;;  %v7500_v56 = vld [vmem:[%s11167_s10 + $0x38c] sm:$0xf]  ;;  %v6742_v1 = vor.u32 %v7484_v50, %v6739_v63  ;;  %v7522_v43 = vld [vmem:[%s11169_s12 + $0x38] sm:$0xff]  ;;  %v7531_v48 = vld [vmem:[%s11169_s12 + $0x80] sm:$0xff] }
 0x327   :  { %4287 = vmatpush.bf16.msra.mxu2 %v6726_v19  ;;  %v6803_v19 = vld [vmem:[%s11167_s10 + $0x398] sm:$0xf0]  ;;  %4587 = vmatpush.bf16.msrb.mxu0 %v7522_v43  ;;  %v7543_v50 = vld [vmem:[%s11169_s12 + $0xe0] sm:$0xff] }
 0x328   :  { %4239 = vmatmul.bf16.vlgmr.msrb.gmra.mxu2 %v10714_v51  ;;  %v6806_v57 = vor.u32 %v7500_v56, %v6803_v19  ;;  %v7546_v49 = vld [vmem:[%s11169_s12 + $0xf8] sm:$0xff]  ;;  %v3444_v56 = vperm.slane %v11077_v18, 1 }
 0x32a   :  { %4246 = vmatpush.bf16.msrb.mxu3 %v6834_v27  ;;  %4278 = vmatpush.bf16.msra.mxu1 %v6518_v28  ;;  %v7488_v27 = vld [vmem:[%s11167_s10 + $0x32c] sm:$0xf]  ;;  %v6755_v28 = vld [vmem:[%s11167_s10 + $0x338] sm:$0xf0] }
 0x32b   :  { %4288 = vmatpush.bf16.msra.mxu2 %v6710_v30  ;;  %v6758_v30 = vor.u32 %v7488_v27, %v6755_v28  ;;  %4588 = vmatpush.bf16.msrb.mxu0 %v7521_v2 }
 0x32e   :  { %4247 = vmatpush.bf16.msrb.mxu3 %v6818_v47  ;;  %4279 = vmatpush.bf16.msra.mxu1 %v6502_v3  ;;  %v7519_v47 = vld [vmem:[%s11169_s12 + $0x20] sm:$0xff]  ;;  %v7530_v3 = vld [vmem:[%s11169_s12 + $0x78] sm:$0xff] }
 0x32f   :  { %4289 = vmatpush.bf16.msra.mxu2 %v6694_v8  ;;  %4589 = vmatpush.bf16.msrb.mxu0 %v7520_v45  ;;  %v7517_v8 = vld [vmem:[%s11169_s12 + $0x10] sm:$0xff] }
 0x332   :  { %4248 = vmatpush.bf16.msrb.mxu3 %v6802_v13  ;;  %4280 = vmatpush.bf16.msra.mxu1 %v6486_v55  ;;  %v7526_v13 = vld [vmem:[%s11169_s12 + $0x58] sm:$0xff] }
 0x333   :  { %4290 = vmatpush.bf16.msra.mxu2 %v6678_v14  ;;  %4590 = vmatpush.bf16.msrb.mxu0 %v7519_v47  ;;  %v7538_v55 = vld [vmem:[%s11169_s12 + $0xb8] sm:$0xff] }
 0x335   :  { %4197 = vmatmul.bf16.vlgmr.msra.gmra.mxu3 %v10860_v53  ;;  %4281 = vmatmul.bf16.vlgmr.msra.gmra.mxu1 %v10635_v4  ;;  %v6754_v4 = vor.u32 %v7490_v5, %v6753_v59  ;;  %v7534_v59 = vld [vmem:[%s11169_s12 + $0x98] sm:$0xff] }
 0x336   :  { %4249 = vmatpush.bf16.msrb.mxu3 %v6786_v6  ;;  %4601 = vmatpush.bf16.msrb.mxu1 %v7530_v3  ;;  %v7536_v6 = vld [vmem:[%s11169_s12 + $0xa8] sm:$0xff] }
 0x337   :  { %4291 = vmatpush.bf16.msra.mxu2 %v6662_v16 }
 0x33a   :  { %4250 = vmatpush.bf16.msrb.mxu3 %v6770_v22  ;;  %4602 = vmatpush.bf16.msrb.mxu1 %v7529_v10  ;;  %v7542_v10 = vld [vmem:[%s11169_s12 + $0xd8] sm:$0xff] }
 0x33b   :  { %4292 = vmatpush.bf16.msra.mxu2 %v6646_v23  ;;  %v3443_v23 = vperm.slane %v11077_v18, 0 }
 0x33e   :  { %4251 = vmatpush.bf16.msrb.mxu3 %v6754_v4  ;;  %4603 = vmatpush.bf16.msrb.mxu1 %v7528_v32 }
 0x33f   :  { %4293 = vmatpush.bf16.msra.mxu2 %v6630_v31 }
 0x342   :  { %4252 = vmatpush.bf16.msrb.mxu3 %v6738_v37  ;;  %4604 = vmatpush.bf16.msrb.mxu1 %v7527_v12 }
 0x343   :  { %4294 = vmatpush.bf16.msra.mxu2 %v6614_v41  ;;  %v7532_v41 = vld [vmem:[%s11169_s12 + $0x88] sm:$0xff] }
 0x345   :  { %4253 = vmatmul.bf16.vlgmr.msrb.gmra.mxu3 %v10860_v53 }
 0x346   :  { %4301 = vmatpush.bf16.msra.mxu3 %v6854_v42  ;;  %4295 = vmatmul.bf16.vlgmr.msra.gmra.mxu2 %v10714_v51  ;;  %v6787_v51 = vld [vmem:[%s11167_s10 + $0x378] sm:$0xf0] }
 0x347   :  { %v6790_v60 = vor.u32 %v7496_v58, %v6787_v51  ;;  %4605 = vmatpush.bf16.msrb.mxu1 %v7526_v13  ;;  %4615 = vmatpush.bf16.msrb.mxu2 %v7538_v55  ;;  %v7545_v58 = vld [vmem:[%s11169_s12 + $0xf0] sm:$0xff] }
 0x34a   :  { %4302 = vmatpush.bf16.msra.mxu3 %v6838_v46 }
 0x34b   :  { %4606 = vmatpush.bf16.msrb.mxu1 %v7525_v17  ;;  %4616 = vmatpush.bf16.msrb.mxu2 %v7537_v0  ;;  %v7540_v17 = vld [vmem:[%s11169_s12 + $0xc8] sm:$0xff] }
 0x34e   :  { %4303 = vmatpush.bf16.msra.mxu3 %v6822_v52 }
 0x34f   :  { %4607 = vmatpush.bf16.msrb.mxu1 %v7524_v40  ;;  %4617 = vmatpush.bf16.msrb.mxu2 %v7536_v6 }
 0x352   :  { %4304 = vmatpush.bf16.msra.mxu3 %v6806_v57 }
 0x353   :  { %4608 = vmatpush.bf16.msrb.mxu1 %v7523_v20  ;;  %4618 = vmatpush.bf16.msrb.mxu2 %v7535_v21  ;;  %v7539_v20 = vld [vmem:[%s11169_s12 + $0xc0] sm:$0xff] }
 0x356   :  { %4305 = vmatpush.bf16.msra.mxu3 %v6790_v60 }
 0x357   :  { %4619 = vmatpush.bf16.msrb.mxu2 %v7534_v59 }
 0x35a   :  { %4306 = vmatpush.bf16.msra.mxu3 %v6774_v29 }
 0x35b   :  { %4620 = vmatpush.bf16.msrb.mxu2 %v7533_v33 }
 0x35e   :  { %4307 = vmatpush.bf16.msra.mxu3 %v6758_v30 }
 0x35f   :  { %4621 = vmatpush.bf16.msrb.mxu2 %v7532_v41 }
 0x362   :  { %4308 = vmatpush.bf16.msra.mxu3 %v6742_v1  ;;  %v4100_v39 = vpop.f32.mrf.mxu0 }
 0x363   :  { %v4101_v25 = vadd.f32 %v4100_v39, %v3443_v23  ;;  %4622 = vmatpush.bf16.msrb.mxu2 %v7531_v48 }
 0x365   :  { %4309 = vmatmul.bf16.vlgmr.msra.gmra.mxu3 %v10860_v53  ;;  %v7518_v53 = vld [vmem:[%s11169_s12 + $0x18] sm:$0xff] }
 0x366   :  { %4591 = vmatpush.bf16.msrb.mxu0 %v7518_v53  ;;  %4629 = vmatpush.bf16.msrb.mxu3 %v7546_v49 }
 0x36a   :  { %4592 = vmatpush.bf16.msrb.mxu0 %v7517_v8  ;;  %v4102_v16 = vpop.f32.mrf.mxu0  ;;  %4630 = vmatpush.bf16.msrb.mxu3 %v7545_v58  ;;  %v4643_v58 = vlaneseq }
 0x36b   :  { %v4103_v4 = vadd.f32 %v4102_v16, %v3443_v23 }
 0x36e   :  { %4593 = vmatpush.bf16.msrb.mxu0 %v7516_v62  ;;  %4631 = vmatpush.bf16.msrb.mxu3 %v7544_v61  ;;  %v3445_v62 = vperm.slane %v11077_v18, 2 }
 0x372   :  { %4594 = vmatpush.bf16.msrb.mxu0 %v7515_v11  ;;  %v4114_v14 = vpop.f32.mrf.mxu1  ;;  %v4156_v26 = vpop.f32.mrf.mxu0  ;;  %4632 = vmatpush.bf16.msrb.mxu3 %v7543_v50  ;;  %v7541_v11 = vld [vmem:[%s11169_s12 + $0xd0] sm:$0xff] }
 0x373   :  { %v4115_v31 = vadd.f32 %v4114_v14, %v4101_v25  ;;  %v4157_v38 = vadd.f32 %v4156_v26, %v3444_v56 }
 0x376   :  { %4633 = vmatpush.bf16.msrb.mxu3 %v7542_v10 }
 0x37a   :  { %v4116_v54 = vpop.f32.mrf.mxu1  ;;  %v4158_v52 = vpop.f32.mrf.mxu0  ;;  %4634 = vmatpush.bf16.msrb.mxu3 %v7541_v11 }
 0x37b   :  { %v4117_v24 = vadd.f32 %v4116_v54, %v4103_v4  ;;  %v4159_v29 = vadd.f32 %v4158_v52, %v3444_v56 }
 0x37e   :  { %4635 = vmatpush.bf16.msrb.mxu3 %v7540_v17 }
 0x382   :  { %v4170_v34 = vpop.f32.mrf.mxu1  ;;  %4636 = vmatpush.bf16.msrb.mxu3 %v7539_v20 }
 0x383   :  { %v4171_v27 = vadd.f32 %v4170_v34, %v4157_v38  ;;  %v11128_v38 = vand.u32 127, %v4643_v58 }
 0x384   :  { %v4212_v63 = vpop.f32.mrf.mxu0 }
 0x385   :  { %v4213_v13 = vadd.f32 %v4212_v63, %v3445_v62  ;;  %vm4668_vm1 = vcmp.eq.s32.totalorder %v11128_v38, 17  ;;  %vm4645_vm2 = vcmp.lt.s32.totalorder %v11128_v38, 17 }
 0x388   :  { %v4128_v15 = vpop.f32.mrf.mxu2 }
 0x389   :  { %v4129_v35 = vadd.f32 %v4128_v15, %v4115_v31  ;;  %v3446_v31 = vperm.slane %v11077_v18, 3  ;;  %v7547_v18 = vld [vmem:[%s11170_s13] ss:$0 sm:$0xff] }
 0x38a   :  { %v4172_v57 = vpop.f32.mrf.mxu1 }
 0x38b   :  { %v4173_v28 = vadd.f32 %v4172_v57, %v4159_v29 }
 0x38c   :  { %v4214_v12 = vpop.f32.mrf.mxu0 }
 0x38d   :  { %v4215_v14 = vadd.f32 %v4214_v12, %v3445_v62 }
 0x390   :  { %v4130_v22 = vpop.f32.mrf.mxu2 }
 0x391   :  { %v4131_v7 = vadd.f32 %v4130_v22, %v4117_v24 }
 0x392   :  { %v4226_v2 = vpop.f32.mrf.mxu1 }
 0x393   :  { %v4227_v15 = vadd.f32 %v4226_v2, %v4213_v13 }
 0x398   :  { %v4184_v36 = vpop.f32.mrf.mxu2 }
 0x399   :  { %v4185_v30 = vadd.f32 %v4184_v36, %v4171_v27 }
 0x39a   :  { %v4228_v55 = vpop.f32.mrf.mxu1 }
 0x39b   :  { %v4229_v40 = vadd.f32 %v4228_v55, %v4215_v14 }
 0x3a0   :  { %v4186_v51 = vpop.f32.mrf.mxu2 }
 0x3a1   :  { %v4187_v1 = vadd.f32 %v4186_v51, %v4173_v28 }
 0x3a2   :  { %v4268_v25 = vpop.f32.mrf.mxu0 }
 0x3a3   :  { %v4269_v24 = vadd.f32 %v4268_v25, %v3446_v31 }
 0x3a8   :  { %v4142_v5 = vpop.f32.mrf.mxu3 }
 0x3a9   :  { %v4143_v37 = vadd.f32 %v4142_v5, %v4129_v35 }
 0x3aa   :  { %v4270_v33 = vpop.f32.mrf.mxu0 }
 0x3ab   :  { %v4315_v9 = vmax.f32 %v4143_v37, 0.0  ;;  %v4240_v53 = vpop.f32.mrf.mxu2  ;;  %v4271_v36 = vadd.f32 %v4270_v33, %v3446_v31 }
 0x3ac   :  { %v4241_v6 = vadd.f32 %v4240_v53, %v4227_v15 }
 0x3b0   :  { %v4144_v42 = vpop.f32.mrf.mxu3 }
 0x3b1   :  { %v4145_v44 = vadd.f32 %v4144_v42, %v4131_v7 }
 0x3b2   :  { %v4282_v26 = vpop.f32.mrf.mxu1 }
 0x3b3   :  { %v4319_v46 = vmax.f32 %v4145_v44, 0.0  ;;  %v4242_v0 = vpop.f32.mrf.mxu2  ;;  %v4283_v7 = vadd.f32 %v4282_v26, %v4269_v24 }
 0x3b4   :  { %v4243_v16 = vadd.f32 %v4242_v0, %v4229_v40 }
 0x3b5   :  { %v4323_v19 = vpack.c.bf16 %v4319_v46, %v4315_v9 }
 0x3b7   :  { %4595 = vmatmul.bf16.vlgmr.msrb.gmra.mxu0 %v4323_v19 }
 0x3b8   :  { %v4198_v60 = vpop.f32.mrf.mxu3 }
 0x3b9   :  { %v4199_v43 = vadd.f32 %v4198_v60, %v4185_v30 }
 0x3ba   :  { %v4284_v35 = vpop.f32.mrf.mxu1 }
 0x3bb   :  { %v4316_v3 = vmax.f32 %v4199_v43, 0.0  ;;  %v4285_v41 = vadd.f32 %v4284_v35, %v4271_v36 }
 0x3c0   :  { %v4200_v45 = vpop.f32.mrf.mxu3 }
 0x3c1   :  { %v4201_v47 = vadd.f32 %v4200_v45, %v4187_v1 }
 0x3c3   :  { %v4320_v8 = vmax.f32 %v4201_v47, 0.0 }
 0x3c5   :  { %v4324_v32 = vpack.c.bf16 %v4320_v8, %v4316_v3 }
 0x3c7   :  { %4609 = vmatmul.bf16.vlgmr.msrb.gmra.mxu1 %v4324_v32 }
 0x3c8   :  { %v4254_v39 = vpop.f32.mrf.mxu3 }
 0x3c9   :  { %v4255_v54 = vadd.f32 %v4254_v39, %v4241_v6  ;;  %v4296_v4 = vpop.f32.mrf.mxu2 }
 0x3ca   :  { %v4297_v42 = vadd.f32 %v4296_v4, %v4283_v7 }
 0x3cb   :  { %v4317_v23 = vmax.f32 %v4255_v54, 0.0 }
 0x3d0   :  { %v4256_v21 = vpop.f32.mrf.mxu3 }
 0x3d1   :  { %v4257_v22 = vadd.f32 %v4256_v21, %v4243_v16  ;;  %v4298_v37 = vpop.f32.mrf.mxu2 }
 0x3d2   :  { %v4299_v44 = vadd.f32 %v4298_v37, %v4285_v41 }
 0x3d3   :  { %v4321_v59 = vmax.f32 %v4257_v22, 0.0 }
 0x3d5   :  { %v4325_v5 = vpack.c.bf16 %v4321_v59, %v4317_v23 }
 0x3d7   :  { %4623 = vmatmul.bf16.vlgmr.msrb.gmra.mxu2 %v4325_v5 }
 0x3e8   :  { %v4310_v34 = vpop.f32.mrf.mxu3 }
 0x3e9   :  { %v4311_v9 = vadd.f32 %v4310_v34, %v4297_v42 }
 0x3eb   :  { %v4318_v49 = vmax.f32 %v4311_v9, 0.0 }
 0x3f0   :  { %v4312_v46 = vpop.f32.mrf.mxu3 }
 0x3f1   :  { %v4313_v48 = vadd.f32 %v4312_v46, %v4299_v44 }
 0x3f3   :  { %v4322_v52 = vmax.f32 %v4313_v48, 0.0 }
 0x3f5   :  { %v4326_v56 = vpack.c.bf16 %v4322_v52, %v4318_v49 }
 0x3f7   :  { %4637 = vmatmul.bf16.vlgmr.msrb.gmra.mxu3 %v4326_v56 }
 0x434   :  { %v4596_v19 = vpop.f32.mrf.mxu0 }
 0x435   :  { %v4597_v60 = vadd.f32 %v7547_v18, %v4596_v19 }
 0x43c   :  { %v4598_v27 = vpop.f32.mrf.mxu0 }
 0x43d   :  { %v4599_v63 = vadd.f32 %v7547_v18, %v4598_v27 }
 0x444   :  { %v4610_v57 = vpop.f32.mrf.mxu1 }
 0x445   :  { %v4611_v61 = vadd.f32 %v4610_v57, %v4597_v60 }
 0x44c   :  { %v4612_v50 = vpop.f32.mrf.mxu1 }
 0x44d   :  { %v4613_v45 = vadd.f32 %v4612_v50, %v4599_v63 }
 0x45a   :  { %v4624_v51 = vpop.f32.mrf.mxu2 }
 0x45b   :  { %v4625_v29 = vadd.f32 %v4624_v51, %v4611_v61 }
 0x462   :  { %v4626_v2 = vpop.f32.mrf.mxu2 }
 0x463   :  { %v4627_v47 = vadd.f32 %v4626_v2, %v4613_v45 }
 0x47a   :  { %v4638_v28 = vpop.f32.mrf.mxu3 }
 0x47b   :  { %v4639_v30 = vadd.f32 %v4638_v28, %v4625_v29 }
 0x47d   :  { %v4669_v1 = vsel %vm4668_vm1, %v4639_v30, -1e+30  ;;  %v4646_v43 = vsel %vm4645_vm2, %v4639_v30, -1e+30 }
 0x47e   :  { %4671 = vmax.xlane.f32.xlu1 %v4669_v1  ;;  %4648 = vmax.xlane.f32.xlu0 %v4646_v43 }
 0x482   :  { %v4640_v53 = vpop.f32.mrf.mxu3 }
 0x483   :  { %v4641_v3 = vadd.f32 %v4640_v53, %v4627_v47 }
 0x485   :  { %v4670_v8 = vsel %vm4668_vm1, %v4641_v3, -1e+30  ;;  %v4647_v10 = vsel %vm4645_vm2, %v4641_v3, -1e+30 }
 0x486   :  { %4673 = vmax.xlane.f32.xlu1 %v4670_v8  ;;  %4650 = vmax.xlane.f32.xlu0 %v4647_v10 }
 0x4f1   :  { %v4649_v62 = vpop.xlane.xlu0 %4648  ;;  %v4672_v15 = vpop.xlane.xlu1 %4671 }
 0x4f2   :  { %v4652_v32 = vsub.f32 %v4646_v43, %v4649_v62  ;;  %v4675_v17 = vsub.f32 0.0, %v4672_v15 }
 0x4f4   :  { %v4654_v11 = vmul.f32 1.442695, %v4652_v32  ;;  %v4677_v0 = vmul.f32 1.442695, %v4675_v17 }
 0x4f6   :  { %7548 = vpow2.f32 %v4654_v11 }
 0x4f9   :  { %v4651_v12 = vpop.xlane.xlu0 %4650  ;;  %v4674_v40 = vpop.xlane.xlu1 %4673 }
 0x4fa   :  { %v11140_v39 = vsub.f32 %v4647_v10, %v4651_v12  ;;  %v4676_v6 = vsub.f32 0.0, %v4674_v40 }
 0x4fc   :  { %v4656_v13 = vmul.f32 1.442695, %v11140_v39  ;;  %v7549_v55 = vpop.eup %7548  ;;  %v4679_v16 = vmul.f32 1.442695, %v4676_v6 }
 0x4fd   :  { %4658 = vadd.xlane.f32.xlu2 %v7549_v55 }
 0x4fe   :  { %7550 = vpow2.f32 %v4656_v13 }
 0x4ff   :  { %7552 = vpow2.f32 %v4677_v0 }
 0x500   :  { %7554 = vpow2.f32 %v4679_v16 }
 0x504   :  { %v7551_v14 = vpop.eup %7550 }
 0x505   :  { %4660 = vadd.xlane.f32.xlu2 %v7551_v14  ;;  %v7553_v54 = vpop.eup %7552 }
 0x506   :  { %v4681_v20 = vadd.f32 1.0, %v7553_v54  ;;  %v7555_v21 = vpop.eup %7554 }
 0x507   :  { %v4682_v22 = vadd.f32 1.0, %v7555_v21 }
 0x508   :  { %7556 = vrcp.f32 %v4681_v20  ;;  %v4694_v34 = vand.u32 2147483648, %v4681_v20  ;;  %vm4688_vm4 = vweird.f32 %v4681_v20  ;;  %v4692_v35 = vand.u32 2147483647, %v4681_v20 }
 0x509   :  { %7558 = vrcp.f32 %v4682_v22  ;;  %v4709_v49 = vand.u32 2147483648, %v4682_v22  ;;  %vm4703_vm8 = vweird.f32 %v4682_v22  ;;  %v4707_v19 = vand.u32 2147483647, %v4682_v22 }
 0x50a   :  { %v4695_v7 = vor.u32 1.1754944e-38, %v4694_v34  ;;  %vm4693_vm6 = vcmp.eq.f32.partialorder %v4692_v35, 8.507059e+37 }
 0x50b   :  { %v4710_v57 = vor.u32 1.1754944e-38, %v4709_v49  ;;  %vm4708_vm10 = vcmp.eq.f32.partialorder %v4707_v19, 8.507059e+37 }
 0x50e   :  { %v7557_v23 = vpop.eup %7556 }
 0x50f   :  { %v4684_v59 = vmul.f32 %v7557_v23, %v4681_v20  ;;  %v7559_v25 = vpop.eup %7558  ;;  %vm4689_vm3 = vweird.f32 %v7557_v23 }
 0x510   :  { %v4699_v4 = vmul.f32 %v7559_v25, %v4682_v22  ;;  %vm4690_vm5 = vmor %vm4688_vm4, %vm4689_vm3  ;;  %vm4704_vm7 = vweird.f32 %v7559_v25 }
 0x511   :  { %v4685_v5 = vsub.f32 1.0, %v4684_v59  ;;  %vm4705_vm9 = vmor %vm4703_vm8, %vm4704_vm7 }
 0x512   :  { %v4700_v24 = vsub.f32 1.0, %v4699_v4 }
 0x513   :  { %v4686_v26 = vmul.f32 %v7557_v23, %v4685_v5 }
 0x514   :  { %v4701_v37 = vmul.f32 %v7559_v25, %v4700_v24 }
 0x515   :  { %v4687_v33 = vadd.f32 %v7557_v23, %v4686_v26 }
 0x516   :  { %v4702_v48 = vadd.f32 %v7559_v25, %v4701_v37 }
 0x517   :  { %v4691_v36 = vsel %vm4690_vm5, %v7557_v23, %v4687_v33 }
 0x518   :  { %v4696_v42 = vsel %vm4693_vm6, %v4695_v7, %v4691_v36  ;;  %v4706_v18 = vsel %vm4705_vm9, %v7559_v25, %v4702_v48 }
 0x519   :  { %v4713_v52 = vsel %vm4668_vm1, %v4696_v42, 0.0  ;;  %v4711_v51 = vsel %vm4708_vm10, %v4710_v57, %v4706_v18 }
 0x51a   :  { %v4714_v29 = vsel %vm4668_vm1, %v4711_v51, 0.0 }
 0x570   :  { %v4659_v31 = vpop.xlane.xlu2 %4658 }
 0x571   :  { %7560 = vlog2.f32 %v4659_v31 }
 0x577   :  { %v7561_v41 = vpop.eup %7560 }
 0x578   :  { %v4663_v44 = vmul.f32 0.6931472, %v7561_v41  ;;  %v4661_v9 = vpop.xlane.xlu2 %4660 }
 0x579   :  { %7562 = vlog2.f32 %v4661_v9 }
 0x57a   :  { %v4666_v46 = vsub.f32 %v4652_v32, %v4663_v44 }
 0x57c   :  { %v4715_v56 = vsel %vm4645_vm2, %v4666_v46, %v4713_v52 }
 0x57d   :  { %4717 = vst [vmem:[%s11172_s14] sm:$0xff] %v4715_v56 }
 0x57f   :  { %v7563_v58 = vpop.eup %7562 }
 0x580   :  { %v4665_v60 = vmul.f32 0.6931472, %v7563_v58 }
 0x582   :  { %v4667_v61 = vsub.f32 %v11140_v39, %v4665_v60 }
 0x584   :  { %v4716_v27 = vsel %vm4645_vm2, %v4667_v61, %v4714_v29 }
 0x585   :  { %4718 = vst [vmem:[%s11172_s14 + $0x8] sm:$0xff] %v4716_v27 }

// kernel: _forward_impl.1
= control target key start
LH: loop header
LB: loop body
LE: loop exit
PB: predicated region body
PF: predicated region fallthrough
CT: control target
= control target key end

     0   :  { %vm181_vm0 = vcmask 654336   ;;  %s11158_s1 = inlined_call_operand.vmem [shape: bf16[80,512], index: 1, kind: input, shape index: {}]   ;;  %s11159_s0 = inlined_call_operand.vmem [shape: f32[16,80], index: 0, kind: input, shape index: {}]   ;;  %s11160_s4 = inlined_call_operand.vmem [shape: bf16[512,512], index: 4, kind: input, shape index: {}]   ;;  %s11161_s2 = inlined_call_operand.vmem [shape: f32[1,512], index: 2, kind: input, shape index: {}]   ;;  %s11162_s3 = inlined_call_operand.vmem [shape: f32[1,512], index: 3, kind: input, shape index: {}]   ;;  %s11163_s6 = inlined_call_operand.vmem [shape: bf16[512,512], index: 6, kind: input, shape index: {}]   ;;  %s11164_s5 = inlined_call_operand.vmem [shape: f32[1,512], index: 5, kind: input, shape index: {}]   ;;  %s11165_s8 = inlined_call_operand.vmem [shape: bf16[512,512], index: 8, kind: input, shape index: {}]   ;;  %s11166_s7 = inlined_call_operand.vmem [shape: f32[1,512], index: 7, kind: input, shape index: {}]   ;;  %s11167_s10 = inlined_call_operand.vmem [shape: bf16[512,512], index: 10, kind: input, shape index: {}]   ;;  %s11168_s9 = inlined_call_operand.vmem [shape: f32[1,512], index: 9, kind: input, shape index: {}]   ;;  %s11169_s12 = inlined_call_operand.vmem [shape: bf16[512,128], index: 12, kind: input, shape index: {}]   ;;  %s11170_s13 = inlined_call_operand.vmem [shape: f32[1,128], index: 13, kind: input, shape index: {}]   ;;  %s11171_s11 = inlined_call_operand.vmem [shape: f32[1,512], index: 11, kind: input, shape index: {}]   ;;  %s11172_s14 = inlined_call_operand.vmem [shape: f32[16,128], index: 14, kind: output, shape index: {}]  }
   0x1   :  { %v4789_v0 = vld [vmem:[%s11158_s1 + $0x80] sm:$0xf]  ;;  %v7001_v1 = vld [vmem:[%s11158_s1 + $0x8c] sm:$0xf0]  ;;  %v6999_v2 = vld [vmem:[%s11158_s1 + $0x84] sm:$0xf] }
   0x2   :  { %v4790_v3 = vor.u32 %v7001_v1, %v4789_v0  ;;  %v4791_v4 = vld [vmem:[%s11158_s1 + $0x90] sm:$0xf0]  ;;  %v4797_v5 = vld [vmem:[%s11158_s1 + $0x88] sm:$0xf]  ;;  %v7002_v6 = vld [vmem:[%s11158_s1 + $0x94] sm:$0xf0] }
   0x3   :  { %v4794_v7 = vor.u32 %v6999_v2, %v4791_v4  ;;  %v4798_v8 = vor.u32 %v7002_v6, %v4797_v5  ;;  %v7000_v9 = vld [vmem:[%s11158_s1 + $0x8c] sm:$0xf]  ;;  %v4799_v10 = vld [vmem:[%s11158_s1 + $0x98] sm:$0xf0]  ;;  %v4773_v11 = vld [vmem:[%s11158_s1 + $0x60] sm:$0xf] }
   0x4   :  { %188 = vmatpush.bf16.msra.mxu0 %v4790_v3  ;;  %v4802_v12 = vor.u32 %v7000_v9, %v4799_v10  ;;  %v6997_v13 = vld [vmem:[%s11158_s1 + $0x6c] sm:$0xf0]  ;;  %v6995_v14 = vld [vmem:[%s11158_s1 + $0x64] sm:$0xf]  ;;  %v4775_v15 = vld [vmem:[%s11158_s1 + $0x70] sm:$0xf0] }
   0x5   :  { %202 = vmatpush.bf16.msra.mxu1 %v4794_v7  ;;  %216 = vmatpush.bf16.msra.mxu2 %v4798_v8  ;;  %v4774_v16 = vor.u32 %v6997_v13, %v4773_v11  ;;  %v4778_v17 = vor.u32 %v6995_v14, %v4775_v15  ;;  %v4781_v18 = vld [vmem:[%s11158_s1 + $0x68] sm:$0xf]  ;;  %v6998_v19 = vld [vmem:[%s11158_s1 + $0x74] sm:$0xf0]  ;;  %v6996_v20 = vld [vmem:[%s11158_s1 + $0x6c] sm:$0xf] }
   0x6   :  { %230 = vmatpush.bf16.msra.mxu3 %v4802_v12  ;;  %v4782_v21 = vor.u32 %v6998_v19, %v4781_v18  ;;  %v4783_v22 = vld [vmem:[%s11158_s1 + $0x78] sm:$0xf0]  ;;  %v4757_v23 = vld [vmem:[%s11158_s1 + $0x40] sm:$0xf]  ;;  %v6993_v24 = vld [vmem:[%s11158_s1 + $0x4c] sm:$0xf0] }
   0x7   :  { %v4786_v25 = vor.u32 %v6996_v20, %v4783_v22  ;;  %v6991_v26 = vld [vmem:[%s11158_s1 + $0x44] sm:$0xf]  ;;  %v4759_v27 = vld [vmem:[%s11158_s1 + $0x50] sm:$0xf0]  ;;  %v4765_v28 = vld [vmem:[%s11158_s1 + $0x48] sm:$0xf]  ;;  %v4758_v29 = vor.u32 %v6993_v24, %v4757_v23 }
   0x8   :  { %189 = vmatpush.bf16.msra.mxu0 %v4774_v16  ;;  %v6994_v30 = vld [vmem:[%s11158_s1 + $0x54] sm:$0xf0]  ;;  %v6992_v31 = vld [vmem:[%s11158_s1 + $0x4c] sm:$0xf]  ;;  %v4767_v32 = vld [vmem:[%s11158_s1 + $0x58] sm:$0xf0]  ;;  %v4762_v33 = vor.u32 %v6991_v26, %v4759_v27 }
   0x9   :  { %203 = vmatpush.bf16.msra.mxu1 %v4778_v17  ;;  %217 = vmatpush.bf16.msra.mxu2 %v4782_v21  ;;  %v4766_v34 = vor.u32 %v6994_v30, %v4765_v28  ;;  %v4741_v35 = vld [vmem:[%s11158_s1 + $0x20] sm:$0xf]  ;;  %v6989_v36 = vld [vmem:[%s11158_s1 + $0x2c] sm:$0xf0]  ;;  %v6987_v37 = vld [vmem:[%s11158_s1 + $0x24] sm:$0xf]  ;;  %v4770_v38 = vor.u32 %v6992_v31, %v4767_v32 }
   0xa   :  { %231 = vmatpush.bf16.msra.mxu3 %v4786_v25  ;;  %v4743_v39 = vld [vmem:[%s11158_s1 + $0x30] sm:$0xf0]  ;;  %v4749_v40 = vld [vmem:[%s11158_s1 + $0x28] sm:$0xf]  ;;  %v6990_v41 = vld [vmem:[%s11158_s1 + $0x34] sm:$0xf0]  ;;  %v4742_v44 = vor.u32 %v6989_v36, %v4741_v35 }
   0xb   :  { %v6988_v42 = vld [vmem:[%s11158_s1 + $0x2c] sm:$0xf]  ;;  %v4751_v43 = vld [vmem:[%s11158_s1 + $0x38] sm:$0xf0]  ;;  %v4725_v45 = vld [vmem:[%s11158_s1] sm:$0xf]  ;;  %v4746_v47 = vor.u32 %v6987_v37, %v4743_v39  ;;  %v4750_v48 = vor.u32 %v6990_v41, %v4749_v40 }
   0xc   :  { %190 = vmatpush.bf16.msra.mxu0 %v4758_v29  ;;  %v6985_v46 = vld [vmem:[%s11158_s1 + $0xc] sm:$0xf0]  ;;  %v6983_v49 = vld [vmem:[%s11158_s1 + $0x4] sm:$0xf]  ;;  %v4727_v50 = vld [vmem:[%s11158_s1 + $0x10] sm:$0xf0]  ;;  %v4754_v52 = vor.u32 %v6988_v42, %v4751_v43 }
   0xd   :  { %204 = vmatpush.bf16.msra.mxu1 %v4762_v33  ;;  %218 = vmatpush.bf16.msra.mxu2 %v4766_v34  ;;  %v4733_v51 = vld [vmem:[%s11158_s1 + $0x8] sm:$0xf]  ;;  %v6986_v53 = vld [vmem:[%s11158_s1 + $0x14] sm:$0xf0]  ;;  %v6984_v54 = vld [vmem:[%s11158_s1 + $0xc] sm:$0xf]  ;;  %v4726_v59 = vor.u32 %v6985_v46, %v4725_v45  ;;  %v4730_v63 = vor.u32 %v6983_v49, %v4727_v50 }
   0xe   :  { %232 = vmatpush.bf16.msra.mxu3 %v4770_v38  ;;  %v4735_v55 = vld [vmem:[%s11158_s1 + $0x18] sm:$0xf0]  ;;  %v48_v56 = vld [vmem:[%s11159_s0] sm:$0xff]  ;;  %v7033_v58 = vld [vmem:[%s11160_s4 + $0xec] sm:$0xf0]  ;;  %v4734_v0 = vor.u32 %v6986_v53, %v4733_v51 }
   0xf   :  { %v4921_v57 = vld [vmem:[%s11160_s4 + $0xe0] sm:$0xf]  ;;  %v49_v60 = vld [vmem:[%s11159_s0 + $0x8] sm:$0xff]  ;;  %v7065_v62 = vld [vmem:[%s11160_s4 + $0x1ec] sm:$0xf0]  ;;  %v4738_v1 = vor.u32 %v6984_v54, %v4735_v55 }
  0x10   :  { %191 = vmatpush.bf16.msra.mxu0 %v4742_v44  ;;  %v5049_v61 = vld [vmem:[%s11160_s4 + $0x1e0] sm:$0xf]  ;;  %v4922_v2 = vor.u32 %v7033_v58, %v4921_v57  ;;  %v7097_v5 = vld [vmem:[%s11160_s4 + $0x2ec] sm:$0xf0]  ;;  %v50_v6 = vpack.c.bf16 %v49_v60, %v48_v56 }
  0x11   :  { %205 = vmatpush.bf16.msra.mxu1 %v4746_v47  ;;  %219 = vmatpush.bf16.msra.mxu2 %v4750_v48  ;;  %v4905_v3 = vld [vmem:[%s11160_s4 + $0xc0] sm:$0xf]  ;;  %v5050_v7 = vor.u32 %v7065_v62, %v5049_v61  ;;  %v7029_v8 = vld [vmem:[%s11160_s4 + $0xcc] sm:$0xf0] }
  0x12   :  { %233 = vmatpush.bf16.msra.mxu3 %v4754_v52  ;;  %v5177_v4 = vld [vmem:[%s11160_s4 + $0x2e0] sm:$0xf]  ;;  %v7129_v10 = vld [vmem:[%s11160_s4 + $0x3ec] sm:$0xf0]  ;;  %v4906_v14 = vor.u32 %v7029_v8, %v4905_v3 }
  0x13   :  { %v5305_v9 = vld [vmem:[%s11160_s4 + $0x3e0] sm:$0xf]  ;;  %v7061_v12 = vld [vmem:[%s11160_s4 + $0x1cc] sm:$0xf0]  ;;  %v5178_v13 = vor.u32 %v7097_v5, %v5177_v4 }
  0x14   :  { %192 = vmatpush.bf16.msra.mxu0 %v4726_v59  ;;  %v5033_v11 = vld [vmem:[%s11160_s4 + $0x1c0] sm:$0xf]  ;;  %v5306_v15 = vor.u32 %v7129_v10, %v5305_v9  ;;  %v7093_v18 = vld [vmem:[%s11160_s4 + $0x2cc] sm:$0xf0] }
  0x15   :  { %206 = vmatpush.bf16.msra.mxu1 %v4730_v63  ;;  %220 = vmatpush.bf16.msra.mxu2 %v4734_v0  ;;  %v4889_v16 = vld [vmem:[%s11160_s4 + $0xa0] sm:$0xf]  ;;  %v5034_v19 = vor.u32 %v7061_v12, %v5033_v11  ;;  %v7025_v20 = vld [vmem:[%s11160_s4 + $0xac] sm:$0xf0] }
  0x16   :  { %234 = vmatpush.bf16.msra.mxu3 %v4738_v1  ;;  %v5161_v17 = vld [vmem:[%s11160_s4 + $0x2c0] sm:$0xf]  ;;  %v7125_v22 = vld [vmem:[%s11160_s4 + $0x3cc] sm:$0xf0]  ;;  %v4890_v26 = vor.u32 %v7025_v20, %v4889_v16 }
  0x17   :  { %4803 = vmatmul.msk.bf16.vlgmr.msra.gmra.mxu0 %vm181_vm0, %v50_v6  ;;  %v5289_v21 = vld [vmem:[%s11160_s4 + $0x3c0] sm:$0xf]  ;;  %v7057_v24 = vld [vmem:[%s11160_s4 + $0x1ac] sm:$0xf0]  ;;  %v5162_v25 = vor.u32 %v7093_v18, %v5161_v17 }
  0x18   :  { %1049 = vmatpush.bf16.msrb.mxu0 %v4922_v2  ;;  %4804 = vmatmul.msk.bf16.vlgmr.msra.gmra.mxu1 %vm181_vm0, %v50_v6  ;;  %v5017_v23 = vld [vmem:[%s11160_s4 + $0x1a0] sm:$0xf]  ;;  %v5290_v27 = vor.u32 %v7125_v22, %v5289_v21  ;;  %v7089_v30 = vld [vmem:[%s11160_s4 + $0x2ac] sm:$0xf0]  ;;  %v7031_v21 = vld [vmem:[%s11160_s4 + $0xe4] sm:$0xf] }
  0x19   :  { %1063 = vmatpush.bf16.msrb.mxu1 %v5050_v7  ;;  %4805 = vmatmul.msk.bf16.vlgmr.msra.gmra.mxu2 %vm181_vm0, %v50_v6  ;;  %v4873_v28 = vld [vmem:[%s11160_s4 + $0x80] sm:$0xf]  ;;  %v5018_v31 = vor.u32 %v7057_v24, %v5017_v23  ;;  %v7021_v32 = vld [vmem:[%s11160_s4 + $0x8c] sm:$0xf0]  ;;  %v4923_v22 = vld [vmem:[%s11160_s4 + $0xf0] sm:$0xf0] }
  0x1a   :  { %4806 = vmatmul.msk.bf16.vlgmr.msra.gmra.mxu3 %vm181_vm0, %v50_v6  ;;  %1077 = vmatpush.bf16.msrb.mxu2 %v5178_v13  ;;  %v5145_v29 = vld [vmem:[%s11160_s4 + $0x2a0] sm:$0xf]  ;;  %v7121_v34 = vld [vmem:[%s11160_s4 + $0x3ac] sm:$0xf0]  ;;  %v4874_v38 = vor.u32 %v7021_v32, %v4873_v28  ;;  %v7063_v23 = vld [vmem:[%s11160_s4 + $0x1e4] sm:$0xf] }
  0x1b   :  { %1091 = vmatpush.bf16.msrb.mxu3 %v5306_v15  ;;  %v5273_v33 = vld [vmem:[%s11160_s4 + $0x3a0] sm:$0xf]  ;;  %v7053_v36 = vld [vmem:[%s11160_s4 + $0x18c] sm:$0xf0]  ;;  %v5146_v37 = vor.u32 %v7089_v30, %v5145_v29  ;;  %v5051_v24 = vld [vmem:[%s11160_s4 + $0x1f0] sm:$0xf0] }
  0x1c   :  { %1050 = vmatpush.bf16.msrb.mxu0 %v4906_v14  ;;  %v5001_v35 = vld [vmem:[%s11160_s4 + $0x180] sm:$0xf]  ;;  %v5274_v39 = vor.u32 %v7121_v34, %v5273_v33  ;;  %v7085_v42 = vld [vmem:[%s11160_s4 + $0x28c] sm:$0xf0]  ;;  %v7027_v28 = vld [vmem:[%s11160_s4 + $0xc4] sm:$0xf]  ;;  %v4926_v33 = vor.u32 %v7031_v21, %v4923_v22 }
  0x1d   :  { %1064 = vmatpush.bf16.msrb.mxu1 %v5034_v19  ;;  %v4857_v40 = vld [vmem:[%s11160_s4 + $0x60] sm:$0xf]  ;;  %v5002_v43 = vor.u32 %v7053_v36, %v5001_v35  ;;  %v7017_v44 = vld [vmem:[%s11160_s4 + $0x6c] sm:$0xf0]  ;;  %v7095_v35 = vld [vmem:[%s11160_s4 + $0x2e4] sm:$0xf] }
  0x1e   :  { %1078 = vmatpush.bf16.msrb.mxu2 %v5162_v25  ;;  %v5129_v41 = vld [vmem:[%s11160_s4 + $0x280] sm:$0xf]  ;;  %v7117_v46 = vld [vmem:[%s11160_s4 + $0x38c] sm:$0xf0]  ;;  %v4858_v50 = vor.u32 %v7017_v44, %v4857_v40  ;;  %v5179_v36 = vld [vmem:[%s11160_s4 + $0x2f0] sm:$0xf0] }
  0x1f   :  { %1092 = vmatpush.bf16.msrb.mxu3 %v5290_v27  ;;  %v5257_v45 = vld [vmem:[%s11160_s4 + $0x380] sm:$0xf]  ;;  %v7049_v48 = vld [vmem:[%s11160_s4 + $0x16c] sm:$0xf0]  ;;  %v5130_v49 = vor.u32 %v7085_v42, %v5129_v41  ;;  %v5307_v40 = vld [vmem:[%s11160_s4 + $0x3f0] sm:$0xf0] }
  0x20   :  { %1051 = vmatpush.bf16.msrb.mxu0 %v4890_v26  ;;  %v4985_v47 = vld [vmem:[%s11160_s4 + $0x160] sm:$0xf]  ;;  %v5258_v51 = vor.u32 %v7117_v46, %v5257_v45  ;;  %v7081_v54 = vld [vmem:[%s11160_s4 + $0x26c] sm:$0xf0]  ;;  %v7059_v41 = vld [vmem:[%s11160_s4 + $0x1c4] sm:$0xf]  ;;  %v5182_v45 = vor.u32 %v7095_v35, %v5179_v36 }
  0x21   :  { %1065 = vmatpush.bf16.msrb.mxu1 %v5018_v31  ;;  %v4841_v52 = vld [vmem:[%s11160_s4 + $0x40] sm:$0xf]  ;;  %v4986_v55 = vor.u32 %v7049_v48, %v4985_v47  ;;  %v7013_v56 = vld [vmem:[%s11160_s4 + $0x4c] sm:$0xf0]  ;;  %v5035_v42 = vld [vmem:[%s11160_s4 + $0x1d0] sm:$0xf0] }
  0x22   :  { %1079 = vmatpush.bf16.msrb.mxu2 %v5146_v37  ;;  %v5113_v53 = vld [vmem:[%s11160_s4 + $0x260] sm:$0xf]  ;;  %v7113_v58 = vld [vmem:[%s11160_s4 + $0x36c] sm:$0xf0]  ;;  %v4842_v62 = vor.u32 %v7013_v56, %v4841_v52  ;;  %v5054_v37 = vor.u32 %v7063_v23, %v5051_v24  ;;  %v7023_v48 = vld [vmem:[%s11160_s4 + $0xa4] sm:$0xf] }
  0x23   :  { %1093 = vmatpush.bf16.msrb.mxu3 %v5274_v39  ;;  %v5241_v57 = vld [vmem:[%s11160_s4 + $0x360] sm:$0xf]  ;;  %v7045_v60 = vld [vmem:[%s11160_s4 + $0x14c] sm:$0xf0]  ;;  %v5114_v61 = vor.u32 %v7081_v54, %v5113_v53  ;;  %v7127_v39 = vld [vmem:[%s11160_s4 + $0x3e4] sm:$0xf] }
  0x24   :  { %1052 = vmatpush.bf16.msrb.mxu0 %v4874_v38  ;;  %v4969_v59 = vld [vmem:[%s11160_s4 + $0x140] sm:$0xf]  ;;  %v5242_v63 = vor.u32 %v7113_v58, %v5241_v57  ;;  %v7077_v2 = vld [vmem:[%s11160_s4 + $0x24c] sm:$0xf0]  ;;  %v4907_v38 = vld [vmem:[%s11160_s4 + $0xd0] sm:$0xf0]  ;;  %v5310_v47 = vor.u32 %v7127_v39, %v5307_v40 }
  0x25   :  { %1066 = vmatpush.bf16.msrb.mxu1 %v5002_v43  ;;  %v4825_v0 = vld [vmem:[%s11160_s4 + $0x20] sm:$0xf]  ;;  %v4970_v3 = vor.u32 %v7045_v60, %v4969_v59  ;;  %v7009_v4 = vld [vmem:[%s11160_s4 + $0x2c] sm:$0xf0]  ;;  %v4910_v46 = vor.u32 %v7027_v28, %v4907_v38  ;;  %v4891_v52 = vld [vmem:[%s11160_s4 + $0xb0] sm:$0xf0] }
  0x26   :  { %1080 = vmatpush.bf16.msrb.mxu2 %v5130_v49  ;;  %v5097_v1 = vld [vmem:[%s11160_s4 + $0x240] sm:$0xf]  ;;  %v7109_v6 = vld [vmem:[%s11160_s4 + $0x34c] sm:$0xf0]  ;;  %v4826_v11 = vor.u32 %v7009_v4, %v4825_v0  ;;  %v7091_v49 = vld [vmem:[%s11160_s4 + $0x2c4] sm:$0xf]  ;;  %v4894_v58 = vor.u32 %v7023_v48, %v4891_v52 }
  0x27   :  { %1094 = vmatpush.bf16.msrb.mxu3 %v5258_v51  ;;  %v5225_v5 = vld [vmem:[%s11160_s4 + $0x340] sm:$0xf]  ;;  %v7041_v8 = vld [vmem:[%s11160_s4 + $0x12c] sm:$0xf0]  ;;  %v5098_v9 = vor.u32 %v7077_v2, %v5097_v1  ;;  %v5038_v51 = vor.u32 %v7059_v41, %v5035_v42  ;;  %v7123_v53 = vld [vmem:[%s11160_s4 + $0x3c4] sm:$0xf] }
  0x28   :  { %1053 = vmatpush.bf16.msrb.mxu0 %v4858_v50  ;;  %v4953_v7 = vld [vmem:[%s11160_s4 + $0x120] sm:$0xf]  ;;  %v5226_v12 = vor.u32 %v7109_v6, %v5225_v5  ;;  %v7005_v13 = vld [vmem:[%s11160_s4 + $0xc] sm:$0xf0]  ;;  %v5163_v50 = vld [vmem:[%s11160_s4 + $0x2d0] sm:$0xf0] }
  0x29   :  { %1067 = vmatpush.bf16.msrb.mxu1 %v4986_v55  ;;  %v4809_v10 = vld [vmem:[%s11160_s4] sm:$0xf]  ;;  %v7073_v15 = vld [vmem:[%s11160_s4 + $0x22c] sm:$0xf0]  ;;  %v4954_v16 = vor.u32 %v7041_v8, %v4953_v7  ;;  %v5291_v54 = vld [vmem:[%s11160_s4 + $0x3d0] sm:$0xf0]  ;;  %v5166_v57 = vor.u32 %v7091_v49, %v5163_v50 }
  0x2a   :  { %1081 = vmatpush.bf16.msrb.mxu2 %v5114_v61  ;;  %v5081_v14 = vld [vmem:[%s11160_s4 + $0x220] sm:$0xf]  ;;  %v7105_v19 = vld [vmem:[%s11160_s4 + $0x32c] sm:$0xf0]  ;;  %v4810_v26 = vor.u32 %v7005_v13, %v4809_v10  ;;  %v7055_v55 = vld [vmem:[%s11160_s4 + $0x1a4] sm:$0xf]  ;;  %v5294_v59 = vor.u32 %v7123_v53, %v5291_v54 }
  0x2b   :  { %1095 = vmatpush.bf16.msrb.mxu3 %v5242_v63  ;;  %v4937_v17 = vld [vmem:[%s11160_s4 + $0x100] sm:$0xf]  ;;  %v7037_v20 = vld [vmem:[%s11160_s4 + $0x10c] sm:$0xf0]  ;;  %v5082_v25 = vor.u32 %v7073_v15, %v5081_v14  ;;  %v5019_v56 = vld [vmem:[%s11160_s4 + $0x1b0] sm:$0xf0] }
  0x2c   :  { %1054 = vmatpush.bf16.msrb.mxu0 %v4842_v62  ;;  %v5209_v18 = vld [vmem:[%s11160_s4 + $0x320] sm:$0xf]  ;;  %v7069_v30 = vld [vmem:[%s11160_s4 + $0x20c] sm:$0xf0]  ;;  %v4938_v32 = vor.u32 %v7037_v20, %v4937_v17  ;;  %v5022_v60 = vor.u32 %v7055_v55, %v5019_v56  ;;  %v7019_v61 = vld [vmem:[%s11160_s4 + $0x84] sm:$0xf] }
  0x2d   :  { %1068 = vmatpush.bf16.msrb.mxu1 %v4970_v3  ;;  %v5210_v27 = vor.u32 %v7105_v19, %v5209_v18  ;;  %v5065_v29 = vld [vmem:[%s11160_s4 + $0x200] sm:$0xf]  ;;  %v7101_v34 = vld [vmem:[%s11160_s4 + $0x30c] sm:$0xf0]  ;;  %v4875_v62 = vld [vmem:[%s11160_s4 + $0x90] sm:$0xf0] }
  0x2e   :  { %1082 = vmatpush.bf16.msrb.mxu2 %v5098_v9  ;;  %v5193_v31 = vld [vmem:[%s11160_s4 + $0x300] sm:$0xf]  ;;  %v5066_v43 = vor.u32 %v7069_v30, %v5065_v29  ;;  %v7051_v63 = vld [vmem:[%s11160_s4 + $0x184] sm:$0xf]  ;;  %v4878_v0 = vor.u32 %v7019_v61, %v4875_v62  ;;  %v5003_v1 = vld [vmem:[%s11160_s4 + $0x190] sm:$0xf0] }
  0x2f   :  { %1096 = vmatpush.bf16.msrb.mxu3 %v5226_v12  ;;  %v5194_v44 = vor.u32 %v7101_v34, %v5193_v31  ;;  %v5006_v2 = vor.u32 %v7051_v63, %v5003_v1  ;;  %v7087_v3 = vld [vmem:[%s11160_s4 + $0x2a4] sm:$0xf]  ;;  %v5147_v4 = vld [vmem:[%s11160_s4 + $0x2b0] sm:$0xf0]  ;;  %v71_v63 = vld [vmem:[%s11161_s2] sm:$0xf] }
  0x30   :  { %1055 = vmatpush.bf16.msrb.mxu0 %v4826_v11  ;;  %v7119_v5 = vld [vmem:[%s11160_s4 + $0x3a4] sm:$0xf]  ;;  %v5150_v6 = vor.u32 %v7087_v3, %v5147_v4  ;;  %v5275_v7 = vld [vmem:[%s11160_s4 + $0x3b0] sm:$0xf0] }
  0x31   :  { %1069 = vmatpush.bf16.msrb.mxu1 %v4954_v16  ;;  %v5278_v8 = vor.u32 %v7119_v5, %v5275_v7  ;;  %v7015_v9 = vld [vmem:[%s11160_s4 + $0x64] sm:$0xf]  ;;  %v4859_v10 = vld [vmem:[%s11160_s4 + $0x70] sm:$0xf0] }
  0x32   :  { %1083 = vmatpush.bf16.msrb.mxu2 %v5082_v25  ;;  %v4862_v11 = vor.u32 %v7015_v9, %v4859_v10  ;;  %v7047_v12 = vld [vmem:[%s11160_s4 + $0x164] sm:$0xf]  ;;  %v4987_v13 = vld [vmem:[%s11160_s4 + $0x170] sm:$0xf0] }
  0x33   :  { %1097 = vmatpush.bf16.msrb.mxu3 %v5210_v27  ;;  %v4990_v14 = vor.u32 %v7047_v12, %v4987_v13  ;;  %v7083_v15 = vld [vmem:[%s11160_s4 + $0x284] sm:$0xf]  ;;  %v5131_v16 = vld [vmem:[%s11160_s4 + $0x290] sm:$0xf0]  ;;  %v75_v12 = vperm.slane %v71_v63, 2 }
  0x34   :  { %1056 = vmatpush.bf16.msrb.mxu0 %v4810_v26  ;;  %v5134_v17 = vor.u32 %v7083_v15, %v5131_v16  ;;  %v7115_v18 = vld [vmem:[%s11160_s4 + $0x384] sm:$0xf]  ;;  %v5259_v19 = vld [vmem:[%s11160_s4 + $0x390] sm:$0xf0]  ;;  %v76_v15 = vperm.slane %v71_v63, 3 }
  0x35   :  { %1070 = vmatpush.bf16.msrb.mxu1 %v4938_v32  ;;  %v5262_v20 = vor.u32 %v7115_v18, %v5259_v19  ;;  %v7011_v21 = vld [vmem:[%s11160_s4 + $0x44] sm:$0xf]  ;;  %v4843_v22 = vld [vmem:[%s11160_s4 + $0x50] sm:$0xf0] }
  0x36   :  { %1084 = vmatpush.bf16.msrb.mxu2 %v5066_v43  ;;  %v7043_v23 = vld [vmem:[%s11160_s4 + $0x144] sm:$0xf]  ;;  %v4846_v24 = vor.u32 %v7011_v21, %v4843_v22  ;;  %v4971_v25 = vld [vmem:[%s11160_s4 + $0x150] sm:$0xf0]  ;;  %v4929_v21 = vld [vmem:[%s11160_s4 + $0xe8] sm:$0xf] }
  0x37   :  { %1098 = vmatpush.bf16.msrb.mxu3 %v5194_v44  ;;  %v4974_v26 = vor.u32 %v7043_v23, %v4971_v25  ;;  %v7079_v27 = vld [vmem:[%s11160_s4 + $0x264] sm:$0xf]  ;;  %v5115_v28 = vld [vmem:[%s11160_s4 + $0x270] sm:$0xf0]  ;;  %v7034_v22 = vld [vmem:[%s11160_s4 + $0xf4] sm:$0xf0] }
  0x38   :  { %1105 = vmatpush.bf16.msra.mxu0 %v4926_v33  ;;  %v5118_v29 = vor.u32 %v7079_v27, %v5115_v28  ;;  %v7111_v30 = vld [vmem:[%s11160_s4 + $0x364] sm:$0xf]  ;;  %v5243_v31 = vld [vmem:[%s11160_s4 + $0x370] sm:$0xf0]  ;;  %v7066_v27 = vld [vmem:[%s11160_s4 + $0x1f4] sm:$0xf0] }
  0x39   :  { %1119 = vmatpush.bf16.msra.mxu1 %v5054_v37  ;;  %v5246_v32 = vor.u32 %v7111_v30, %v5243_v31  ;;  %v7007_v33 = vld [vmem:[%s11160_s4 + $0x24] sm:$0xf]  ;;  %v4827_v34 = vld [vmem:[%s11160_s4 + $0x30] sm:$0xf0]  ;;  %v4930_v31 = vor.u32 %v7034_v22, %v4929_v21  ;;  %v4865_v21 = vld [vmem:[%s11160_s4 + $0x68] sm:$0xf] }
  0x3a   :  { %1133 = vmatpush.bf16.msra.mxu2 %v5182_v45  ;;  %v7039_v35 = vld [vmem:[%s11160_s4 + $0x124] sm:$0xf]  ;;  %v4830_v36 = vor.u32 %v7007_v33, %v4827_v34  ;;  %v4955_v37 = vld [vmem:[%s11160_s4 + $0x130] sm:$0xf0]  ;;  %v7018_v22 = vld [vmem:[%s11160_s4 + $0x74] sm:$0xf0] }
  0x3b   :  { %1147 = vmatpush.bf16.msra.mxu3 %v5310_v47  ;;  %v4958_v38 = vor.u32 %v7039_v35, %v4955_v37  ;;  %v7075_v39 = vld [vmem:[%s11160_s4 + $0x244] sm:$0xf]  ;;  %v5099_v40 = vld [vmem:[%s11160_s4 + $0x250] sm:$0xf0]  ;;  %v4913_v35 = vld [vmem:[%s11160_s4 + $0xc8] sm:$0xf] }
  0x3c   :  { %1106 = vmatpush.bf16.msra.mxu0 %v4910_v46  ;;  %v7107_v41 = vld [vmem:[%s11160_s4 + $0x344] sm:$0xf]  ;;  %v5102_v42 = vor.u32 %v7075_v39, %v5099_v40  ;;  %v5227_v43 = vld [vmem:[%s11160_s4 + $0x350] sm:$0xf0] }
  0x3d   :  { %1120 = vmatpush.bf16.msra.mxu1 %v5038_v51  ;;  %v5230_v44 = vor.u32 %v7107_v41, %v5227_v43  ;;  %v7003_v45 = vld [vmem:[%s11160_s4 + $0x4] sm:$0xf]  ;;  %v4811_v46 = vld [vmem:[%s11160_s4 + $0x10] sm:$0xf0]  ;;  %v7062_v43 = vld [vmem:[%s11160_s4 + $0x1d4] sm:$0xf0] }
  0x3e   :  { %1134 = vmatpush.bf16.msra.mxu2 %v5166_v57  ;;  %v7035_v47 = vld [vmem:[%s11160_s4 + $0x104] sm:$0xf]  ;;  %v4814_v48 = vor.u32 %v7003_v45, %v4811_v46  ;;  %v4939_v49 = vld [vmem:[%s11160_s4 + $0x110] sm:$0xf0] }
  0x3f   :  { %1148 = vmatpush.bf16.msra.mxu3 %v5294_v59  ;;  %v4942_v50 = vor.u32 %v7035_v47, %v4939_v49  ;;  %v7071_v51 = vld [vmem:[%s11160_s4 + $0x224] sm:$0xf]  ;;  %v5083_v52 = vld [vmem:[%s11160_s4 + $0x230] sm:$0xf0]  ;;  %v5185_v47 = vld [vmem:[%s11160_s4 + $0x2e8] sm:$0xf] }
  0x40   :  { %1107 = vmatpush.bf16.msra.mxu0 %v4894_v58  ;;  %v7103_v53 = vld [vmem:[%s11160_s4 + $0x324] sm:$0xf]  ;;  %v5211_v54 = vld [vmem:[%s11160_s4 + $0x330] sm:$0xf0]  ;;  %v5086_v55 = vor.u32 %v7071_v51, %v5083_v52  ;;  %v5313_v51 = vld [vmem:[%s11160_s4 + $0x3e8] sm:$0xf] }
  0x41   :  { %1121 = vmatpush.bf16.msra.mxu1 %v5022_v60  ;;  %v5214_v56 = vor.u32 %v7103_v53, %v5211_v54  ;;  %v7067_v57 = vld [vmem:[%s11160_s4 + $0x204] sm:$0xf]  ;;  %v5067_v58 = vld [vmem:[%s11160_s4 + $0x210] sm:$0xf0]  ;;  %v7130_v52 = vld [vmem:[%s11160_s4 + $0x3f4] sm:$0xf0] }
  0x42   :  { %1135 = vmatpush.bf16.msra.mxu2 %v5150_v6  ;;  %v5070_v59 = vor.u32 %v7067_v57, %v5067_v58  ;;  %v7099_v60 = vld [vmem:[%s11160_s4 + $0x304] sm:$0xf]  ;;  %v5195_v61 = vld [vmem:[%s11160_s4 + $0x310] sm:$0xf0]  ;;  %v249_v6 = vld [vmem:[%s11162_s3] sm:$0xf] }
  0x43   :  { %1149 = vmatpush.bf16.msra.mxu3 %v5278_v8  ;;  %v5198_v62 = vor.u32 %v7099_v60, %v5195_v61  ;;  %v251_v8 = vperm.slane %v249_v6, 0  ;;  %v254_v45 = vperm.slane %v249_v6, 3  ;;  %v7058_v60 = vld [vmem:[%s11160_s4 + $0x1b4] sm:$0xf0] }
  0x44   :  { %1108 = vmatpush.bf16.msra.mxu0 %v4878_v0  ;;  %v73_v0 = vperm.slane %v71_v63, 0 }
  0x45   :  { %1122 = vmatpush.bf16.msra.mxu1 %v5006_v2  ;;  %v74_v2 = vperm.slane %v71_v63, 1 }
  0x46   :  { %1136 = vmatpush.bf16.msra.mxu2 %v5134_v17 }
  0x47   :  { %1150 = vmatpush.bf16.msra.mxu3 %v5262_v20 }
  0x48   :  { %1109 = vmatpush.bf16.msra.mxu0 %v4862_v11  ;;  %v252_v11 = vperm.slane %v249_v6, 1 }
  0x49   :  { %1123 = vmatpush.bf16.msra.mxu1 %v4990_v14 }
  0x4a   :  { %1137 = vmatpush.bf16.msra.mxu2 %v5118_v29 }
  0x4b   :  { %1151 = vmatpush.bf16.msra.mxu3 %v5246_v32 }
  0x4c   :  { %1110 = vmatpush.bf16.msra.mxu0 %v4846_v24 }
  0x4d   :  { %1124 = vmatpush.bf16.msra.mxu1 %v4974_v26  ;;  %v5057_v26 = vld [vmem:[%s11160_s4 + $0x1e8] sm:$0xf] }
  0x4e   :  { %1138 = vmatpush.bf16.msra.mxu2 %v5102_v42  ;;  %v5058_v34 = vor.u32 %v7066_v27, %v5057_v26  ;;  %v5041_v42 = vld [vmem:[%s11160_s4 + $0x1c8] sm:$0xf] }
  0x4f   :  { %1152 = vmatpush.bf16.msra.mxu3 %v5230_v44  ;;  %v5042_v54 = vor.u32 %v7062_v43, %v5041_v42  ;;  %v5137_v27 = vld [vmem:[%s11160_s4 + $0x288] sm:$0xf]  ;;  %v7082_v42 = vld [vmem:[%s11160_s4 + $0x274] sm:$0xf0] }
  0x50   :  { %1111 = vmatpush.bf16.msra.mxu0 %v4830_v36  ;;  %v7030_v36 = vld [vmem:[%s11160_s4 + $0xd4] sm:$0xf0] }
  0x51   :  { %1125 = vmatpush.bf16.msra.mxu1 %v4958_v38  ;;  %v253_v38 = vperm.slane %v249_v6, 2 }
  0x52   :  { %1139 = vmatpush.bf16.msra.mxu2 %v5086_v55  ;;  %v4897_v55 = vld [vmem:[%s11160_s4 + $0xa8] sm:$0xf] }
  0x53   :  { %1153 = vmatpush.bf16.msra.mxu3 %v5214_v56  ;;  %v7026_v56 = vld [vmem:[%s11160_s4 + $0xb4] sm:$0xf0] }
  0x54   :  { %1112 = vmatpush.bf16.msra.mxu0 %v4814_v48  ;;  %v7098_v48 = vld [vmem:[%s11160_s4 + $0x2f4] sm:$0xf0] }
  0x55   :  { %1126 = vmatpush.bf16.msra.mxu1 %v4942_v50  ;;  %v4914_v50 = vor.u32 %v7030_v36, %v4913_v35  ;;  %v5186_v63 = vor.u32 %v7098_v48, %v5185_v47  ;;  %v7014_v35 = vld [vmem:[%s11160_s4 + $0x54] sm:$0xf0]  ;;  %v4977_v36 = vld [vmem:[%s11160_s4 + $0x148] sm:$0xf] }
  0x56   :  { %1140 = vmatpush.bf16.msra.mxu2 %v5070_v59  ;;  %v5025_v59 = vld [vmem:[%s11160_s4 + $0x1a8] sm:$0xf]  ;;  %v7010_v48 = vld [vmem:[%s11160_s4 + $0x34] sm:$0xf0] }
  0x57   :  { %1154 = vmatpush.bf16.msra.mxu3 %v5198_v62  ;;  %v4833_v47 = vld [vmem:[%s11160_s4 + $0x28] sm:$0xf] }
  0x94   :  { %v194_v1 = vpop.f32.mrf.mxu0 }
  0x95   :  { %v208_v3 = vpop.f32.mrf.mxu1  ;;  %v195_v4 = vadd.f32 %v194_v1, %v73_v0  ;;  %v5314_v1 = vor.u32 %v7130_v52, %v5313_v51 }
  0x96   :  { %v209_v5 = vadd.f32 %v208_v3, %v74_v2  ;;  %v5169_v3 = vld [vmem:[%s11160_s4 + $0x2c8] sm:$0xf] }
  0x97   :  { %v241_v7 = vmax.f32 %v195_v4, 0.0  ;;  %v7094_v4 = vld [vmem:[%s11160_s4 + $0x2d4] sm:$0xf0] }
  0x98   :  { %v242_v10 = vmax.f32 %v209_v5, 0.0  ;;  %v5297_v5 = vld [vmem:[%s11160_s4 + $0x3c8] sm:$0xf] }
  0x99   :  { %v259_v19 = vadd.f32 %v251_v8, %v241_v7  ;;  %v5026_v7 = vor.u32 %v7058_v60, %v5025_v59  ;;  %v4817_v59 = vld [vmem:[%s11160_s4 + $0x8] sm:$0xf]  ;;  %v7006_v60 = vld [vmem:[%s11160_s4 + $0x14] sm:$0xf0] }
  0x9a   :  { %v260_v23 = vadd.f32 %v252_v11, %v242_v10  ;;  %v7022_v10 = vld [vmem:[%s11160_s4 + $0x94] sm:$0xf0] }
  0x9c   :  { %v222_v9 = vpop.f32.mrf.mxu2  ;;  %v196_v14 = vpop.f32.mrf.mxu0 }
  0x9d   :  { %v236_v13 = vpop.f32.mrf.mxu3  ;;  %v197_v16 = vadd.f32 %v196_v14, %v73_v0  ;;  %v210_v17 = vpop.f32.mrf.mxu1  ;;  %v223_v24 = vadd.f32 %v222_v9, %v75_v12  ;;  %v4881_v9 = vld [vmem:[%s11160_s4 + $0x88] sm:$0xf] }
  0x9e   :  { %v211_v18 = vadd.f32 %v210_v17, %v74_v2  ;;  %v237_v28 = vadd.f32 %v236_v13, %v76_v15  ;;  %v4898_v2 = vor.u32 %v7026_v56, %v4897_v55  ;;  %v5170_v13 = vor.u32 %v7094_v4, %v5169_v3  ;;  %v7090_v17 = vld [vmem:[%s11160_s4 + $0x2b4] sm:$0xf0]  ;;  %v5233_v55 = vld [vmem:[%s11160_s4 + $0x348] sm:$0xf]  ;;  %v7064_v3 = vld [vmem:[%s11160_s4 + $0x1ec] sm:$0xf] }
  0x9f   :  { %v245_v20 = vmax.f32 %v197_v16, 0.0  ;;  %v243_v37 = vmax.f32 %v223_v24, 0.0  ;;  %v5153_v16 = vld [vmem:[%s11160_s4 + $0x2a8] sm:$0xf]  ;;  %v7050_v24 = vld [vmem:[%s11160_s4 + $0x174] sm:$0xf0]  ;;  %v4834_v56 = vor.u32 %v7010_v48, %v4833_v47 }
  0xa0   :  { %v246_v25 = vmax.f32 %v211_v18, 0.0  ;;  %v244_v44 = vmax.f32 %v237_v28, 0.0  ;;  %v7086_v28 = vld [vmem:[%s11160_s4 + $0x294] sm:$0xf0]  ;;  %v5059_v4 = vld [vmem:[%s11160_s4 + $0x1f8] sm:$0xf0] }
  0xa1   :  { %v263_v29 = vadd.f32 %v251_v8, %v245_v20  ;;  %v261_v57 = vadd.f32 %v253_v38, %v243_v37  ;;  %v7126_v8 = vld [vmem:[%s11160_s4 + $0x3d4] sm:$0xf0]  ;;  %v7020_v47 = vld [vmem:[%s11160_s4 + $0x8c] sm:$0xf]  ;;  %v4883_v48 = vld [vmem:[%s11160_s4 + $0x98] sm:$0xf0] }
  0xa2   :  { %v264_v30 = vadd.f32 %v252_v11, %v246_v25  ;;  %v262_v61 = vadd.f32 %v254_v45, %v244_v44  ;;  %v5009_v11 = vld [vmem:[%s11160_s4 + $0x188] sm:$0xf]  ;;  %v5298_v14 = vor.u32 %v7126_v8, %v5297_v5  ;;  %v7122_v20 = vld [vmem:[%s11160_s4 + $0x3b4] sm:$0xf0]  ;;  %v5154_v25 = vor.u32 %v7090_v17, %v5153_v16  ;;  %v4915_v17 = vld [vmem:[%s11160_s4 + $0xd8] sm:$0xf0] }
  0xa3   :  { %v8171_v32 = vpack.c.bf16 %v263_v29, %v259_v19  ;;  %v5281_v19 = vld [vmem:[%s11160_s4 + $0x3a8] sm:$0xf]  ;;  %v4866_v29 = vor.u32 %v7018_v22, %v4865_v21  ;;  %v7046_v37 = vld [vmem:[%s11160_s4 + $0x154] sm:$0xf0] }
  0xa4   :  { %v224_v33 = vpop.f32.mrf.mxu2  ;;  %v8179_v39 = vpack.c.bf16 %v264_v30, %v260_v23  ;;  %v4993_v23 = vld [vmem:[%s11160_s4 + $0x168] sm:$0xf]  ;;  %v5282_v26 = vor.u32 %v7122_v20, %v5281_v19  ;;  %v4978_v44 = vor.u32 %v7046_v37, %v4977_v36  ;;  %v7074_v8 = vld [vmem:[%s11160_s4 + $0x234] sm:$0xf0]  ;;  %v5043_v19 = vld [vmem:[%s11160_s4 + $0x1d8] sm:$0xf0] }
  0xa5   :  { %v225_v40 = vadd.f32 %v224_v33, %v75_v12  ;;  %v238_v41 = vpop.f32.mrf.mxu3  ;;  %1057 = vmatmul.bf16.vlgmr.msrb.gmra.mxu0 %v8171_v32  ;;  %v7054_v12 = vld [vmem:[%s11160_s4 + $0x194] sm:$0xf0]  ;;  %v4994_v30 = vor.u32 %v7050_v24, %v4993_v23  ;;  %v5073_v21 = vld [vmem:[%s11160_s4 + $0x208] sm:$0xf]  ;;  %v5027_v36 = vld [vmem:[%s11160_s4 + $0x1b8] sm:$0xf0] }
  0xa6   :  { %v239_v46 = vadd.f32 %v238_v41, %v76_v15  ;;  %1071 = vmatmul.bf16.vlgmr.msrb.gmra.mxu1 %v8179_v39  ;;  %1161 = vmatpush.bf16.msrb.mxu0 %v4930_v31  ;;  %v4882_v15 = vor.u32 %v7022_v10, %v4881_v9  ;;  %v5010_v18 = vor.u32 %v7054_v12, %v5009_v11  ;;  %v5265_v31 = vld [vmem:[%s11160_s4 + $0x388] sm:$0xf]  ;;  %v7118_v33 = vld [vmem:[%s11160_s4 + $0x394] sm:$0xf0] }
  0xa7   :  { %v247_v49 = vmax.f32 %v225_v40, 0.0  ;;  %1175 = vmatpush.bf16.msrb.mxu1 %v5058_v34  ;;  %v4849_v34 = vld [vmem:[%s11160_s4 + $0x48] sm:$0xf]  ;;  %v5266_v40 = vor.u32 %v7118_v33, %v5265_v31  ;;  %v4818_v9 = vor.u32 %v7006_v60, %v4817_v59  ;;  %v7106_v12 = vld [vmem:[%s11160_s4 + $0x334] sm:$0xf0] }
  0xa8   :  { %v248_v53 = vmax.f32 %v239_v46, 0.0  ;;  %v5121_v41 = vld [vmem:[%s11160_s4 + $0x268] sm:$0xf]  ;;  %v4850_v43 = vor.u32 %v7014_v35, %v4849_v34  ;;  %v7114_v46 = vld [vmem:[%s11160_s4 + $0x374] sm:$0xf0] }
  0xa9   :  { %v265_v58 = vadd.f32 %v253_v38, %v247_v49  ;;  %v5138_v38 = vor.u32 %v7086_v28, %v5137_v27  ;;  %v4961_v49 = vld [vmem:[%s11160_s4 + $0x128] sm:$0xf]  ;;  %v5122_v51 = vor.u32 %v7082_v42, %v5121_v41  ;;  %v7070_v22 = vld [vmem:[%s11160_s4 + $0x214] sm:$0xf0]  ;;  %v7024_v31 = vld [vmem:[%s11160_s4 + $0xac] sm:$0xf] }
  0xaa   :  { %v266_v62 = vadd.f32 %v254_v45, %v248_v53  ;;  %1162 = vmatpush.bf16.msrb.mxu0 %v4914_v50  ;;  %v5249_v45 = vld [vmem:[%s11160_s4 + $0x368] sm:$0xf]  ;;  %v7042_v50 = vld [vmem:[%s11160_s4 + $0x134] sm:$0xf0]  ;;  %v5074_v33 = vor.u32 %v7070_v22, %v5073_v21  ;;  %v4899_v34 = vld [vmem:[%s11160_s4 + $0xb8] sm:$0xf0] }
  0xab   :  { %v8213_v0 = vpack.c.bf16 %v265_v58, %v261_v57  ;;  %1176 = vmatpush.bf16.msrb.mxu1 %v5042_v54  ;;  %v5250_v52 = vor.u32 %v7114_v46, %v5249_v45  ;;  %v5105_v53 = vld [vmem:[%s11160_s4 + $0x248] sm:$0xf]  ;;  %v7078_v54 = vld [vmem:[%s11160_s4 + $0x254] sm:$0xf0]  ;;  %v4962_v57 = vor.u32 %v7042_v50, %v4961_v49  ;;  %v7056_v35 = vld [vmem:[%s11160_s4 + $0x1ac] sm:$0xf] }
  0xac   :  { %v8224_v6 = vpack.c.bf16 %v266_v62, %v262_v61  ;;  %v7110_v58 = vld [vmem:[%s11160_s4 + $0x354] sm:$0xf0]  ;;  %v4945_v61 = vld [vmem:[%s11160_s4 + $0x108] sm:$0xf]  ;;  %v7092_v41 = vld [vmem:[%s11160_s4 + $0x2cc] sm:$0xf] }
  0xad   :  { %1085 = vmatmul.bf16.vlgmr.msrb.gmra.mxu2 %v8213_v0  ;;  %v7038_v62 = vld [vmem:[%s11160_s4 + $0x114] sm:$0xf0]  ;;  %v5234_v5 = vor.u32 %v7110_v58, %v5233_v55  ;;  %v5217_v11 = vld [vmem:[%s11160_s4 + $0x328] sm:$0xf]  ;;  %v5171_v42 = vld [vmem:[%s11160_s4 + $0x2d8] sm:$0xf0]  ;;  %v4886_v55 = vor.u32 %v7020_v47, %v4883_v48 }
  0xae   :  { %1099 = vmatmul.bf16.vlgmr.msrb.gmra.mxu3 %v8224_v6  ;;  %1189 = vmatpush.bf16.msrb.mxu2 %v5186_v63  ;;  %v7032_v63 = vld [vmem:[%s11160_s4 + $0xec] sm:$0xf]  ;;  %v4946_v10 = vor.u32 %v7038_v62, %v4945_v61  ;;  %v5218_v20 = vor.u32 %v7106_v12, %v5217_v11  ;;  %v5201_v23 = vld [vmem:[%s11160_s4 + $0x308] sm:$0xf]  ;;  %v7102_v24 = vld [vmem:[%s11160_s4 + $0x314] sm:$0xf0] }
  0xaf   :  { %1203 = vmatpush.bf16.msrb.mxu3 %v5314_v1  ;;  %1163 = vmatpush.bf16.msrb.mxu0 %v4898_v2  ;;  %v5106_v1 = vor.u32 %v7078_v54, %v5105_v53  ;;  %v4931_v2 = vld [vmem:[%s11160_s4 + $0xf8] sm:$0xf0]  ;;  %v5202_v37 = vor.u32 %v7102_v24, %v5201_v23  ;;  %v7124_v45 = vld [vmem:[%s11160_s4 + $0x3cc] sm:$0xf] }
  0xb0   :  { %1177 = vmatpush.bf16.msrb.mxu1 %v5026_v7  ;;  %v5089_v7 = vld [vmem:[%s11160_s4 + $0x228] sm:$0xf]  ;;  %v5299_v46 = vld [vmem:[%s11160_s4 + $0x3d8] sm:$0xf0]  ;;  %v7052_v49 = vld [vmem:[%s11160_s4 + $0x18c] sm:$0xf] }
  0xb1   :  { %v5090_v16 = vor.u32 %v7074_v8, %v5089_v7  ;;  %v5011_v50 = vld [vmem:[%s11160_s4 + $0x198] sm:$0xf0]  ;;  %v7088_v53 = vld [vmem:[%s11160_s4 + $0x2ac] sm:$0xf] }
  0xb2   :  { %1190 = vmatpush.bf16.msrb.mxu2 %v5170_v13  ;;  %v4934_v13 = vor.u32 %v7032_v63, %v4931_v2  ;;  %v5155_v54 = vld [vmem:[%s11160_s4 + $0x2b8] sm:$0xf0]  ;;  %v7016_v59 = vld [vmem:[%s11160_s4 + $0x6c] sm:$0xf] }
  0xb3   :  { %1204 = vmatpush.bf16.msrb.mxu3 %v5298_v14  ;;  %1164 = vmatpush.bf16.msrb.mxu0 %v4882_v15  ;;  %v5062_v14 = vor.u32 %v7064_v3, %v5059_v4  ;;  %v7028_v15 = vld [vmem:[%s11160_s4 + $0xcc] sm:$0xf]  ;;  %v5283_v58 = vld [vmem:[%s11160_s4 + $0x3b8] sm:$0xf0]  ;;  %v5158_v63 = vor.u32 %v7088_v53, %v5155_v54 }
  0xb4   :  { %1178 = vmatpush.bf16.msrb.mxu1 %v5010_v18  ;;  %v7060_v18 = vld [vmem:[%s11160_s4 + $0x1cc] sm:$0xf]  ;;  %v4918_v27 = vor.u32 %v7028_v15, %v4915_v17  ;;  %v4867_v60 = vld [vmem:[%s11160_s4 + $0x78] sm:$0xf0] }
  0xb5   :  { %1113 = vmatmul.bf16.vlgmr.msra.gmra.mxu0 %v8171_v32  ;;  %v5046_v28 = vor.u32 %v7060_v18, %v5043_v19  ;;  %v7048_v61 = vld [vmem:[%s11160_s4 + $0x16c] sm:$0xf]  ;;  %v4995_v62 = vld [vmem:[%s11160_s4 + $0x178] sm:$0xf0]  ;;  %v4870_v4 = vor.u32 %v7016_v59, %v4867_v60 }
  0xb6   :  { %1191 = vmatpush.bf16.msrb.mxu2 %v5154_v25  ;;  %1127 = vmatmul.bf16.vlgmr.msra.gmra.mxu1 %v8179_v39  ;;  %v7096_v25 = vld [vmem:[%s11160_s4 + $0x2ec] sm:$0xf]  ;;  %v5139_v3 = vld [vmem:[%s11160_s4 + $0x298] sm:$0xf0] }
  0xb7   :  { %1205 = vmatpush.bf16.msrb.mxu3 %v5282_v26  ;;  %1165 = vmatpush.bf16.msrb.mxu0 %v4866_v29  ;;  %v5187_v26 = vld [vmem:[%s11160_s4 + $0x2f8] sm:$0xf0]  ;;  %v7128_v29 = vld [vmem:[%s11160_s4 + $0x3ec] sm:$0xf] }
  0xb8   :  { %1179 = vmatpush.bf16.msrb.mxu1 %v4994_v30  ;;  %v5315_v30 = vld [vmem:[%s11160_s4 + $0x3f8] sm:$0xf0]  ;;  %v7084_v2 = vld [vmem:[%s11160_s4 + $0x28c] sm:$0xf] }
  0xb9   :  { %v7116_v7 = vld [vmem:[%s11160_s4 + $0x38c] sm:$0xf]  ;;  %v5267_v8 = vld [vmem:[%s11160_s4 + $0x398] sm:$0xf0] }
  0xba   :  { %1192 = vmatpush.bf16.msrb.mxu2 %v5138_v38  ;;  %v5190_v38 = vor.u32 %v7096_v25, %v5187_v26  ;;  %v7044_v11 = vld [vmem:[%s11160_s4 + $0x14c] sm:$0xf]  ;;  %v4979_v12 = vld [vmem:[%s11160_s4 + $0x158] sm:$0xf0] }
  0xbb   :  { %1206 = vmatpush.bf16.msrb.mxu3 %v5266_v40  ;;  %1166 = vmatpush.bf16.msrb.mxu0 %v4850_v43  ;;  %v5318_v40 = vor.u32 %v7128_v29, %v5315_v30  ;;  %v4902_v43 = vor.u32 %v7024_v31, %v4899_v34  ;;  %v7080_v15 = vld [vmem:[%s11160_s4 + $0x26c] sm:$0xf]  ;;  %v4982_v18 = vor.u32 %v7044_v11, %v4979_v12  ;;  %v4835_v22 = vld [vmem:[%s11160_s4 + $0x38] sm:$0xf0]  ;;  %v5513_v12 = vld [vmem:[%s11163_s6 + $0x180] sm:$0xf] }
  0xbc   :  { %1180 = vmatpush.bf16.msrb.mxu1 %v4978_v44  ;;  %v5030_v44 = vor.u32 %v7056_v35, %v5027_v36  ;;  %v7112_v19 = vld [vmem:[%s11160_s4 + $0x36c] sm:$0xf]  ;;  %v4963_v24 = vld [vmem:[%s11160_s4 + $0x138] sm:$0xf0] }
  0xbd   :  { %1141 = vmatmul.bf16.vlgmr.msra.gmra.mxu2 %v8213_v0  ;;  %v7008_v21 = vld [vmem:[%s11160_s4 + $0x2c] sm:$0xf]  ;;  %v4819_v35 = vld [vmem:[%s11160_s4 + $0x18] sm:$0xf0] }
  0xbe   :  { %1155 = vmatmul.bf16.vlgmr.msra.gmra.mxu3 %v8224_v6  ;;  %1193 = vmatpush.bf16.msrb.mxu2 %v5122_v51  ;;  %v5174_v51 = vor.u32 %v7092_v41, %v5171_v42  ;;  %v7040_v23 = vld [vmem:[%s11160_s4 + $0x12c] sm:$0xf]  ;;  %v4838_v30 = vor.u32 %v7008_v21, %v4835_v22  ;;  %v7161_v41 = vld [vmem:[%s11163_s6 + $0xec] sm:$0xf0]  ;;  %v5561_v42 = vld [vmem:[%s11163_s6 + $0x1e0] sm:$0xf] }
  0xbf   :  { %1207 = vmatpush.bf16.msrb.mxu3 %v5250_v52  ;;  %1167 = vmatpush.bf16.msrb.mxu0 %v4834_v56  ;;  %v5302_v52 = vor.u32 %v7124_v45, %v5299_v46  ;;  %v5014_v56 = vor.u32 %v7052_v49, %v5011_v50  ;;  %v7108_v29 = vld [vmem:[%s11160_s4 + $0x34c] sm:$0xf]  ;;  %v4966_v31 = vor.u32 %v7040_v23, %v4963_v24  ;;  %v5091_v46 = vld [vmem:[%s11160_s4 + $0x238] sm:$0xf0]  ;;  %v5321_v22 = vld [vmem:[%s11163_s6] sm:$0xf] }
  0xc0   :  { %1181 = vmatpush.bf16.msrb.mxu1 %v4962_v57  ;;  %v7120_v57 = vld [vmem:[%s11160_s4 + $0x3ac] sm:$0xf]  ;;  %v5219_v50 = vld [vmem:[%s11160_s4 + $0x338] sm:$0xf0]  ;;  %v7133_v23 = vld [vmem:[%s11163_s6 + $0xc] sm:$0xf0] }
  0xc1   :  { %v7004_v34 = vld [vmem:[%s11160_s4 + $0xc] sm:$0xf]  ;;  %v5075_v60 = vld [vmem:[%s11160_s4 + $0x218] sm:$0xf0]  ;;  %v7159_v24 = vld [vmem:[%s11163_s6 + $0xe4] sm:$0xf] }
  0xc2   :  { %1194 = vmatpush.bf16.msrb.mxu2 %v5106_v1  ;;  %v5286_v1 = vor.u32 %v7120_v57, %v5283_v58  ;;  %v7036_v36 = vld [vmem:[%s11160_s4 + $0x10c] sm:$0xf]  ;;  %v4822_v47 = vor.u32 %v7004_v34, %v4819_v35  ;;  %v7189_v57 = vld [vmem:[%s11163_s6 + $0x1cc] sm:$0xf0]  ;;  %v7155_v34 = vld [vmem:[%s11163_s6 + $0xc4] sm:$0xf] }
  0xc3   :  { %1208 = vmatpush.bf16.msrb.mxu3 %v5234_v5  ;;  %1168 = vmatpush.bf16.msrb.mxu0 %v4818_v9  ;;  %v4998_v5 = vor.u32 %v7048_v61, %v4995_v62  ;;  %v7012_v9 = vld [vmem:[%s11160_s4 + $0x4c] sm:$0xf]  ;;  %v5203_v62 = vld [vmem:[%s11160_s4 + $0x318] sm:$0xf0]  ;;  %v5419_v35 = vld [vmem:[%s11163_s6 + $0xd0] sm:$0xf0] }
  0xc4   :  { %1182 = vmatpush.bf16.msrb.mxu1 %v4946_v10  ;;  %v4851_v10 = vld [vmem:[%s11160_s4 + $0x58] sm:$0xf0]  ;;  %v7072_v45 = vld [vmem:[%s11160_s4 + $0x22c] sm:$0xf] }
  0xc5   :  { %v4854_v17 = vor.u32 %v7012_v9, %v4851_v10  ;;  %v7104_v49 = vld [vmem:[%s11160_s4 + $0x32c] sm:$0xf]  ;;  %v5094_v54 = vor.u32 %v7072_v45, %v5091_v46  ;;  %v5385_v10 = vld [vmem:[%s11163_s6 + $0x80] sm:$0xf]  ;;  %v5403_v45 = vld [vmem:[%s11163_s6 + $0xb0] sm:$0xf0] }
  0xc6   :  { %1195 = vmatpush.bf16.msrb.mxu2 %v5090_v16  ;;  %1169 = vmatmul.bf16.vlgmr.msrb.gmra.mxu0 %v8171_v32  ;;  %v5123_v16 = vld [vmem:[%s11160_s4 + $0x278] sm:$0xf0]  ;;  %v5222_v58 = vor.u32 %v7104_v49, %v5219_v50  ;;  %v7068_v59 = vld [vmem:[%s11160_s4 + $0x20c] sm:$0xf]  ;;  %v7169_v49 = vld [vmem:[%s11163_s6 + $0x12c] sm:$0xf0] }
  0xc7   :  { %1217 = vmatpush.bf16.msra.mxu0 %v4934_v13  ;;  %1209 = vmatpush.bf16.msrb.mxu3 %v5218_v20  ;;  %v5142_v13 = vor.u32 %v7084_v2, %v5139_v3  ;;  %v5251_v20 = vld [vmem:[%s11160_s4 + $0x378] sm:$0xf0]  ;;  %v5126_v25 = vor.u32 %v7080_v15, %v5123_v16  ;;  %v7100_v61 = vld [vmem:[%s11160_s4 + $0x30c] sm:$0xf]  ;;  %v5078_v2 = vor.u32 %v7068_v59, %v5075_v60  ;;  %v5401_v3 = vld [vmem:[%s11163_s6 + $0xa0] sm:$0xf] }
  0xc8   :  { %1231 = vmatpush.bf16.msra.mxu1 %v5062_v14  ;;  %v5270_v14 = vor.u32 %v7116_v7, %v5267_v8  ;;  %v5254_v26 = vor.u32 %v7112_v19, %v5251_v20  ;;  %v5529_v7 = vld [vmem:[%s11163_s6 + $0x1a0] sm:$0xf]  ;;  %v7185_v8 = vld [vmem:[%s11163_s6 + $0x1ac] sm:$0xf0] }
  0xc9   :  { %1183 = vmatmul.bf16.vlgmr.msrb.gmra.mxu1 %v8179_v39  ;;  %v5530_v11 = vor.u32 %v7185_v8, %v5529_v7  ;;  %v7145_v15 = vld [vmem:[%s11163_s6 + $0x6c] sm:$0xf0]  ;;  %v5337_v19 = vld [vmem:[%s11163_s6 + $0x20] sm:$0xf] }
  0xca   :  { %1196 = vmatpush.bf16.msrb.mxu2 %v5074_v33  ;;  %v5235_v33 = vld [vmem:[%s11160_s4 + $0x358] sm:$0xf0]  ;;  %v7137_v20 = vld [vmem:[%s11163_s6 + $0x2c] sm:$0xf0]  ;;  %v5657_v50 = vld [vmem:[%s11163_s6 + $0x2a0] sm:$0xf] }
  0xcb   :  { %1218 = vmatpush.bf16.msra.mxu0 %v4918_v27  ;;  %1210 = vmatpush.bf16.msrb.mxu3 %v5202_v37  ;;  %v7076_v27 = vld [vmem:[%s11160_s4 + $0x24c] sm:$0xf]  ;;  %v4947_v37 = vld [vmem:[%s11160_s4 + $0x118] sm:$0xf0]  ;;  %v5338_v21 = vor.u32 %v7137_v20, %v5337_v19  ;;  %v5641_v59 = vld [vmem:[%s11163_s6 + $0x280] sm:$0xf] }
  0xcc   :  { %1232 = vmatpush.bf16.msra.mxu1 %v5046_v28  ;;  %v5107_v28 = vld [vmem:[%s11160_s4 + $0x258] sm:$0xf0]  ;;  %v4950_v48 = vor.u32 %v7036_v36, %v4947_v37  ;;  %v5422_v37 = vor.u32 %v7155_v34, %v5419_v35  ;;  %v5625_v7 = vld [vmem:[%s11163_s6 + $0x260] sm:$0xf]  ;;  %v7209_v8 = vld [vmem:[%s11163_s6 + $0x26c] sm:$0xf0] }
  0xcd   :  { %1197 = vmatmul.bf16.vlgmr.msrb.gmra.mxu2 %v8213_v0  ;;  %v5531_v19 = vld [vmem:[%s11163_s6 + $0x1b0] sm:$0xf0]  ;;  %v7257_v35 = vld [vmem:[%s11163_s6 + $0x3ec] sm:$0xf0] }
  0xce   :  { %1245 = vmatpush.bf16.msra.mxu2 %v5190_v38  ;;  %1211 = vmatmul.bf16.vlgmr.msrb.gmra.mxu3 %v8224_v6  ;;  %v5433_v38 = vld [vmem:[%s11163_s6 + $0xe0] sm:$0xf] }
  0xcf   :  { %1259 = vmatpush.bf16.msra.mxu3 %v5318_v40  ;;  %1219 = vmatpush.bf16.msra.mxu0 %v4902_v43  ;;  %v5110_v40 = vor.u32 %v7076_v27, %v5107_v28  ;;  %v7193_v43 = vld [vmem:[%s11163_s6 + $0x1ec] sm:$0xf0]  ;;  %v5497_v28 = vld [vmem:[%s11163_s6 + $0x160] sm:$0xf] }
  0xd0   :  { %1233 = vmatpush.bf16.msra.mxu1 %v5030_v44  ;;  %v5238_v44 = vor.u32 %v7108_v29, %v5235_v33  ;;  %v5562_v53 = vor.u32 %v7193_v43, %v5561_v42  ;;  %v7177_v29 = vld [vmem:[%s11163_s6 + $0x16c] sm:$0xf0] }
  0xd1   :  { %v7225_v33 = vld [vmem:[%s11163_s6 + $0x2ec] sm:$0xf0] }
  0xd2   :  { %1246 = vmatpush.bf16.msra.mxu2 %v5174_v51  ;;  %v5434_v51 = vor.u32 %v7161_v41, %v5433_v38  ;;  %v5481_v38 = vld [vmem:[%s11163_s6 + $0x140] sm:$0xf]  ;;  %v7221_v43 = vld [vmem:[%s11163_s6 + $0x2cc] sm:$0xf0] }
  0xd3   :  { %1260 = vmatpush.bf16.msra.mxu3 %v5302_v52  ;;  %1220 = vmatpush.bf16.msra.mxu0 %v4886_v55  ;;  %v5417_v52 = vld [vmem:[%s11163_s6 + $0xc0] sm:$0xf]  ;;  %v7157_v55 = vld [vmem:[%s11163_s6 + $0xcc] sm:$0xf0] }
  0xd4   :  { %1234 = vmatpush.bf16.msra.mxu1 %v5014_v56  ;;  %v5545_v56 = vld [vmem:[%s11163_s6 + $0x1c0] sm:$0xf] }
  0xd5   :  { %v5673_v41 = vld [vmem:[%s11163_s6 + $0x2c0] sm:$0xf] }
  0xd6   :  { %1247 = vmatpush.bf16.msra.mxu2 %v5158_v63  ;;  %v5418_v63 = vor.u32 %v7157_v55, %v5417_v52  ;;  %v5674_v46 = vor.u32 %v7221_v43, %v5673_v41  ;;  %v7217_v52 = vld [vmem:[%s11163_s6 + $0x2ac] sm:$0xf0]  ;;  %v7223_v41 = vld [vmem:[%s11163_s6 + $0x2e4] sm:$0xf] }
  0xd7   :  { %1261 = vmatpush.bf16.msra.mxu3 %v5286_v1  ;;  %1221 = vmatpush.bf16.msra.mxu0 %v4870_v4  ;;  %v5546_v1 = vor.u32 %v7189_v57, %v5545_v56  ;;  %v7153_v4 = vld [vmem:[%s11163_s6 + $0xac] sm:$0xf0]  ;;  %v5658_v55 = vor.u32 %v7217_v52, %v5657_v50  ;;  %v5449_v57 = vld [vmem:[%s11163_s6 + $0x100] sm:$0xf]  ;;  %v5483_v50 = vld [vmem:[%s11163_s6 + $0x150] sm:$0xf0] }
  0xd8   :  { %1235 = vmatpush.bf16.msra.mxu1 %v4998_v5  ;;  %v5206_v5 = vor.u32 %v7100_v61, %v5203_v62  ;;  %v5402_v9 = vor.u32 %v7153_v4, %v5401_v3  ;;  %v7213_v61 = vld [vmem:[%s11163_s6 + $0x28c] sm:$0xf0]  ;;  %v7143_v62 = vld [vmem:[%s11163_s6 + $0x64] sm:$0xf]  ;;  %v5563_v4 = vld [vmem:[%s11163_s6 + $0x1f0] sm:$0xf0] }
  0xd9   :  { %v7191_v3 = vld [vmem:[%s11163_s6 + $0x1e4] sm:$0xf] }
  0xda   :  { %1248 = vmatpush.bf16.msra.mxu2 %v5142_v13 }
  0xdb   :  { %1262 = vmatpush.bf16.msra.mxu3 %v5270_v14  ;;  %1222 = vmatpush.bf16.msra.mxu0 %v4854_v17  ;;  %v5369_v14 = vld [vmem:[%s11163_s6 + $0x60] sm:$0xf] }
  0xdc   :  { %1236 = vmatpush.bf16.msra.mxu1 %v4982_v18  ;;  %v5370_v17 = vor.u32 %v7145_v15, %v5369_v14  ;;  %v5609_v14 = vld [vmem:[%s11163_s6 + $0x240] sm:$0xf]  ;;  %v7205_v15 = vld [vmem:[%s11163_s6 + $0x24c] sm:$0xf0] }
  0xde   :  { %1249 = vmatpush.bf16.msra.mxu2 %v5126_v25  ;;  %v5435_v25 = vld [vmem:[%s11163_s6 + $0xf0] sm:$0xf0] }
  0xdf   :  { %1263 = vmatpush.bf16.msra.mxu3 %v5254_v26  ;;  %1223 = vmatpush.bf16.msra.mxu0 %v4838_v30  ;;  %v5322_v26 = vor.u32 %v7133_v23, %v5321_v22  ;;  %v5438_v27 = vor.u32 %v7159_v24, %v5435_v25  ;;  %v5689_v30 = vld [vmem:[%s11163_s6 + $0x2e0] sm:$0xf]  ;;  %v7201_v22 = vld [vmem:[%s11163_s6 + $0x22c] sm:$0xf0]  ;;  %v7131_v24 = vld [vmem:[%s11163_s6 + $0x4] sm:$0xf] }
  0xe0   :  { %1237 = vmatpush.bf16.msra.mxu1 %v4966_v31  ;;  %v5498_v31 = vor.u32 %v7177_v29, %v5497_v28  ;;  %v5690_v36 = vor.u32 %v7225_v33, %v5689_v30  ;;  %v5323_v25 = vld [vmem:[%s11163_s6 + $0x10] sm:$0xf0]  ;;  %v5577_v30 = vld [vmem:[%s11163_s6 + $0x200] sm:$0xf] }
  0xe1   :  { %v5515_v28 = vld [vmem:[%s11163_s6 + $0x190] sm:$0xf0]  ;;  %v5817_v33 = vld [vmem:[%s11163_s6 + $0x3e0] sm:$0xf] }
  0xe2   :  { %1250 = vmatpush.bf16.msra.mxu2 %v5110_v40  ;;  %v7173_v40 = vld [vmem:[%s11163_s6 + $0x14c] sm:$0xf0] }
  0xe3   :  { %1264 = vmatpush.bf16.msra.mxu3 %v5238_v44  ;;  %1224 = vmatpush.bf16.msra.mxu0 %v4822_v47  ;;  %v5482_v42 = vor.u32 %v7173_v40, %v5481_v38  ;;  %v7151_v44 = vld [vmem:[%s11163_s6 + $0xa4] sm:$0xf]  ;;  %v5818_v38 = vor.u32 %v7257_v35, %v5817_v33  ;;  %v5441_v33 = vld [vmem:[%s11163_s6 + $0xe8] sm:$0xf]  ;;  %v7233_v35 = vld [vmem:[%s11163_s6 + $0x32c] sm:$0xf0] }
  0xe4   :  { %1238 = vmatpush.bf16.msra.mxu1 %v4950_v48  ;;  %v5406_v47 = vor.u32 %v7151_v44, %v5403_v45  ;;  %v5465_v48 = vld [vmem:[%s11163_s6 + $0x120] sm:$0xf] }
  0xe5   :  { %v5801_v45 = vld [vmem:[%s11163_s6 + $0x3c0] sm:$0xf] }
  0xe6   :  { %1251 = vmatpush.bf16.msra.mxu2 %v5094_v54  ;;  %1225 = vmatmul.bf16.vlgmr.msra.gmra.mxu0 %v8171_v32  ;;  %v7149_v32 = vld [vmem:[%s11163_s6 + $0x8c] sm:$0xf0]  ;;  %v5387_v54 = vld [vmem:[%s11163_s6 + $0x90] sm:$0xf0] }
  0xe7   :  { %2055 = vmatpush.bf16.msrb.mxu0 %v5434_v51  ;;  %1265 = vmatpush.bf16.msra.mxu3 %v5222_v58  ;;  %v5386_v13 = vor.u32 %v7149_v32, %v5385_v10  ;;  %v5466_v51 = vor.u32 %v7169_v49, %v5465_v48  ;;  %v7165_v58 = vld [vmem:[%s11163_s6 + $0x10c] sm:$0xf0]  ;;  %v7139_v10 = vld [vmem:[%s11163_s6 + $0x44] sm:$0xf]  ;;  %v5355_v32 = vld [vmem:[%s11163_s6 + $0x50] sm:$0xf0] }
  0xe8   :  { %2069 = vmatpush.bf16.msrb.mxu1 %v5562_v53  ;;  %v7147_v53 = vld [vmem:[%s11163_s6 + $0x84] sm:$0xf]  ;;  %v5450_v60 = vor.u32 %v7165_v58, %v5449_v57  ;;  %v7249_v57 = vld [vmem:[%s11163_s6 + $0x3ac] sm:$0xf0] }
  0xe9   :  { %1239 = vmatmul.bf16.vlgmr.msra.gmra.mxu1 %v8179_v39  ;;  %v7181_v39 = vld [vmem:[%s11163_s6 + $0x18c] sm:$0xf0]  ;;  %v5390_v56 = vor.u32 %v7147_v53, %v5387_v54  ;;  %v7171_v49 = vld [vmem:[%s11163_s6 + $0x144] sm:$0xf]  ;;  %v5675_v53 = vld [vmem:[%s11163_s6 + $0x2d0] sm:$0xf0] }
  0xea   :  { %1252 = vmatpush.bf16.msra.mxu2 %v5078_v2  ;;  %v5514_v16 = vor.u32 %v7181_v39, %v5513_v12  ;;  %v5358_v12 = vor.u32 %v7139_v10, %v5355_v32  ;;  %v5547_v39 = vld [vmem:[%s11163_s6 + $0x1d0] sm:$0xf0]  ;;  %v5486_v52 = vor.u32 %v7171_v49, %v5483_v50  ;;  %v7211_v10 = vld [vmem:[%s11163_s6 + $0x284] sm:$0xf] }
  0xeb   :  { %2056 = vmatpush.bf16.msrb.mxu0 %v5418_v63  ;;  %1266 = vmatpush.bf16.msra.mxu3 %v5206_v5  ;;  %v5371_v63 = vld [vmem:[%s11163_s6 + $0x70] sm:$0xf0]  ;;  %v5566_v5 = vor.u32 %v7191_v3, %v5563_v4  ;;  %v5769_v4 = vld [vmem:[%s11163_s6 + $0x380] sm:$0xf] }
  0xec   :  { %2070 = vmatpush.bf16.msrb.mxu1 %v5546_v1  ;;  %v5642_v1 = vor.u32 %v7213_v61, %v5641_v59  ;;  %v5374_v2 = vor.u32 %v7143_v62, %v5371_v63  ;;  %v7167_v59 = vld [vmem:[%s11163_s6 + $0x124] sm:$0xf]  ;;  %v5659_v63 = vld [vmem:[%s11163_s6 + $0x2b0] sm:$0xf0] }
  0xed   :  { %1253 = vmatmul.bf16.vlgmr.msra.gmra.mxu2 %v8213_v0  ;;  %v5353_v0 = vld [vmem:[%s11163_s6 + $0x40] sm:$0xf]  ;;  %v7215_v61 = vld [vmem:[%s11163_s6 + $0x2a4] sm:$0xf] }
  0xee   :  { %1267 = vmatmul.bf16.vlgmr.msra.gmra.mxu3 %v8224_v6  ;;  %v7141_v6 = vld [vmem:[%s11163_s6 + $0x4c] sm:$0xf0]  ;;  %2083 = vmatpush.bf16.msrb.mxu2 %v5690_v36  ;;  %v7175_v36 = vld [vmem:[%s11163_s6 + $0x164] sm:$0xf] }
  0xef   :  { %2057 = vmatpush.bf16.msrb.mxu0 %v5402_v9  ;;  %v5354_v18 = vor.u32 %v7141_v6, %v5353_v0  ;;  %v5626_v9 = vor.u32 %v7209_v8, %v5625_v7  ;;  %v5339_v0 = vld [vmem:[%s11163_s6 + $0x30] sm:$0xf0]  ;;  %v7183_v6 = vld [vmem:[%s11163_s6 + $0x1a4] sm:$0xf]  ;;  %2097 = vmatpush.bf16.msrb.mxu3 %v5818_v38 }
  0xf0   :  { %2071 = vmatpush.bf16.msrb.mxu1 %v5530_v11  ;;  %v7187_v11 = vld [vmem:[%s11163_s6 + $0x1c4] sm:$0xf]  ;;  %v5534_v20 = vor.u32 %v7183_v6, %v5531_v19 }
  0xf1   :  { %v7163_v8 = vld [vmem:[%s11163_s6 + $0x104] sm:$0xf] }
  0xf2   :  { %2084 = vmatpush.bf16.msrb.mxu2 %v5674_v46  ;;  %v7253_v46 = vld [vmem:[%s11163_s6 + $0x3cc] sm:$0xf0]  ;;  %v7207_v6 = vld [vmem:[%s11163_s6 + $0x264] sm:$0xf] }
  0xf3   :  { %2058 = vmatpush.bf16.msrb.mxu0 %v5386_v13  ;;  %v5550_v13 = vor.u32 %v7187_v11, %v5547_v39  ;;  %v5802_v48 = vor.u32 %v7253_v46, %v5801_v45  ;;  %v5643_v11 = vld [vmem:[%s11163_s6 + $0x290] sm:$0xf0] }
  0xf4   :  { %2072 = vmatpush.bf16.msrb.mxu1 %v5514_v16  ;;  %v5610_v16 = vor.u32 %v7205_v15, %v5609_v14  ;;  %v5646_v39 = vor.u32 %v7211_v10, %v5643_v11  ;;  %v5753_v14 = vld [vmem:[%s11163_s6 + $0x360] sm:$0xf]  ;;  %v7241_v15 = vld [vmem:[%s11163_s6 + $0x36c] sm:$0xf0] }
  0xf5   :  { %2098 = vmatpush.bf16.msrb.mxu3 %v5802_v48  ;;  %v5425_v48 = vld [vmem:[%s11163_s6 + $0xc8] sm:$0xf] }
  0xf6   :  { %2085 = vmatpush.bf16.msrb.mxu2 %v5658_v55  ;;  %v8822_v55 = vld [vmem:[%s11164_s5] sm:$0xf] }
  0xf7   :  { %2059 = vmatpush.bf16.msrb.mxu0 %v5370_v17  ;;  %v7135_v17 = vld [vmem:[%s11163_s6 + $0x24] sm:$0xf]  ;;  %v401_v3 = vperm.slane %v8822_v55, 0  ;;  %v402_v46 = vperm.slane %v8822_v55, 1 }
  0xf8   :  { %2073 = vmatpush.bf16.msrb.mxu1 %v5498_v31  ;;  %v7197_v31 = vld [vmem:[%s11163_s6 + $0x20c] sm:$0xf0] }
  0xf9   :  { %v5578_v34 = vor.u32 %v7197_v31, %v5577_v30 }
  0xfa   :  { %2086 = vmatpush.bf16.msrb.mxu2 %v5642_v1 }
  0xfb   :  { %2060 = vmatpush.bf16.msrb.mxu0 %v5354_v18  ;;  %v5342_v18 = vor.u32 %v7135_v17, %v5339_v0  ;;  %v5754_v0 = vor.u32 %v7241_v15, %v5753_v14  ;;  %v7247_v14 = vld [vmem:[%s11163_s6 + $0x3a4] sm:$0xf]  ;;  %v5787_v15 = vld [vmem:[%s11163_s6 + $0x3b0] sm:$0xf0] }
  0xfc   :  { %2074 = vmatpush.bf16.msrb.mxu1 %v5482_v42  ;;  %v5691_v42 = vld [vmem:[%s11163_s6 + $0x2f0] sm:$0xf0] }
  0xfd   :  { %v5694_v44 = vor.u32 %v7223_v41, %v5691_v42  ;;  %v7199_v42 = vld [vmem:[%s11163_s6 + $0x224] sm:$0xf] }
  0xfe   :  { %2087 = vmatpush.bf16.msrb.mxu2 %v5626_v9  ;;  %v5451_v9 = vld [vmem:[%s11163_s6 + $0x110] sm:$0xf0] }
  0xff   :  { %2061 = vmatpush.bf16.msrb.mxu0 %v5338_v21  ;;  %v5593_v21 = vld [vmem:[%s11163_s6 + $0x220] sm:$0xf]  ;;  %v5454_v32 = vor.u32 %v7163_v8, %v5451_v9  ;;  %v5803_v8 = vld [vmem:[%s11163_s6 + $0x3d0] sm:$0xf0] }
 0x100   :  { %2075 = vmatpush.bf16.msrb.mxu1 %v5466_v51  ;;  %v5594_v23 = vor.u32 %v7201_v22, %v5593_v21  ;;  %v7219_v51 = vld [vmem:[%s11163_s6 + $0x2c4] sm:$0xf]  ;;  %v5737_v22 = vld [vmem:[%s11163_s6 + $0x340] sm:$0xf] }
 0x101   :  { %v5678_v54 = vor.u32 %v7219_v51, %v5675_v53  ;;  %v7158_v51 = vld [vmem:[%s11163_s6 + $0xd4] sm:$0xf0]  ;;  %v7229_v53 = vld [vmem:[%s11163_s6 + $0x30c] sm:$0xf0] }
 0x102   :  { %2088 = vmatpush.bf16.msrb.mxu2 %v5610_v16 }
 0x103   :  { %2062 = vmatpush.bf16.msrb.mxu0 %v5322_v26  ;;  %v7179_v26 = vld [vmem:[%s11163_s6 + $0x184] sm:$0xf] }
 0x104   :  { %2076 = vmatpush.bf16.msrb.mxu1 %v5450_v60  ;;  %v5518_v29 = vor.u32 %v7179_v26, %v5515_v28  ;;  %v5467_v60 = vld [vmem:[%s11163_s6 + $0x130] sm:$0xf0] }
 0x105   :  { %v5470_v62 = vor.u32 %v7167_v59, %v5467_v60  ;;  %v7255_v59 = vld [vmem:[%s11163_s6 + $0x3e4] sm:$0xf] }
 0x106   :  { %2089 = vmatpush.bf16.msrb.mxu2 %v5594_v23  ;;  %v7237_v23 = vld [vmem:[%s11163_s6 + $0x34c] sm:$0xf0] }
 0x107   :  { %2111 = vmatpush.bf16.msra.mxu0 %v5438_v27  ;;  %v5326_v27 = vor.u32 %v7131_v24, %v5323_v25  ;;  %v7203_v24 = vld [vmem:[%s11163_s6 + $0x244] sm:$0xf]  ;;  %v5738_v26 = vor.u32 %v7237_v23, %v5737_v22  ;;  %v5569_v22 = vld [vmem:[%s11163_s6 + $0x1e8] sm:$0xf] }
 0x108   :  { %2125 = vmatpush.bf16.msra.mxu1 %v5566_v5  ;;  %v7245_v5 = vld [vmem:[%s11163_s6 + $0x38c] sm:$0xf0] }
 0x109   :  { %v5770_v7 = vor.u32 %v7245_v5, %v5769_v4  ;;  %v7154_v5 = vld [vmem:[%s11163_s6 + $0xb4] sm:$0xf0] }
 0x10a   :  { %2090 = vmatpush.bf16.msrb.mxu2 %v5578_v34  ;;  %v5721_v34 = vld [vmem:[%s11163_s6 + $0x320] sm:$0xf] }
 0x10b   :  { %2112 = vmatpush.bf16.msra.mxu0 %v5422_v37  ;;  %v5499_v37 = vld [vmem:[%s11163_s6 + $0x170] sm:$0xf0]  ;;  %v5722_v41 = vor.u32 %v7233_v35, %v5721_v34  ;;  %v5361_v34 = vld [vmem:[%s11163_s6 + $0x48] sm:$0xf]  ;;  %v7142_v35 = vld [vmem:[%s11163_s6 + $0x54] sm:$0xf0] }
 0x10c   :  { %2126 = vmatpush.bf16.msra.mxu1 %v5550_v13  ;;  %v5502_v40 = vor.u32 %v7175_v36, %v5499_v37 }
 0x10e   :  { %2139 = vmatpush.bf16.msra.mxu2 %v5694_v44 }
 0x10f   :  { %2113 = vmatpush.bf16.msra.mxu0 %v5406_v47 }
 0x110   :  { %2127 = vmatpush.bf16.msra.mxu1 %v5534_v20 }
 0x112   :  { %2140 = vmatpush.bf16.msra.mxu2 %v5678_v54 }
 0x113   :  { %2114 = vmatpush.bf16.msra.mxu0 %v5390_v56  ;;  %v5785_v56 = vld [vmem:[%s11163_s6 + $0x3a0] sm:$0xf] }
 0x114   :  { %2128 = vmatpush.bf16.msra.mxu1 %v5518_v29  ;;  %v5786_v58 = vor.u32 %v7249_v57, %v5785_v56  ;;  %v7195_v57 = vld [vmem:[%s11163_s6 + $0x204] sm:$0xf] }
 0x116   :  { %2099 = vmatpush.bf16.msrb.mxu3 %v5786_v58  ;;  %v5579_v58 = vld [vmem:[%s11163_s6 + $0x210] sm:$0xf0] }
 0x117   :  { %2115 = vmatpush.bf16.msra.mxu0 %v5374_v2  ;;  %v5662_v2 = vor.u32 %v7215_v61, %v5659_v63  ;;  %v5582_v60 = vor.u32 %v7195_v57, %v5579_v58  ;;  %v5819_v61 = vld [vmem:[%s11163_s6 + $0x3f0] sm:$0xf0]  ;;  %v7186_v57 = vld [vmem:[%s11163_s6 + $0x1b4] sm:$0xf0]  ;;  %v7235_v58 = vld [vmem:[%s11163_s6 + $0x344] sm:$0xf] }
 0x118   :  { %2129 = vmatpush.bf16.msra.mxu1 %v5502_v40  ;;  %v7162_v40 = vld [vmem:[%s11163_s6 + $0xf4] sm:$0xf0] }
 0x119   :  { %2141 = vmatpush.bf16.msra.mxu2 %v5662_v2  ;;  %v5442_v50 = vor.u32 %v7162_v40, %v5441_v33  ;;  %v5409_v2 = vld [vmem:[%s11163_s6 + $0xa8] sm:$0xf]  ;;  %v7190_v40 = vld [vmem:[%s11163_s6 + $0x1d4] sm:$0xf0] }
 0x11a   :  { %2100 = vmatpush.bf16.msrb.mxu3 %v5770_v7  ;;  %v7251_v7 = vld [vmem:[%s11163_s6 + $0x3c4] sm:$0xf]  ;;  %v5410_v11 = vor.u32 %v7154_v5, %v5409_v2  ;;  %v5329_v2 = vld [vmem:[%s11163_s6 + $0x8] sm:$0xf]  ;;  %v7182_v5 = vld [vmem:[%s11163_s6 + $0x194] sm:$0xf0] }
 0x11b   :  { %2116 = vmatpush.bf16.msra.mxu0 %v5358_v12  ;;  %v5806_v9 = vor.u32 %v7251_v7, %v5803_v8  ;;  %v7231_v7 = vld [vmem:[%s11163_s6 + $0x324] sm:$0xf]  ;;  %v5723_v8 = vld [vmem:[%s11163_s6 + $0x330] sm:$0xf0] }
 0x11c   :  { %2130 = vmatpush.bf16.msra.mxu1 %v5486_v52  ;;  %v5705_v52 = vld [vmem:[%s11163_s6 + $0x300] sm:$0xf] }
 0x11d   :  { %2142 = vmatpush.bf16.msra.mxu2 %v5646_v39  ;;  %v5706_v56 = vor.u32 %v7229_v53, %v5705_v52  ;;  %v5537_v52 = vld [vmem:[%s11163_s6 + $0x1a8] sm:$0xf] }
 0x11e   :  { %2101 = vmatpush.bf16.msrb.mxu3 %v5754_v0 }
 0x11f   :  { %2117 = vmatpush.bf16.msra.mxu0 %v5342_v18  ;;  %v5627_v18 = vld [vmem:[%s11163_s6 + $0x270] sm:$0xf0] }
 0x120   :  { %2131 = vmatpush.bf16.msra.mxu1 %v5470_v62  ;;  %v5630_v19 = vor.u32 %v7207_v6, %v5627_v18  ;;  %v5822_v62 = vor.u32 %v7255_v59, %v5819_v61  ;;  %v5739_v59 = vld [vmem:[%s11163_s6 + $0x350] sm:$0xf0] }
 0x121   :  { %v5742_v61 = vor.u32 %v7235_v58, %v5739_v59 }
 0x122   :  { %v1058_v43 = vpop.f32.mrf.mxu0  ;;  %2143 = vmatpush.bf16.msra.mxu2 %v5630_v19  ;;  %2102 = vmatpush.bf16.msrb.mxu3 %v5738_v26  ;;  %v7243_v26 = vld [vmem:[%s11163_s6 + $0x384] sm:$0xf] }
 0x123   :  { %2118 = vmatpush.bf16.msra.mxu0 %v5326_v27  ;;  %v1072_v47 = vpop.f32.mrf.mxu1  ;;  %v1059_v16 = vadd.f32 %v1058_v43, %v401_v3  ;;  %v5611_v27 = vld [vmem:[%s11163_s6 + $0x250] sm:$0xf0] }
 0x124   :  { %2132 = vmatpush.bf16.msra.mxu1 %v5454_v32  ;;  %v5614_v28 = vor.u32 %v7203_v24, %v5611_v27  ;;  %v5595_v43 = vld [vmem:[%s11163_s6 + $0x230] sm:$0xf0] }
 0x125   :  { %v1073_v25 = vadd.f32 %v1072_v47, %v1059_v16  ;;  %v5598_v44 = vor.u32 %v7199_v42, %v5595_v43  ;;  %v5771_v27 = vld [vmem:[%s11163_s6 + $0x390] sm:$0xf0]  ;;  %v403_v43 = vperm.slane %v8822_v55, 2 }
 0x126   :  { %2144 = vmatpush.bf16.msra.mxu2 %v5614_v28  ;;  %2103 = vmatpush.bf16.msrb.mxu3 %v5722_v41  ;;  %v5774_v28 = vor.u32 %v7243_v26, %v5771_v27  ;;  %v7239_v41 = vld [vmem:[%s11163_s6 + $0x364] sm:$0xf]  ;;  %v5755_v42 = vld [vmem:[%s11163_s6 + $0x370] sm:$0xf0] }
 0x12a   :  { %v1060_v1 = vpop.f32.mrf.mxu0  ;;  %2145 = vmatpush.bf16.msra.mxu2 %v5598_v44  ;;  %2104 = vmatpush.bf16.msrb.mxu3 %v5706_v56  ;;  %v5758_v44 = vor.u32 %v7239_v41, %v5755_v42  ;;  %v7222_v41 = vld [vmem:[%s11163_s6 + $0x2d4] sm:$0xf0]  ;;  %v7152_v42 = vld [vmem:[%s11163_s6 + $0xac] sm:$0xf] }
 0x12b   :  { %v1074_v12 = vpop.f32.mrf.mxu1  ;;  %v1061_v20 = vadd.f32 %v1060_v1, %v401_v3  ;;  %v5426_v1 = vor.u32 %v7158_v51, %v5425_v48  ;;  %v5362_v48 = vor.u32 %v7142_v35, %v5361_v34  ;;  %v7138_v51 = vld [vmem:[%s11163_s6 + $0x34] sm:$0xf0]  ;;  %v5489_v35 = vld [vmem:[%s11163_s6 + $0x148] sm:$0xf] }
 0x12d   :  { %v1075_v29 = vadd.f32 %v1074_v12, %v1061_v20  ;;  %v5393_v12 = vld [vmem:[%s11163_s6 + $0x88] sm:$0xf] }
 0x12e   :  { %2146 = vmatpush.bf16.msra.mxu2 %v5582_v60  ;;  %2153 = vmatpush.bf16.msra.mxu3 %v5822_v62  ;;  %v5377_v20 = vld [vmem:[%s11163_s6 + $0x68] sm:$0xf] }
 0x130   :  { %v1086_v13 = vpop.f32.mrf.mxu2 }
 0x131   :  { %v1100_v17 = vpop.f32.mrf.mxu3  ;;  %v1087_v30 = vadd.f32 %v1086_v13, %v1073_v25  ;;  %v7150_v13 = vld [vmem:[%s11163_s6 + $0x94] sm:$0xf0] }
 0x132   :  { %v1114_v21 = vpop.f32.mrf.mxu0  ;;  %2154 = vmatpush.bf16.msra.mxu3 %v5806_v9  ;;  %v5394_v19 = vor.u32 %v7150_v13, %v5393_v12  ;;  %v7194_v25 = vld [vmem:[%s11163_s6 + $0x1f4] sm:$0xf0] }
 0x133   :  { %v1128_v36 = vpop.f32.mrf.mxu1  ;;  %v8903_v45 = vadd.f32 %v1100_v17, %v1087_v30  ;;  %v1115_v3 = vadd.f32 %v1114_v21, %v402_v46  ;;  %v5790_v17 = vor.u32 %v7247_v14, %v5787_v15  ;;  %v7146_v21 = vld [vmem:[%s11163_s6 + $0x74] sm:$0xf0]  ;;  %v5570_v33 = vor.u32 %v7194_v25, %v5569_v22 }
 0x134   :  { %v7226_v22 = vld [vmem:[%s11163_s6 + $0x2f4] sm:$0xf0] }
 0x135   :  { %v1129_v39 = vadd.f32 %v1128_v36, %v1115_v3  ;;  %v5553_v36 = vld [vmem:[%s11163_s6 + $0x1c8] sm:$0xf]  ;;  %v7134_v3 = vld [vmem:[%s11163_s6 + $0x14] sm:$0xf0] }
 0x136   :  { %2155 = vmatpush.bf16.msra.mxu3 %v5790_v17  ;;  %v7178_v17 = vld [vmem:[%s11163_s6 + $0x174] sm:$0xf0] }
 0x138   :  { %v1088_v31 = vpop.f32.mrf.mxu2 }
 0x139   :  { %v1089_v37 = vadd.f32 %v1088_v31, %v1075_v29  ;;  %v1102_v38 = vpop.f32.mrf.mxu3  ;;  %v5378_v31 = vor.u32 %v7146_v21, %v5377_v20  ;;  %v5707_v20 = vld [vmem:[%s11163_s6 + $0x310] sm:$0xf0] }
 0x13a   :  { %v1116_v49 = vpop.f32.mrf.mxu0  ;;  %2156 = vmatpush.bf16.msra.mxu3 %v5774_v28 }
 0x13b   :  { %v8906_v47 = vadd.f32 %v1102_v38, %v1089_v37  ;;  %v1117_v10 = vadd.f32 %v1116_v49, %v402_v46  ;;  %v1130_v32 = vpop.f32.mrf.mxu1  ;;  %v5554_v49 = vor.u32 %v7190_v40, %v5553_v36  ;;  %v7174_v36 = vld [vmem:[%s11163_s6 + $0x154] sm:$0xf0] }
 0x13d   :  { %v8922_v54 = vpack.c.bf16 %v8906_v47, %v8903_v45  ;;  %v1131_v0 = vadd.f32 %v1130_v32, %v1117_v10  ;;  %v7160_v10 = vld [vmem:[%s11163_s6 + $0xec] sm:$0xf]  ;;  %v5443_v32 = vld [vmem:[%s11163_s6 + $0xf8] sm:$0xf0] }
 0x13e   :  { %2157 = vmatpush.bf16.msra.mxu3 %v5758_v44  ;;  %v5490_v44 = vor.u32 %v7174_v36, %v5489_v35  ;;  %v5601_v35 = vld [vmem:[%s11163_s6 + $0x228] sm:$0xf] }
 0x13f   :  { %2063 = vmatmul.bf16.vlgmr.msrb.gmra.mxu0 %v8922_v54 }
 0x140   :  { %2167 = vmatpush.bf16.msrb.mxu0 %v5442_v50  ;;  %v1142_v63 = vpop.f32.mrf.mxu2  ;;  %v5345_v50 = vld [vmem:[%s11163_s6 + $0x28] sm:$0xf] }
 0x141   :  { %v1156_v4 = vpop.f32.mrf.mxu3  ;;  %v1143_v6 = vadd.f32 %v1142_v63, %v1129_v39  ;;  %v5346_v63 = vor.u32 %v7138_v51, %v5345_v50  ;;  %v5330_v39 = vor.u32 %v7134_v3, %v5329_v2  ;;  %v7170_v50 = vld [vmem:[%s11163_s6 + $0x134] sm:$0xf0]  ;;  %v5665_v51 = vld [vmem:[%s11163_s6 + $0x2a8] sm:$0xf]  ;;  %v7144_v2 = vld [vmem:[%s11163_s6 + $0x6c] sm:$0xf] }
 0x142   :  { %2158 = vmatpush.bf16.msra.mxu3 %v5742_v61  ;;  %v5457_v61 = vld [vmem:[%s11163_s6 + $0x108] sm:$0xf]  ;;  %v5379_v3 = vld [vmem:[%s11163_s6 + $0x78] sm:$0xf0] }
 0x143   :  { %v1170_v16 = vpop.f32.mrf.mxu0  ;;  %v8979_v29 = vadd.f32 %v1156_v4, %v1143_v6  ;;  %v5521_v4 = vld [vmem:[%s11163_s6 + $0x188] sm:$0xf]  ;;  %v5446_v6 = vor.u32 %v7160_v10, %v5443_v32  ;;  %v5382_v32 = vor.u32 %v7144_v2, %v5379_v3  ;;  %v7224_v2 = vld [vmem:[%s11163_s6 + $0x2ec] sm:$0xf]  ;;  %v5699_v3 = vld [vmem:[%s11163_s6 + $0x2f8] sm:$0xf0] }
 0x144   :  { %2168 = vmatpush.bf16.msrb.mxu0 %v5426_v1  ;;  %v1171_v60 = vadd.f32 %v1170_v16, %v403_v43  ;;  %v5538_v1 = vor.u32 %v7186_v57, %v5537_v52  ;;  %v5522_v15 = vor.u32 %v7182_v5, %v5521_v4  ;;  %v5505_v16 = vld [vmem:[%s11163_s6 + $0x168] sm:$0xf]  ;;  %v7218_v52 = vld [vmem:[%s11163_s6 + $0x2b4] sm:$0xf0]  ;;  %v7192_v4 = vld [vmem:[%s11163_s6 + $0x1ec] sm:$0xf] }
 0x145   :  { %v5666_v59 = vor.u32 %v7218_v52, %v5665_v51  ;;  %v5571_v5 = vld [vmem:[%s11163_s6 + $0x1f8] sm:$0xf0] }
 0x146   :  { %v1184_v37 = vpop.f32.mrf.mxu1 }
 0x147   :  { %v1185_v9 = vadd.f32 %v1184_v37, %v1171_v60  ;;  %v5681_v37 = vld [vmem:[%s11163_s6 + $0x2c8] sm:$0xf] }
 0x148   :  { %2169 = vmatpush.bf16.msrb.mxu0 %v5410_v11  ;;  %v1144_v18 = vpop.f32.mrf.mxu2  ;;  %v5726_v11 = vor.u32 %v7231_v7, %v5723_v8  ;;  %v404_v8 = vperm.slane %v8822_v55, 3  ;;  %v5363_v55 = vld [vmem:[%s11163_s6 + $0x58] sm:$0xf0] }
 0x149   :  { %v1145_v23 = vadd.f32 %v1144_v18, %v1131_v0  ;;  %v1158_v24 = vpop.f32.mrf.mxu3  ;;  %v5697_v18 = vld [vmem:[%s11163_s6 + $0x2e8] sm:$0xf] }
 0x14a   :  { %2159 = vmatpush.bf16.msra.mxu3 %v5726_v11  ;;  %v5633_v11 = vld [vmem:[%s11163_s6 + $0x268] sm:$0xf] }
 0x14b   :  { %v8981_v30 = vadd.f32 %v1158_v24, %v1145_v23  ;;  %v1172_v46 = vpop.f32.mrf.mxu0  ;;  %v7156_v23 = vld [vmem:[%s11163_s6 + $0xcc] sm:$0xf]  ;;  %v5427_v24 = vld [vmem:[%s11163_s6 + $0xd8] sm:$0xf0] }
 0x14c   :  { %2170 = vmatpush.bf16.msrb.mxu0 %v5394_v19  ;;  %v1173_v62 = vadd.f32 %v1172_v46, %v403_v43  ;;  %v7227_v19 = vld [vmem:[%s11163_s6 + $0x304] sm:$0xf]  ;;  %v5430_v34 = vor.u32 %v7156_v23, %v5427_v24  ;;  %v5411_v43 = vld [vmem:[%s11163_s6 + $0xb8] sm:$0xf0]  ;;  %v5682_v46 = vor.u32 %v7222_v41, %v5681_v37  ;;  %v7136_v23 = vld [vmem:[%s11163_s6 + $0x2c] sm:$0xf] }
 0x14d   :  { %v8994_v38 = vpack.c.bf16 %v8981_v30, %v8979_v29  ;;  %v5710_v25 = vor.u32 %v7227_v19, %v5707_v20  ;;  %v5347_v24 = vld [vmem:[%s11163_s6 + $0x38] sm:$0xf0]  ;;  %v7202_v41 = vld [vmem:[%s11163_s6 + $0x234] sm:$0xf0] }
 0x14e   :  { %v1186_v12 = vpop.f32.mrf.mxu1  ;;  %v5602_v52 = vor.u32 %v7202_v41, %v5601_v35  ;;  %v5761_v41 = vld [vmem:[%s11163_s6 + $0x368] sm:$0xf] }
 0x14f   :  { %2077 = vmatmul.bf16.vlgmr.msrb.gmra.mxu1 %v8994_v38  ;;  %2119 = vmatmul.bf16.vlgmr.msra.gmra.mxu0 %v8922_v54  ;;  %v1187_v13 = vadd.f32 %v1186_v12, %v1173_v62  ;;  %v7166_v62 = vld [vmem:[%s11163_s6 + $0x114] sm:$0xf0]  ;;  %v5574_v12 = vor.u32 %v7192_v4, %v5571_v5 }
 0x150   :  { %2171 = vmatpush.bf16.msrb.mxu0 %v5378_v31  ;;  %2181 = vmatpush.bf16.msrb.mxu1 %v5570_v33  ;;  %v1198_v53 = vpop.f32.mrf.mxu2  ;;  %v5506_v31 = vor.u32 %v7178_v17, %v5505_v16  ;;  %v5698_v33 = vor.u32 %v7226_v22, %v5697_v18  ;;  %v5458_v7 = vor.u32 %v7166_v62, %v5457_v61  ;;  %v5617_v18 = vld [vmem:[%s11163_s6 + $0x248] sm:$0xf]  ;;  %v7206_v22 = vld [vmem:[%s11163_s6 + $0x254] sm:$0xf0]  ;;  %v7176_v62 = vld [vmem:[%s11163_s6 + $0x16c] sm:$0xf] }
 0x151   :  { %v1212_v56 = vpop.f32.mrf.mxu3  ;;  %v1199_v14 = vadd.f32 %v1198_v53, %v1185_v9  ;;  %2160 = vmatpush.bf16.msra.mxu3 %v5710_v25  ;;  %v7148_v53 = vld [vmem:[%s11163_s6 + $0x8c] sm:$0xf]  ;;  %v7258_v61 = vld [vmem:[%s11163_s6 + $0x3f4] sm:$0xf0] }
 0x152   :  { %v7184_v25 = vld [vmem:[%s11163_s6 + $0x1ac] sm:$0xf] }
 0x153   :  { %v9074_v27 = vadd.f32 %v1212_v56, %v1199_v14  ;;  %v5395_v56 = vld [vmem:[%s11163_s6 + $0x98] sm:$0xf0]  ;;  %v7188_v14 = vld [vmem:[%s11163_s6 + $0x1cc] sm:$0xf] }
 0x154   :  { %2172 = vmatpush.bf16.msrb.mxu0 %v5362_v48  ;;  %2182 = vmatpush.bf16.msrb.mxu1 %v5554_v49  ;;  %v5414_v48 = vor.u32 %v7152_v42, %v5411_v43  ;;  %v5473_v49 = vld [vmem:[%s11163_s6 + $0x128] sm:$0xf]  ;;  %v5398_v60 = vor.u32 %v7148_v53, %v5395_v56  ;;  %v7132_v42 = vld [vmem:[%s11163_s6 + $0xc] sm:$0xf]  ;;  %v5331_v43 = vld [vmem:[%s11163_s6 + $0x18] sm:$0xf0] }
 0x155   :  { %v5474_v58 = vor.u32 %v7170_v50, %v5473_v49  ;;  %v5334_v53 = vor.u32 %v7132_v42, %v5331_v43  ;;  %v5585_v56 = vld [vmem:[%s11163_s6 + $0x208] sm:$0xf]  ;;  %v7242_v42 = vld [vmem:[%s11163_s6 + $0x374] sm:$0xf0]  ;;  %v7208_v43 = vld [vmem:[%s11163_s6 + $0x26c] sm:$0xf] }
 0x158   :  { %2173 = vmatpush.bf16.msrb.mxu0 %v5346_v63  ;;  %2183 = vmatpush.bf16.msrb.mxu1 %v5538_v1  ;;  %v1200_v0 = vpop.f32.mrf.mxu2  ;;  %v5649_v63 = vld [vmem:[%s11163_s6 + $0x288] sm:$0xf]  ;;  %v7214_v1 = vld [vmem:[%s11163_s6 + $0x294] sm:$0xf0] }
 0x159   :  { %v1201_v21 = vadd.f32 %v1200_v0, %v1187_v13  ;;  %v1214_v26 = vpop.f32.mrf.mxu3  ;;  %v5650_v10 = vor.u32 %v7214_v1, %v5649_v63  ;;  %v7140_v13 = vld [vmem:[%s11163_s6 + $0x4c] sm:$0xf]  ;;  %v5507_v1 = vld [vmem:[%s11163_s6 + $0x178] sm:$0xf0] }
 0x15b   :  { %v9076_v28 = vadd.f32 %v1214_v26, %v1201_v21  ;;  %v5539_v26 = vld [vmem:[%s11163_s6 + $0x1b8] sm:$0xf0] }
 0x15c   :  { %2174 = vmatpush.bf16.msrb.mxu0 %v5330_v39  ;;  %2184 = vmatpush.bf16.msrb.mxu1 %v5522_v15  ;;  %v7210_v39 = vld [vmem:[%s11163_s6 + $0x274] sm:$0xf0]  ;;  %v5555_v15 = vld [vmem:[%s11163_s6 + $0x1d8] sm:$0xf0]  ;;  %v5542_v37 = vor.u32 %v7184_v25, %v5539_v26  ;;  %v7164_v26 = vld [vmem:[%s11163_s6 + $0x10c] sm:$0xf] }
 0x15d   :  { %v9089_v40 = vpack.c.bf16 %v9076_v28, %v9074_v27  ;;  %v5634_v0 = vor.u32 %v7210_v39, %v5633_v11  ;;  %v5558_v21 = vor.u32 %v7188_v14, %v5555_v15  ;;  %v5809_v11 = vld [vmem:[%s11163_s6 + $0x3c8] sm:$0xf]  ;;  %v7172_v39 = vld [vmem:[%s11163_s6 + $0x14c] sm:$0xf]  ;;  %v5683_v14 = vld [vmem:[%s11163_s6 + $0x2d8] sm:$0xf0] }
 0x15e   :  { %v7246_v25 = vld [vmem:[%s11163_s6 + $0x394] sm:$0xf0] }
 0x15f   :  { %2133 = vmatmul.bf16.vlgmr.msra.gmra.mxu1 %v8994_v38  ;;  %2175 = vmatmul.bf16.vlgmr.msrb.gmra.mxu0 %v8922_v54 }
 0x160   :  { %2223 = vmatpush.bf16.msra.mxu0 %v5446_v6  ;;  %2091 = vmatmul.bf16.vlgmr.msrb.gmra.mxu2 %v9089_v40  ;;  %v5366_v6 = vor.u32 %v7140_v13, %v5363_v55  ;;  %v5491_v13 = vld [vmem:[%s11163_s6 + $0x158] sm:$0xf0]  ;;  %v7220_v55 = vld [vmem:[%s11163_s6 + $0x2cc] sm:$0xf] }
 0x161   :  { %2185 = vmatpush.bf16.msrb.mxu1 %v5506_v31  ;;  %2195 = vmatpush.bf16.msrb.mxu2 %v5698_v33  ;;  %v5618_v33 = vor.u32 %v7206_v22, %v5617_v18  ;;  %v7168_v18 = vld [vmem:[%s11163_s6 + $0x12c] sm:$0xf] }
 0x163   :  { %v1226_v57 = vpop.f32.mrf.mxu0 }
 0x164   :  { %2224 = vmatpush.bf16.msra.mxu0 %v5430_v34  ;;  %v1227_v19 = vadd.f32 %v1226_v57, %v404_v8  ;;  %v5350_v34 = vor.u32 %v7136_v23, %v5347_v24  ;;  %v7198_v57 = vld [vmem:[%s11163_s6 + $0x214] sm:$0xf0]  ;;  %v5777_v24 = vld [vmem:[%s11163_s6 + $0x388] sm:$0xf] }
 0x165   :  { %2186 = vmatpush.bf16.msrb.mxu1 %v5490_v44  ;;  %2196 = vmatpush.bf16.msrb.mxu2 %v5682_v46  ;;  %v7180_v46 = vld [vmem:[%s11163_s6 + $0x18c] sm:$0xf]  ;;  %v5778_v35 = vor.u32 %v7246_v25, %v5777_v24  ;;  %v5715_v24 = vld [vmem:[%s11163_s6 + $0x318] sm:$0xf0] }
 0x166   :  { %v1240_v9 = vpop.f32.mrf.mxu1 }
 0x167   :  { %v1241_v36 = vadd.f32 %v1240_v9, %v1227_v19  ;;  %v7216_v19 = vld [vmem:[%s11163_s6 + $0x2ac] sm:$0xf] }
 0x168   :  { %2225 = vmatpush.bf16.msra.mxu0 %v5414_v48  ;;  %v5523_v48 = vld [vmem:[%s11163_s6 + $0x198] sm:$0xf0] }
 0x169   :  { %2187 = vmatpush.bf16.msrb.mxu1 %v5474_v58  ;;  %2197 = vmatpush.bf16.msrb.mxu2 %v5666_v59  ;;  %v5526_v59 = vor.u32 %v7180_v46, %v5523_v48  ;;  %v5762_v46 = vor.u32 %v7242_v42, %v5761_v41  ;;  %v7281_v41 = vld [vmem:[%s11165_s8 + $0xac] sm:$0xf0] }
 0x16b   :  { %v1228_v16 = vpop.f32.mrf.mxu0 }
 0x16c   :  { %2226 = vmatpush.bf16.msra.mxu0 %v5398_v60  ;;  %v1229_v31 = vadd.f32 %v1228_v16, %v404_v8  ;;  %v5825_v60 = vld [vmem:[%s11163_s6 + $0x3e8] sm:$0xf]  ;;  %v5494_v16 = vor.u32 %v7172_v39, %v5491_v13  ;;  %v7248_v13 = vld [vmem:[%s11163_s6 + $0x3ac] sm:$0xf] }
 0x16d   :  { %2188 = vmatpush.bf16.msrb.mxu1 %v5458_v7  ;;  %2198 = vmatpush.bf16.msrb.mxu2 %v5650_v10  ;;  %v5586_v7 = vor.u32 %v7198_v57, %v5585_v56  ;;  %v5826_v8 = vor.u32 %v7258_v61, %v5825_v60  ;;  %v5510_v10 = vor.u32 %v7176_v62, %v5507_v1  ;;  %v5729_v57 = vld [vmem:[%s11163_s6 + $0x328] sm:$0xf]  ;;  %v5603_v60 = vld [vmem:[%s11163_s6 + $0x238] sm:$0xf0]  ;;  %v7196_v1 = vld [vmem:[%s11163_s6 + $0x20c] sm:$0xf] }
 0x16e   :  { %v1242_v44 = vpop.f32.mrf.mxu1  ;;  %v5713_v62 = vld [vmem:[%s11163_s6 + $0x308] sm:$0xf] }
 0x16f   :  { %v1243_v49 = vadd.f32 %v1242_v44, %v1229_v31  ;;  %v5459_v31 = vld [vmem:[%s11163_s6 + $0x118] sm:$0xf0] }
 0x170   :  { %v1254_v17 = vpop.f32.mrf.mxu2  ;;  %2227 = vmatpush.bf16.msra.mxu0 %v5382_v32  ;;  %2189 = vmatmul.bf16.vlgmr.msrb.gmra.mxu1 %v8994_v38  ;;  %v5702_v32 = vor.u32 %v7224_v2, %v5699_v3  ;;  %v5635_v44 = vld [vmem:[%s11163_s6 + $0x278] sm:$0xf0]  ;;  %v7256_v3 = vld [vmem:[%s11163_s6 + $0x3ec] sm:$0xf] }
 0x171   :  { %v1268_v20 = vpop.f32.mrf.mxu3  ;;  %2237 = vmatpush.bf16.msra.mxu1 %v5574_v12  ;;  %2147 = vmatmul.bf16.vlgmr.msra.gmra.mxu2 %v9089_v40  ;;  %v1255_v50 = vadd.f32 %v1254_v17, %v1241_v36  ;;  %v7254_v12 = vld [vmem:[%s11163_s6 + $0x3d4] sm:$0xf0]  ;;  %v5686_v17 = vor.u32 %v7220_v55, %v5683_v14  ;;  %v5462_v36 = vor.u32 %v7164_v26, %v5459_v31  ;;  %v5587_v2 = vld [vmem:[%s11163_s6 + $0x218] sm:$0xf0]  ;;  %v5945_v26 = vld [vmem:[%s11165_s8 + $0xe0] sm:$0xf] }
 0x172   :  { %2199 = vmatpush.bf16.msrb.mxu2 %v5634_v0  ;;  %v5810_v15 = vor.u32 %v7254_v12, %v5809_v11  ;;  %v5793_v0 = vld [vmem:[%s11163_s6 + $0x3a8] sm:$0xf]  ;;  %v5638_v48 = vor.u32 %v7208_v43, %v5635_v44  ;;  %v7252_v11 = vld [vmem:[%s11163_s6 + $0x3cc] sm:$0xf]  ;;  %v5811_v12 = vld [vmem:[%s11163_s6 + $0x3d8] sm:$0xf0] }
 0x173   :  { %v9226_v4 = vadd.f32 %v1268_v20, %v1255_v50  ;;  %v5667_v20 = vld [vmem:[%s11163_s6 + $0x2b8] sm:$0xf0]  ;;  %v7238_v50 = vld [vmem:[%s11163_s6 + $0x354] sm:$0xf0]  ;;  %v5814_v39 = vor.u32 %v7252_v11, %v5811_v12  ;;  %v7289_v31 = vld [vmem:[%s11165_s8 + $0xec] sm:$0xf0] }
 0x174   :  { %2228 = vmatpush.bf16.msra.mxu0 %v5366_v6  ;;  %v7250_v6 = vld [vmem:[%s11163_s6 + $0x3b4] sm:$0xf0]  ;;  %v5670_v23 = vor.u32 %v7216_v19, %v5667_v20  ;;  %v5795_v55 = vld [vmem:[%s11163_s6 + $0x3b8] sm:$0xf0]  ;;  %v7232_v20 = vld [vmem:[%s11163_s6 + $0x32c] sm:$0xf] }
 0x175   :  { %2238 = vmatpush.bf16.msra.mxu1 %v5558_v21  ;;  %v5794_v21 = vor.u32 %v7250_v6, %v5793_v0  ;;  %v5798_v14 = vor.u32 %v7248_v13, %v5795_v55  ;;  %v7240_v0 = vld [vmem:[%s11163_s6 + $0x36c] sm:$0xf]  ;;  %v5897_v43 = vld [vmem:[%s11165_s8 + $0x80] sm:$0xf]  ;;  %v7277_v44 = vld [vmem:[%s11165_s8 + $0x8c] sm:$0xf0] }
 0x176   :  { %2200 = vmatpush.bf16.msrb.mxu2 %v5618_v33  ;;  %v7212_v33 = vld [vmem:[%s11163_s6 + $0x28c] sm:$0xf]  ;;  %v7287_v12 = vld [vmem:[%s11165_s8 + $0xe4] sm:$0xf]  ;;  %v6009_v55 = vld [vmem:[%s11165_s8 + $0x160] sm:$0xf] }
 0x178   :  { %v1256_v51 = vpop.f32.mrf.mxu2  ;;  %2229 = vmatpush.bf16.msra.mxu0 %v5350_v34  ;;  %v5651_v34 = vld [vmem:[%s11163_s6 + $0x298] sm:$0xf0] }
 0x179   :  { %v1257_v58 = vadd.f32 %v1256_v51, %v1243_v49  ;;  %2239 = vmatpush.bf16.msra.mxu1 %v5542_v37  ;;  %v1270_v63 = vpop.f32.mrf.mxu3  ;;  %v5654_v37 = vor.u32 %v7212_v33, %v5651_v34  ;;  %v5745_v49 = vld [vmem:[%s11163_s6 + $0x348] sm:$0xf]  ;;  %v7204_v51 = vld [vmem:[%s11163_s6 + $0x24c] sm:$0xf]  ;;  %v5946_v33 = vor.u32 %v7289_v31, %v5945_v26  ;;  %v5929_v34 = vld [vmem:[%s11165_s8 + $0xc0] sm:$0xf] }
 0x17a   :  { %2201 = vmatpush.bf16.msrb.mxu2 %v5602_v52  ;;  %v5619_v52 = vld [vmem:[%s11163_s6 + $0x258] sm:$0xf0]  ;;  %v5977_v31 = vld [vmem:[%s11165_s8 + $0x120] sm:$0xf] }
 0x17b   :  { %v9228_v5 = vadd.f32 %v1270_v63, %v1257_v58  ;;  %v5622_v56 = vor.u32 %v7204_v51, %v5619_v52  ;;  %v7234_v58 = vld [vmem:[%s11163_s6 + $0x334] sm:$0xf0]  ;;  %v7321_v51 = vld [vmem:[%s11165_s8 + $0x1ec] sm:$0xf0]  ;;  %v5865_v52 = vld [vmem:[%s11165_s8 + $0x40] sm:$0xf] }
 0x17c   :  { %2230 = vmatpush.bf16.msra.mxu0 %v5334_v53  ;;  %v5746_v53 = vor.u32 %v7238_v50, %v5745_v49  ;;  %v7230_v63 = vld [vmem:[%s11163_s6 + $0x314] sm:$0xf0]  ;;  %v6073_v49 = vld [vmem:[%s11165_s8 + $0x1e0] sm:$0xf] }
 0x17d   :  { %v9232_v9 = vpack.c.bf16 %v9228_v5, %v9226_v4  ;;  %2240 = vmatpush.bf16.msra.mxu1 %v5526_v59  ;;  %v7200_v59 = vld [vmem:[%s11163_s6 + $0x22c] sm:$0xf] }
 0x17e   :  { %2202 = vmatpush.bf16.msrb.mxu2 %v5586_v7  ;;  %v5606_v61 = vor.u32 %v7200_v59, %v5603_v60  ;;  %v5827_v7 = vld [vmem:[%s11163_s6 + $0x3f8] sm:$0xf0] }
 0x17f   :  { %2105 = vmatmul.bf16.vlgmr.msrb.gmra.mxu3 %v9232_v9  ;;  %2231 = vmatmul.bf16.vlgmr.msra.gmra.mxu0 %v8922_v54  ;;  %v5475_v54 = vld [vmem:[%s11163_s6 + $0x138] sm:$0xf0] }
 0x180   :  { %2209 = vmatpush.bf16.msrb.mxu3 %v5826_v8  ;;  %v5478_v22 = vor.u32 %v7168_v18, %v5475_v54  ;;  %v5714_v8 = vor.u32 %v7230_v63, %v5713_v62  ;;  %v7236_v18 = vld [vmem:[%s11163_s6 + $0x34c] sm:$0xf]  ;;  %v5747_v54 = vld [vmem:[%s11163_s6 + $0x358] sm:$0xf0]  ;;  %3077 = vmatpush.bf16.msrb.mxu0 %v5946_v33  ;;  %v6041_v62 = vld [vmem:[%s11165_s8 + $0x1a0] sm:$0xf] }
 0x181   :  { %2241 = vmatpush.bf16.msra.mxu1 %v5510_v10  ;;  %2203 = vmatmul.bf16.vlgmr.msrb.gmra.mxu2 %v9089_v40  ;;  %v5590_v10 = vor.u32 %v7196_v1, %v5587_v2  ;;  %v5750_v19 = vor.u32 %v7236_v18, %v5747_v54  ;;  %v7313_v1 = vld [vmem:[%s11165_s8 + $0x1ac] sm:$0xf0]  ;;  %v5833_v2 = vld [vmem:[%s11165_s8] sm:$0xf] }
 0x182   :  { %2251 = vmatpush.bf16.msra.mxu2 %v5702_v32  ;;  %v5830_v32 = vor.u32 %v7256_v3, %v5827_v7  ;;  %v7261_v3 = vld [vmem:[%s11165_s8 + $0xc] sm:$0xf0]  ;;  %v6042_v7 = vor.u32 %v7313_v1, %v6041_v62  ;;  %v5993_v54 = vld [vmem:[%s11165_s8 + $0x140] sm:$0xf]  ;;  %v5867_v62 = vld [vmem:[%s11165_s8 + $0x50] sm:$0xf0] }
 0x183   :  { %v7297_v33 = vld [vmem:[%s11165_s8 + $0x12c] sm:$0xf0] }
 0x184   :  { %2210 = vmatpush.bf16.msrb.mxu3 %v5810_v15  ;;  %v7244_v15 = vld [vmem:[%s11163_s6 + $0x38c] sm:$0xf] }
 0x185   :  { %2242 = vmatpush.bf16.msra.mxu1 %v5494_v16  ;;  %v5779_v16 = vld [vmem:[%s11163_s6 + $0x398] sm:$0xf0] }
 0x186   :  { %2252 = vmatpush.bf16.msra.mxu2 %v5686_v17  ;;  %v5782_v17 = vor.u32 %v7244_v15, %v5779_v16  ;;  %v6201_v15 = vld [vmem:[%s11165_s8 + $0x2e0] sm:$0xf] }
 0x188   :  { %2211 = vmatpush.bf16.msrb.mxu3 %v5794_v21  ;;  %v5731_v21 = vld [vmem:[%s11163_s6 + $0x338] sm:$0xf0] }
 0x189   :  { %2243 = vmatpush.bf16.msra.mxu1 %v5478_v22  ;;  %v5734_v22 = vor.u32 %v7232_v20, %v5731_v21  ;;  %v6185_v20 = vld [vmem:[%s11165_s8 + $0x2c0] sm:$0xf] }
 0x18a   :  { %2253 = vmatpush.bf16.msra.mxu2 %v5670_v23  ;;  %v7228_v23 = vld [vmem:[%s11163_s6 + $0x30c] sm:$0xf] }
 0x18b   :  { %v5718_v25 = vor.u32 %v7228_v23, %v5715_v24  ;;  %v7279_v23 = vld [vmem:[%s11165_s8 + $0xa4] sm:$0xf]  ;;  %v5915_v24 = vld [vmem:[%s11165_s8 + $0xb0] sm:$0xf0] }
 0x18c   :  { %2212 = vmatpush.bf16.msrb.mxu3 %v5778_v35  ;;  %v7285_v35 = vld [vmem:[%s11165_s8 + $0xcc] sm:$0xf0]  ;;  %v5918_v26 = vor.u32 %v7279_v23, %v5915_v24  ;;  %v6329_v23 = vld [vmem:[%s11165_s8 + $0x3e0] sm:$0xf] }
 0x18d   :  { %2244 = vmatpush.bf16.msra.mxu1 %v5462_v36  ;;  %v5930_v36 = vor.u32 %v7285_v35, %v5929_v34  ;;  %v6169_v34 = vld [vmem:[%s11165_s8 + $0x2a0] sm:$0xf]  ;;  %v5978_v35 = vor.u32 %v7297_v33, %v5977_v31  ;;  %v7303_v31 = vld [vmem:[%s11165_s8 + $0x164] sm:$0xf]  ;;  %v6011_v33 = vld [vmem:[%s11165_s8 + $0x170] sm:$0xf0] }
 0x18e   :  { %2254 = vmatpush.bf16.msra.mxu2 %v5654_v37  ;;  %v5913_v37 = vld [vmem:[%s11165_s8 + $0xa0] sm:$0xf] }
 0x18f   :  { %2161 = vmatmul.bf16.vlgmr.msra.gmra.mxu3 %v9232_v9  ;;  %3078 = vmatpush.bf16.msrb.mxu0 %v5930_v36  ;;  %v5914_v42 = vor.u32 %v7281_v41, %v5913_v37  ;;  %v7345_v36 = vld [vmem:[%s11165_s8 + $0x2ac] sm:$0xf0]  ;;  %v7275_v37 = vld [vmem:[%s11165_s8 + $0x84] sm:$0xf]  ;;  %v5899_v41 = vld [vmem:[%s11165_s8 + $0x90] sm:$0xf0] }
 0x190   :  { %2213 = vmatpush.bf16.msrb.mxu3 %v5762_v46  ;;  %2245 = vmatmul.bf16.vlgmr.msra.gmra.mxu1 %v8994_v38  ;;  %v5730_v38 = vor.u32 %v7234_v58, %v5729_v57  ;;  %v5881_v46 = vld [vmem:[%s11165_s8 + $0x60] sm:$0xf]  ;;  %v7317_v58 = vld [vmem:[%s11165_s8 + $0x1cc] sm:$0xf0] }
 0x191   :  { %v6057_v57 = vld [vmem:[%s11165_s8 + $0x1c0] sm:$0xf] }
 0x192   :  { %2255 = vmatpush.bf16.msra.mxu2 %v5638_v48  ;;  %v7273_v48 = vld [vmem:[%s11165_s8 + $0x6c] sm:$0xf0]  ;;  %v6058_v60 = vor.u32 %v7317_v58, %v6057_v57  ;;  %v6075_v57 = vld [vmem:[%s11165_s8 + $0x1f0] sm:$0xf0] }
 0x193   :  { %3079 = vmatpush.bf16.msrb.mxu0 %v5914_v42  ;;  %v5882_v50 = vor.u32 %v7273_v48, %v5881_v46  ;;  %v6170_v42 = vor.u32 %v7345_v36, %v6169_v34  ;;  %v6153_v46 = vld [vmem:[%s11165_s8 + $0x280] sm:$0xf]  ;;  %v7351_v36 = vld [vmem:[%s11165_s8 + $0x2e4] sm:$0xf] }
 0x194   :  { %2214 = vmatpush.bf16.msrb.mxu3 %v5746_v53  ;;  %v7269_v53 = vld [vmem:[%s11165_s8 + $0x4c] sm:$0xf0] }
 0x195   :  { %v5866_v59 = vor.u32 %v7269_v53, %v5865_v52 }
 0x196   :  { %2256 = vmatpush.bf16.msra.mxu2 %v5622_v56  ;;  %v6074_v56 = vor.u32 %v7321_v51, %v6073_v49  ;;  %v7341_v49 = vld [vmem:[%s11165_s8 + $0x28c] sm:$0xf0]  ;;  %v5883_v51 = vld [vmem:[%s11165_s8 + $0x70] sm:$0xf0] }
 0x197   :  { %v6154_v52 = vor.u32 %v7341_v49, %v6153_v46  ;;  %v5995_v46 = vld [vmem:[%s11165_s8 + $0x150] sm:$0xf0] }
 0x198   :  { %2215 = vmatpush.bf16.msrb.mxu3 %v5730_v38  ;;  %3091 = vmatpush.bf16.msrb.mxu1 %v6074_v56  ;;  %v5849_v38 = vld [vmem:[%s11165_s8 + $0x20] sm:$0xf]  ;;  %v7319_v56 = vld [vmem:[%s11165_s8 + $0x1e4] sm:$0xf] }
 0x199   :  { %v6078_v58 = vor.u32 %v7319_v56, %v6075_v57  ;;  %v6297_v56 = vld [vmem:[%s11165_s8 + $0x3a0] sm:$0xf]  ;;  %v7377_v57 = vld [vmem:[%s11165_s8 + $0x3ac] sm:$0xf0] }
 0x19a   :  { %2257 = vmatpush.bf16.msra.mxu2 %v5606_v61  ;;  %v7265_v61 = vld [vmem:[%s11165_s8 + $0x2c] sm:$0xf0] }
 0x19b   :  { %v5850_v63 = vor.u32 %v7265_v61, %v5849_v38  ;;  %v7267_v61 = vld [vmem:[%s11165_s8 + $0x44] sm:$0xf] }
 0x19c   :  { %2216 = vmatpush.bf16.msrb.mxu3 %v5714_v8  ;;  %3092 = vmatpush.bf16.msrb.mxu1 %v6058_v60  ;;  %v6025_v8 = vld [vmem:[%s11165_s8 + $0x180] sm:$0xf]  ;;  %v7337_v60 = vld [vmem:[%s11165_s8 + $0x26c] sm:$0xf0]  ;;  %v5870_v1 = vor.u32 %v7267_v61, %v5867_v62  ;;  %v7343_v61 = vld [vmem:[%s11165_s8 + $0x2a4] sm:$0xf] }
 0x19e   :  { %2258 = vmatpush.bf16.msra.mxu2 %v5590_v10  ;;  %v7309_v10 = vld [vmem:[%s11165_s8 + $0x18c] sm:$0xf0] }
 0x19f   :  { %2217 = vmatmul.bf16.vlgmr.msrb.gmra.mxu3 %v9232_v9  ;;  %v6026_v11 = vor.u32 %v7309_v10, %v6025_v8  ;;  %v7333_v8 = vld [vmem:[%s11165_s8 + $0x24c] sm:$0xf0] }
 0x1a0   :  { %2265 = vmatpush.bf16.msra.mxu3 %v5830_v32  ;;  %v5834_v32 = vor.u32 %v7261_v3, %v5833_v2  ;;  %3093 = vmatpush.bf16.msrb.mxu1 %v6042_v7  ;;  %v6059_v2 = vld [vmem:[%s11165_s8 + $0x1d0] sm:$0xf0]  ;;  %v6121_v7 = vld [vmem:[%s11165_s8 + $0x240] sm:$0xf] }
 0x1a1   :  { %2259 = vmatmul.bf16.vlgmr.msra.gmra.mxu2 %v9089_v40  ;;  %v5763_v40 = vld [vmem:[%s11163_s6 + $0x378] sm:$0xf0]  ;;  %v6122_v10 = vor.u32 %v7333_v8, %v6121_v7  ;;  %v6281_v7 = vld [vmem:[%s11165_s8 + $0x380] sm:$0xf]  ;;  %v7373_v8 = vld [vmem:[%s11165_s8 + $0x38c] sm:$0xf0] }
 0x1a2   :  { %v5766_v6 = vor.u32 %v7240_v0, %v5763_v40  ;;  %v7283_v0 = vld [vmem:[%s11165_s8 + $0xc4] sm:$0xf]  ;;  %v5931_v40 = vld [vmem:[%s11165_s8 + $0xd0] sm:$0xf0] }
 0x1a3   :  { %v5934_v18 = vor.u32 %v7283_v0, %v5931_v40  ;;  %v7259_v0 = vld [vmem:[%s11165_s8 + $0x4] sm:$0xf]  ;;  %v5835_v40 = vld [vmem:[%s11165_s8 + $0x10] sm:$0xf0] }
 0x1a4   :  { %2266 = vmatpush.bf16.msra.mxu3 %v5814_v39  ;;  %v5947_v39 = vld [vmem:[%s11165_s8 + $0xf0] sm:$0xf0]  ;;  %3094 = vmatpush.bf16.msrb.mxu1 %v6026_v11 }
 0x1a5   :  { %v5950_v13 = vor.u32 %v7287_v12, %v5947_v39  ;;  %v5851_v11 = vld [vmem:[%s11165_s8 + $0x30] sm:$0xf0]  ;;  %v7311_v12 = vld [vmem:[%s11165_s8 + $0x1a4] sm:$0xf] }
 0x1a8   :  { %2267 = vmatpush.bf16.msra.mxu3 %v5798_v14  ;;  %v7305_v14 = vld [vmem:[%s11165_s8 + $0x16c] sm:$0xf0] }
 0x1a9   :  { %v6010_v16 = vor.u32 %v7305_v14, %v6009_v55  ;;  %v6105_v14 = vld [vmem:[%s11165_s8 + $0x220] sm:$0xf] }
 0x1ab   :  { %3095 = vmatpush.bf16.msrb.mxu1 %v6010_v16 }
 0x1ac   :  { %2268 = vmatpush.bf16.msra.mxu3 %v5782_v17  ;;  %v7353_v17 = vld [vmem:[%s11165_s8 + $0x2ec] sm:$0xf0] }
 0x1b0   :  { %2269 = vmatpush.bf16.msra.mxu3 %v5766_v6  ;;  %v6202_v6 = vor.u32 %v7353_v17, %v6201_v15  ;;  %v7329_v15 = vld [vmem:[%s11165_s8 + $0x22c] sm:$0xf0] }
 0x1b1   :  { %v6106_v17 = vor.u32 %v7329_v15, %v6105_v14 }
 0x1b2   :  { %3105 = vmatpush.bf16.msrb.mxu2 %v6202_v6  ;;  %v7307_v6 = vld [vmem:[%s11165_s8 + $0x184] sm:$0xf] }
 0x1b4   :  { %2270 = vmatpush.bf16.msra.mxu3 %v5750_v19  ;;  %v7301_v19 = vld [vmem:[%s11165_s8 + $0x14c] sm:$0xf0] }
 0x1b5   :  { %v5994_v21 = vor.u32 %v7301_v19, %v5993_v54  ;;  %v6027_v54 = vld [vmem:[%s11165_s8 + $0x190] sm:$0xf0] }
 0x1b7   :  { %3096 = vmatpush.bf16.msrb.mxu1 %v5994_v21  ;;  %v6089_v21 = vld [vmem:[%s11165_s8 + $0x200] sm:$0xf] }
 0x1b8   :  { %2271 = vmatpush.bf16.msra.mxu3 %v5734_v22  ;;  %v7349_v22 = vld [vmem:[%s11165_s8 + $0x2cc] sm:$0xf0] }
 0x1bb   :  { %3097 = vmatpush.bf16.msrb.mxu1 %v5978_v35  ;;  %v6014_v35 = vor.u32 %v7303_v31, %v6011_v33  ;;  %v7365_v31 = vld [vmem:[%s11165_s8 + $0x34c] sm:$0xf0] }
 0x1bc   :  { %2272 = vmatpush.bf16.msra.mxu3 %v5718_v25  ;;  %v6186_v25 = vor.u32 %v7349_v22, %v6185_v20  ;;  %v9590_v16 = vpop.f32.mrf.mxu0  ;;  %v6030_v20 = vor.u32 %v7307_v6, %v6027_v54  ;;  %v7325_v22 = vld [vmem:[%s11165_s8 + $0x20c] sm:$0xf0]  ;;  %v6139_v54 = vld [vmem:[%s11165_s8 + $0x270] sm:$0xf0] }
 0x1be   :  { %3106 = vmatpush.bf16.msrb.mxu2 %v6186_v25  ;;  %v6090_v25 = vor.u32 %v7325_v22, %v6089_v21 }
 0x1bf   :  { %2273 = vmatmul.bf16.vlgmr.msra.gmra.mxu3 %v9232_v9  ;;  %v5898_v9 = vor.u32 %v7277_v44, %v5897_v43  ;;  %v5902_v43 = vor.u32 %v7275_v37, %v5899_v41  ;;  %v5961_v44 = vld [vmem:[%s11165_s8 + $0x100] sm:$0xf]  ;;  %v6203_v37 = vld [vmem:[%s11165_s8 + $0x2f0] sm:$0xf0] }
 0x1c0   :  { %v6206_v41 = vor.u32 %v7351_v36, %v6203_v37 }
 0x1c1   :  { %3080 = vmatpush.bf16.msrb.mxu0 %v5898_v9  ;;  %v7293_v9 = vld [vmem:[%s11165_s8 + $0x10c] sm:$0xf0] }
 0x1c2   :  { %3107 = vmatpush.bf16.msrb.mxu2 %v6170_v42  ;;  %v5962_v48 = vor.u32 %v7293_v9, %v5961_v44  ;;  %v6313_v42 = vld [vmem:[%s11165_s8 + $0x3c0] sm:$0xf]  ;;  %v7299_v9 = vld [vmem:[%s11165_s8 + $0x144] sm:$0xf] }
 0x1c3   :  { %v5998_v49 = vor.u32 %v7299_v9, %v5995_v46  ;;  %v7361_v9 = vld [vmem:[%s11165_s8 + $0x32c] sm:$0xf0] }
 0x1c4   :  { %3098 = vmatpush.bf16.msrb.mxu1 %v5962_v48  ;;  %v7347_v48 = vld [vmem:[%s11165_s8 + $0x2c4] sm:$0xf] }
 0x1c5   :  { %3081 = vmatpush.bf16.msrb.mxu0 %v5882_v50  ;;  %v7271_v50 = vld [vmem:[%s11165_s8 + $0x64] sm:$0xf] }
 0x1c6   :  { %v5886_v53 = vor.u32 %v7271_v50, %v5883_v51  ;;  %3108 = vmatpush.bf16.msrb.mxu2 %v6154_v52  ;;  %v6187_v50 = vld [vmem:[%s11165_s8 + $0x2d0] sm:$0xf0]  ;;  %v9653_v51 = vld [vmem:[%s11166_s7] sm:$0xf]  ;;  %v2066_v52 = vpop.f32.mrf.mxu0 }
 0x1c7   :  { %v1407_v62 = vperm.slane %v9653_v51, 0 }
 0x1c8   :  { %3147 = vmatpush.bf16.msra.mxu1 %v6078_v58 }
 0x1c9   :  { %3082 = vmatpush.bf16.msrb.mxu0 %v5866_v59  ;;  %v6137_v59 = vld [vmem:[%s11165_s8 + $0x260] sm:$0xf] }
 0x1ca   :  { %v6138_v38 = vor.u32 %v7337_v60, %v6137_v59  ;;  %v6298_v59 = vor.u32 %v7377_v57, %v6297_v56  ;;  %v7295_v60 = vld [vmem:[%s11165_s8 + $0x124] sm:$0xf]  ;;  %v7290_v56 = vld [vmem:[%s11165_s8 + $0xf4] sm:$0xf0] }
 0x1cc   :  { %3109 = vmatpush.bf16.msrb.mxu2 %v6138_v38  ;;  %v9604_v19 = vpop.f32.mrf.mxu1  ;;  %v5979_v38 = vld [vmem:[%s11165_s8 + $0x130] sm:$0xf0] }
 0x1cd   :  { %3083 = vmatpush.bf16.msrb.mxu0 %v5850_v63  ;;  %v7315_v63 = vld [vmem:[%s11165_s8 + $0x1c4] sm:$0xf] }
 0x1ce   :  { %v6062_v3 = vor.u32 %v7315_v63, %v6059_v2  ;;  %v5982_v63 = vor.u32 %v7295_v60, %v5979_v38  ;;  %v2120_v6 = vpop.f32.mrf.mxu0  ;;  %v6217_v38 = vld [vmem:[%s11165_s8 + $0x300] sm:$0xf] }
 0x1d0   :  { %3148 = vmatpush.bf16.msra.mxu1 %v6062_v3  ;;  %3110 = vmatpush.bf16.msrb.mxu2 %v6122_v10  ;;  %v6282_v10 = vor.u32 %v7373_v8, %v6281_v7  ;;  %v5937_v8 = vld [vmem:[%s11165_s8 + $0xc8] sm:$0xf] }
 0x1d1   :  { %3084 = vmatpush.bf16.msrb.mxu0 %v5834_v32  ;;  %v7263_v32 = vld [vmem:[%s11165_s8 + $0x24] sm:$0xf] }
 0x1d2   :  { %v5854_v39 = vor.u32 %v7263_v32, %v5851_v11  ;;  %v7291_v32 = vld [vmem:[%s11165_s8 + $0x104] sm:$0xf]  ;;  %v5963_v11 = vld [vmem:[%s11165_s8 + $0x110] sm:$0xf0] }
 0x1d4   :  { %3111 = vmatpush.bf16.msrb.mxu2 %v6106_v17  ;;  %v2080_v58 = vpop.f32.mrf.mxu1 }
 0x1d5   :  { %3133 = vmatpush.bf16.msra.mxu0 %v5950_v13  ;;  %v6043_v13 = vld [vmem:[%s11165_s8 + $0x1b0] sm:$0xf0] }
 0x1d6   :  { %v6046_v55 = vor.u32 %v7311_v12, %v6043_v13  ;;  %v7339_v12 = vld [vmem:[%s11165_s8 + $0x284] sm:$0xf]  ;;  %v5966_v13 = vor.u32 %v7291_v32, %v5963_v11  ;;  %v6331_v11 = vld [vmem:[%s11165_s8 + $0x3f0] sm:$0xf0] }
 0x1d8   :  { %3149 = vmatpush.bf16.msra.mxu1 %v6046_v55  ;;  %3112 = vmatpush.bf16.msrb.mxu2 %v6090_v25  ;;  %v6155_v55 = vld [vmem:[%s11165_s8 + $0x290] sm:$0xf0] }
 0x1d9   :  { %3134 = vmatpush.bf16.msra.mxu0 %v5934_v18  ;;  %v5838_v18 = vor.u32 %v7259_v0, %v5835_v40  ;;  %v6158_v15 = vor.u32 %v7339_v12, %v6155_v55  ;;  %v6265_v0 = vld [vmem:[%s11165_s8 + $0x360] sm:$0xf]  ;;  %v7369_v40 = vld [vmem:[%s11165_s8 + $0x36c] sm:$0xf0] }
 0x1dc   :  { %3150 = vmatpush.bf16.msra.mxu1 %v6030_v20  ;;  %3161 = vmatpush.bf16.msra.mxu2 %v6206_v41  ;;  %v2134_v22 = vpop.f32.mrf.mxu1 }
 0x1dd   :  { %3135 = vmatpush.bf16.msra.mxu0 %v5918_v26  ;;  %v7385_v26 = vld [vmem:[%s11165_s8 + $0x3ec] sm:$0xf0] }
 0x1de   :  { %v6330_v34 = vor.u32 %v7385_v26, %v6329_v23  ;;  %v6249_v26 = vld [vmem:[%s11165_s8 + $0x340] sm:$0xf] }
 0x1e0   :  { %3119 = vmatpush.bf16.msrb.mxu3 %v6330_v34  ;;  %3151 = vmatpush.bf16.msra.mxu1 %v6014_v35  ;;  %v6250_v34 = vor.u32 %v7365_v31, %v6249_v26  ;;  %v6123_v35 = vld [vmem:[%s11165_s8 + $0x250] sm:$0xf0]  ;;  %v7375_v26 = vld [vmem:[%s11165_s8 + $0x3a4] sm:$0xf] }
 0x1e1   :  { %3136 = vmatpush.bf16.msra.mxu0 %v5902_v43  ;;  %v7381_v43 = vld [vmem:[%s11165_s8 + $0x3cc] sm:$0xf0]  ;;  %v6299_v31 = vld [vmem:[%s11165_s8 + $0x3b0] sm:$0xf0] }
 0x1e2   :  { %v6314_v44 = vor.u32 %v7381_v43, %v6313_v42 }
 0x1e3   :  { %v9615_v24 = vpop.f32.mrf.mxu2 }
 0x1e4   :  { %3120 = vmatpush.bf16.msrb.mxu3 %v6314_v44  ;;  %3152 = vmatpush.bf16.msra.mxu1 %v5998_v49  ;;  %v6233_v44 = vld [vmem:[%s11165_s8 + $0x320] sm:$0xf]  ;;  %v6107_v49 = vld [vmem:[%s11165_s8 + $0x230] sm:$0xf0] }
 0x1e5   :  { %3137 = vmatpush.bf16.msra.mxu0 %v5886_v53  ;;  %v6190_v53 = vor.u32 %v7347_v48, %v6187_v50  ;;  %v6234_v46 = vor.u32 %v7361_v9, %v6233_v44  ;;  %v7327_v48 = vld [vmem:[%s11165_s8 + $0x224] sm:$0xf]  ;;  %v1408_v50 = vperm.slane %v9653_v51, 1  ;;  %v6081_v44 = vld [vmem:[%s11165_s8 + $0x1e8] sm:$0xf] }
 0x1e6   :  { %v6110_v57 = vor.u32 %v7327_v48, %v6107_v49  ;;  %v7322_v9 = vld [vmem:[%s11165_s8 + $0x1f4] sm:$0xf0]  ;;  %v7371_v49 = vld [vmem:[%s11165_s8 + $0x384] sm:$0xf] }
 0x1e7   :  { %3162 = vmatpush.bf16.msra.mxu2 %v6190_v53  ;;  %v5953_v53 = vld [vmem:[%s11165_s8 + $0xe8] sm:$0xf] }
 0x1e8   :  { %3121 = vmatpush.bf16.msrb.mxu3 %v6298_v59  ;;  %3153 = vmatpush.bf16.msra.mxu1 %v5982_v63  ;;  %v5954_v63 = vor.u32 %v7290_v56, %v5953_v53 }
 0x1e9   :  { %3138 = vmatpush.bf16.msra.mxu0 %v5870_v1  ;;  %v6171_v1 = vld [vmem:[%s11165_s8 + $0x2b0] sm:$0xf0] }
 0x1ea   :  { %v6174_v3 = vor.u32 %v7343_v61, %v6171_v1  ;;  %v7357_v61 = vld [vmem:[%s11165_s8 + $0x30c] sm:$0xf0] }
 0x1eb   :  { %v2094_v2 = vpop.f32.mrf.mxu2  ;;  %v6218_v1 = vor.u32 %v7357_v61, %v6217_v38  ;;  %v6065_v38 = vld [vmem:[%s11165_s8 + $0x1c8] sm:$0xf] }
 0x1ec   :  { %3163 = vmatpush.bf16.msra.mxu2 %v6174_v3  ;;  %3122 = vmatpush.bf16.msrb.mxu3 %v6282_v10  ;;  %v2121_v3 = vadd.f32 %v2120_v6, %v1408_v50  ;;  %v7286_v10 = vld [vmem:[%s11165_s8 + $0xd4] sm:$0xf0]  ;;  %v7379_v6 = vld [vmem:[%s11165_s8 + $0x3c4] sm:$0xf] }
 0x1ed   :  { %3139 = vmatpush.bf16.msra.mxu0 %v5854_v39  ;;  %v2065_v39 = vadd.f32 %v9590_v16, %v1407_v62  ;;  %3154 = vmatpush.bf16.msra.mxu1 %v5966_v13  ;;  %v6266_v16 = vor.u32 %v7369_v40, %v6265_v0  ;;  %v7282_v40 = vld [vmem:[%s11165_s8 + $0xb4] sm:$0xf0] }
 0x1ee   :  { %v2135_v55 = vadd.f32 %v2134_v22, %v2121_v3  ;;  %v5905_v22 = vld [vmem:[%s11165_s8 + $0x88] sm:$0xf] }
 0x1ef   :  { %v2079_v17 = vadd.f32 %v9604_v19, %v2065_v39  ;;  %v2067_v19 = vadd.f32 %v2066_v52, %v1407_v62  ;;  %v2136_v62 = vpop.f32.mrf.mxu1 }
 0x1f0   :  { %3164 = vmatpush.bf16.msra.mxu2 %v6158_v15  ;;  %3123 = vmatpush.bf16.msrb.mxu3 %v6266_v16  ;;  %v5921_v15 = vld [vmem:[%s11165_s8 + $0xa8] sm:$0xf]  ;;  %v6315_v16 = vld [vmem:[%s11165_s8 + $0x3d0] sm:$0xf0] }
 0x1f1   :  { %3140 = vmatpush.bf16.msra.mxu0 %v5838_v18  ;;  %v7335_v18 = vld [vmem:[%s11165_s8 + $0x264] sm:$0xf]  ;;  %v2093_v20 = vadd.f32 %v9615_v24, %v2079_v17  ;;  %v2081_v23 = vadd.f32 %v2080_v58, %v2067_v19  ;;  %v2122_v58 = vpop.f32.mrf.mxu0 }
 0x1f2   :  { %v6142_v21 = vor.u32 %v7335_v18, %v6139_v54  ;;  %v7331_v24 = vld [vmem:[%s11165_s8 + $0x244] sm:$0xf]  ;;  %v2123_v17 = vadd.f32 %v2122_v58, %v1408_v50  ;;  %v6318_v18 = vor.u32 %v7379_v6, %v6315_v16  ;;  %v6283_v50 = vld [vmem:[%s11165_s8 + $0x390] sm:$0xf0]  ;;  %v6082_v58 = vor.u32 %v7322_v9, %v6081_v44 }
 0x1f3   :  { %v2095_v36 = vadd.f32 %v2094_v2, %v2081_v23  ;;  %v6126_v37 = vor.u32 %v7331_v24, %v6123_v35  ;;  %v7323_v2 = vld [vmem:[%s11165_s8 + $0x204] sm:$0xf]  ;;  %v6302_v24 = vor.u32 %v7375_v26, %v6299_v31  ;;  %v7288_v31 = vld [vmem:[%s11165_s8 + $0xec] sm:$0xf] }
 0x1f4   :  { %v2148_v33 = vpop.f32.mrf.mxu2  ;;  %3165 = vmatpush.bf16.msra.mxu2 %v6142_v21  ;;  %3124 = vmatpush.bf16.msrb.mxu3 %v6250_v34  ;;  %v2137_v54 = vadd.f32 %v2136_v62, %v2123_v17  ;;  %v5922_v21 = vor.u32 %v7282_v40, %v5921_v15  ;;  %v6251_v15 = vld [vmem:[%s11165_s8 + $0x350] sm:$0xf0] }
 0x1f5   :  { %v2149_v0 = vadd.f32 %v2148_v33, %v2135_v55  ;;  %v7314_v55 = vld [vmem:[%s11165_s8 + $0x1b4] sm:$0xf0] }
 0x1f7   :  { %v2190_v33 = vpop.f32.mrf.mxu1 }
 0x1f8   :  { %3166 = vmatpush.bf16.msra.mxu2 %v6126_v37  ;;  %3125 = vmatpush.bf16.msrb.mxu3 %v6234_v46  ;;  %v5889_v37 = vld [vmem:[%s11165_s8 + $0x68] sm:$0xf]  ;;  %v1409_v46 = vperm.slane %v9653_v51, 2 }
 0x1fc   :  { %3167 = vmatpush.bf16.msra.mxu2 %v6110_v57  ;;  %v2150_v12 = vpop.f32.mrf.mxu2  ;;  %3126 = vmatpush.bf16.msrb.mxu3 %v6218_v1 }
 0x1fd   :  { %v2151_v23 = vadd.f32 %v2150_v12, %v2137_v54  ;;  %v6049_v12 = vld [vmem:[%s11165_s8 + $0x1a8] sm:$0xf] }
 0x1fe   :  { %v5841_v54 = vld [vmem:[%s11165_s8 + $0x8] sm:$0xf] }
 0x1ff   :  { %v2192_v3 = vpop.f32.mrf.mxu1 }
 0x202   :  { %v2106_v14 = vpop.f32.mrf.mxu3 }
 0x203   :  { %v2107_v25 = vadd.f32 %v2106_v14, %v2093_v20  ;;  %v5938_v14 = vor.u32 %v7286_v10, %v5937_v8  ;;  %v2176_v20 = vpop.f32.mrf.mxu0 }
 0x204   :  { %v2177_v61 = vadd.f32 %v2176_v20, %v1409_v46  ;;  %v6033_v20 = vld [vmem:[%s11165_s8 + $0x188] sm:$0xf] }
 0x205   :  { %v2279_v42 = vmax.f32 %v2107_v25, 0.0  ;;  %v7278_v25 = vld [vmem:[%s11165_s8 + $0x94] sm:$0xf0] }
 0x207   :  { %v2287_v59 = vadd.f32 %v2279_v42, %v8903_v45  ;;  %v6091_v45 = vld [vmem:[%s11165_s8 + $0x210] sm:$0xf0]  ;;  %v5906_v42 = vor.u32 %v7278_v25, %v5905_v22  ;;  %v7310_v22 = vld [vmem:[%s11165_s8 + $0x194] sm:$0xf0] }
 0x208   :  { %v6094_v32 = vor.u32 %v7323_v2, %v6091_v45  ;;  %v6235_v25 = vld [vmem:[%s11165_s8 + $0x330] sm:$0xf0] }
 0x20a   :  { %v2108_v41 = vpop.f32.mrf.mxu3  ;;  %3168 = vmatpush.bf16.msra.mxu2 %v6094_v32  ;;  %v5857_v32 = vld [vmem:[%s11165_s8 + $0x28] sm:$0xf] }
 0x20b   :  { %v2109_v43 = vadd.f32 %v2108_v41, %v2095_v36  ;;  %v2204_v41 = vpop.f32.mrf.mxu2  ;;  %v2178_v1 = vpop.f32.mrf.mxu0 }
 0x20d   :  { %v2283_v52 = vmax.f32 %v2109_v43, 0.0  ;;  %v7274_v43 = vld [vmem:[%s11165_s8 + $0x74] sm:$0xf0] }
 0x20e   :  { %v5890_v57 = vor.u32 %v7274_v43, %v5889_v37  ;;  %v6034_v37 = vor.u32 %v7310_v22, %v6033_v20  ;;  %v6209_v43 = vld [vmem:[%s11165_s8 + $0x2e8] sm:$0xf] }
 0x20f   :  { %v2291_v60 = vadd.f32 %v2283_v52, %v8906_v47  ;;  %v7383_v47 = vld [vmem:[%s11165_s8 + $0x3e4] sm:$0xf]  ;;  %v6286_v52 = vor.u32 %v7371_v49, %v6283_v50  ;;  %v7354_v49 = vld [vmem:[%s11165_s8 + $0x2f4] sm:$0xf0]  ;;  %v7284_v50 = vld [vmem:[%s11165_s8 + $0xcc] sm:$0xf] }
 0x210   :  { %v6334_v13 = vor.u32 %v7383_v47, %v6331_v11  ;;  %v2191_v47 = vadd.f32 %v2190_v33, %v2177_v61  ;;  %v7266_v11 = vld [vmem:[%s11165_s8 + $0x34] sm:$0xf0]  ;;  %v5955_v33 = vld [vmem:[%s11165_s8 + $0xf8] sm:$0xf0]  ;;  %v6001_v61 = vld [vmem:[%s11165_s8 + $0x148] sm:$0xf] }
 0x211   :  { %v9755_v7 = vpack.c.bf16 %v2291_v60, %v2287_v59  ;;  %v5873_v59 = vld [vmem:[%s11165_s8 + $0x48] sm:$0xf]  ;;  %v7270_v60 = vld [vmem:[%s11165_s8 + $0x54] sm:$0xf0]  ;;  %v5858_v16 = vor.u32 %v7266_v11, %v5857_v32  ;;  %v5958_v9 = vor.u32 %v7288_v31, %v5955_v33  ;;  %v7276_v11 = vld [vmem:[%s11165_s8 + $0x8c] sm:$0xf] }
 0x212   :  { %v2162_v39 = vpop.f32.mrf.mxu3  ;;  %3175 = vmatpush.bf16.msra.mxu3 %v6334_v13  ;;  %v5874_v8 = vor.u32 %v7270_v60, %v5873_v59  ;;  %v2205_v13 = vadd.f32 %v2204_v41, %v2191_v47  ;;  %v6017_v41 = vld [vmem:[%s11165_s8 + $0x168] sm:$0xf]  ;;  %v6210_v60 = vor.u32 %v7354_v49, %v6209_v43  ;;  %v7346_v32 = vld [vmem:[%s11165_s8 + $0x2b4] sm:$0xf0]  ;;  %v7268_v33 = vld [vmem:[%s11165_s8 + $0x4c] sm:$0xf] }
 0x213   :  { %3085 = vmatmul.bf16.vlgmr.msrb.gmra.mxu0 %v9755_v7  ;;  %v2163_v19 = vadd.f32 %v2162_v39, %v2149_v0  ;;  %v2179_v39 = vadd.f32 %v2178_v1, %v1409_v46  ;;  %v2206_v17 = vpop.f32.mrf.mxu2  ;;  %v7355_v46 = vld [vmem:[%s11165_s8 + $0x304] sm:$0xf]  ;;  %v7338_v31 = vld [vmem:[%s11165_s8 + $0x274] sm:$0xf0] }
 0x214   :  { %3189 = vmatpush.bf16.msrb.mxu0 %v5954_v63  ;;  %v6267_v63 = vld [vmem:[%s11165_s8 + $0x370] sm:$0xf0] }
 0x215   :  { %v2280_v35 = vmax.f32 %v2163_v19, 0.0  ;;  %v2193_v40 = vadd.f32 %v2192_v3, %v2179_v39  ;;  %v7262_v19 = vld [vmem:[%s11165_s8 + $0x14] sm:$0xf0]  ;;  %v5985_v3 = vld [vmem:[%s11165_s8 + $0x128] sm:$0xf]  ;;  %v2246_v39 = vpop.f32.mrf.mxu1 }
 0x216   :  { %3176 = vmatpush.bf16.msra.mxu3 %v6318_v18  ;;  %v6050_v18 = vor.u32 %v7314_v55, %v6049_v12  ;;  %v5907_v12 = vld [vmem:[%s11165_s8 + $0x98] sm:$0xf0] }
 0x217   :  { %v2288_v53 = vadd.f32 %v2280_v35, %v8979_v29  ;;  %v7318_v29 = vld [vmem:[%s11165_s8 + $0x1d4] sm:$0xf0] }
 0x218   :  { %3190 = vmatpush.bf16.msrb.mxu0 %v5938_v14  ;;  %v6066_v10 = vor.u32 %v7318_v29, %v6065_v38  ;;  %v7363_v14 = vld [vmem:[%s11165_s8 + $0x344] sm:$0xf]  ;;  %v7302_v29 = vld [vmem:[%s11165_s8 + $0x154] sm:$0xf0] }
 0x219   :  { %v6254_v0 = vor.u32 %v7363_v14, %v6251_v15  ;;  %v6002_v1 = vor.u32 %v7302_v29, %v6001_v61 }
 0x21a   :  { %v2164_v34 = vpop.f32.mrf.mxu3  ;;  %3177 = vmatpush.bf16.msra.mxu3 %v6302_v24 }
 0x21b   :  { %v2165_v36 = vadd.f32 %v2164_v34, %v2151_v23  ;;  %v7359_v23 = vld [vmem:[%s11165_s8 + $0x324] sm:$0xf] }
 0x21c   :  { %3191 = vmatpush.bf16.msrb.mxu0 %v5922_v21  ;;  %v2207_v21 = vadd.f32 %v2206_v17, %v2193_v40  ;;  %v6238_v34 = vor.u32 %v7359_v23, %v6235_v25  ;;  %v5910_v17 = vor.u32 %v7276_v11, %v5907_v12  ;;  %v7294_v40 = vld [vmem:[%s11165_s8 + $0x114] sm:$0xf0]  ;;  %v6145_v23 = vld [vmem:[%s11165_s8 + $0x268] sm:$0xf] }
 0x21d   :  { %v2284_v48 = vmax.f32 %v2165_v36, 0.0  ;;  %v5842_v36 = vor.u32 %v7262_v19, %v5841_v54  ;;  %v7320_v54 = vld [vmem:[%s11165_s8 + $0x1ec] sm:$0xf]  ;;  %v6083_v19 = vld [vmem:[%s11165_s8 + $0x1f8] sm:$0xf0]  ;;  %v6146_v43 = vor.u32 %v7338_v31, %v6145_v23 }
 0x21e   :  { %3178 = vmatpush.bf16.msra.mxu3 %v6286_v52  ;;  %v5939_v52 = vld [vmem:[%s11165_s8 + $0xd8] sm:$0xf0]  ;;  %v6097_v12 = vld [vmem:[%s11165_s8 + $0x208] sm:$0xf]  ;;  %v7382_v23 = vld [vmem:[%s11165_s8 + $0x3d4] sm:$0xf0] }
 0x21f   :  { %v2292_v56 = vadd.f32 %v2284_v48, %v8981_v30  ;;  %v7367_v30 = vld [vmem:[%s11165_s8 + $0x364] sm:$0xf]  ;;  %v6219_v48 = vld [vmem:[%s11165_s8 + $0x310] sm:$0xf0]  ;;  %v5942_v38 = vor.u32 %v7284_v50, %v5939_v52  ;;  %v7334_v50 = vld [vmem:[%s11165_s8 + $0x254] sm:$0xf0] }
 0x220   :  { %3192 = vmatpush.bf16.msrb.mxu0 %v5906_v42  ;;  %v6270_v45 = vor.u32 %v7367_v30, %v6267_v63  ;;  %v7306_v42 = vld [vmem:[%s11165_s8 + $0x174] sm:$0xf0]  ;;  %v7280_v30 = vld [vmem:[%s11165_s8 + $0xac] sm:$0xf]  ;;  %v5923_v63 = vld [vmem:[%s11165_s8 + $0xb8] sm:$0xf0] }
 0x221   :  { %v9821_v62 = vpack.c.bf16 %v2292_v56, %v2288_v53  ;;  %v6222_v53 = vor.u32 %v7355_v46, %v6219_v48  ;;  %v5926_v47 = vor.u32 %v7280_v30, %v5923_v63  ;;  %v7264_v52 = vld [vmem:[%s11165_s8 + $0x2c] sm:$0xf]  ;;  %v7330_v63 = vld [vmem:[%s11165_s8 + $0x234] sm:$0xf0] }
 0x222   :  { %v2218_v2 = vpop.f32.mrf.mxu3  ;;  %3179 = vmatpush.bf16.msra.mxu3 %v6270_v45 }
 0x223   :  { %3099 = vmatmul.bf16.vlgmr.msrb.gmra.mxu1 %v9821_v62  ;;  %3141 = vmatmul.bf16.vlgmr.msra.gmra.mxu0 %v9755_v7  ;;  %v2219_v6 = vadd.f32 %v2218_v2, %v2205_v13  ;;  %v2232_v2 = vpop.f32.mrf.mxu0  ;;  %v1410_v13 = vperm.slane %v9653_v51, 3  ;;  %v7342_v51 = vld [vmem:[%s11165_s8 + $0x294] sm:$0xf0] }
 0x224   :  { %3193 = vmatpush.bf16.msrb.mxu0 %v5890_v57  ;;  %3203 = vmatpush.bf16.msrb.mxu1 %v6082_v58  ;;  %v6018_v58 = vor.u32 %v7306_v42, %v6017_v41  ;;  %v2260_v14 = vpop.f32.mrf.mxu2  ;;  %v2248_v42 = vpop.f32.mrf.mxu1 }
 0x225   :  { %v2281_v24 = vmax.f32 %v2219_v6, 0.0  ;;  %v6161_v6 = vld [vmem:[%s11165_s8 + $0x288] sm:$0xf]  ;;  %v2233_v25 = vadd.f32 %v2232_v2, %v1410_v13  ;;  %v5843_v2 = vld [vmem:[%s11165_s8 + $0x18] sm:$0xf0] }
 0x226   :  { %3180 = vmatpush.bf16.msra.mxu3 %v6254_v0  ;;  %v5969_v0 = vld [vmem:[%s11165_s8 + $0x108] sm:$0xf] }
 0x227   :  { %v2289_v56 = vadd.f32 %v2281_v24, %v9074_v27  ;;  %v6193_v27 = vld [vmem:[%s11165_s8 + $0x2c8] sm:$0xf]  ;;  %v5970_v20 = vor.u32 %v7294_v40, %v5969_v0  ;;  %v2247_v41 = vadd.f32 %v2246_v39, %v2233_v25  ;;  %v7326_v39 = vld [vmem:[%s11165_s8 + $0x214] sm:$0xf0]  ;;  %v6019_v0 = vld [vmem:[%s11165_s8 + $0x178] sm:$0xf0] }
 0x228   :  { %3194 = vmatpush.bf16.msrb.mxu0 %v5874_v8  ;;  %3204 = vmatpush.bf16.msrb.mxu1 %v6066_v10  ;;  %v7298_v8 = vld [vmem:[%s11165_s8 + $0x134] sm:$0xf0]  ;;  %v6177_v10 = vld [vmem:[%s11165_s8 + $0x2a8] sm:$0xf]  ;;  %v7352_v40 = vld [vmem:[%s11165_s8 + $0x2ec] sm:$0xf] }
 0x229   :  { %v5986_v55 = vor.u32 %v7298_v8, %v5985_v3  ;;  %v6178_v15 = vor.u32 %v7346_v32, %v6177_v10  ;;  %v2261_v48 = vadd.f32 %v2260_v14, %v2247_v41  ;;  %v6035_v3 = vld [vmem:[%s11165_s8 + $0x198] sm:$0xf0]  ;;  %v7348_v25 = vld [vmem:[%s11165_s8 + $0x2cc] sm:$0xf] }
 0x22a   :  { %v2220_v26 = vpop.f32.mrf.mxu3  ;;  %3181 = vmatpush.bf16.msra.mxu3 %v6238_v34  ;;  %v5875_v34 = vld [vmem:[%s11165_s8 + $0x58] sm:$0xf0] }
 0x22b   :  { %v2221_v35 = vadd.f32 %v2220_v26, %v2207_v21  ;;  %v6162_v21 = vor.u32 %v7342_v51, %v6161_v6  ;;  %v6086_v26 = vor.u32 %v7320_v54, %v6083_v19  ;;  %v2234_v24 = vpop.f32.mrf.mxu0  ;;  %v6211_v6 = vld [vmem:[%s11165_s8 + $0x2f8] sm:$0xf0] }
 0x22c   :  { %3195 = vmatpush.bf16.msrb.mxu0 %v5858_v16  ;;  %3205 = vmatpush.bf16.msrb.mxu1 %v6050_v18  ;;  %v7272_v16 = vld [vmem:[%s11165_s8 + $0x6c] sm:$0xf]  ;;  %v5891_v18 = vld [vmem:[%s11165_s8 + $0x78] sm:$0xf0]  ;;  %v2235_v46 = vadd.f32 %v2234_v24, %v1410_v13  ;;  %v6337_v13 = vld [vmem:[%s11165_s8 + $0x3e8] sm:$0xf] }
 0x22d   :  { %v2285_v44 = vmax.f32 %v2221_v35, 0.0  ;;  %v5894_v22 = vor.u32 %v7272_v16, %v5891_v18  ;;  %v6098_v18 = vor.u32 %v7326_v39, %v6097_v12  ;;  %v6305_v24 = vld [vmem:[%s11165_s8 + $0x3a8] sm:$0xf]  ;;  %v6179_v41 = vld [vmem:[%s11165_s8 + $0x2b8] sm:$0xf0] }
 0x22e   :  { %3182 = vmatpush.bf16.msra.mxu3 %v6222_v53  ;;  %v5859_v53 = vld [vmem:[%s11165_s8 + $0x38] sm:$0xf0]  ;;  %v7358_v12 = vld [vmem:[%s11165_s8 + $0x314] sm:$0xf0]  ;;  %v7324_v39 = vld [vmem:[%s11165_s8 + $0x20c] sm:$0xf] }
 0x22f   :  { %v2293_v57 = vadd.f32 %v2285_v44, %v9076_v28  ;;  %v7350_v28 = vld [vmem:[%s11165_s8 + $0x2d4] sm:$0xf0]  ;;  %v5878_v44 = vor.u32 %v7268_v33, %v5875_v34  ;;  %v5862_v29 = vor.u32 %v7264_v52, %v5859_v53  ;;  %v6163_v52 = vld [vmem:[%s11165_s8 + $0x298] sm:$0xf0] }
 0x230   :  { %3196 = vmatpush.bf16.msrb.mxu0 %v5842_v36  ;;  %3206 = vmatpush.bf16.msrb.mxu1 %v6034_v37  ;;  %v6194_v45 = vor.u32 %v7350_v28, %v6193_v27  ;;  %v7316_v36 = vld [vmem:[%s11165_s8 + $0x1cc] sm:$0xf]  ;;  %v6067_v37 = vld [vmem:[%s11165_s8 + $0x1d8] sm:$0xf0]  ;;  %v6113_v27 = vld [vmem:[%s11165_s8 + $0x228] sm:$0xf] }
 0x231   :  { %v9902_v59 = vpack.c.bf16 %v2293_v57, %v2289_v56  ;;  %v6070_v49 = vor.u32 %v7316_v36, %v6067_v37  ;;  %v2262_v56 = vpop.f32.mrf.mxu2  ;;  %v7312_v57 = vld [vmem:[%s11165_s8 + $0x1ac] sm:$0xf]  ;;  %v6114_v32 = vor.u32 %v7330_v63, %v6113_v27 }
 0x232   :  { %v7296_v36 = vld [vmem:[%s11165_s8 + $0x12c] sm:$0xf] }
 0x233   :  { %3113 = vmatmul.bf16.vlgmr.msrb.gmra.mxu2 %v9902_v59  ;;  %3155 = vmatmul.bf16.vlgmr.msra.gmra.mxu1 %v9821_v62  ;;  %v7344_v37 = vld [vmem:[%s11165_s8 + $0x2ac] sm:$0xf] }
 0x234   :  { %3245 = vmatpush.bf16.msra.mxu0 %v5958_v9  ;;  %3207 = vmatpush.bf16.msrb.mxu1 %v6018_v58  ;;  %v6129_v9 = vld [vmem:[%s11165_s8 + $0x248] sm:$0xf]  ;;  %v6051_v58 = vld [vmem:[%s11165_s8 + $0x1b8] sm:$0xf0]  ;;  %v7332_v63 = vld [vmem:[%s11165_s8 + $0x24c] sm:$0xf] }
 0x235   :  { %3197 = vmatmul.bf16.vlgmr.msrb.gmra.mxu0 %v9755_v7  ;;  %3217 = vmatpush.bf16.msrb.mxu2 %v6210_v60  ;;  %v2249_v60 = vadd.f32 %v2248_v42, %v2235_v46  ;;  %v6130_v61 = vor.u32 %v7334_v50, %v6129_v9  ;;  %v6054_v30 = vor.u32 %v7312_v57, %v6051_v58  ;;  %v6289_v9 = vld [vmem:[%s11165_s8 + $0x388] sm:$0xf]  ;;  %v7374_v46 = vld [vmem:[%s11165_s8 + $0x394] sm:$0xf0]  ;;  %v7340_v50 = vld [vmem:[%s11165_s8 + $0x28c] sm:$0xf] }
 0x236   :  { %v6290_v53 = vor.u32 %v7374_v46, %v6289_v9  ;;  %v6166_v57 = vor.u32 %v7340_v50, %v6163_v52  ;;  %v6273_v58 = vld [vmem:[%s11165_s8 + $0x368] sm:$0xf]  ;;  %v7409_v46 = vld [vmem:[%s11167_s10 + $0xac] sm:$0xf0] }
 0x237   :  { %v2263_v28 = vadd.f32 %v2262_v56, %v2249_v60  ;;  %v7370_v60 = vld [vmem:[%s11165_s8 + $0x374] sm:$0xf0]  ;;  %v7405_v50 = vld [vmem:[%s11167_s10 + $0x8c] sm:$0xf0] }
 0x238   :  { %3246 = vmatpush.bf16.msra.mxu0 %v5942_v38  ;;  %3208 = vmatpush.bf16.msrb.mxu1 %v6002_v1  ;;  %v7260_v1 = vld [vmem:[%s11165_s8 + $0xc] sm:$0xf] }
 0x239   :  { %3218 = vmatpush.bf16.msrb.mxu2 %v6194_v45  ;;  %v5846_v11 = vor.u32 %v7260_v1, %v5843_v2  ;;  %v6131_v1 = vld [vmem:[%s11165_s8 + $0x258] sm:$0xf0] }
 0x23c   :  { %3247 = vmatpush.bf16.msra.mxu0 %v5926_v47  ;;  %3209 = vmatpush.bf16.msrb.mxu1 %v5986_v55  ;;  %v7308_v47 = vld [vmem:[%s11165_s8 + $0x18c] sm:$0xf] }
 0x23d   :  { %3219 = vmatpush.bf16.msrb.mxu2 %v6178_v15  ;;  %v6038_v14 = vor.u32 %v7308_v47, %v6035_v3  ;;  %v7386_v15 = vld [vmem:[%s11165_s8 + $0x3f4] sm:$0xf0]  ;;  %v6241_v47 = vld [vmem:[%s11165_s8 + $0x328] sm:$0xf] }
 0x23e   :  { %v6338_v54 = vor.u32 %v7386_v15, %v6337_v13  ;;  %v7362_v3 = vld [vmem:[%s11165_s8 + $0x334] sm:$0xf0]  ;;  %v6099_v13 = vld [vmem:[%s11165_s8 + $0x218] sm:$0xf0] }
 0x240   :  { %3248 = vmatpush.bf16.msra.mxu0 %v5910_v17  ;;  %3210 = vmatpush.bf16.msrb.mxu1 %v5970_v20  ;;  %v7304_v17 = vld [vmem:[%s11165_s8 + $0x16c] sm:$0xf] }
 0x241   :  { %3220 = vmatpush.bf16.msrb.mxu2 %v6162_v21  ;;  %v6022_v20 = vor.u32 %v7304_v17, %v6019_v0  ;;  %v6214_v21 = vor.u32 %v7352_v40, %v6211_v6  ;;  %v6102_v17 = vor.u32 %v7324_v39, %v6099_v13  ;;  %v7380_v40 = vld [vmem:[%s11165_s8 + $0x3cc] sm:$0xf]  ;;  %v6323_v6 = vld [vmem:[%s11165_s8 + $0x3d8] sm:$0xf0]  ;;  %v6459_v39 = vld [vmem:[%s11167_s10 + $0xf0] sm:$0xf0] }
 0x242   :  { %v2274_v35 = vpop.f32.mrf.mxu3 }
 0x243   :  { %3169 = vmatmul.bf16.vlgmr.msra.gmra.mxu2 %v9902_v59  ;;  %3211 = vmatmul.bf16.vlgmr.msrb.gmra.mxu1 %v9821_v62  ;;  %v2275_v38 = vadd.f32 %v2274_v35, %v2261_v48  ;;  %v7378_v35 = vld [vmem:[%s11165_s8 + $0x3b4] sm:$0xf0]  ;;  %v7292_v48 = vld [vmem:[%s11165_s8 + $0x10c] sm:$0xf] }
 0x244   :  { %3249 = vmatpush.bf16.msra.mxu0 %v5894_v22  ;;  %3259 = vmatpush.bf16.msra.mxu1 %v6086_v26  ;;  %v6321_v22 = vld [vmem:[%s11165_s8 + $0x3c8] sm:$0xf]  ;;  %v6195_v26 = vld [vmem:[%s11165_s8 + $0x2d8] sm:$0xf0]  ;;  %v6306_v42 = vor.u32 %v7378_v35, %v6305_v24  ;;  %v7417_v24 = vld [vmem:[%s11167_s10 + $0xec] sm:$0xf0] }
 0x245   :  { %3221 = vmatpush.bf16.msrb.mxu2 %v6146_v43  ;;  %v2282_v8 = vmax.f32 %v2275_v38, 0.0  ;;  %v6322_v31 = vor.u32 %v7382_v23, %v6321_v22  ;;  %v6198_v34 = vor.u32 %v7348_v25, %v6195_v26  ;;  %v7336_v38 = vld [vmem:[%s11165_s8 + $0x26c] sm:$0xf]  ;;  %v6259_v25 = vld [vmem:[%s11165_s8 + $0x358] sm:$0xf0] }
 0x246   :  { %v7368_v23 = vld [vmem:[%s11165_s8 + $0x36c] sm:$0xf] }
 0x247   :  { %v2290_v51 = vadd.f32 %v2282_v8, %v9226_v4  ;;  %v7300_v4 = vld [vmem:[%s11165_s8 + $0x14c] sm:$0xf] }
 0x248   :  { %3250 = vmatpush.bf16.msra.mxu0 %v5878_v44  ;;  %3260 = vmatpush.bf16.msra.mxu1 %v6070_v49  ;;  %v6182_v44 = vor.u32 %v7344_v37, %v6179_v41  ;;  %v5971_v49 = vld [vmem:[%s11165_s8 + $0x118] sm:$0xf0]  ;;  %v7328_v8 = vld [vmem:[%s11165_s8 + $0x22c] sm:$0xf] }
 0x249   :  { %3222 = vmatpush.bf16.msrb.mxu2 %v6130_v61  ;;  %v5974_v56 = vor.u32 %v7292_v48, %v5971_v49  ;;  %v6147_v61 = vld [vmem:[%s11165_s8 + $0x278] sm:$0xf0]  ;;  %v6409_v49 = vld [vmem:[%s11167_s10 + $0x80] sm:$0xf] }
 0x24a   :  { %v2276_v45 = vpop.f32.mrf.mxu3  ;;  %v6150_v27 = vor.u32 %v7336_v38, %v6147_v61  ;;  %v6227_v37 = vld [vmem:[%s11165_s8 + $0x318] sm:$0xf0]  ;;  %v6410_v52 = vor.u32 %v7405_v50, %v6409_v49  ;;  %v6377_v38 = vld [vmem:[%s11167_s10 + $0x40] sm:$0xf]  ;;  %v7397_v61 = vld [vmem:[%s11167_s10 + $0x4c] sm:$0xf0] }
 0x24b   :  { %v2277_v10 = vadd.f32 %v2276_v45, %v2263_v28  ;;  %v6257_v28 = vld [vmem:[%s11165_s8 + $0x348] sm:$0xf]  ;;  %v6134_v45 = vor.u32 %v7332_v63, %v6131_v1  ;;  %v6361_v63 = vld [vmem:[%s11167_s10 + $0x20] sm:$0xf]  ;;  %v7393_v1 = vld [vmem:[%s11167_s10 + $0x2c] sm:$0xf0] }
 0x24c   :  { %3251 = vmatpush.bf16.msra.mxu0 %v5862_v29  ;;  %3261 = vmatpush.bf16.msra.mxu1 %v6054_v30  ;;  %v6274_v29 = vor.u32 %v7370_v60, %v6273_v58  ;;  %v7366_v30 = vld [vmem:[%s11165_s8 + $0x354] sm:$0xf0]  ;;  %v7449_v58 = vld [vmem:[%s11167_s10 + $0x1ec] sm:$0xf0] }
 0x24d   :  { %v2286_v55 = vmax.f32 %v2277_v10, 0.0  ;;  %3223 = vmatpush.bf16.msrb.mxu2 %v6114_v32  ;;  %v6258_v2 = vor.u32 %v7366_v30, %v6257_v28  ;;  %v6115_v10 = vld [vmem:[%s11165_s8 + $0x238] sm:$0xf0]  ;;  %v7445_v28 = vld [vmem:[%s11167_s10 + $0x1cc] sm:$0xf0] }
 0x24e   :  { %v6118_v32 = vor.u32 %v7328_v8, %v6115_v10  ;;  %v6345_v8 = vld [vmem:[%s11167_s10] sm:$0xf]  ;;  %v7389_v10 = vld [vmem:[%s11167_s10 + $0xc] sm:$0xf0] }
 0x24f   :  { %v2294_v16 = vadd.f32 %v2286_v55, %v9228_v5  ;;  %v6003_v5 = vld [vmem:[%s11165_s8 + $0x158] sm:$0xf0]  ;;  %v7384_v55 = vld [vmem:[%s11165_s8 + $0x3ec] sm:$0xf] }
 0x250   :  { %3252 = vmatpush.bf16.msra.mxu0 %v5846_v11  ;;  %3262 = vmatpush.bf16.msra.mxu1 %v6038_v14  ;;  %v6006_v33 = vor.u32 %v7300_v4, %v6003_v5  ;;  %v6225_v11 = vld [vmem:[%s11165_s8 + $0x308] sm:$0xf]  ;;  %v6339_v14 = vld [vmem:[%s11165_s8 + $0x3f8] sm:$0xf0]  ;;  %v7364_v5 = vld [vmem:[%s11165_s8 + $0x34c] sm:$0xf] }
 0x251   :  { %v10050_v19 = vpack.c.bf16 %v2294_v16, %v2290_v51  ;;  %3224 = vmatpush.bf16.msrb.mxu2 %v6098_v18  ;;  %v6226_v15 = vor.u32 %v7358_v12, %v6225_v11  ;;  %v6342_v0 = vor.u32 %v7384_v55, %v6339_v14  ;;  %v6326_v51 = vor.u32 %v7380_v40, %v6323_v6  ;;  %v7376_v16 = vld [vmem:[%s11165_s8 + $0x3ac] sm:$0xf]  ;;  %v6307_v18 = vld [vmem:[%s11165_s8 + $0x3b8] sm:$0xf0]  ;;  %v7437_v11 = vld [vmem:[%s11167_s10 + $0x18c] sm:$0xf0] }
 0x252   :  { %v6262_v26 = vor.u32 %v7364_v5, %v6259_v25  ;;  %v7415_v12 = vld [vmem:[%s11167_s10 + $0xe4] sm:$0xf]  ;;  %v6521_v14 = vld [vmem:[%s11167_s10 + $0x160] sm:$0xf]  ;;  %v7481_v40 = vld [vmem:[%s11167_s10 + $0x2ec] sm:$0xf0] }
 0x253   :  { %3127 = vmatmul.bf16.vlgmr.msrb.gmra.mxu3 %v10050_v19  ;;  %3253 = vmatmul.bf16.vlgmr.msra.gmra.mxu0 %v9755_v7  ;;  %v5987_v7 = vld [vmem:[%s11165_s8 + $0x138] sm:$0xf0]  ;;  %v6462_v55 = vor.u32 %v7415_v12, %v6459_v39  ;;  %v7411_v6 = vld [vmem:[%s11167_s10 + $0xc4] sm:$0xf]  ;;  %v6427_v5 = vld [vmem:[%s11167_s10 + $0xb0] sm:$0xf0] }
 0x254   :  { %3231 = vmatpush.bf16.msrb.mxu3 %v6338_v54  ;;  %3263 = vmatpush.bf16.msra.mxu1 %v6022_v20  ;;  %v5990_v43 = vor.u32 %v7296_v36, %v5987_v7  ;;  %v6310_v54 = vor.u32 %v7376_v16, %v6307_v18  ;;  %v7372_v20 = vld [vmem:[%s11165_s8 + $0x38c] sm:$0xf]  ;;  %v7387_v12 = vld [vmem:[%s11167_s10 + $0x4] sm:$0xf]  ;;  %v6347_v39 = vld [vmem:[%s11167_s10 + $0x10] sm:$0xf0] }
 0x255   :  { %3273 = vmatpush.bf16.msra.mxu2 %v6214_v21  ;;  %v6291_v21 = vld [vmem:[%s11165_s8 + $0x398] sm:$0xf0]  ;;  %v7356_v7 = vld [vmem:[%s11165_s8 + $0x30c] sm:$0xf] }
 0x256   :  { %3225 = vmatmul.bf16.vlgmr.msrb.gmra.mxu2 %v9902_v59  ;;  %v6294_v22 = vor.u32 %v7372_v20, %v6291_v21  ;;  %v6230_v41 = vor.u32 %v7356_v7, %v6227_v37  ;;  %v7429_v20 = vld [vmem:[%s11167_s10 + $0x14c] sm:$0xf0]  ;;  %v6697_v21 = vld [vmem:[%s11167_s10 + $0x2c0] sm:$0xf] }
 0x258   :  { %3232 = vmatpush.bf16.msrb.mxu3 %v6322_v31  ;;  %3264 = vmatpush.bf16.msra.mxu1 %v6006_v33  ;;  %v7360_v31 = vld [vmem:[%s11165_s8 + $0x32c] sm:$0xf]  ;;  %v6243_v33 = vld [vmem:[%s11165_s8 + $0x338] sm:$0xf0] }
 0x259   :  { %3274 = vmatpush.bf16.msra.mxu2 %v6198_v34  ;;  %v6457_v34 = vld [vmem:[%s11167_s10 + $0xe0] sm:$0xf]  ;;  %v6246_v35 = vor.u32 %v7360_v31, %v6243_v33  ;;  %v7425_v31 = vld [vmem:[%s11167_s10 + $0x12c] sm:$0xf0] }
 0x25a   :  { %v6458_v36 = vor.u32 %v7417_v24, %v6457_v34  ;;  %v6681_v33 = vld [vmem:[%s11167_s10 + $0x2a0] sm:$0xf]  ;;  %v7473_v24 = vld [vmem:[%s11167_s10 + $0x2ac] sm:$0xf0] }
 0x25b   :  { %v6682_v7 = vor.u32 %v7473_v24, %v6681_v33  ;;  %v7427_v33 = vld [vmem:[%s11167_s10 + $0x144] sm:$0xf] }
 0x25c   :  { %3233 = vmatpush.bf16.msrb.mxu3 %v6306_v42  ;;  %3265 = vmatpush.bf16.msra.mxu1 %v5990_v43  ;;  %v6441_v42 = vld [vmem:[%s11167_s10 + $0xc0] sm:$0xf]  ;;  %v7413_v43 = vld [vmem:[%s11167_s10 + $0xcc] sm:$0xf0]  ;;  %v7475_v24 = vld [vmem:[%s11167_s10 + $0x2c4] sm:$0xf] }
 0x25d   :  { %3275 = vmatpush.bf16.msra.mxu2 %v6182_v44  ;;  %4091 = vmatpush.bf16.msrb.mxu0 %v6458_v36  ;;  %v6425_v44 = vld [vmem:[%s11167_s10 + $0xa0] sm:$0xf]  ;;  %v6442_v9 = vor.u32 %v7413_v43, %v6441_v42  ;;  %v6411_v36 = vld [vmem:[%s11167_s10 + $0x90] sm:$0xf0]  ;;  %v7421_v42 = vld [vmem:[%s11167_s10 + $0x10c] sm:$0xf0] }
 0x25e   :  { %v6426_v48 = vor.u32 %v7409_v46, %v6425_v44  ;;  %v6665_v43 = vld [vmem:[%s11167_s10 + $0x280] sm:$0xf]  ;;  %v7399_v46 = vld [vmem:[%s11167_s10 + $0x64] sm:$0xf] }
 0x260   :  { %3234 = vmatpush.bf16.msrb.mxu3 %v6290_v53  ;;  %3266 = vmatpush.bf16.msra.mxu1 %v5974_v56  ;;  %v6393_v53 = vld [vmem:[%s11167_s10 + $0x60] sm:$0xf]  ;;  %v7401_v56 = vld [vmem:[%s11167_s10 + $0x6c] sm:$0xf0] }
 0x261   :  { %3276 = vmatpush.bf16.msra.mxu2 %v6166_v57  ;;  %4092 = vmatpush.bf16.msrb.mxu0 %v6442_v9  ;;  %v6394_v57 = vor.u32 %v7401_v56, %v6393_v53  ;;  %v7469_v9 = vld [vmem:[%s11167_s10 + $0x28c] sm:$0xf0]  ;;  %v6587_v53 = vld [vmem:[%s11167_s10 + $0x1f0] sm:$0xf0] }
 0x262   :  { %v6666_v49 = vor.u32 %v7469_v9, %v6665_v43  ;;  %v6491_v9 = vld [vmem:[%s11167_s10 + $0x130] sm:$0xf0] }
 0x263   :  { %3183 = vmatmul.bf16.vlgmr.msra.gmra.mxu3 %v10050_v19  ;;  %3267 = vmatmul.bf16.vlgmr.msra.gmra.mxu1 %v9821_v62  ;;  %v6242_v62 = vor.u32 %v7362_v3, %v6241_v47  ;;  %v7441_v47 = vld [vmem:[%s11167_s10 + $0x1ac] sm:$0xf0] }
 0x264   :  { %3235 = vmatpush.bf16.msrb.mxu3 %v6274_v29  ;;  %v6569_v29 = vld [vmem:[%s11167_s10 + $0x1c0] sm:$0xf] }
 0x265   :  { %3277 = vmatpush.bf16.msra.mxu2 %v6150_v27  ;;  %4093 = vmatpush.bf16.msrb.mxu0 %v6426_v48  ;;  %v6378_v27 = vor.u32 %v7397_v61, %v6377_v38  ;;  %v6570_v30 = vor.u32 %v7445_v28, %v6569_v29  ;;  %v6395_v48 = vld [vmem:[%s11167_s10 + $0x70] sm:$0xf0]  ;;  %v7443_v61 = vld [vmem:[%s11167_s10 + $0x1c4] sm:$0xf] }
 0x266   :  { %v6398_v50 = vor.u32 %v7399_v46, %v6395_v48  ;;  %v6379_v38 = vld [vmem:[%s11167_s10 + $0x50] sm:$0xf0]  ;;  %v7471_v46 = vld [vmem:[%s11167_s10 + $0x2a4] sm:$0xf] }
 0x268   :  { %3236 = vmatpush.bf16.msrb.mxu3 %v6258_v2  ;;  %v6553_v2 = vld [vmem:[%s11167_s10 + $0x1a0] sm:$0xf] }
 0x269   :  { %3278 = vmatpush.bf16.msra.mxu2 %v6134_v45  ;;  %4094 = vmatpush.bf16.msrb.mxu0 %v6410_v52  ;;  %v6362_v45 = vor.u32 %v7393_v1, %v6361_v63  ;;  %v6554_v3 = vor.u32 %v7441_v47, %v6553_v2  ;;  %v7447_v52 = vld [vmem:[%s11167_s10 + $0x1e4] sm:$0xf]  ;;  %v7461_v63 = vld [vmem:[%s11167_s10 + $0x24c] sm:$0xf0] }
 0x26a   :  { %v6590_v56 = vor.u32 %v7447_v52, %v6587_v53  ;;  %v7391_v2 = vld [vmem:[%s11167_s10 + $0x24] sm:$0xf] }
 0x26b   :  { %v7439_v47 = vld [vmem:[%s11167_s10 + $0x1a4] sm:$0xf] }
 0x26c   :  { %3237 = vmatpush.bf16.msrb.mxu3 %v6242_v62  ;;  %v6537_v62 = vld [vmem:[%s11167_s10 + $0x180] sm:$0xf] }
 0x26d   :  { %3279 = vmatpush.bf16.msra.mxu2 %v6118_v32  ;;  %4095 = vmatpush.bf16.msrb.mxu0 %v6394_v57  ;;  %v6346_v32 = vor.u32 %v7389_v10, %v6345_v8  ;;  %v6538_v13 = vor.u32 %v7437_v11, %v6537_v62  ;;  %v7465_v57 = vld [vmem:[%s11167_s10 + $0x26c] sm:$0xf0]  ;;  %v6555_v8 = vld [vmem:[%s11167_s10 + $0x1b0] sm:$0xf0]  ;;  %v6617_v62 = vld [vmem:[%s11167_s10 + $0x220] sm:$0xf] }
 0x26e   :  { %v6558_v10 = vor.u32 %v7439_v47, %v6555_v8  ;;  %v7463_v47 = vld [vmem:[%s11167_s10 + $0x264] sm:$0xf] }
 0x270   :  { %3238 = vmatpush.bf16.msrb.mxu3 %v6226_v15  ;;  %v7433_v15 = vld [vmem:[%s11167_s10 + $0x16c] sm:$0xf0] }
 0x271   :  { %3280 = vmatpush.bf16.msra.mxu2 %v6102_v17  ;;  %4096 = vmatpush.bf16.msrb.mxu0 %v6378_v27  ;;  %v6713_v17 = vld [vmem:[%s11167_s10 + $0x2e0] sm:$0xf]  ;;  %v6571_v27 = vld [vmem:[%s11167_s10 + $0x1d0] sm:$0xf0] }
 0x272   :  { %v6714_v16 = vor.u32 %v7481_v40, %v6713_v17  ;;  %v6574_v28 = vor.u32 %v7443_v61, %v6571_v27  ;;  %v7453_v40 = vld [vmem:[%s11167_s10 + $0x20c] sm:$0xf0]  ;;  %v7467_v61 = vld [vmem:[%s11167_s10 + $0x284] sm:$0xf] }
 0x273   :  { %3239 = vmatmul.bf16.vlgmr.msrb.gmra.mxu3 %v10050_v19 }
 0x274   :  { %3287 = vmatpush.bf16.msra.mxu3 %v6342_v0  ;;  %3281 = vmatmul.bf16.vlgmr.msra.gmra.mxu2 %v9902_v59  ;;  %v6275_v59 = vld [vmem:[%s11165_s8 + $0x378] sm:$0xf0]  ;;  %v6522_v0 = vor.u32 %v7433_v15, %v6521_v14  ;;  %v6539_v14 = vld [vmem:[%s11167_s10 + $0x190] sm:$0xf0] }
 0x275   :  { %v6278_v4 = vor.u32 %v7368_v23, %v6275_v59  ;;  %4097 = vmatpush.bf16.msrb.mxu0 %v6362_v45  ;;  %4119 = vmatpush.bf16.msrb.mxu2 %v6714_v16  ;;  %v7477_v23 = vld [vmem:[%s11167_s10 + $0x2cc] sm:$0xf0]  ;;  %v6363_v45 = vld [vmem:[%s11167_s10 + $0x30] sm:$0xf0] }
 0x276   :  { %v6698_v59 = vor.u32 %v7477_v23, %v6697_v21  ;;  %v7479_v23 = vld [vmem:[%s11167_s10 + $0x2e4] sm:$0xf] }
 0x278   :  { %3288 = vmatpush.bf16.msra.mxu3 %v6326_v51  ;;  %v6443_v51 = vld [vmem:[%s11167_s10 + $0xd0] sm:$0xf0] }
 0x279   :  { %4098 = vmatpush.bf16.msrb.mxu0 %v6346_v32  ;;  %v6446_v18 = vor.u32 %v7411_v6, %v6443_v51  ;;  %4120 = vmatpush.bf16.msrb.mxu2 %v6698_v59  ;;  %v7457_v32 = vld [vmem:[%s11167_s10 + $0x22c] sm:$0xf0]  ;;  %v6841_v6 = vld [vmem:[%s11167_s10 + $0x3e0] sm:$0xf]  ;;  %v6715_v59 = vld [vmem:[%s11167_s10 + $0x2f0] sm:$0xf0] }
 0x27a   :  { %v6618_v11 = vor.u32 %v7457_v32, %v6617_v62 }
 0x27c   :  { %3289 = vmatpush.bf16.msra.mxu3 %v6310_v54  ;;  %v6505_v54 = vld [vmem:[%s11167_s10 + $0x140] sm:$0xf] }
 0x27d   :  { %4147 = vmatpush.bf16.msra.mxu0 %v6462_v55  ;;  %4121 = vmatpush.bf16.msrb.mxu2 %v6682_v7  ;;  %v6350_v55 = vor.u32 %v7387_v12, %v6347_v39  ;;  %v6761_v12 = vld [vmem:[%s11167_s10 + $0x340] sm:$0xf]  ;;  %v7493_v39 = vld [vmem:[%s11167_s10 + $0x34c] sm:$0xf0] }
 0x280   :  { %3290 = vmatpush.bf16.msra.mxu3 %v6294_v22  ;;  %v6506_v22 = vor.u32 %v7429_v20, %v6505_v54  ;;  %v7431_v54 = vld [vmem:[%s11167_s10 + $0x164] sm:$0xf]  ;;  %v6523_v20 = vld [vmem:[%s11167_s10 + $0x170] sm:$0xf0] }
 0x281   :  { %4148 = vmatpush.bf16.msra.mxu0 %v6446_v18  ;;  %4122 = vmatpush.bf16.msrb.mxu2 %v6666_v49  ;;  %v7513_v18 = vld [vmem:[%s11167_s10 + $0x3ec] sm:$0xf0]  ;;  %v6683_v49 = vld [vmem:[%s11167_s10 + $0x2b0] sm:$0xf0] }
 0x282   :  { %v6842_v21 = vor.u32 %v7513_v18, %v6841_v6  ;;  %v6686_v53 = vor.u32 %v7471_v46, %v6683_v49  ;;  %v6745_v18 = vld [vmem:[%s11167_s10 + $0x320] sm:$0xf] }
 0x284   :  { %3291 = vmatpush.bf16.msra.mxu3 %v6278_v4  ;;  %v7407_v4 = vld [vmem:[%s11167_s10 + $0xa4] sm:$0xf] }
 0x285   :  { %v6430_v25 = vor.u32 %v7407_v4, %v6427_v5  ;;  %v6718_v5 = vor.u32 %v7479_v23, %v6715_v59  ;;  %v6619_v23 = vld [vmem:[%s11167_s10 + $0x230] sm:$0xf0] }
 0x287   :  { %4149 = vmatpush.bf16.msra.mxu0 %v6430_v25  ;;  %v6825_v25 = vld [vmem:[%s11167_s10 + $0x3c0] sm:$0xf] }
 0x288   :  { %3292 = vmatpush.bf16.msra.mxu3 %v6262_v26  ;;  %v6489_v26 = vld [vmem:[%s11167_s10 + $0x120] sm:$0xf] }
 0x289   :  { %v6490_v34 = vor.u32 %v7425_v31, %v6489_v26  ;;  %v7509_v26 = vld [vmem:[%s11167_s10 + $0x3cc] sm:$0xf0] }
 0x28a   :  { %v6826_v31 = vor.u32 %v7509_v26, %v6825_v25 }
 0x28c   :  { %3293 = vmatpush.bf16.msra.mxu3 %v6246_v35  ;;  %v7403_v35 = vld [vmem:[%s11167_s10 + $0x84] sm:$0xf] }
 0x28d   :  { %v6414_v37 = vor.u32 %v7403_v35, %v6411_v36  ;;  %v6699_v36 = vld [vmem:[%s11167_s10 + $0x2d0] sm:$0xf0] }
 0x28e   :  { %v6702_v7 = vor.u32 %v7475_v24, %v6699_v36  ;;  %v7485_v24 = vld [vmem:[%s11167_s10 + $0x30c] sm:$0xf0] }
 0x28f   :  { %4150 = vmatpush.bf16.msra.mxu0 %v6414_v37  ;;  %v6809_v37 = vld [vmem:[%s11167_s10 + $0x3a0] sm:$0xf] }
 0x290   :  { %3294 = vmatpush.bf16.msra.mxu3 %v6230_v41  ;;  %v6473_v41 = vld [vmem:[%s11167_s10 + $0x100] sm:$0xf]  ;;  %v10420_v15 = vpop.f32.mrf.mxu0 }
 0x291   :  { %v6474_v44 = vor.u32 %v7421_v42, %v6473_v41  ;;  %v7505_v41 = vld [vmem:[%s11167_s10 + $0x3ac] sm:$0xf0] }
 0x292   :  { %v6810_v43 = vor.u32 %v7505_v41, %v6809_v37  ;;  %v7451_v37 = vld [vmem:[%s11167_s10 + $0x204] sm:$0xf]  ;;  %v6603_v41 = vld [vmem:[%s11167_s10 + $0x210] sm:$0xf0] }
 0x293   :  { %3295 = vmatmul.bf16.vlgmr.msra.gmra.mxu3 %v10050_v19  ;;  %v6585_v19 = vld [vmem:[%s11167_s10 + $0x1e0] sm:$0xf]  ;;  %4151 = vmatpush.bf16.msra.mxu0 %v6398_v50  ;;  %v6606_v46 = vor.u32 %v7451_v37, %v6603_v41  ;;  %v6561_v37 = vld [vmem:[%s11167_s10 + $0x1a8] sm:$0xf] }
 0x294   :  { %v6586_v60 = vor.u32 %v7449_v58, %v6585_v19  ;;  %v6649_v19 = vld [vmem:[%s11167_s10 + $0x260] sm:$0xf]  ;;  %4133 = vmatpush.bf16.msrb.mxu3 %v6842_v21 }
 0x295   :  { %v6650_v58 = vor.u32 %v7465_v57, %v6649_v19  ;;  %v10489_v50 = vld [vmem:[%s11168_s9] sm:$0xf]  ;;  %v7501_v19 = vld [vmem:[%s11167_s10 + $0x38c] sm:$0xf0] }
 0x296   :  { %4105 = vmatpush.bf16.msrb.mxu1 %v6586_v60  ;;  %v7395_v60 = vld [vmem:[%s11167_s10 + $0x44] sm:$0xf]  ;;  %v2430_v26 = vperm.slane %v10489_v50, 1 }
 0x297   :  { %v6382_v29 = vor.u32 %v7395_v60, %v6379_v38  ;;  %4123 = vmatpush.bf16.msrb.mxu2 %v6650_v58  ;;  %v7419_v60 = vld [vmem:[%s11167_s10 + $0x104] sm:$0xf]  ;;  %v6475_v38 = vld [vmem:[%s11167_s10 + $0x110] sm:$0xf0] }
 0x298   :  { %4134 = vmatpush.bf16.msrb.mxu3 %v6826_v31  ;;  %v3088_v42 = vpop.f32.mrf.mxu0  ;;  %v6478_v27 = vor.u32 %v7419_v60, %v6475_v38  ;;  %v7410_v60 = vld [vmem:[%s11167_s10 + $0xb4] sm:$0xf0]  ;;  %v7507_v38 = vld [vmem:[%s11167_s10 + $0x3c4] sm:$0xf] }
 0x299   :  { %4152 = vmatpush.bf16.msra.mxu0 %v6382_v29  ;;  %v2429_v29 = vperm.slane %v10489_v50, 0 }
 0x29a   :  { %4106 = vmatpush.bf16.msrb.mxu1 %v6570_v30  ;;  %v6633_v30 = vld [vmem:[%s11167_s10 + $0x240] sm:$0xf] }
 0x29b   :  { %v6634_v1 = vor.u32 %v7461_v63, %v6633_v30  ;;  %v6777_v63 = vld [vmem:[%s11167_s10 + $0x360] sm:$0xf]  ;;  %v3087_v8 = vadd.f32 %v10420_v15, %v2429_v29  ;;  %v3089_v32 = vadd.f32 %v3088_v42, %v2429_v29  ;;  %v6635_v15 = vld [vmem:[%s11167_s10 + $0x250] sm:$0xf0]  ;;  %v7511_v42 = vld [vmem:[%s11167_s10 + $0x3e4] sm:$0xf] }
 0x29c   :  { %4135 = vmatpush.bf16.msrb.mxu3 %v6810_v43 }
 0x29d   :  { %4124 = vmatpush.bf16.msrb.mxu2 %v6634_v1  ;;  %v7497_v1 = vld [vmem:[%s11167_s10 + $0x36c] sm:$0xf0] }
 0x29e   :  { %4107 = vmatpush.bf16.msrb.mxu1 %v6554_v3  ;;  %v6366_v3 = vor.u32 %v7391_v2, %v6363_v45  ;;  %v6778_v45 = vor.u32 %v7497_v1, %v6777_v63  ;;  %v6417_v63 = vld [vmem:[%s11167_s10 + $0x88] sm:$0xf] }
 0x2a0   :  { %4153 = vmatpush.bf16.msra.mxu0 %v6366_v3  ;;  %v10431_v51 = vpop.f32.mrf.mxu1  ;;  %v6651_v3 = vld [vmem:[%s11167_s10 + $0x270] sm:$0xf0]  ;;  %v3142_v62 = vpop.f32.mrf.mxu0 }
 0x2a1   :  { %4125 = vmatpush.bf16.msrb.mxu2 %v6618_v11  ;;  %v3101_v11 = vadd.f32 %v10431_v51, %v3087_v8 }
 0x2a2   :  { %4108 = vmatpush.bf16.msrb.mxu1 %v6538_v13  ;;  %v7435_v13 = vld [vmem:[%s11167_s10 + $0x184] sm:$0xf] }
 0x2a3   :  { %v6542_v17 = vor.u32 %v7435_v13, %v6539_v14  ;;  %v7459_v14 = vld [vmem:[%s11167_s10 + $0x244] sm:$0xf] }
 0x2a4   :  { %4154 = vmatpush.bf16.msra.mxu0 %v6350_v55  ;;  %v6762_v55 = vor.u32 %v7493_v39, %v6761_v12 }
 0x2a6   :  { %4109 = vmatpush.bf16.msrb.mxu1 %v6522_v0  ;;  %v6601_v0 = vld [vmem:[%s11167_s10 + $0x200] sm:$0xf] }
 0x2a7   :  { %v6602_v16 = vor.u32 %v7453_v40, %v6601_v0  ;;  %v6638_v40 = vor.u32 %v7459_v14, %v6635_v15  ;;  %v6593_v14 = vld [vmem:[%s11167_s10 + $0x1e8] sm:$0xf] }
 0x2a8   :  { %v3102_v52 = vpop.f32.mrf.mxu1 }
 0x2a9   :  { %4126 = vmatpush.bf16.msrb.mxu2 %v6602_v16 }
 0x2aa   :  { %4110 = vmatpush.bf16.msrb.mxu1 %v6506_v22  ;;  %v6526_v22 = vor.u32 %v7431_v54, %v6523_v20  ;;  %v7489_v54 = vld [vmem:[%s11167_s10 + $0x32c] sm:$0xf0] }
 0x2ab   :  { %v6746_v21 = vor.u32 %v7489_v54, %v6745_v18 }
 0x2ad   :  { %4175 = vmatpush.bf16.msra.mxu2 %v6718_v5  ;;  %v7418_v5 = vld [vmem:[%s11167_s10 + $0xf4] sm:$0xf0] }
 0x2ae   :  { %4111 = vmatpush.bf16.msrb.mxu1 %v6490_v34  ;;  %v6507_v34 = vld [vmem:[%s11167_s10 + $0x150] sm:$0xf0] }
 0x2af   :  { %v6510_v35 = vor.u32 %v7427_v33, %v6507_v34  ;;  %v6729_v34 = vld [vmem:[%s11167_s10 + $0x300] sm:$0xf] }
 0x2b0   :  { %v3156_v13 = vpop.f32.mrf.mxu1 }
 0x2b1   :  { %4176 = vmatpush.bf16.msra.mxu2 %v6702_v7  ;;  %v6730_v7 = vor.u32 %v7485_v24, %v6729_v34 }
 0x2b2   :  { %4112 = vmatpush.bf16.msrb.mxu1 %v6474_v44  ;;  %v7423_v44 = vld [vmem:[%s11167_s10 + $0x124] sm:$0xf] }
 0x2b3   :  { %v6494_v48 = vor.u32 %v7423_v44, %v6491_v9  ;;  %v6449_v44 = vld [vmem:[%s11167_s10 + $0xc8] sm:$0xf]  ;;  %v7414_v9 = vld [vmem:[%s11167_s10 + $0xd4] sm:$0xf0] }
 0x2b5   :  { %4177 = vmatpush.bf16.msra.mxu2 %v6686_v53 }
 0x2b6   :  { %4161 = vmatpush.bf16.msra.mxu1 %v6590_v56  ;;  %v10448_v4 = vpop.f32.mrf.mxu2  ;;  %v6793_v56 = vld [vmem:[%s11167_s10 + $0x380] sm:$0xf] }
 0x2b7   :  { %v6794_v58 = vor.u32 %v7501_v19, %v6793_v56  ;;  %v3115_v0 = vadd.f32 %v10448_v4, %v3101_v11  ;;  %v6465_v4 = vld [vmem:[%s11167_s10 + $0xe8] sm:$0xf]  ;;  %v6450_v19 = vor.u32 %v7414_v9, %v6449_v44  ;;  %v7491_v44 = vld [vmem:[%s11167_s10 + $0x344] sm:$0xf]  ;;  %v6763_v9 = vld [vmem:[%s11167_s10 + $0x350] sm:$0xf0] }
 0x2b8   :  { %v6466_v36 = vor.u32 %v7418_v5, %v6465_v4  ;;  %v3158_v49 = vpop.f32.mrf.mxu1  ;;  %v7446_v5 = vld [vmem:[%s11167_s10 + $0x1d4] sm:$0xf0] }
 0x2b9   :  { %4136 = vmatpush.bf16.msrb.mxu3 %v6794_v58  ;;  %v3143_v58 = vadd.f32 %v3142_v62, %v2430_v26 }
 0x2ba   :  { %4162 = vmatpush.bf16.msra.mxu1 %v6574_v28  ;;  %v6667_v28 = vld [vmem:[%s11167_s10 + $0x290] sm:$0xf0] }
 0x2bb   :  { %v6670_v30 = vor.u32 %v7467_v61, %v6667_v28  ;;  %v6827_v61 = vld [vmem:[%s11167_s10 + $0x3d0] sm:$0xf0]  ;;  %v3157_v28 = vadd.f32 %v3156_v13, %v3143_v58  ;;  %v6401_v13 = vld [vmem:[%s11167_s10 + $0x68] sm:$0xf]  ;;  %v7390_v58 = vld [vmem:[%s11167_s10 + $0x14] sm:$0xf0] }
 0x2bc   :  { %v6830_v29 = vor.u32 %v7507_v38, %v6827_v61 }
 0x2bd   :  { %4178 = vmatpush.bf16.msra.mxu2 %v6670_v30  ;;  %4137 = vmatpush.bf16.msrb.mxu3 %v6778_v45  ;;  %v7406_v45 = vld [vmem:[%s11167_s10 + $0x94] sm:$0xf0] }
 0x2be   :  { %4163 = vmatpush.bf16.msra.mxu1 %v6558_v10  ;;  %v3116_v57 = vpop.f32.mrf.mxu2  ;;  %v6654_v10 = vor.u32 %v7463_v47, %v6651_v3  ;;  %v7503_v47 = vld [vmem:[%s11167_s10 + $0x3a4] sm:$0xf]  ;;  %v6811_v3 = vld [vmem:[%s11167_s10 + $0x3b0] sm:$0xf0]  ;;  %v6418_v39 = vor.u32 %v7406_v45, %v6417_v63  ;;  %v6467_v63 = vld [vmem:[%s11167_s10 + $0xf8] sm:$0xf0] }
 0x2c0   :  { %v3212_v11 = vpop.f32.mrf.mxu1 }
 0x2c1   :  { %4179 = vmatpush.bf16.msra.mxu2 %v6654_v10  ;;  %4138 = vmatpush.bf16.msrb.mxu3 %v6762_v55  ;;  %v6814_v10 = vor.u32 %v7503_v47, %v6811_v3  ;;  %v7402_v55 = vld [vmem:[%s11167_s10 + $0x74] sm:$0xf0] }
 0x2c2   :  { %4164 = vmatpush.bf16.msra.mxu1 %v6542_v17  ;;  %v3103_v17 = vadd.f32 %v3102_v52, %v3089_v32 }
 0x2c4   :  { %v3117_v51 = vadd.f32 %v3116_v57, %v3103_v17  ;;  %v6433_v57 = vld [vmem:[%s11167_s10 + $0xa8] sm:$0xf]  ;;  %v7450_v17 = vld [vmem:[%s11167_s10 + $0x1f4] sm:$0xf0] }
 0x2c5   :  { %4180 = vmatpush.bf16.msra.mxu2 %v6638_v40  ;;  %4139 = vmatpush.bf16.msrb.mxu3 %v6746_v21  ;;  %v6434_v30 = vor.u32 %v7410_v60, %v6433_v57  ;;  %v6795_v40 = vld [vmem:[%s11167_s10 + $0x390] sm:$0xf0]  ;;  %v6594_v21 = vor.u32 %v7450_v17, %v6593_v14  ;;  %v6353_v57 = vld [vmem:[%s11167_s10 + $0x8] sm:$0xf]  ;;  %v7412_v14 = vld [vmem:[%s11167_s10 + $0xcc] sm:$0xf] }
 0x2c6   :  { %4165 = vmatpush.bf16.msra.mxu1 %v6526_v22  ;;  %v3170_v6 = vpop.f32.mrf.mxu2  ;;  %v7455_v22 = vld [vmem:[%s11167_s10 + $0x224] sm:$0xf]  ;;  %v6545_v60 = vld [vmem:[%s11167_s10 + $0x188] sm:$0xf]  ;;  %v6354_v3 = vor.u32 %v7390_v58, %v6353_v57  ;;  %v6595_v57 = vld [vmem:[%s11167_s10 + $0x1f8] sm:$0xf0] }
 0x2c7   :  { %v6622_v25 = vor.u32 %v7455_v22, %v6619_v23  ;;  %v6385_v22 = vld [vmem:[%s11167_s10 + $0x48] sm:$0xf]  ;;  %v7398_v23 = vld [vmem:[%s11167_s10 + $0x54] sm:$0xf0] }
 0x2c8   :  { %v6386_v24 = vor.u32 %v7398_v23, %v6385_v22  ;;  %v7478_v22 = vld [vmem:[%s11167_s10 + $0x2d4] sm:$0xf0]  ;;  %v7408_v23 = vld [vmem:[%s11167_s10 + $0xac] sm:$0xf] }
 0x2c9   :  { %4181 = vmatpush.bf16.msra.mxu2 %v6622_v25  ;;  %4140 = vmatpush.bf16.msrb.mxu3 %v6730_v7  ;;  %v7495_v25 = vld [vmem:[%s11167_s10 + $0x364] sm:$0xf]  ;;  %v7394_v7 = vld [vmem:[%s11167_s10 + $0x34] sm:$0xf0] }
 0x2ca   :  { %4166 = vmatpush.bf16.msra.mxu1 %v6510_v35  ;;  %v3144_v35 = vpop.f32.mrf.mxu0 }
 0x2cd   :  { %4182 = vmatpush.bf16.msra.mxu2 %v6606_v46  ;;  %v3214_v46 = vpop.f32.mrf.mxu1 }
 0x2ce   :  { %4167 = vmatpush.bf16.msra.mxu1 %v6494_v48  ;;  %v6843_v48 = vld [vmem:[%s11167_s10 + $0x3f0] sm:$0xf0]  ;;  %v3172_v53 = vpop.f32.mrf.mxu2 }
 0x2cf   :  { %v6846_v52 = vor.u32 %v7511_v42, %v6843_v48  ;;  %v7442_v42 = vld [vmem:[%s11167_s10 + $0x1b4] sm:$0xf0]  ;;  %v6766_v48 = vor.u32 %v7491_v44, %v6763_v9  ;;  %v6481_v9 = vld [vmem:[%s11167_s10 + $0x108] sm:$0xf] }
 0x2d1   :  { %4189 = vmatpush.bf16.msra.mxu3 %v6846_v52 }
 0x2d2   :  { %4168 = vmatpush.bf16.msra.mxu1 %v6478_v27  ;;  %v3145_v27 = vadd.f32 %v3144_v35, %v2430_v26  ;;  %v3198_v8 = vpop.f32.mrf.mxu0  ;;  %v6779_v26 = vld [vmem:[%s11167_s10 + $0x370] sm:$0xf0] }
 0x2d4   :  { %v3159_v1 = vadd.f32 %v3158_v49, %v3145_v27  ;;  %v7487_v27 = vld [vmem:[%s11167_s10 + $0x324] sm:$0xf] }
 0x2d5   :  { %4190 = vmatpush.bf16.msra.mxu3 %v6830_v29  ;;  %v7438_v29 = vld [vmem:[%s11167_s10 + $0x194] sm:$0xf0] }
 0x2d6   :  { %v3128_v2 = vpop.f32.mrf.mxu3  ;;  %v3173_v62 = vadd.f32 %v3172_v53, %v3159_v1 }
 0x2d7   :  { %v3129_v16 = vadd.f32 %v3128_v2, %v3115_v0  ;;  %v3171_v2 = vadd.f32 %v3170_v6, %v3157_v28  ;;  %v7499_v0 = vld [vmem:[%s11167_s10 + $0x384] sm:$0xf]  ;;  %v6747_v28 = vld [vmem:[%s11167_s10 + $0x330] sm:$0xf0] }
 0x2d8   :  { %v6750_v1 = vor.u32 %v7487_v27, %v6747_v28  ;;  %v7466_v28 = vld [vmem:[%s11167_s10 + $0x274] sm:$0xf0] }
 0x2d9   :  { %v3301_v31 = vmax.f32 %v3129_v16, 0.0  ;;  %4191 = vmatpush.bf16.msra.mxu3 %v6814_v10  ;;  %v3226_v6 = vpop.f32.mrf.mxu2  ;;  %v2431_v16 = vperm.slane %v10489_v50, 2  ;;  %v6529_v10 = vld [vmem:[%s11167_s10 + $0x168] sm:$0xf] }
 0x2db   :  { %v3199_v41 = vadd.f32 %v3198_v8, %v2431_v16  ;;  %v6546_v8 = vor.u32 %v7438_v29, %v6545_v60  ;;  %v2432_v60 = vperm.slane %v10489_v50, 3  ;;  %v6657_v29 = vld [vmem:[%s11167_s10 + $0x268] sm:$0xf]  ;;  %v6387_v50 = vld [vmem:[%s11167_s10 + $0x58] sm:$0xf0] }
 0x2dd   :  { %v3213_v52 = vadd.f32 %v3212_v11, %v3199_v41 }
 0x2de   :  { %v3130_v20 = vpop.f32.mrf.mxu3 }
 0x2df   :  { %v3131_v59 = vadd.f32 %v3130_v20, %v3117_v51  ;;  %v6798_v51 = vor.u32 %v7499_v0, %v6795_v40  ;;  %v6402_v20 = vor.u32 %v7402_v55, %v6401_v13  ;;  %v3227_v61 = vadd.f32 %v3226_v6, %v3213_v52  ;;  %v6731_v13 = vld [vmem:[%s11167_s10 + $0x310] sm:$0xf0]  ;;  %v7482_v55 = vld [vmem:[%s11167_s10 + $0x2f4] sm:$0xf0]  ;;  %v7400_v52 = vld [vmem:[%s11167_s10 + $0x6c] sm:$0xf] }
 0x2e0   :  { %v3268_v41 = vpop.f32.mrf.mxu1 }
 0x2e1   :  { %v3305_v33 = vmax.f32 %v3131_v59, 0.0  ;;  %v6577_v59 = vld [vmem:[%s11167_s10 + $0x1c8] sm:$0xf]  ;;  %4192 = vmatpush.bf16.msra.mxu3 %v6798_v51  ;;  %v3228_v53 = vpop.f32.mrf.mxu2 }
 0x2e2   :  { %v6578_v35 = vor.u32 %v7446_v5, %v6577_v59  ;;  %v6435_v59 = vld [vmem:[%s11167_s10 + $0xb8] sm:$0xf0] }
 0x2e3   :  { %v10571_v43 = vpack.c.bf16 %v3305_v33, %v3301_v31  ;;  %v6782_v31 = vor.u32 %v7495_v25, %v6779_v26  ;;  %v3200_v33 = vpop.f32.mrf.mxu0  ;;  %v6438_v26 = vor.u32 %v7408_v23, %v6435_v59  ;;  %v7436_v23 = vld [vmem:[%s11167_s10 + $0x18c] sm:$0xf]  ;;  %v6547_v59 = vld [vmem:[%s11167_s10 + $0x198] sm:$0xf0] }
 0x2e4   :  { %v3201_v49 = vadd.f32 %v3200_v33, %v2431_v16  ;;  %v7426_v33 = vld [vmem:[%s11167_s10 + $0x134] sm:$0xf0] }
 0x2e5   :  { %4099 = vmatmul.bf16.vlgmr.msrb.gmra.mxu0 %v10571_v43  ;;  %4193 = vmatpush.bf16.msra.mxu3 %v6782_v31  ;;  %v6497_v31 = vld [vmem:[%s11167_s10 + $0x128] sm:$0xf] }
 0x2e6   :  { %4203 = vmatpush.bf16.msrb.mxu0 %v6466_v36  ;;  %v3184_v56 = vpop.f32.mrf.mxu3  ;;  %v6369_v36 = vld [vmem:[%s11167_s10 + $0x28] sm:$0xf]  ;;  %v3215_v38 = vadd.f32 %v3214_v46, %v3201_v49  ;;  %v7422_v46 = vld [vmem:[%s11167_s10 + $0x114] sm:$0xf0] }
 0x2e7   :  { %v3185_v32 = vadd.f32 %v3184_v56, %v3171_v2  ;;  %v6370_v56 = vor.u32 %v7394_v7, %v6369_v36  ;;  %v6419_v36 = vld [vmem:[%s11167_s10 + $0x98] sm:$0xf0]  ;;  %v7470_v49 = vld [vmem:[%s11167_s10 + $0x294] sm:$0xf0]  ;;  %v6482_v58 = vor.u32 %v7422_v46, %v6481_v9 }
 0x2e8   :  { %v3229_v2 = vadd.f32 %v3228_v53, %v3215_v38  ;;  %v6403_v53 = vld [vmem:[%s11167_s10 + $0x78] sm:$0xf0] }
 0x2e9   :  { %v3302_v18 = vmax.f32 %v3185_v32, 0.0  ;;  %4194 = vmatpush.bf16.msra.mxu3 %v6766_v48  ;;  %v6673_v48 = vld [vmem:[%s11167_s10 + $0x288] sm:$0xf]  ;;  %v6723_v9 = vld [vmem:[%s11167_s10 + $0x2f8] sm:$0xf0] }
 0x2ea   :  { %4204 = vmatpush.bf16.msrb.mxu0 %v6450_v19  ;;  %v6562_v19 = vor.u32 %v7442_v42, %v6561_v37  ;;  %v6498_v37 = vor.u32 %v7426_v33, %v6497_v31  ;;  %v6674_v38 = vor.u32 %v7470_v49, %v6673_v48 }
 0x2eb   :  { %v3254_v7 = vpop.f32.mrf.mxu0 }
 0x2ed   :  { %4195 = vmatpush.bf16.msra.mxu3 %v6750_v1  ;;  %v6579_v1 = vld [vmem:[%s11167_s10 + $0x1d8] sm:$0xf0] }
 0x2ee   :  { %4205 = vmatpush.bf16.msrb.mxu0 %v6434_v30  ;;  %v3186_v12 = vpop.f32.mrf.mxu3  ;;  %v7416_v30 = vld [vmem:[%s11167_s10 + $0xec] sm:$0xf] }
 0x2ef   :  { %v3187_v15 = vadd.f32 %v3186_v12, %v3173_v62  ;;  %v7434_v62 = vld [vmem:[%s11167_s10 + $0x174] sm:$0xf0]  ;;  %v6470_v11 = vor.u32 %v7416_v30, %v6467_v63  ;;  %v6721_v12 = vld [vmem:[%s11167_s10 + $0x2e8] sm:$0xf]  ;;  %v7396_v30 = vld [vmem:[%s11167_s10 + $0x4c] sm:$0xf] }
 0x2f0   :  { %v6530_v6 = vor.u32 %v7434_v62, %v6529_v10  ;;  %v6722_v16 = vor.u32 %v7482_v55, %v6721_v12  ;;  %v7444_v63 = vld [vmem:[%s11167_s10 + $0x1cc] sm:$0xf]  ;;  %v3255_v10 = vadd.f32 %v3254_v7, %v2432_v60  ;;  %v6371_v12 = vld [vmem:[%s11167_s10 + $0x38] sm:$0xf0]  ;;  %v6849_v7 = vld [vmem:[%s11167_s10 + $0x3e8] sm:$0xf] }
 0x2f1   :  { %v3306_v54 = vmax.f32 %v3187_v15, 0.0  ;;  %v6451_v15 = vld [vmem:[%s11167_s10 + $0xd8] sm:$0xf0]  ;;  %v6582_v62 = vor.u32 %v7444_v63, %v6579_v1  ;;  %v7506_v63 = vld [vmem:[%s11167_s10 + $0x3b4] sm:$0xf0] }
 0x2f2   :  { %4206 = vmatpush.bf16.msrb.mxu0 %v6418_v39  ;;  %v7483_v39 = vld [vmem:[%s11167_s10 + $0x304] sm:$0xf]  ;;  %v6563_v55 = vld [vmem:[%s11167_s10 + $0x1b8] sm:$0xf0]  ;;  %v7424_v1 = vld [vmem:[%s11167_s10 + $0x12c] sm:$0xf] }
 0x2f3   :  { %v10635_v4 = vpack.c.bf16 %v3306_v54, %v3302_v18  ;;  %v6734_v17 = vor.u32 %v7483_v39, %v6731_v13  ;;  %v6454_v18 = vor.u32 %v7412_v14, %v6451_v15  ;;  %v6513_v54 = vld [vmem:[%s11167_s10 + $0x148] sm:$0xf]  ;;  %v3270_v39 = vpop.f32.mrf.mxu1  ;;  %v7440_v13 = vld [vmem:[%s11167_s10 + $0x1ac] sm:$0xf]  ;;  %v3269_v15 = vadd.f32 %v3268_v41, %v3255_v10 }
 0x2f4   :  { %v7432_v41 = vld [vmem:[%s11167_s10 + $0x16c] sm:$0xf]  ;;  %v6801_v10 = vld [vmem:[%s11167_s10 + $0x388] sm:$0xf] }
 0x2f5   :  { %4113 = vmatmul.bf16.vlgmr.msrb.gmra.mxu1 %v10635_v4  ;;  %4155 = vmatmul.bf16.vlgmr.msra.gmra.mxu0 %v10571_v43 }
 0x2f6   :  { %4207 = vmatpush.bf16.msrb.mxu0 %v6402_v20  ;;  %4217 = vmatpush.bf16.msrb.mxu1 %v6594_v21  ;;  %v3240_v34 = vpop.f32.mrf.mxu3  ;;  %v7430_v20 = vld [vmem:[%s11167_s10 + $0x154] sm:$0xf0]  ;;  %v6705_v21 = vld [vmem:[%s11167_s10 + $0x2c8] sm:$0xf] }
 0x2f7   :  { %v3241_v45 = vadd.f32 %v3240_v34, %v3227_v61  ;;  %4196 = vmatpush.bf16.msra.mxu3 %v6734_v17  ;;  %v6514_v5 = vor.u32 %v7430_v20, %v6513_v54  ;;  %v6706_v25 = vor.u32 %v7478_v22, %v6705_v21  ;;  %v6689_v34 = vld [vmem:[%s11167_s10 + $0x2a8] sm:$0xf]  ;;  %v6406_v61 = vor.u32 %v7400_v52, %v6403_v53  ;;  %v7458_v20 = vld [vmem:[%s11167_s10 + $0x234] sm:$0xf0]  ;;  %v7388_v21 = vld [vmem:[%s11167_s10 + $0xc] sm:$0xf] }
 0x2f8   :  { %v6566_v54 = vor.u32 %v7440_v13, %v6563_v55  ;;  %v6355_v22 = vld [vmem:[%s11167_s10 + $0x18] sm:$0xf0] }
 0x2f9   :  { %v3303_v0 = vmax.f32 %v3241_v45, 0.0  ;;  %v6358_v33 = vor.u32 %v7388_v21, %v6355_v22  ;;  %v6643_v21 = vld [vmem:[%s11167_s10 + $0x258] sm:$0xf0] }
 0x2fa   :  { %4208 = vmatpush.bf16.msrb.mxu0 %v6386_v24  ;;  %4218 = vmatpush.bf16.msrb.mxu1 %v6578_v35  ;;  %v7474_v24 = vld [vmem:[%s11167_s10 + $0x2b4] sm:$0xf0]  ;;  %v7404_v35 = vld [vmem:[%s11167_s10 + $0x8c] sm:$0xf] }
 0x2fb   :  { %v6690_v42 = vor.u32 %v7474_v24, %v6689_v34  ;;  %v6422_v44 = vor.u32 %v7404_v35, %v6419_v36  ;;  %v6609_v34 = vld [vmem:[%s11167_s10 + $0x208] sm:$0xf]  ;;  %v7454_v24 = vld [vmem:[%s11167_s10 + $0x214] sm:$0xf0]  ;;  %v6550_v36 = vor.u32 %v7436_v23, %v6547_v59 }
 0x2fc   :  { %v6610_v49 = vor.u32 %v7454_v24, %v6609_v34  ;;  %v6753_v59 = vld [vmem:[%s11167_s10 + $0x328] sm:$0xf]  ;;  %v7486_v34 = vld [vmem:[%s11167_s10 + $0x314] sm:$0xf0]  ;;  %v7452_v24 = vld [vmem:[%s11167_s10 + $0x20c] sm:$0xf] }
 0x2fe   :  { %4209 = vmatpush.bf16.msrb.mxu0 %v6370_v56  ;;  %4219 = vmatpush.bf16.msrb.mxu1 %v6562_v19  ;;  %v3242_v47 = vpop.f32.mrf.mxu3  ;;  %v3282_v56 = vpop.f32.mrf.mxu2  ;;  %v7448_v19 = vld [vmem:[%s11167_s10 + $0x1ec] sm:$0xf] }
 0x2ff   :  { %v3243_v32 = vadd.f32 %v3242_v47, %v3229_v2  ;;  %v6598_v27 = vor.u32 %v7448_v19, %v6595_v57  ;;  %v3256_v2 = vpop.f32.mrf.mxu0  ;;  %v6658_v47 = vor.u32 %v7466_v28, %v6657_v29  ;;  %v6833_v57 = vld [vmem:[%s11167_s10 + $0x3c8] sm:$0xf]  ;;  %v6707_v29 = vld [vmem:[%s11167_s10 + $0x2d8] sm:$0xf0] }
 0x300   :  { %v3257_v14 = vadd.f32 %v3256_v2, %v2432_v60  ;;  %v7428_v60 = vld [vmem:[%s11167_s10 + $0x14c] sm:$0xf] }
 0x301   :  { %v3307_v40 = vmax.f32 %v3243_v32, 0.0  ;;  %v7462_v32 = vld [vmem:[%s11167_s10 + $0x254] sm:$0xf0]  ;;  %v7472_v2 = vld [vmem:[%s11167_s10 + $0x2ac] sm:$0xf] }
 0x302   :  { %4210 = vmatpush.bf16.msrb.mxu0 %v6354_v3  ;;  %4220 = vmatpush.bf16.msrb.mxu1 %v6546_v8  ;;  %v6390_v3 = vor.u32 %v7396_v30, %v6387_v50  ;;  %v6641_v8 = vld [vmem:[%s11167_s10 + $0x248] sm:$0xf] }
 0x303   :  { %v10714_v51 = vpack.c.bf16 %v3307_v40, %v3303_v0  ;;  %v6642_v0 = vor.u32 %v7462_v32, %v6641_v8  ;;  %v6817_v50 = vld [vmem:[%s11167_s10 + $0x3a8] sm:$0xf]  ;;  %v7420_v32 = vld [vmem:[%s11167_s10 + $0x10c] sm:$0xf] }
 0x305   :  { %4127 = vmatmul.bf16.vlgmr.msrb.gmra.mxu2 %v10714_v51  ;;  %4169 = vmatmul.bf16.vlgmr.msra.gmra.mxu1 %v10635_v4 }
 0x306   :  { %4259 = vmatpush.bf16.msra.mxu0 %v6470_v11  ;;  %4221 = vmatpush.bf16.msrb.mxu1 %v6530_v6  ;;  %v7392_v11 = vld [vmem:[%s11167_s10 + $0x2c] sm:$0xf]  ;;  %v3284_v17 = vpop.f32.mrf.mxu2  ;;  %v6625_v6 = vld [vmem:[%s11167_s10 + $0x228] sm:$0xf] }
 0x307   :  { %4211 = vmatmul.bf16.vlgmr.msrb.gmra.mxu0 %v10571_v43  ;;  %4231 = vmatpush.bf16.msrb.mxu2 %v6722_v16  ;;  %v6374_v40 = vor.u32 %v7392_v11, %v6371_v12  ;;  %v3271_v16 = vadd.f32 %v3270_v39, %v3257_v14  ;;  %v6626_v31 = vor.u32 %v7458_v20, %v6625_v6  ;;  %v6483_v11 = vld [vmem:[%s11167_s10 + $0x118] sm:$0xf0]  ;;  %v7468_v12 = vld [vmem:[%s11167_s10 + $0x28c] sm:$0xf] }
 0x308   :  { %v6675_v39 = vld [vmem:[%s11167_s10 + $0x298] sm:$0xf0]  ;;  %v6486_v55 = vor.u32 %v7420_v32, %v6483_v11  ;;  %v7460_v20 = vld [vmem:[%s11167_s10 + $0x24c] sm:$0xf]  ;;  %v7515_v11 = vld [vmem:[%s11169_s12] sm:$0xff] }
 0x309   :  { %v6678_v14 = vor.u32 %v7468_v12, %v6675_v39  ;;  %v6646_v23 = vor.u32 %v7460_v20, %v6643_v21  ;;  %v7528_v32 = vld [vmem:[%s11169_s12 + $0x68] sm:$0xff]  ;;  %v7527_v12 = vld [vmem:[%s11169_s12 + $0x60] sm:$0xff] }
 0x30a   :  { %4260 = vmatpush.bf16.msra.mxu0 %v6454_v18  ;;  %4222 = vmatpush.bf16.msrb.mxu1 %v6514_v5  ;;  %v3283_v18 = vadd.f32 %v3282_v56, %v3269_v15  ;;  %v3285_v5 = vadd.f32 %v3284_v17, %v3271_v16  ;;  %v6785_v15 = vld [vmem:[%s11167_s10 + $0x368] sm:$0xf]  ;;  %v7498_v17 = vld [vmem:[%s11167_s10 + $0x374] sm:$0xf0]  ;;  %v7523_v20 = vld [vmem:[%s11169_s12 + $0x40] sm:$0xff] }
 0x30b   :  { %4232 = vmatpush.bf16.msrb.mxu2 %v6706_v25  ;;  %v6786_v6 = vor.u32 %v7498_v17, %v6785_v15  ;;  %v7525_v17 = vld [vmem:[%s11169_s12 + $0x50] sm:$0xff]  ;;  %v7535_v21 = vld [vmem:[%s11169_s12 + $0xa0] sm:$0xff] }
 0x30e   :  { %4261 = vmatpush.bf16.msra.mxu0 %v6438_v26  ;;  %4223 = vmatpush.bf16.msrb.mxu1 %v6498_v37  ;;  %v7514_v37 = vld [vmem:[%s11167_s10 + $0x3f4] sm:$0xf0] }
 0x30f   :  { %4233 = vmatpush.bf16.msrb.mxu2 %v6690_v42  ;;  %v6531_v42 = vld [vmem:[%s11167_s10 + $0x178] sm:$0xf0]  ;;  %v6850_v52 = vor.u32 %v7514_v37, %v6849_v7 }
 0x310   :  { %v6534_v56 = vor.u32 %v7432_v41, %v6531_v42  ;;  %v6851_v7 = vld [vmem:[%s11167_s10 + $0x3f8] sm:$0xf0] }
 0x312   :  { %4262 = vmatpush.bf16.msra.mxu0 %v6422_v44  ;;  %4224 = vmatpush.bf16.msrb.mxu1 %v6482_v58  ;;  %v7480_v44 = vld [vmem:[%s11167_s10 + $0x2ec] sm:$0xf]  ;;  %v7510_v58 = vld [vmem:[%s11167_s10 + $0x3d4] sm:$0xf0] }
 0x313   :  { %4234 = vmatpush.bf16.msrb.mxu2 %v6674_v38  ;;  %v6726_v19 = vor.u32 %v7480_v44, %v6723_v9  ;;  %v6515_v38 = vld [vmem:[%s11167_s10 + $0x158] sm:$0xf0]  ;;  %v7508_v44 = vld [vmem:[%s11167_s10 + $0x3cc] sm:$0xf] }
 0x314   :  { %v6518_v28 = vor.u32 %v7428_v60, %v6515_v38  ;;  %v6835_v9 = vld [vmem:[%s11167_s10 + $0x3d8] sm:$0xf0]  ;;  %v7492_v38 = vld [vmem:[%s11167_s10 + $0x34c] sm:$0xf] }
 0x315   :  { %4183 = vmatmul.bf16.vlgmr.msra.gmra.mxu2 %v10714_v51  ;;  %4225 = vmatmul.bf16.vlgmr.msrb.gmra.mxu1 %v10635_v4 }
 0x316   :  { %v3296_v45 = vpop.f32.mrf.mxu3  ;;  %4263 = vmatpush.bf16.msra.mxu0 %v6406_v61  ;;  %4273 = vmatpush.bf16.msra.mxu1 %v6598_v27  ;;  %v7476_v61 = vld [vmem:[%s11167_s10 + $0x2cc] sm:$0xf]  ;;  %v6834_v27 = vor.u32 %v7510_v58, %v6833_v57 }
 0x317   :  { %4235 = vmatpush.bf16.msrb.mxu2 %v6658_v47  ;;  %v3297_v25 = vadd.f32 %v3296_v45, %v3283_v18  ;;  %v6710_v30 = vor.u32 %v7476_v61, %v6707_v29  ;;  %v6691_v45 = vld [vmem:[%s11167_s10 + $0x2b8] sm:$0xf0]  ;;  %v6818_v47 = vor.u32 %v7506_v63, %v6817_v50  ;;  %v6769_v18 = vld [vmem:[%s11167_s10 + $0x348] sm:$0xf]  ;;  %v7496_v58 = vld [vmem:[%s11167_s10 + $0x36c] sm:$0xf] }
 0x318   :  { %v6694_v8 = vor.u32 %v7472_v2, %v6691_v45  ;;  %v6771_v61 = vld [vmem:[%s11167_s10 + $0x358] sm:$0xf0]  ;;  %v7484_v50 = vld [vmem:[%s11167_s10 + $0x30c] sm:$0xf]  ;;  %v7521_v2 = vld [vmem:[%s11169_s12 + $0x30] sm:$0xff] }
 0x319   :  { %v3304_v46 = vmax.f32 %v3297_v25, 0.0  ;;  %v7456_v25 = vld [vmem:[%s11167_s10 + $0x22c] sm:$0xf]  ;;  %v6774_v29 = vor.u32 %v7492_v38, %v6771_v61  ;;  %v6739_v63 = vld [vmem:[%s11167_s10 + $0x318] sm:$0xf0] }
 0x31a   :  { %4264 = vmatpush.bf16.msra.mxu0 %v6390_v3  ;;  %4274 = vmatpush.bf16.msra.mxu1 %v6582_v62  ;;  %v7502_v62 = vld [vmem:[%s11167_s10 + $0x394] sm:$0xf0]  ;;  %v7520_v45 = vld [vmem:[%s11169_s12 + $0x28] sm:$0xff] }
 0x31b   :  { %4236 = vmatpush.bf16.msrb.mxu2 %v6642_v0  ;;  %v6802_v13 = vor.u32 %v7502_v62, %v6801_v10  ;;  %v7464_v0 = vld [vmem:[%s11167_s10 + $0x26c] sm:$0xf]  ;;  %v7529_v10 = vld [vmem:[%s11169_s12 + $0x70] sm:$0xff] }
 0x31c   :  { %v7516_v62 = vld [vmem:[%s11169_s12 + $0x8] sm:$0xff] }
 0x31d   :  { %v7544_v61 = vld [vmem:[%s11169_s12 + $0xe8] sm:$0xff] }
 0x31e   :  { %v3298_v26 = vpop.f32.mrf.mxu3  ;;  %4265 = vmatpush.bf16.msra.mxu0 %v6374_v40  ;;  %4275 = vmatpush.bf16.msra.mxu1 %v6566_v54  ;;  %v6659_v40 = vld [vmem:[%s11167_s10 + $0x278] sm:$0xf0]  ;;  %v7494_v54 = vld [vmem:[%s11167_s10 + $0x354] sm:$0xf0] }
 0x31f   :  { %v3299_v35 = vadd.f32 %v3298_v26, %v3285_v5  ;;  %4237 = vmatpush.bf16.msrb.mxu2 %v6626_v31  ;;  %v6662_v16 = vor.u32 %v7464_v0, %v6659_v40  ;;  %v6770_v22 = vor.u32 %v7494_v54, %v6769_v18  ;;  %v7490_v5 = vld [vmem:[%s11167_s10 + $0x334] sm:$0xf0]  ;;  %v6627_v26 = vld [vmem:[%s11167_s10 + $0x238] sm:$0xf0]  ;;  %v7537_v0 = vld [vmem:[%s11169_s12 + $0xb0] sm:$0xff] }
 0x320   :  { %v6630_v31 = vor.u32 %v7456_v25, %v6627_v26  ;;  %v7524_v40 = vld [vmem:[%s11169_s12 + $0x48] sm:$0xff]  ;;  %v11077_v18 = vld [vmem:[%s11171_s11] sm:$0xf] }
 0x321   :  { %v3308_v48 = vmax.f32 %v3299_v35, 0.0  ;;  %v6611_v35 = vld [vmem:[%s11167_s10 + $0x218] sm:$0xf0] }
 0x322   :  { %4266 = vmatpush.bf16.msra.mxu0 %v6358_v33  ;;  %4276 = vmatpush.bf16.msra.mxu1 %v6550_v36  ;;  %v6737_v33 = vld [vmem:[%s11167_s10 + $0x308] sm:$0xf]  ;;  %v7512_v36 = vld [vmem:[%s11167_s10 + $0x3ec] sm:$0xf]  ;;  %v6614_v41 = vor.u32 %v7452_v24, %v6611_v35 }
 0x323   :  { %v10860_v53 = vpack.c.bf16 %v3308_v48, %v3304_v46  ;;  %4238 = vmatpush.bf16.msrb.mxu2 %v6610_v49  ;;  %v6738_v37 = vor.u32 %v7486_v34, %v6737_v33  ;;  %v6854_v42 = vor.u32 %v7512_v36, %v6851_v7  ;;  %v6838_v46 = vor.u32 %v7508_v44, %v6835_v9  ;;  %v7504_v48 = vld [vmem:[%s11167_s10 + $0x3ac] sm:$0xf]  ;;  %v6819_v49 = vld [vmem:[%s11167_s10 + $0x3b8] sm:$0xf0]  ;;  %v7533_v33 = vld [vmem:[%s11169_s12 + $0x90] sm:$0xff] }
 0x325   :  { %4141 = vmatmul.bf16.vlgmr.msrb.gmra.mxu3 %v10860_v53  ;;  %4267 = vmatmul.bf16.vlgmr.msra.gmra.mxu0 %v10571_v43  ;;  %v6499_v43 = vld [vmem:[%s11167_s10 + $0x138] sm:$0xf0] }
 0x326   :  { %4245 = vmatpush.bf16.msrb.mxu3 %v6850_v52  ;;  %4277 = vmatpush.bf16.msra.mxu1 %v6534_v56  ;;  %v6502_v3 = vor.u32 %v7424_v1, %v6499_v43  ;;  %v6822_v52 = vor.u32 %v7504_v48, %v6819_v49  ;;  %v7500_v56 = vld [vmem:[%s11167_s10 + $0x38c] sm:$0xf]  ;;  %v6742_v1 = vor.u32 %v7484_v50, %v6739_v63  ;;  %v7522_v43 = vld [vmem:[%s11169_s12 + $0x38] sm:$0xff]  ;;  %v7531_v48 = vld [vmem:[%s11169_s12 + $0x80] sm:$0xff] }
 0x327   :  { %4287 = vmatpush.bf16.msra.mxu2 %v6726_v19  ;;  %v6803_v19 = vld [vmem:[%s11167_s10 + $0x398] sm:$0xf0]  ;;  %4587 = vmatpush.bf16.msrb.mxu0 %v7522_v43  ;;  %v7543_v50 = vld [vmem:[%s11169_s12 + $0xe0] sm:$0xff] }
 0x328   :  { %4239 = vmatmul.bf16.vlgmr.msrb.gmra.mxu2 %v10714_v51  ;;  %v6806_v57 = vor.u32 %v7500_v56, %v6803_v19  ;;  %v7546_v49 = vld [vmem:[%s11169_s12 + $0xf8] sm:$0xff]  ;;  %v3444_v56 = vperm.slane %v11077_v18, 1 }
 0x32a   :  { %4246 = vmatpush.bf16.msrb.mxu3 %v6834_v27  ;;  %4278 = vmatpush.bf16.msra.mxu1 %v6518_v28  ;;  %v7488_v27 = vld [vmem:[%s11167_s10 + $0x32c] sm:$0xf]  ;;  %v6755_v28 = vld [vmem:[%s11167_s10 + $0x338] sm:$0xf0] }
 0x32b   :  { %4288 = vmatpush.bf16.msra.mxu2 %v6710_v30  ;;  %v6758_v30 = vor.u32 %v7488_v27, %v6755_v28  ;;  %4588 = vmatpush.bf16.msrb.mxu0 %v7521_v2 }
 0x32e   :  { %4247 = vmatpush.bf16.msrb.mxu3 %v6818_v47  ;;  %4279 = vmatpush.bf16.msra.mxu1 %v6502_v3  ;;  %v7519_v47 = vld [vmem:[%s11169_s12 + $0x20] sm:$0xff]  ;;  %v7530_v3 = vld [vmem:[%s11169_s12 + $0x78] sm:$0xff] }
 0x32f   :  { %4289 = vmatpush.bf16.msra.mxu2 %v6694_v8  ;;  %4589 = vmatpush.bf16.msrb.mxu0 %v7520_v45  ;;  %v7517_v8 = vld [vmem:[%s11169_s12 + $0x10] sm:$0xff] }
 0x332   :  { %4248 = vmatpush.bf16.msrb.mxu3 %v6802_v13  ;;  %4280 = vmatpush.bf16.msra.mxu1 %v6486_v55  ;;  %v7526_v13 = vld [vmem:[%s11169_s12 + $0x58] sm:$0xff] }
 0x333   :  { %4290 = vmatpush.bf16.msra.mxu2 %v6678_v14  ;;  %4590 = vmatpush.bf16.msrb.mxu0 %v7519_v47  ;;  %v7538_v55 = vld [vmem:[%s11169_s12 + $0xb8] sm:$0xff] }
 0x335   :  { %4197 = vmatmul.bf16.vlgmr.msra.gmra.mxu3 %v10860_v53  ;;  %4281 = vmatmul.bf16.vlgmr.msra.gmra.mxu1 %v10635_v4  ;;  %v6754_v4 = vor.u32 %v7490_v5, %v6753_v59  ;;  %v7534_v59 = vld [vmem:[%s11169_s12 + $0x98] sm:$0xff] }
 0x336   :  { %4249 = vmatpush.bf16.msrb.mxu3 %v6786_v6  ;;  %4601 = vmatpush.bf16.msrb.mxu1 %v7530_v3  ;;  %v7536_v6 = vld [vmem:[%s11169_s12 + $0xa8] sm:$0xff] }
 0x337   :  { %4291 = vmatpush.bf16.msra.mxu2 %v6662_v16 }
 0x33a   :  { %4250 = vmatpush.bf16.msrb.mxu3 %v6770_v22  ;;  %4602 = vmatpush.bf16.msrb.mxu1 %v7529_v10  ;;  %v7542_v10 = vld [vmem:[%s11169_s12 + $0xd8] sm:$0xff] }
 0x33b   :  { %4292 = vmatpush.bf16.msra.mxu2 %v6646_v23  ;;  %v3443_v23 = vperm.slane %v11077_v18, 0 }
 0x33e   :  { %4251 = vmatpush.bf16.msrb.mxu3 %v6754_v4  ;;  %4603 = vmatpush.bf16.msrb.mxu1 %v7528_v32 }
 0x33f   :  { %4293 = vmatpush.bf16.msra.mxu2 %v6630_v31 }
 0x342   :  { %4252 = vmatpush.bf16.msrb.mxu3 %v6738_v37  ;;  %4604 = vmatpush.bf16.msrb.mxu1 %v7527_v12 }
 0x343   :  { %4294 = vmatpush.bf16.msra.mxu2 %v6614_v41  ;;  %v7532_v41 = vld [vmem:[%s11169_s12 + $0x88] sm:$0xff] }
 0x345   :  { %4253 = vmatmul.bf16.vlgmr.msrb.gmra.mxu3 %v10860_v53 }
 0x346   :  { %4301 = vmatpush.bf16.msra.mxu3 %v6854_v42  ;;  %4295 = vmatmul.bf16.vlgmr.msra.gmra.mxu2 %v10714_v51  ;;  %v6787_v51 = vld [vmem:[%s11167_s10 + $0x378] sm:$0xf0] }
 0x347   :  { %v6790_v60 = vor.u32 %v7496_v58, %v6787_v51  ;;  %4605 = vmatpush.bf16.msrb.mxu1 %v7526_v13  ;;  %4615 = vmatpush.bf16.msrb.mxu2 %v7538_v55  ;;  %v7545_v58 = vld [vmem:[%s11169_s12 + $0xf0] sm:$0xff] }
 0x34a   :  { %4302 = vmatpush.bf16.msra.mxu3 %v6838_v46 }
 0x34b   :  { %4606 = vmatpush.bf16.msrb.mxu1 %v7525_v17  ;;  %4616 = vmatpush.bf16.msrb.mxu2 %v7537_v0  ;;  %v7540_v17 = vld [vmem:[%s11169_s12 + $0xc8] sm:$0xff] }
 0x34e   :  { %4303 = vmatpush.bf16.msra.mxu3 %v6822_v52 }
 0x34f   :  { %4607 = vmatpush.bf16.msrb.mxu1 %v7524_v40  ;;  %4617 = vmatpush.bf16.msrb.mxu2 %v7536_v6 }
 0x352   :  { %4304 = vmatpush.bf16.msra.mxu3 %v6806_v57 }
 0x353   :  { %4608 = vmatpush.bf16.msrb.mxu1 %v7523_v20  ;;  %4618 = vmatpush.bf16.msrb.mxu2 %v7535_v21  ;;  %v7539_v20 = vld [vmem:[%s11169_s12 + $0xc0] sm:$0xff] }
 0x356   :  { %4305 = vmatpush.bf16.msra.mxu3 %v6790_v60 }
 0x357   :  { %4619 = vmatpush.bf16.msrb.mxu2 %v7534_v59 }
 0x35a   :  { %4306 = vmatpush.bf16.msra.mxu3 %v6774_v29 }
 0x35b   :  { %4620 = vmatpush.bf16.msrb.mxu2 %v7533_v33 }
 0x35e   :  { %4307 = vmatpush.bf16.msra.mxu3 %v6758_v30 }
 0x35f   :  { %4621 = vmatpush.bf16.msrb.mxu2 %v7532_v41 }
 0x362   :  { %4308 = vmatpush.bf16.msra.mxu3 %v6742_v1  ;;  %v4100_v39 = vpop.f32.mrf.mxu0 }
 0x363   :  { %v4101_v25 = vadd.f32 %v4100_v39, %v3443_v23  ;;  %4622 = vmatpush.bf16.msrb.mxu2 %v7531_v48 }
 0x365   :  { %4309 = vmatmul.bf16.vlgmr.msra.gmra.mxu3 %v10860_v53  ;;  %v7518_v53 = vld [vmem:[%s11169_s12 + $0x18] sm:$0xff] }
 0x366   :  { %4591 = vmatpush.bf16.msrb.mxu0 %v7518_v53  ;;  %4629 = vmatpush.bf16.msrb.mxu3 %v7546_v49 }
 0x36a   :  { %4592 = vmatpush.bf16.msrb.mxu0 %v7517_v8  ;;  %v4102_v16 = vpop.f32.mrf.mxu0  ;;  %4630 = vmatpush.bf16.msrb.mxu3 %v7545_v58  ;;  %v4643_v58 = vlaneseq }
 0x36b   :  { %v4103_v4 = vadd.f32 %v4102_v16, %v3443_v23 }
 0x36e   :  { %4593 = vmatpush.bf16.msrb.mxu0 %v7516_v62  ;;  %4631 = vmatpush.bf16.msrb.mxu3 %v7544_v61  ;;  %v3445_v62 = vperm.slane %v11077_v18, 2 }
 0x372   :  { %4594 = vmatpush.bf16.msrb.mxu0 %v7515_v11  ;;  %v4114_v14 = vpop.f32.mrf.mxu1  ;;  %v4156_v26 = vpop.f32.mrf.mxu0  ;;  %4632 = vmatpush.bf16.msrb.mxu3 %v7543_v50  ;;  %v7541_v11 = vld [vmem:[%s11169_s12 + $0xd0] sm:$0xff] }
 0x373   :  { %v4115_v31 = vadd.f32 %v4114_v14, %v4101_v25  ;;  %v4157_v38 = vadd.f32 %v4156_v26, %v3444_v56 }
 0x376   :  { %4633 = vmatpush.bf16.msrb.mxu3 %v7542_v10 }
 0x37a   :  { %v4116_v54 = vpop.f32.mrf.mxu1  ;;  %v4158_v52 = vpop.f32.mrf.mxu0  ;;  %4634 = vmatpush.bf16.msrb.mxu3 %v7541_v11 }
 0x37b   :  { %v4117_v24 = vadd.f32 %v4116_v54, %v4103_v4  ;;  %v4159_v29 = vadd.f32 %v4158_v52, %v3444_v56 }
 0x37e   :  { %4635 = vmatpush.bf16.msrb.mxu3 %v7540_v17 }
 0x382   :  { %v4170_v34 = vpop.f32.mrf.mxu1  ;;  %4636 = vmatpush.bf16.msrb.mxu3 %v7539_v20 }
 0x383   :  { %v4171_v27 = vadd.f32 %v4170_v34, %v4157_v38  ;;  %v11128_v38 = vand.u32 127, %v4643_v58 }
 0x384   :  { %v4212_v63 = vpop.f32.mrf.mxu0 }
 0x385   :  { %v4213_v13 = vadd.f32 %v4212_v63, %v3445_v62  ;;  %vm4668_vm1 = vcmp.eq.s32.totalorder %v11128_v38, 17  ;;  %vm4645_vm2 = vcmp.lt.s32.totalorder %v11128_v38, 17 }
 0x388   :  { %v4128_v15 = vpop.f32.mrf.mxu2 }
 0x389   :  { %v4129_v35 = vadd.f32 %v4128_v15, %v4115_v31  ;;  %v3446_v31 = vperm.slane %v11077_v18, 3  ;;  %v7547_v18 = vld [vmem:[%s11170_s13] ss:$0 sm:$0xff] }
 0x38a   :  { %v4172_v57 = vpop.f32.mrf.mxu1 }
 0x38b   :  { %v4173_v28 = vadd.f32 %v4172_v57, %v4159_v29 }
 0x38c   :  { %v4214_v12 = vpop.f32.mrf.mxu0 }
 0x38d   :  { %v4215_v14 = vadd.f32 %v4214_v12, %v3445_v62 }
 0x390   :  { %v4130_v22 = vpop.f32.mrf.mxu2 }
 0x391   :  { %v4131_v7 = vadd.f32 %v4130_v22, %v4117_v24 }
 0x392   :  { %v4226_v2 = vpop.f32.mrf.mxu1 }
 0x393   :  { %v4227_v15 = vadd.f32 %v4226_v2, %v4213_v13 }
 0x398   :  { %v4184_v36 = vpop.f32.mrf.mxu2 }
 0x399   :  { %v4185_v30 = vadd.f32 %v4184_v36, %v4171_v27 }
 0x39a   :  { %v4228_v55 = vpop.f32.mrf.mxu1 }
 0x39b   :  { %v4229_v40 = vadd.f32 %v4228_v55, %v4215_v14 }
 0x3a0   :  { %v4186_v51 = vpop.f32.mrf.mxu2 }
 0x3a1   :  { %v4187_v1 = vadd.f32 %v4186_v51, %v4173_v28 }
 0x3a2   :  { %v4268_v25 = vpop.f32.mrf.mxu0 }
 0x3a3   :  { %v4269_v24 = vadd.f32 %v4268_v25, %v3446_v31 }
 0x3a8   :  { %v4142_v5 = vpop.f32.mrf.mxu3 }
 0x3a9   :  { %v4143_v37 = vadd.f32 %v4142_v5, %v4129_v35 }
 0x3aa   :  { %v4270_v33 = vpop.f32.mrf.mxu0 }
 0x3ab   :  { %v4315_v9 = vmax.f32 %v4143_v37, 0.0  ;;  %v4240_v53 = vpop.f32.mrf.mxu2  ;;  %v4271_v36 = vadd.f32 %v4270_v33, %v3446_v31 }
 0x3ac   :  { %v4241_v6 = vadd.f32 %v4240_v53, %v4227_v15 }
 0x3b0   :  { %v4144_v42 = vpop.f32.mrf.mxu3 }
 0x3b1   :  { %v4145_v44 = vadd.f32 %v4144_v42, %v4131_v7 }
 0x3b2   :  { %v4282_v26 = vpop.f32.mrf.mxu1 }
 0x3b3   :  { %v4319_v46 = vmax.f32 %v4145_v44, 0.0  ;;  %v4242_v0 = vpop.f32.mrf.mxu2  ;;  %v4283_v7 = vadd.f32 %v4282_v26, %v4269_v24 }
 0x3b4   :  { %v4243_v16 = vadd.f32 %v4242_v0, %v4229_v40 }
 0x3b5   :  { %v4323_v19 = vpack.c.bf16 %v4319_v46, %v4315_v9 }
 0x3b7   :  { %4595 = vmatmul.bf16.vlgmr.msrb.gmra.mxu0 %v4323_v19 }
 0x3b8   :  { %v4198_v60 = vpop.f32.mrf.mxu3 }
 0x3b9   :  { %v4199_v43 = vadd.f32 %v4198_v60, %v4185_v30 }
 0x3ba   :  { %v4284_v35 = vpop.f32.mrf.mxu1 }
 0x3bb   :  { %v4316_v3 = vmax.f32 %v4199_v43, 0.0  ;;  %v4285_v41 = vadd.f32 %v4284_v35, %v4271_v36 }
 0x3c0   :  { %v4200_v45 = vpop.f32.mrf.mxu3 }
 0x3c1   :  { %v4201_v47 = vadd.f32 %v4200_v45, %v4187_v1 }
 0x3c3   :  { %v4320_v8 = vmax.f32 %v4201_v47, 0.0 }
 0x3c5   :  { %v4324_v32 = vpack.c.bf16 %v4320_v8, %v4316_v3 }
 0x3c7   :  { %4609 = vmatmul.bf16.vlgmr.msrb.gmra.mxu1 %v4324_v32 }
 0x3c8   :  { %v4254_v39 = vpop.f32.mrf.mxu3 }
 0x3c9   :  { %v4255_v54 = vadd.f32 %v4254_v39, %v4241_v6  ;;  %v4296_v4 = vpop.f32.mrf.mxu2 }
 0x3ca   :  { %v4297_v42 = vadd.f32 %v4296_v4, %v4283_v7 }
 0x3cb   :  { %v4317_v23 = vmax.f32 %v4255_v54, 0.0 }
 0x3d0   :  { %v4256_v21 = vpop.f32.mrf.mxu3 }
 0x3d1   :  { %v4257_v22 = vadd.f32 %v4256_v21, %v4243_v16  ;;  %v4298_v37 = vpop.f32.mrf.mxu2 }
 0x3d2   :  { %v4299_v44 = vadd.f32 %v4298_v37, %v4285_v41 }
 0x3d3   :  { %v4321_v59 = vmax.f32 %v4257_v22, 0.0 }
 0x3d5   :  { %v4325_v5 = vpack.c.bf16 %v4321_v59, %v4317_v23 }
 0x3d7   :  { %4623 = vmatmul.bf16.vlgmr.msrb.gmra.mxu2 %v4325_v5 }
 0x3e8   :  { %v4310_v34 = vpop.f32.mrf.mxu3 }
 0x3e9   :  { %v4311_v9 = vadd.f32 %v4310_v34, %v4297_v42 }
 0x3eb   :  { %v4318_v49 = vmax.f32 %v4311_v9, 0.0 }
 0x3f0   :  { %v4312_v46 = vpop.f32.mrf.mxu3 }
 0x3f1   :  { %v4313_v48 = vadd.f32 %v4312_v46, %v4299_v44 }
 0x3f3   :  { %v4322_v52 = vmax.f32 %v4313_v48, 0.0 }
 0x3f5   :  { %v4326_v56 = vpack.c.bf16 %v4322_v52, %v4318_v49 }
 0x3f7   :  { %4637 = vmatmul.bf16.vlgmr.msrb.gmra.mxu3 %v4326_v56 }
 0x434   :  { %v4596_v19 = vpop.f32.mrf.mxu0 }
 0x435   :  { %v4597_v60 = vadd.f32 %v7547_v18, %v4596_v19 }
 0x43c   :  { %v4598_v27 = vpop.f32.mrf.mxu0 }
 0x43d   :  { %v4599_v63 = vadd.f32 %v7547_v18, %v4598_v27 }
 0x444   :  { %v4610_v57 = vpop.f32.mrf.mxu1 }
 0x445   :  { %v4611_v61 = vadd.f32 %v4610_v57, %v4597_v60 }
 0x44c   :  { %v4612_v50 = vpop.f32.mrf.mxu1 }
 0x44d   :  { %v4613_v45 = vadd.f32 %v4612_v50, %v4599_v63 }
 0x45a   :  { %v4624_v51 = vpop.f32.mrf.mxu2 }
 0x45b   :  { %v4625_v29 = vadd.f32 %v4624_v51, %v4611_v61 }
 0x462   :  { %v4626_v2 = vpop.f32.mrf.mxu2 }
 0x463   :  { %v4627_v47 = vadd.f32 %v4626_v2, %v4613_v45 }
 0x47a   :  { %v4638_v28 = vpop.f32.mrf.mxu3 }
 0x47b   :  { %v4639_v30 = vadd.f32 %v4638_v28, %v4625_v29 }
 0x47d   :  { %v4669_v1 = vsel %vm4668_vm1, %v4639_v30, -1e+30  ;;  %v4646_v43 = vsel %vm4645_vm2, %v4639_v30, -1e+30 }
 0x47e   :  { %4671 = vmax.xlane.f32.xlu1 %v4669_v1  ;;  %4648 = vmax.xlane.f32.xlu0 %v4646_v43 }
 0x482   :  { %v4640_v53 = vpop.f32.mrf.mxu3 }
 0x483   :  { %v4641_v3 = vadd.f32 %v4640_v53, %v4627_v47 }
 0x485   :  { %v4670_v8 = vsel %vm4668_vm1, %v4641_v3, -1e+30  ;;  %v4647_v10 = vsel %vm4645_vm2, %v4641_v3, -1e+30 }
 0x486   :  { %4673 = vmax.xlane.f32.xlu1 %v4670_v8  ;;  %4650 = vmax.xlane.f32.xlu0 %v4647_v10 }
 0x4f1   :  { %v4649_v62 = vpop.xlane.xlu0 %4648  ;;  %v4672_v15 = vpop.xlane.xlu1 %4671 }
 0x4f2   :  { %v4652_v32 = vsub.f32 %v4646_v43, %v4649_v62  ;;  %v4675_v17 = vsub.f32 0.0, %v4672_v15 }
 0x4f4   :  { %v4654_v11 = vmul.f32 1.442695, %v4652_v32  ;;  %v4677_v0 = vmul.f32 1.442695, %v4675_v17 }
 0x4f6   :  { %7548 = vpow2.f32 %v4654_v11 }
 0x4f9   :  { %v4651_v12 = vpop.xlane.xlu0 %4650  ;;  %v4674_v40 = vpop.xlane.xlu1 %4673 }
 0x4fa   :  { %v11140_v39 = vsub.f32 %v4647_v10, %v4651_v12  ;;  %v4676_v6 = vsub.f32 0.0, %v4674_v40 }
 0x4fc   :  { %v4656_v13 = vmul.f32 1.442695, %v11140_v39  ;;  %v7549_v55 = vpop.eup %7548  ;;  %v4679_v16 = vmul.f32 1.442695, %v4676_v6 }
 0x4fd   :  { %4658 = vadd.xlane.f32.xlu2 %v7549_v55 }
 0x4fe   :  { %7550 = vpow2.f32 %v4656_v13 }
 0x4ff   :  { %7552 = vpow2.f32 %v4677_v0 }
 0x500   :  { %7554 = vpow2.f32 %v4679_v16 }
 0x504   :  { %v7551_v14 = vpop.eup %7550 }
 0x505   :  { %4660 = vadd.xlane.f32.xlu2 %v7551_v14  ;;  %v7553_v54 = vpop.eup %7552 }
 0x506   :  { %v4681_v20 = vadd.f32 1.0, %v7553_v54  ;;  %v7555_v21 = vpop.eup %7554 }
 0x507   :  { %v4682_v22 = vadd.f32 1.0, %v7555_v21 }
 0x508   :  { %7556 = vrcp.f32 %v4681_v20  ;;  %v4694_v34 = vand.u32 2147483648, %v4681_v20  ;;  %vm4688_vm4 = vweird.f32 %v4681_v20  ;;  %v4692_v35 = vand.u32 2147483647, %v4681_v20 }
 0x509   :  { %7558 = vrcp.f32 %v4682_v22  ;;  %v4709_v49 = vand.u32 2147483648, %v4682_v22  ;;  %vm4703_vm8 = vweird.f32 %v4682_v22  ;;  %v4707_v19 = vand.u32 2147483647, %v4682_v22 }
 0x50a   :  { %v4695_v7 = vor.u32 1.1754944e-38, %v4694_v34  ;;  %vm4693_vm6 = vcmp.eq.f32.partialorder %v4692_v35, 8.507059e+37 }
 0x50b   :  { %v4710_v57 = vor.u32 1.1754944e-38, %v4709_v49  ;;  %vm4708_vm10 = vcmp.eq.f32.partialorder %v4707_v19, 8.507059e+37 }
 0x50e   :  { %v7557_v23 = vpop.eup %7556 }
 0x50f   :  { %v4684_v59 = vmul.f32 %v7557_v23, %v4681_v20  ;;  %v7559_v25 = vpop.eup %7558  ;;  %vm4689_vm3 = vweird.f32 %v7557_v23 }
 0x510   :  { %v4699_v4 = vmul.f32 %v7559_v25, %v4682_v22  ;;  %vm4690_vm5 = vmor %vm4688_vm4, %vm4689_vm3  ;;  %vm4704_vm7 = vweird.f32 %v7559_v25 }
 0x511   :  { %v4685_v5 = vsub.f32 1.0, %v4684_v59  ;;  %vm4705_vm9 = vmor %vm4703_vm8, %vm4704_vm7 }
 0x512   :  { %v4700_v24 = vsub.f32 1.0, %v4699_v4 }
 0x513   :  { %v4686_v26 = vmul.f32 %v7557_v23, %v4685_v5 }
 0x514   :  { %v4701_v37 = vmul.f32 %v7559_v25, %v4700_v24 }
 0x515   :  { %v4687_v33 = vadd.f32 %v7557_v23, %v4686_v26 }
 0x516   :  { %v4702_v48 = vadd.f32 %v7559_v25, %v4701_v37 }
 0x517   :  { %v4691_v36 = vsel %vm4690_vm5, %v7557_v23, %v4687_v33 }
 0x518   :  { %v4696_v42 = vsel %vm4693_vm6, %v4695_v7, %v4691_v36  ;;  %v4706_v18 = vsel %vm4705_vm9, %v7559_v25, %v4702_v48 }
 0x519   :  { %v4713_v52 = vsel %vm4668_vm1, %v4696_v42, 0.0  ;;  %v4711_v51 = vsel %vm4708_vm10, %v4710_v57, %v4706_v18 }
 0x51a   :  { %v4714_v29 = vsel %vm4668_vm1, %v4711_v51, 0.0 }
 0x570   :  { %v4659_v31 = vpop.xlane.xlu2 %4658 }
 0x571   :  { %7560 = vlog2.f32 %v4659_v31 }
 0x577   :  { %v7561_v41 = vpop.eup %7560 }
 0x578   :  { %v4663_v44 = vmul.f32 0.6931472, %v7561_v41  ;;  %v4661_v9 = vpop.xlane.xlu2 %4660 }
 0x579   :  { %7562 = vlog2.f32 %v4661_v9 }
 0x57a   :  { %v4666_v46 = vsub.f32 %v4652_v32, %v4663_v44 }
 0x57c   :  { %v4715_v56 = vsel %vm4645_vm2, %v4666_v46, %v4713_v52 }
 0x57d   :  { %4717 = vst [vmem:[%s11172_s14] sm:$0xff] %v4715_v56 }
 0x57f   :  { %v7563_v58 = vpop.eup %7562 }
 0x580   :  { %v4665_v60 = vmul.f32 0.6931472, %v7563_v58 }
 0x582   :  { %v4667_v61 = vsub.f32 %v11140_v39, %v4665_v60 }
 0x584   :  { %v4716_v27 = vsel %vm4645_vm2, %v4667_v61, %v4714_v29 }
 0x585   :  { %4718 = vst [vmem:[%s11172_s14 + $0x8] sm:$0xff] %v4716_v27 }

</bundles_post_ra>
